<compile_context>
chip_gen: v5e
topology: v5e:2x2
jax: 0.10.0
libtpu: 0.0.40
codegen_flags: <defaults>
</compile_context>

<pallas_src>
import functools

import jax
import jax.numpy as jnp
from jax.experimental import pallas as pl
from jax.experimental.pallas import tpu as pltpu

X_DIM = 32                 # config.gcn.X_dim
ROBOT_DIM = 9              # (px, py, vx, vy, radius, gx, gy, v_pref, theta)
HUMAN_DIM = 5              # (px, py, vx, vy, radius)
NODE_DIM = ROBOT_DIM + HUMAN_DIM   # 14
NODE_PAD = 16              # per-node feature slot, padded 14 -> 16
VALUE_DIMS = (32, 100, 1)  # config.model_predictive_rl.value_network_dims
VALUE_HID_PAD = 128        # value-net hidden width padded 100 -> 128 (dense lane group)


def _round_up(x, m):
    return (x + m - 1) // m * m


def _chip_defaults():
    """Per-generation (max_batch_tile, vmem_limit_bytes or None, tensorcores/chip)."""
    try:
        kind = jax.devices()[0].device_kind.lower()
    except Exception:
        kind = ""
    if "7" in kind:
        # v7x: 64 MiB physical VMEM per TensorCore, 2 TensorCores per chip.
        return 512, 32 * 1024 * 1024, 2
    if "v5 lite" in kind or "v5e" in kind or "v6" in kind:
        # v5e / v6e: 128 MiB VMEM, 1 TensorCore -> bigger tiles amortize step overhead.
        return 1024, 64 * 1024 * 1024, 1
    # Unknown / older chips: conservative.
    return 512, None, 1


def _value_estimator_kernel(
    nodes_ref,                     # (M*16, bt) bf16   node features, batch in lanes
    we_ref,                        # (M*32, M*16) bf16 block-diag embedding weight (transposed)
    eb_ref,                        # (M*32, 1)  f32    per-node embedding bias
    wa_ref, w1_ref, w2_ref,        # (M*32, M*32) bf16 block-diag Wa^T / W1^T / W2^T
    v1_ref, v1b_ref,               # (32, 32) bf16, (32, 1) f32
    v2_ref, v2b_ref,               # (128, 32) bf16, (128, 1) f32
    v3_ref, v3b_ref,               # (1, 128) bf16, (1, 1) f32
    out_ref,                       # (1, bt) f32 -- lane-dense value row
    *, num_nodes,
):
    m = num_nodes
    x_dim = X_DIM

    # ---------------- graph_model: RGL-style GCN (transposed layout) ----------------
    # Node embeddings for robot + all humans: one block-diagonal MXU GEMM.
    x = jnp.dot(we_ref[...], nodes_ref[...],
                preferred_element_type=jnp.float32) + eb_ref[...]        # (M*X, bt) f32
    x_bf = x.astype(jnp.bfloat16)                                        # single hoisted cast

    # Embedded-gaussian similarity projection: xa = blockdiag(Wa^T) @ x.
    xa = jnp.dot(wa_ref[...], x_bf, preferred_element_type=jnp.float32)  # (M*X, bt) f32

    x_slab = [x[n * x_dim:(n + 1) * x_dim, :] for n in range(m)]         # (X, bt) slabs
    xa_slab = [xa[n * x_dim:(n + 1) * x_dim, :] for n in range(m)]

    # Row-softmax adjacency, one (M, bt) slab per query node. All reductions run
    # over sublanes (batch stays dense in lanes); adjacency stays in f32.
    adj = []
    for n in range(m):
        s_n = jnp.concatenate(
            [jnp.sum(xa_slab[n] * x_slab[mm], axis=0, keepdims=True) for mm in range(m)],
            axis=0)                                                      # (M, bt)
        s_n = s_n - jnp.max(s_n, axis=0, keepdims=True)
        e_n = jnp.exp(s_n)
        adj.append(e_n * pl.reciprocal(jnp.sum(e_n, axis=0, keepdims=True), approx=True))

    # GCN layer 1: adjacency aggregation as broadcast FMAs (VPU, f32), node-wise
    # linear as one block-diagonal MXU GEMM, relu + skip connection in f32.
    ax = jnp.concatenate(
        [sum(adj[n][mm:mm + 1, :] * x_slab[mm] for mm in range(m)) for n in range(m)],
        axis=0)                                                          # (M*X, bt) f32
    h1 = jax.nn.relu(jnp.dot(w1_ref[...], ax.astype(jnp.bfloat16),
                             preferred_element_type=jnp.float32)) + x

    # GCN layer 2 (same normalized adjacency, as in the reference RGL).
    h1_slab = [h1[n * x_dim:(n + 1) * x_dim, :] for n in range(m)]
    ah = jnp.concatenate(
        [sum(adj[n][mm:mm + 1, :] * h1_slab[mm] for mm in range(m)) for n in range(m)],
        axis=0)                                                          # (M*X, bt) f32
    h2 = jax.nn.relu(jnp.dot(w2_ref[...], ah.astype(jnp.bfloat16),
                             preferred_element_type=jnp.float32)) + h1

    # "Take the first row of the feature matrix": node-0 slab (contiguous sublanes).
    emb = h2[0:x_dim, :]                                                 # (X, bt) f32

    # ---------------- value_network: mlp(X_dim, value_network_dims) ----------------
    h = jax.nn.relu(jnp.dot(v1_ref[...], emb.astype(jnp.bfloat16),
                            preferred_element_type=jnp.float32) + v1b_ref[...])
    h = jax.nn.relu(jnp.dot(v2_ref[...], h.astype(jnp.bfloat16),
                            preferred_element_type=jnp.float32) + v2b_ref[...])
    out_ref[...] = jnp.dot(v3_ref[...], h.astype(jnp.bfloat16),
                           preferred_element_type=jnp.float32) + v3b_ref[...]   # (1, bt)


def init_params(key):
    """Deterministic synthetic parameters (PyTorch-Linear-style uniform init)."""
    ks = jax.random.split(key, 8)

    def linear(k, din, dout):
        kw, kb = jax.random.split(k)
        bound = 1.0 / jnp.sqrt(jnp.float32(din))
        w = jax.random.uniform(kw, (din, dout), jnp.float32, -bound, bound)
        b = jax.random.uniform(kb, (1, dout), jnp.float32, -bound, bound)
        return w, b

    wr_w, wr_b = linear(ks[0], ROBOT_DIM, X_DIM)
    wh_w, wh_b = linear(ks[1], HUMAN_DIM, X_DIM)
    wa = jax.random.uniform(ks[2], (X_DIM, X_DIM), jnp.float32, -0.1, 0.1)
    w1 = jax.random.uniform(ks[3], (X_DIM, X_DIM), jnp.float32, -0.1, 0.1)
    w2 = jax.random.uniform(ks[4], (X_DIM, X_DIM), jnp.float32, -0.1, 0.1)
    v1_w, v1_b = linear(ks[5], X_DIM, VALUE_DIMS[0])
    v2_w, v2_b = linear(ks[6], VALUE_DIMS[0], VALUE_DIMS[1])
    v3_w, v3_b = linear(ks[7], VALUE_DIMS[1], VALUE_DIMS[2])
    return (wr_w, wr_b, wh_w, wh_b, wa, w1, w2,
            v1_w, v1_b, v2_w, v2_b, v3_w, v3_b)


def _kernel_params(params, n_humans):
    """Pack canonical f32 params into the kernel's transposed / block-diagonal layout."""
    (wr_w, wr_b, wh_w, wh_b, wa, w1, w2,
     v1_w, v1_b, v2_w, v2_b, v3_w, v3_b) = params
    m = 1 + n_humans
    eye_m = jnp.eye(m, dtype=jnp.float32)

    # Shared per-node embedding block: robot feats at [0:9], human feats at [9:14], pad to 16.
    we_comb = jnp.concatenate(
        [wr_w, wh_w, jnp.zeros((NODE_PAD - NODE_DIM, X_DIM), jnp.float32)], axis=0)  # (16, X)
    we_bd_t = jnp.kron(eye_m, we_comb.T)                                  # (M*X, M*16)
    wa_bd_t = jnp.kron(eye_m, wa.T)                                       # (M*X, M*X)
    w1_bd_t = jnp.kron(eye_m, w1.T)
    w2_bd_t = jnp.kron(eye_m, w2.T)
    node_b = jnp.concatenate([wr_b, jnp.tile(wh_b, (n_humans, 1))], axis=0)   # (M, X)
    eb = node_b.reshape(m * X_DIM, 1)

    h1d, h2d = VALUE_DIMS[0], VALUE_DIMS[1]
    pad = VALUE_HID_PAD - h2d
    v1_t = v1_w.T                                                         # (32, 32)
    v1b = v1_b.reshape(h1d, 1)
    v2_t = jnp.pad(v2_w, ((0, 0), (0, pad))).T                            # (128, 32)
    v2b = jnp.pad(v2_b, ((0, 0), (0, pad))).reshape(VALUE_HID_PAD, 1)
    v3_t = jnp.pad(v3_w, ((0, pad), (0, 0))).T                            # (1, 128)
    v3b = v3_b.reshape(1, 1)

    bf = lambda a: a.astype(jnp.bfloat16)
    return (bf(we_bd_t), eb.astype(jnp.float32),
            bf(wa_bd_t), bf(w1_bd_t), bf(w2_bd_t),
            bf(v1_t), v1b.astype(jnp.float32),
            bf(v2_t), v2b.astype(jnp.float32),
            bf(v3_t), v3b.astype(jnp.float32))


def value_estimator_forward(state, params, batch_tile=None):
    """Mirrors ValueEstimator.forward(state) with state = 3-tuple of 3-D arrays."""
    robot_state, human_states, extra = state
    assert robot_state.ndim == 3
    assert human_states.ndim == 3
    assert extra.ndim == 3
    # TODO(synk): state[2] is only consumed by graph_model variants with edge/occupancy
    # features; this embedded-gaussian RGL graph model does not use it.

    batch = robot_state.shape[0]
    n_humans = human_states.shape[1]
    num_nodes = 1 + n_humans

    # Pack robot + humans into 16-wide node slots (robot -> [0:9], human -> [9:14]),
    # flatten node features into sublanes and put the batch in lanes: (M*16, B).
    robot_nodes = jnp.pad(robot_state.astype(jnp.float32),
                          ((0, 0), (0, 0), (0, NODE_PAD - ROBOT_DIM)))
    human_nodes = jnp.pad(human_states.astype(jnp.float32),
                          ((0, 0), (0, 0), (ROBOT_DIM, NODE_PAD - NODE_DIM)))
    nodes = jnp.concatenate([robot_nodes, human_nodes], axis=1)           # (B, M, 16)
    nodes_t = nodes.reshape(batch, num_nodes * NODE_PAD).T                # (M*16, B)

    max_tile, vmem_limit, n_cores = _chip_defaults()
    if batch_tile is None:
        b128 = _round_up(batch, 128)
        if n_cores > 1 and b128 >= 256:
            # Guarantee >= 2 grid steps so both v7x TensorCores get work.
            batch_tile = min(max_tile, _round_up((b128 + 1) // 2, 128))
        else:
            batch_tile = min(max_tile, b128)
    batch_tile = _round_up(batch_tile, 128)
    b_pad = _round_up(batch, batch_tile)
    nodes_t = jnp.pad(nodes_t, ((0, 0), (0, b_pad - batch))).astype(jnp.bfloat16)

    kparams = _kernel_params(params, n_humans)

    grid = (b_pad // batch_tile,)
    in_specs = [pl.BlockSpec((num_nodes * NODE_PAD, batch_tile), lambda i: (0, i))]
    # Weights/biases: full-extent blocks + constant index_map -> resident in VMEM
    # across the whole batch grid (no per-step re-tiling).
    for p in kparams:
        in_specs.append(pl.BlockSpec(p.shape, lambda i, nd=p.ndim: (0,) * nd))

    cp_kwargs = dict(dimension_semantics=("parallel",))   # megacore sharding on v7x
    if vmem_limit is not None:
        cp_kwargs["vmem_limit_bytes"] = vmem_limit

    out = pl.pallas_call(
        functools.partial(_value_estimator_kernel, num_nodes=num_nodes),
        out_shape=jax.ShapeDtypeStruct((1, b_pad), jnp.float32),
        grid_spec=pltpu.PrefetchScalarGridSpec(
            num_scalar_prefetch=0,
            grid=grid,
            in_specs=in_specs,
            out_specs=pl.BlockSpec((1, batch_tile), lambda i: (0, i)),
        ),
        compiler_params=pltpu.CompilerParams(**cp_kwargs),
    )(nodes_t, *kparams)

    return out[0, :batch][:, None]                        # (B, 1), matches the module


if __name__ == "__main__":
    key = jax.random.PRNGKey(0)
    k_r, k_h, k_e, k_p = jax.random.split(key, 4)

    B, N_HUMANS = 2, 7
    robot_state = jax.random.normal(k_r, (B, 1, ROBOT_DIM), jnp.float32)
    human_states = jax.random.normal(k_h, (B, N_HUMANS, HUMAN_DIM), jnp.float32)
    extra = jax.random.normal(k_e, (B, N_HUMANS, 2), jnp.float32)

    params = init_params(k_p)

    value = value_estimator_forward((robot_state, human_states, extra), params)
    value = jax.block_until_ready(value)
    assert value.shape == (B, 1) and value.dtype == jnp.float32
    print("KERNEL_OK")
</pallas_src>

<mosaic_0001>
module attributes {stable_mosaic.version = 11 : i64} {
  func.func @_value_estimator_kernel(%arg0: i32, %arg1: memref<128x128xbf16, #tpu.memory_space<vmem>>, %arg2: memref<256x128xbf16, #tpu.memory_space<vmem>>, %arg3: memref<256x1xf32, #tpu.memory_space<vmem>>, %arg4: memref<256x256xbf16, #tpu.memory_space<vmem>>, %arg5: memref<256x256xbf16, #tpu.memory_space<vmem>>, %arg6: memref<256x256xbf16, #tpu.memory_space<vmem>>, %arg7: memref<32x32xbf16, #tpu.memory_space<vmem>>, %arg8: memref<32x1xf32, #tpu.memory_space<vmem>>, %arg9: memref<128x32xbf16, #tpu.memory_space<vmem>>, %arg10: memref<128x1xf32, #tpu.memory_space<vmem>>, %arg11: memref<1x128xbf16, #tpu.memory_space<vmem>>, %arg12: memref<1x1xf32, #tpu.memory_space<vmem>>, %arg13: memref<1x128xf32, #tpu.memory_space<vmem>>) attributes {dimension_semantics = [#tpu.dimension_semantics<parallel>], iteration_bounds = array<i64: 1>, scalar_prefetch = 0 : i64, scratch_operands = 0 : i64, tpu.core_type = #tpu.core_type<tc>, window_params = [{transform_indices = @transform_0, window_bounds = array<i64: 128, 128>}, {pipeline_mode = #tpu.pipeline_mode<synchronous>, transform_indices = @transform_1, window_bounds = array<i64: 256, 128>}, {pipeline_mode = #tpu.pipeline_mode<synchronous>, transform_indices = @transform_2, window_bounds = array<i64: 256, 1>}, {pipeline_mode = #tpu.pipeline_mode<synchronous>, transform_indices = @transform_3, window_bounds = array<i64: 256, 256>}, {pipeline_mode = #tpu.pipeline_mode<synchronous>, transform_indices = @transform_4, window_bounds = array<i64: 256, 256>}, {pipeline_mode = #tpu.pipeline_mode<synchronous>, transform_indices = @transform_5, window_bounds = array<i64: 256, 256>}, {pipeline_mode = #tpu.pipeline_mode<synchronous>, transform_indices = @transform_6, window_bounds = array<i64: 32, 32>}, {pipeline_mode = #tpu.pipeline_mode<synchronous>, transform_indices = @transform_7, window_bounds = array<i64: 32, 1>}, {pipeline_mode = #tpu.pipeline_mode<synchronous>, transform_indices = @transform_8, window_bounds = array<i64: 128, 32>}, {pipeline_mode = #tpu.pipeline_mode<synchronous>, transform_indices = @transform_9, window_bounds = array<i64: 128, 1>}, {pipeline_mode = #tpu.pipeline_mode<synchronous>, transform_indices = @transform_10, window_bounds = array<i64: 1, 128>}, {pipeline_mode = #tpu.pipeline_mode<synchronous>, transform_indices = @transform_11, window_bounds = array<i64: 1, 1>}, {transform_indices = @transform_12, window_bounds = array<i64: 1, 128>}]} {
    %c0 = arith.constant 0 : index
    %c0_0 = arith.constant 0 : index
    %0 = vector.load %arg2[%c0, %c0_0] : memref<256x128xbf16, #tpu.memory_space<vmem>>, vector<256x128xbf16>
    %c0_1 = arith.constant 0 : index
    %c0_2 = arith.constant 0 : index
    %1 = vector.load %arg1[%c0_1, %c0_2] : memref<128x128xbf16, #tpu.memory_space<vmem>>, vector<128x128xbf16>
    %cst = arith.constant dense<0.000000e+00> : vector<256x128xf32>
    %2 = tpu.matmul %0, %1, %cst {dimension_numbers = #tpu.dot_dimension_numbers<[1], [0], [0], [1], [0, 0, 1, 1], [], []>} : vector<256x128xbf16>, vector<128x128xbf16>, vector<256x128xf32> -> vector<256x128xf32>
    %c0_3 = arith.constant 0 : index
    %c0_4 = arith.constant 0 : index
    %3 = vector.load %arg3[%c0_3, %c0_4] : memref<256x1xf32, #tpu.memory_space<vmem>>, vector<256x1xf32>
    %4 = vector.broadcast %3 : vector<256x1xf32> to vector<256x128xf32>
    %5 = arith.addf %2, %4 : vector<256x128xf32>
    %6 = arith.truncf %5 : vector<256x128xf32> to vector<256x128xbf16>
    %c0_5 = arith.constant 0 : index
    %c0_6 = arith.constant 0 : index
    %7 = vector.load %arg4[%c0_5, %c0_6] : memref<256x256xbf16, #tpu.memory_space<vmem>>, vector<256x256xbf16>
    %cst_7 = arith.constant dense<0.000000e+00> : vector<256x128xf32>
    %8 = tpu.matmul %7, %6, %cst_7 {dimension_numbers = #tpu.dot_dimension_numbers<[1], [0], [0], [1], [0, 0, 1, 1], [], []>} : vector<256x256xbf16>, vector<256x128xbf16>, vector<256x128xf32> -> vector<256x128xf32>
    %9 = vector.extract_strided_slice %5 {offsets = [0, 0], sizes = [32, 128], strides = [1, 1]} : vector<256x128xf32> to vector<32x128xf32>
    %10 = vector.extract_strided_slice %5 {offsets = [32, 0], sizes = [32, 128], strides = [1, 1]} : vector<256x128xf32> to vector<32x128xf32>
    %11 = vector.extract_strided_slice %5 {offsets = [64, 0], sizes = [32, 128], strides = [1, 1]} : vector<256x128xf32> to vector<32x128xf32>
    %12 = vector.extract_strided_slice %5 {offsets = [96, 0], sizes = [32, 128], strides = [1, 1]} : vector<256x128xf32> to vector<32x128xf32>
    %13 = vector.extract_strided_slice %5 {offsets = [128, 0], sizes = [32, 128], strides = [1, 1]} : vector<256x128xf32> to vector<32x128xf32>
    %14 = vector.extract_strided_slice %5 {offsets = [160, 0], sizes = [32, 128], strides = [1, 1]} : vector<256x128xf32> to vector<32x128xf32>
    %15 = vector.extract_strided_slice %5 {offsets = [192, 0], sizes = [32, 128], strides = [1, 1]} : vector<256x128xf32> to vector<32x128xf32>
    %16 = vector.extract_strided_slice %5 {offsets = [224, 0], sizes = [32, 128], strides = [1, 1]} : vector<256x128xf32> to vector<32x128xf32>
    %17 = vector.extract_strided_slice %8 {offsets = [0, 0], sizes = [32, 128], strides = [1, 1]} : vector<256x128xf32> to vector<32x128xf32>
    %18 = vector.extract_strided_slice %8 {offsets = [32, 0], sizes = [32, 128], strides = [1, 1]} : vector<256x128xf32> to vector<32x128xf32>
    %19 = vector.extract_strided_slice %8 {offsets = [64, 0], sizes = [32, 128], strides = [1, 1]} : vector<256x128xf32> to vector<32x128xf32>
    %20 = vector.extract_strided_slice %8 {offsets = [96, 0], sizes = [32, 128], strides = [1, 1]} : vector<256x128xf32> to vector<32x128xf32>
    %21 = vector.extract_strided_slice %8 {offsets = [128, 0], sizes = [32, 128], strides = [1, 1]} : vector<256x128xf32> to vector<32x128xf32>
    %22 = vector.extract_strided_slice %8 {offsets = [160, 0], sizes = [32, 128], strides = [1, 1]} : vector<256x128xf32> to vector<32x128xf32>
    %23 = vector.extract_strided_slice %8 {offsets = [192, 0], sizes = [32, 128], strides = [1, 1]} : vector<256x128xf32> to vector<32x128xf32>
    %24 = vector.extract_strided_slice %8 {offsets = [224, 0], sizes = [32, 128], strides = [1, 1]} : vector<256x128xf32> to vector<32x128xf32>
    %25 = arith.mulf %17, %9 : vector<32x128xf32>
    %cst_8 = arith.constant dense<0.000000e+00> : vector<128xf32>
    %26 = vector.multi_reduction <add>, %25, %cst_8 [0] : vector<32x128xf32> to vector<128xf32>
    %27 = vector.shape_cast %26 : vector<128xf32> to vector<1x128xf32>
    %28 = arith.mulf %17, %10 : vector<32x128xf32>
    %cst_9 = arith.constant dense<0.000000e+00> : vector<128xf32>
    %29 = vector.multi_reduction <add>, %28, %cst_9 [0] : vector<32x128xf32> to vector<128xf32>
    %30 = vector.shape_cast %29 : vector<128xf32> to vector<1x128xf32>
    %31 = arith.mulf %17, %11 : vector<32x128xf32>
    %cst_10 = arith.constant dense<0.000000e+00> : vector<128xf32>
    %32 = vector.multi_reduction <add>, %31, %cst_10 [0] : vector<32x128xf32> to vector<128xf32>
    %33 = vector.shape_cast %32 : vector<128xf32> to vector<1x128xf32>
    %34 = arith.mulf %17, %12 : vector<32x128xf32>
    %cst_11 = arith.constant dense<0.000000e+00> : vector<128xf32>
    %35 = vector.multi_reduction <add>, %34, %cst_11 [0] : vector<32x128xf32> to vector<128xf32>
    %36 = vector.shape_cast %35 : vector<128xf32> to vector<1x128xf32>
    %37 = arith.mulf %17, %13 : vector<32x128xf32>
    %cst_12 = arith.constant dense<0.000000e+00> : vector<128xf32>
    %38 = vector.multi_reduction <add>, %37, %cst_12 [0] : vector<32x128xf32> to vector<128xf32>
    %39 = vector.shape_cast %38 : vector<128xf32> to vector<1x128xf32>
    %40 = arith.mulf %17, %14 : vector<32x128xf32>
    %cst_13 = arith.constant dense<0.000000e+00> : vector<128xf32>
    %41 = vector.multi_reduction <add>, %40, %cst_13 [0] : vector<32x128xf32> to vector<128xf32>
    %42 = vector.shape_cast %41 : vector<128xf32> to vector<1x128xf32>
    %43 = arith.mulf %17, %15 : vector<32x128xf32>
    %cst_14 = arith.constant dense<0.000000e+00> : vector<128xf32>
    %44 = vector.multi_reduction <add>, %43, %cst_14 [0] : vector<32x128xf32> to vector<128xf32>
    %45 = vector.shape_cast %44 : vector<128xf32> to vector<1x128xf32>
    %46 = arith.mulf %17, %16 : vector<32x128xf32>
    %cst_15 = arith.constant dense<0.000000e+00> : vector<128xf32>
    %47 = vector.multi_reduction <add>, %46, %cst_15 [0] : vector<32x128xf32> to vector<128xf32>
    %48 = vector.shape_cast %47 : vector<128xf32> to vector<1x128xf32>
    %49 = tpu.concatenate %27, %30, %33, %36, %39, %42, %45, %48 in 0 : vector<1x128xf32>, vector<1x128xf32>, vector<1x128xf32>, vector<1x128xf32>, vector<1x128xf32>, vector<1x128xf32>, vector<1x128xf32>, vector<1x128xf32> -> vector<8x128xf32>
    %cst_16 = arith.constant dense<0xFF800000> : vector<128xf32>
    %50 = vector.multi_reduction <maximumf>, %49, %cst_16 [0] : vector<8x128xf32> to vector<128xf32>
    %51 = vector.shape_cast %50 : vector<128xf32> to vector<1x128xf32>
    %52 = vector.broadcast %51 : vector<1x128xf32> to vector<8x128xf32>
    %53 = arith.subf %49, %52 : vector<8x128xf32>
    %54 = math.exp %53 : vector<8x128xf32>
    %cst_17 = arith.constant dense<0.000000e+00> : vector<128xf32>
    %55 = vector.multi_reduction <add>, %54, %cst_17 [0] : vector<8x128xf32> to vector<128xf32>
    %56 = vector.shape_cast %55 : vector<128xf32> to vector<1x128xf32>
    %57 = tpu.reciprocal %56 {approx = true} : vector<1x128xf32> -> vector<1x128xf32>
    %58 = vector.broadcast %57 : vector<1x128xf32> to vector<8x128xf32>
    %59 = arith.mulf %54, %58 : vector<8x128xf32>
    %60 = arith.mulf %18, %9 : vector<32x128xf32>
    %cst_18 = arith.constant dense<0.000000e+00> : vector<128xf32>
    %61 = vector.multi_reduction <add>, %60, %cst_18 [0] : vector<32x128xf32> to vector<128xf32>
    %62 = vector.shape_cast %61 : vector<128xf32> to vector<1x128xf32>
    %63 = arith.mulf %18, %10 : vector<32x128xf32>
    %cst_19 = arith.constant dense<0.000000e+00> : vector<128xf32>
    %64 = vector.multi_reduction <add>, %63, %cst_19 [0] : vector<32x128xf32> to vector<128xf32>
    %65 = vector.shape_cast %64 : vector<128xf32> to vector<1x128xf32>
    %66 = arith.mulf %18, %11 : vector<32x128xf32>
    %cst_20 = arith.constant dense<0.000000e+00> : vector<128xf32>
    %67 = vector.multi_reduction <add>, %66, %cst_20 [0] : vector<32x128xf32> to vector<128xf32>
    %68 = vector.shape_cast %67 : vector<128xf32> to vector<1x128xf32>
    %69 = arith.mulf %18, %12 : vector<32x128xf32>
    %cst_21 = arith.constant dense<0.000000e+00> : vector<128xf32>
    %70 = vector.multi_reduction <add>, %69, %cst_21 [0] : vector<32x128xf32> to vector<128xf32>
    %71 = vector.shape_cast %70 : vector<128xf32> to vector<1x128xf32>
    %72 = arith.mulf %18, %13 : vector<32x128xf32>
    %cst_22 = arith.constant dense<0.000000e+00> : vector<128xf32>
    %73 = vector.multi_reduction <add>, %72, %cst_22 [0] : vector<32x128xf32> to vector<128xf32>
    %74 = vector.shape_cast %73 : vector<128xf32> to vector<1x128xf32>
    %75 = arith.mulf %18, %14 : vector<32x128xf32>
    %cst_23 = arith.constant dense<0.000000e+00> : vector<128xf32>
    %76 = vector.multi_reduction <add>, %75, %cst_23 [0] : vector<32x128xf32> to vector<128xf32>
    %77 = vector.shape_cast %76 : vector<128xf32> to vector<1x128xf32>
    %78 = arith.mulf %18, %15 : vector<32x128xf32>
    %cst_24 = arith.constant dense<0.000000e+00> : vector<128xf32>
    %79 = vector.multi_reduction <add>, %78, %cst_24 [0] : vector<32x128xf32> to vector<128xf32>
    %80 = vector.shape_cast %79 : vector<128xf32> to vector<1x128xf32>
    %81 = arith.mulf %18, %16 : vector<32x128xf32>
    %cst_25 = arith.constant dense<0.000000e+00> : vector<128xf32>
    %82 = vector.multi_reduction <add>, %81, %cst_25 [0] : vector<32x128xf32> to vector<128xf32>
    %83 = vector.shape_cast %82 : vector<128xf32> to vector<1x128xf32>
    %84 = tpu.concatenate %62, %65, %68, %71, %74, %77, %80, %83 in 0 : vector<1x128xf32>, vector<1x128xf32>, vector<1x128xf32>, vector<1x128xf32>, vector<1x128xf32>, vector<1x128xf32>, vector<1x128xf32>, vector<1x128xf32> -> vector<8x128xf32>
    %cst_26 = arith.constant dense<0xFF800000> : vector<128xf32>
    %85 = vector.multi_reduction <maximumf>, %84, %cst_26 [0] : vector<8x128xf32> to vector<128xf32>
    %86 = vector.shape_cast %85 : vector<128xf32> to vector<1x128xf32>
    %87 = vector.broadcast %86 : vector<1x128xf32> to vector<8x128xf32>
    %88 = arith.subf %84, %87 : vector<8x128xf32>
    %89 = math.exp %88 : vector<8x128xf32>
    %cst_27 = arith.constant dense<0.000000e+00> : vector<128xf32>
    %90 = vector.multi_reduction <add>, %89, %cst_27 [0] : vector<8x128xf32> to vector<128xf32>
    %91 = vector.shape_cast %90 : vector<128xf32> to vector<1x128xf32>
    %92 = tpu.reciprocal %91 {approx = true} : vector<1x128xf32> -> vector<1x128xf32>
    %93 = vector.broadcast %92 : vector<1x128xf32> to vector<8x128xf32>
    %94 = arith.mulf %89, %93 : vector<8x128xf32>
    %95 = arith.mulf %19, %9 : vector<32x128xf32>
    %cst_28 = arith.constant dense<0.000000e+00> : vector<128xf32>
    %96 = vector.multi_reduction <add>, %95, %cst_28 [0] : vector<32x128xf32> to vector<128xf32>
    %97 = vector.shape_cast %96 : vector<128xf32> to vector<1x128xf32>
    %98 = arith.mulf %19, %10 : vector<32x128xf32>
    %cst_29 = arith.constant dense<0.000000e+00> : vector<128xf32>
    %99 = vector.multi_reduction <add>, %98, %cst_29 [0] : vector<32x128xf32> to vector<128xf32>
    %100 = vector.shape_cast %99 : vector<128xf32> to vector<1x128xf32>
    %101 = arith.mulf %19, %11 : vector<32x128xf32>
    %cst_30 = arith.constant dense<0.000000e+00> : vector<128xf32>
    %102 = vector.multi_reduction <add>, %101, %cst_30 [0] : vector<32x128xf32> to vector<128xf32>
    %103 = vector.shape_cast %102 : vector<128xf32> to vector<1x128xf32>
    %104 = arith.mulf %19, %12 : vector<32x128xf32>
    %cst_31 = arith.constant dense<0.000000e+00> : vector<128xf32>
    %105 = vector.multi_reduction <add>, %104, %cst_31 [0] : vector<32x128xf32> to vector<128xf32>
    %106 = vector.shape_cast %105 : vector<128xf32> to vector<1x128xf32>
    %107 = arith.mulf %19, %13 : vector<32x128xf32>
    %cst_32 = arith.constant dense<0.000000e+00> : vector<128xf32>
    %108 = vector.multi_reduction <add>, %107, %cst_32 [0] : vector<32x128xf32> to vector<128xf32>
    %109 = vector.shape_cast %108 : vector<128xf32> to vector<1x128xf32>
    %110 = arith.mulf %19, %14 : vector<32x128xf32>
    %cst_33 = arith.constant dense<0.000000e+00> : vector<128xf32>
    %111 = vector.multi_reduction <add>, %110, %cst_33 [0] : vector<32x128xf32> to vector<128xf32>
    %112 = vector.shape_cast %111 : vector<128xf32> to vector<1x128xf32>
    %113 = arith.mulf %19, %15 : vector<32x128xf32>
    %cst_34 = arith.constant dense<0.000000e+00> : vector<128xf32>
    %114 = vector.multi_reduction <add>, %113, %cst_34 [0] : vector<32x128xf32> to vector<128xf32>
    %115 = vector.shape_cast %114 : vector<128xf32> to vector<1x128xf32>
    %116 = arith.mulf %19, %16 : vector<32x128xf32>
    %cst_35 = arith.constant dense<0.000000e+00> : vector<128xf32>
    %117 = vector.multi_reduction <add>, %116, %cst_35 [0] : vector<32x128xf32> to vector<128xf32>
    %118 = vector.shape_cast %117 : vector<128xf32> to vector<1x128xf32>
    %119 = tpu.concatenate %97, %100, %103, %106, %109, %112, %115, %118 in 0 : vector<1x128xf32>, vector<1x128xf32>, vector<1x128xf32>, vector<1x128xf32>, vector<1x128xf32>, vector<1x128xf32>, vector<1x128xf32>, vector<1x128xf32> -> vector<8x128xf32>
    %cst_36 = arith.constant dense<0xFF800000> : vector<128xf32>
    %120 = vector.multi_reduction <maximumf>, %119, %cst_36 [0] : vector<8x128xf32> to vector<128xf32>
    %121 = vector.shape_cast %120 : vector<128xf32> to vector<1x128xf32>
    %122 = vector.broadcast %121 : vector<1x128xf32> to vector<8x128xf32>
    %123 = arith.subf %119, %122 : vector<8x128xf32>
    %124 = math.exp %123 : vector<8x128xf32>
    %cst_37 = arith.constant dense<0.000000e+00> : vector<128xf32>
    %125 = vector.multi_reduction <add>, %124, %cst_37 [0] : vector<8x128xf32> to vector<128xf32>
    %126 = vector.shape_cast %125 : vector<128xf32> to vector<1x128xf32>
    %127 = tpu.reciprocal %126 {approx = true} : vector<1x128xf32> -> vector<1x128xf32>
    %128 = vector.broadcast %127 : vector<1x128xf32> to vector<8x128xf32>
    %129 = arith.mulf %124, %128 : vector<8x128xf32>
    %130 = arith.mulf %20, %9 : vector<32x128xf32>
    %cst_38 = arith.constant dense<0.000000e+00> : vector<128xf32>
    %131 = vector.multi_reduction <add>, %130, %cst_38 [0] : vector<32x128xf32> to vector<128xf32>
    %132 = vector.shape_cast %131 : vector<128xf32> to vector<1x128xf32>
    %133 = arith.mulf %20, %10 : vector<32x128xf32>
    %cst_39 = arith.constant dense<0.000000e+00> : vector<128xf32>
    %134 = vector.multi_reduction <add>, %133, %cst_39 [0] : vector<32x128xf32> to vector<128xf32>
    %135 = vector.shape_cast %134 : vector<128xf32> to vector<1x128xf32>
    %136 = arith.mulf %20, %11 : vector<32x128xf32>
    %cst_40 = arith.constant dense<0.000000e+00> : vector<128xf32>
    %137 = vector.multi_reduction <add>, %136, %cst_40 [0] : vector<32x128xf32> to vector<128xf32>
    %138 = vector.shape_cast %137 : vector<128xf32> to vector<1x128xf32>
    %139 = arith.mulf %20, %12 : vector<32x128xf32>
    %cst_41 = arith.constant dense<0.000000e+00> : vector<128xf32>
    %140 = vector.multi_reduction <add>, %139, %cst_41 [0] : vector<32x128xf32> to vector<128xf32>
    %141 = vector.shape_cast %140 : vector<128xf32> to vector<1x128xf32>
    %142 = arith.mulf %20, %13 : vector<32x128xf32>
    %cst_42 = arith.constant dense<0.000000e+00> : vector<128xf32>
    %143 = vector.multi_reduction <add>, %142, %cst_42 [0] : vector<32x128xf32> to vector<128xf32>
    %144 = vector.shape_cast %143 : vector<128xf32> to vector<1x128xf32>
    %145 = arith.mulf %20, %14 : vector<32x128xf32>
    %cst_43 = arith.constant dense<0.000000e+00> : vector<128xf32>
    %146 = vector.multi_reduction <add>, %145, %cst_43 [0] : vector<32x128xf32> to vector<128xf32>
    %147 = vector.shape_cast %146 : vector<128xf32> to vector<1x128xf32>
    %148 = arith.mulf %20, %15 : vector<32x128xf32>
    %cst_44 = arith.constant dense<0.000000e+00> : vector<128xf32>
    %149 = vector.multi_reduction <add>, %148, %cst_44 [0] : vector<32x128xf32> to vector<128xf32>
    %150 = vector.shape_cast %149 : vector<128xf32> to vector<1x128xf32>
    %151 = arith.mulf %20, %16 : vector<32x128xf32>
    %cst_45 = arith.constant dense<0.000000e+00> : vector<128xf32>
    %152 = vector.multi_reduction <add>, %151, %cst_45 [0] : vector<32x128xf32> to vector<128xf32>
    %153 = vector.shape_cast %152 : vector<128xf32> to vector<1x128xf32>
    %154 = tpu.concatenate %132, %135, %138, %141, %144, %147, %150, %153 in 0 : vector<1x128xf32>, vector<1x128xf32>, vector<1x128xf32>, vector<1x128xf32>, vector<1x128xf32>, vector<1x128xf32>, vector<1x128xf32>, vector<1x128xf32> -> vector<8x128xf32>
    %cst_46 = arith.constant dense<0xFF800000> : vector<128xf32>
    %155 = vector.multi_reduction <maximumf>, %154, %cst_46 [0] : vector<8x128xf32> to vector<128xf32>
    %156 = vector.shape_cast %155 : vector<128xf32> to vector<1x128xf32>
    %157 = vector.broadcast %156 : vector<1x128xf32> to vector<8x128xf32>
    %158 = arith.subf %154, %157 : vector<8x128xf32>
    %159 = math.exp %158 : vector<8x128xf32>
    %cst_47 = arith.constant dense<0.000000e+00> : vector<128xf32>
    %160 = vector.multi_reduction <add>, %159, %cst_47 [0] : vector<8x128xf32> to vector<128xf32>
    %161 = vector.shape_cast %160 : vector<128xf32> to vector<1x128xf32>
    %162 = tpu.reciprocal %161 {approx = true} : vector<1x128xf32> -> vector<1x128xf32>
    %163 = vector.broadcast %162 : vector<1x128xf32> to vector<8x128xf32>
    %164 = arith.mulf %159, %163 : vector<8x128xf32>
    %165 = arith.mulf %21, %9 : vector<32x128xf32>
    %cst_48 = arith.constant dense<0.000000e+00> : vector<128xf32>
    %166 = vector.multi_reduction <add>, %165, %cst_48 [0] : vector<32x128xf32> to vector<128xf32>
    %167 = vector.shape_cast %166 : vector<128xf32> to vector<1x128xf32>
    %168 = arith.mulf %21, %10 : vector<32x128xf32>
    %cst_49 = arith.constant dense<0.000000e+00> : vector<128xf32>
    %169 = vector.multi_reduction <add>, %168, %cst_49 [0] : vector<32x128xf32> to vector<128xf32>
    %170 = vector.shape_cast %169 : vector<128xf32> to vector<1x128xf32>
    %171 = arith.mulf %21, %11 : vector<32x128xf32>
    %cst_50 = arith.constant dense<0.000000e+00> : vector<128xf32>
    %172 = vector.multi_reduction <add>, %171, %cst_50 [0] : vector<32x128xf32> to vector<128xf32>
    %173 = vector.shape_cast %172 : vector<128xf32> to vector<1x128xf32>
    %174 = arith.mulf %21, %12 : vector<32x128xf32>
    %cst_51 = arith.constant dense<0.000000e+00> : vector<128xf32>
    %175 = vector.multi_reduction <add>, %174, %cst_51 [0] : vector<32x128xf32> to vector<128xf32>
    %176 = vector.shape_cast %175 : vector<128xf32> to vector<1x128xf32>
    %177 = arith.mulf %21, %13 : vector<32x128xf32>
    %cst_52 = arith.constant dense<0.000000e+00> : vector<128xf32>
    %178 = vector.multi_reduction <add>, %177, %cst_52 [0] : vector<32x128xf32> to vector<128xf32>
    %179 = vector.shape_cast %178 : vector<128xf32> to vector<1x128xf32>
    %180 = arith.mulf %21, %14 : vector<32x128xf32>
    %cst_53 = arith.constant dense<0.000000e+00> : vector<128xf32>
    %181 = vector.multi_reduction <add>, %180, %cst_53 [0] : vector<32x128xf32> to vector<128xf32>
    %182 = vector.shape_cast %181 : vector<128xf32> to vector<1x128xf32>
    %183 = arith.mulf %21, %15 : vector<32x128xf32>
    %cst_54 = arith.constant dense<0.000000e+00> : vector<128xf32>
    %184 = vector.multi_reduction <add>, %183, %cst_54 [0] : vector<32x128xf32> to vector<128xf32>
    %185 = vector.shape_cast %184 : vector<128xf32> to vector<1x128xf32>
    %186 = arith.mulf %21, %16 : vector<32x128xf32>
    %cst_55 = arith.constant dense<0.000000e+00> : vector<128xf32>
    %187 = vector.multi_reduction <add>, %186, %cst_55 [0] : vector<32x128xf32> to vector<128xf32>
    %188 = vector.shape_cast %187 : vector<128xf32> to vector<1x128xf32>
    %189 = tpu.concatenate %167, %170, %173, %176, %179, %182, %185, %188 in 0 : vector<1x128xf32>, vector<1x128xf32>, vector<1x128xf32>, vector<1x128xf32>, vector<1x128xf32>, vector<1x128xf32>, vector<1x128xf32>, vector<1x128xf32> -> vector<8x128xf32>
    %cst_56 = arith.constant dense<0xFF800000> : vector<128xf32>
    %190 = vector.multi_reduction <maximumf>, %189, %cst_56 [0] : vector<8x128xf32> to vector<128xf32>
    %191 = vector.shape_cast %190 : vector<128xf32> to vector<1x128xf32>
    %192 = vector.broadcast %191 : vector<1x128xf32> to vector<8x128xf32>
    %193 = arith.subf %189, %192 : vector<8x128xf32>
    %194 = math.exp %193 : vector<8x128xf32>
    %cst_57 = arith.constant dense<0.000000e+00> : vector<128xf32>
    %195 = vector.multi_reduction <add>, %194, %cst_57 [0] : vector<8x128xf32> to vector<128xf32>
    %196 = vector.shape_cast %195 : vector<128xf32> to vector<1x128xf32>
    %197 = tpu.reciprocal %196 {approx = true} : vector<1x128xf32> -> vector<1x128xf32>
    %198 = vector.broadcast %197 : vector<1x128xf32> to vector<8x128xf32>
    %199 = arith.mulf %194, %198 : vector<8x128xf32>
    %200 = arith.mulf %22, %9 : vector<32x128xf32>
    %cst_58 = arith.constant dense<0.000000e+00> : vector<128xf32>
    %201 = vector.multi_reduction <add>, %200, %cst_58 [0] : vector<32x128xf32> to vector<128xf32>
    %202 = vector.shape_cast %201 : vector<128xf32> to vector<1x128xf32>
    %203 = arith.mulf %22, %10 : vector<32x128xf32>
    %cst_59 = arith.constant dense<0.000000e+00> : vector<128xf32>
    %204 = vector.multi_reduction <add>, %203, %cst_59 [0] : vector<32x128xf32> to vector<128xf32>
    %205 = vector.shape_cast %204 : vector<128xf32> to vector<1x128xf32>
    %206 = arith.mulf %22, %11 : vector<32x128xf32>
    %cst_60 = arith.constant dense<0.000000e+00> : vector<128xf32>
    %207 = vector.multi_reduction <add>, %206, %cst_60 [0] : vector<32x128xf32> to vector<128xf32>
    %208 = vector.shape_cast %207 : vector<128xf32> to vector<1x128xf32>
    %209 = arith.mulf %22, %12 : vector<32x128xf32>
    %cst_61 = arith.constant dense<0.000000e+00> : vector<128xf32>
    %210 = vector.multi_reduction <add>, %209, %cst_61 [0] : vector<32x128xf32> to vector<128xf32>
    %211 = vector.shape_cast %210 : vector<128xf32> to vector<1x128xf32>
    %212 = arith.mulf %22, %13 : vector<32x128xf32>
    %cst_62 = arith.constant dense<0.000000e+00> : vector<128xf32>
    %213 = vector.multi_reduction <add>, %212, %cst_62 [0] : vector<32x128xf32> to vector<128xf32>
    %214 = vector.shape_cast %213 : vector<128xf32> to vector<1x128xf32>
    %215 = arith.mulf %22, %14 : vector<32x128xf32>
    %cst_63 = arith.constant dense<0.000000e+00> : vector<128xf32>
    %216 = vector.multi_reduction <add>, %215, %cst_63 [0] : vector<32x128xf32> to vector<128xf32>
    %217 = vector.shape_cast %216 : vector<128xf32> to vector<1x128xf32>
    %218 = arith.mulf %22, %15 : vector<32x128xf32>
    %cst_64 = arith.constant dense<0.000000e+00> : vector<128xf32>
    %219 = vector.multi_reduction <add>, %218, %cst_64 [0] : vector<32x128xf32> to vector<128xf32>
    %220 = vector.shape_cast %219 : vector<128xf32> to vector<1x128xf32>
    %221 = arith.mulf %22, %16 : vector<32x128xf32>
    %cst_65 = arith.constant dense<0.000000e+00> : vector<128xf32>
    %222 = vector.multi_reduction <add>, %221, %cst_65 [0] : vector<32x128xf32> to vector<128xf32>
    %223 = vector.shape_cast %222 : vector<128xf32> to vector<1x128xf32>
    %224 = tpu.concatenate %202, %205, %208, %211, %214, %217, %220, %223 in 0 : vector<1x128xf32>, vector<1x128xf32>, vector<1x128xf32>, vector<1x128xf32>, vector<1x128xf32>, vector<1x128xf32>, vector<1x128xf32>, vector<1x128xf32> -> vector<8x128xf32>
    %cst_66 = arith.constant dense<0xFF800000> : vector<128xf32>
    %225 = vector.multi_reduction <maximumf>, %224, %cst_66 [0] : vector<8x128xf32> to vector<128xf32>
    %226 = vector.shape_cast %225 : vector<128xf32> to vector<1x128xf32>
    %227 = vector.broadcast %226 : vector<1x128xf32> to vector<8x128xf32>
    %228 = arith.subf %224, %227 : vector<8x128xf32>
    %229 = math.exp %228 : vector<8x128xf32>
    %cst_67 = arith.constant dense<0.000000e+00> : vector<128xf32>
    %230 = vector.multi_reduction <add>, %229, %cst_67 [0] : vector<8x128xf32> to vector<128xf32>
    %231 = vector.shape_cast %230 : vector<128xf32> to vector<1x128xf32>
    %232 = tpu.reciprocal %231 {approx = true} : vector<1x128xf32> -> vector<1x128xf32>
    %233 = vector.broadcast %232 : vector<1x128xf32> to vector<8x128xf32>
    %234 = arith.mulf %229, %233 : vector<8x128xf32>
    %235 = arith.mulf %23, %9 : vector<32x128xf32>
    %cst_68 = arith.constant dense<0.000000e+00> : vector<128xf32>
    %236 = vector.multi_reduction <add>, %235, %cst_68 [0] : vector<32x128xf32> to vector<128xf32>
    %237 = vector.shape_cast %236 : vector<128xf32> to vector<1x128xf32>
    %238 = arith.mulf %23, %10 : vector<32x128xf32>
    %cst_69 = arith.constant dense<0.000000e+00> : vector<128xf32>
    %239 = vector.multi_reduction <add>, %238, %cst_69 [0] : vector<32x128xf32> to vector<128xf32>
    %240 = vector.shape_cast %239 : vector<128xf32> to vector<1x128xf32>
    %241 = arith.mulf %23, %11 : vector<32x128xf32>
    %cst_70 = arith.constant dense<0.000000e+00> : vector<128xf32>
    %242 = vector.multi_reduction <add>, %241, %cst_70 [0] : vector<32x128xf32> to vector<128xf32>
    %243 = vector.shape_cast %242 : vector<128xf32> to vector<1x128xf32>
    %244 = arith.mulf %23, %12 : vector<32x128xf32>
    %cst_71 = arith.constant dense<0.000000e+00> : vector<128xf32>
    %245 = vector.multi_reduction <add>, %244, %cst_71 [0] : vector<32x128xf32> to vector<128xf32>
    %246 = vector.shape_cast %245 : vector<128xf32> to vector<1x128xf32>
    %247 = arith.mulf %23, %13 : vector<32x128xf32>
    %cst_72 = arith.constant dense<0.000000e+00> : vector<128xf32>
    %248 = vector.multi_reduction <add>, %247, %cst_72 [0] : vector<32x128xf32> to vector<128xf32>
    %249 = vector.shape_cast %248 : vector<128xf32> to vector<1x128xf32>
    %250 = arith.mulf %23, %14 : vector<32x128xf32>
    %cst_73 = arith.constant dense<0.000000e+00> : vector<128xf32>
    %251 = vector.multi_reduction <add>, %250, %cst_73 [0] : vector<32x128xf32> to vector<128xf32>
    %252 = vector.shape_cast %251 : vector<128xf32> to vector<1x128xf32>
    %253 = arith.mulf %23, %15 : vector<32x128xf32>
    %cst_74 = arith.constant dense<0.000000e+00> : vector<128xf32>
    %254 = vector.multi_reduction <add>, %253, %cst_74 [0] : vector<32x128xf32> to vector<128xf32>
    %255 = vector.shape_cast %254 : vector<128xf32> to vector<1x128xf32>
    %256 = arith.mulf %23, %16 : vector<32x128xf32>
    %cst_75 = arith.constant dense<0.000000e+00> : vector<128xf32>
    %257 = vector.multi_reduction <add>, %256, %cst_75 [0] : vector<32x128xf32> to vector<128xf32>
    %258 = vector.shape_cast %257 : vector<128xf32> to vector<1x128xf32>
    %259 = tpu.concatenate %237, %240, %243, %246, %249, %252, %255, %258 in 0 : vector<1x128xf32>, vector<1x128xf32>, vector<1x128xf32>, vector<1x128xf32>, vector<1x128xf32>, vector<1x128xf32>, vector<1x128xf32>, vector<1x128xf32> -> vector<8x128xf32>
    %cst_76 = arith.constant dense<0xFF800000> : vector<128xf32>
    %260 = vector.multi_reduction <maximumf>, %259, %cst_76 [0] : vector<8x128xf32> to vector<128xf32>
    %261 = vector.shape_cast %260 : vector<128xf32> to vector<1x128xf32>
    %262 = vector.broadcast %261 : vector<1x128xf32> to vector<8x128xf32>
    %263 = arith.subf %259, %262 : vector<8x128xf32>
    %264 = math.exp %263 : vector<8x128xf32>
    %cst_77 = arith.constant dense<0.000000e+00> : vector<128xf32>
    %265 = vector.multi_reduction <add>, %264, %cst_77 [0] : vector<8x128xf32> to vector<128xf32>
    %266 = vector.shape_cast %265 : vector<128xf32> to vector<1x128xf32>
    %267 = tpu.reciprocal %266 {approx = true} : vector<1x128xf32> -> vector<1x128xf32>
    %268 = vector.broadcast %267 : vector<1x128xf32> to vector<8x128xf32>
    %269 = arith.mulf %264, %268 : vector<8x128xf32>
    %270 = arith.mulf %24, %9 : vector<32x128xf32>
    %cst_78 = arith.constant dense<0.000000e+00> : vector<128xf32>
    %271 = vector.multi_reduction <add>, %270, %cst_78 [0] : vector<32x128xf32> to vector<128xf32>
    %272 = vector.shape_cast %271 : vector<128xf32> to vector<1x128xf32>
    %273 = arith.mulf %24, %10 : vector<32x128xf32>
    %cst_79 = arith.constant dense<0.000000e+00> : vector<128xf32>
    %274 = vector.multi_reduction <add>, %273, %cst_79 [0] : vector<32x128xf32> to vector<128xf32>
    %275 = vector.shape_cast %274 : vector<128xf32> to vector<1x128xf32>
    %276 = arith.mulf %24, %11 : vector<32x128xf32>
    %cst_80 = arith.constant dense<0.000000e+00> : vector<128xf32>
    %277 = vector.multi_reduction <add>, %276, %cst_80 [0] : vector<32x128xf32> to vector<128xf32>
    %278 = vector.shape_cast %277 : vector<128xf32> to vector<1x128xf32>
    %279 = arith.mulf %24, %12 : vector<32x128xf32>
    %cst_81 = arith.constant dense<0.000000e+00> : vector<128xf32>
    %280 = vector.multi_reduction <add>, %279, %cst_81 [0] : vector<32x128xf32> to vector<128xf32>
    %281 = vector.shape_cast %280 : vector<128xf32> to vector<1x128xf32>
    %282 = arith.mulf %24, %13 : vector<32x128xf32>
    %cst_82 = arith.constant dense<0.000000e+00> : vector<128xf32>
    %283 = vector.multi_reduction <add>, %282, %cst_82 [0] : vector<32x128xf32> to vector<128xf32>
    %284 = vector.shape_cast %283 : vector<128xf32> to vector<1x128xf32>
    %285 = arith.mulf %24, %14 : vector<32x128xf32>
    %cst_83 = arith.constant dense<0.000000e+00> : vector<128xf32>
    %286 = vector.multi_reduction <add>, %285, %cst_83 [0] : vector<32x128xf32> to vector<128xf32>
    %287 = vector.shape_cast %286 : vector<128xf32> to vector<1x128xf32>
    %288 = arith.mulf %24, %15 : vector<32x128xf32>
    %cst_84 = arith.constant dense<0.000000e+00> : vector<128xf32>
    %289 = vector.multi_reduction <add>, %288, %cst_84 [0] : vector<32x128xf32> to vector<128xf32>
    %290 = vector.shape_cast %289 : vector<128xf32> to vector<1x128xf32>
    %291 = arith.mulf %24, %16 : vector<32x128xf32>
    %cst_85 = arith.constant dense<0.000000e+00> : vector<128xf32>
    %292 = vector.multi_reduction <add>, %291, %cst_85 [0] : vector<32x128xf32> to vector<128xf32>
    %293 = vector.shape_cast %292 : vector<128xf32> to vector<1x128xf32>
    %294 = tpu.concatenate %272, %275, %278, %281, %284, %287, %290, %293 in 0 : vector<1x128xf32>, vector<1x128xf32>, vector<1x128xf32>, vector<1x128xf32>, vector<1x128xf32>, vector<1x128xf32>, vector<1x128xf32>, vector<1x128xf32> -> vector<8x128xf32>
    %cst_86 = arith.constant dense<0xFF800000> : vector<128xf32>
    %295 = vector.multi_reduction <maximumf>, %294, %cst_86 [0] : vector<8x128xf32> to vector<128xf32>
    %296 = vector.shape_cast %295 : vector<128xf32> to vector<1x128xf32>
    %297 = vector.broadcast %296 : vector<1x128xf32> to vector<8x128xf32>
    %298 = arith.subf %294, %297 : vector<8x128xf32>
    %299 = math.exp %298 : vector<8x128xf32>
    %cst_87 = arith.constant dense<0.000000e+00> : vector<128xf32>
    %300 = vector.multi_reduction <add>, %299, %cst_87 [0] : vector<8x128xf32> to vector<128xf32>
    %301 = vector.shape_cast %300 : vector<128xf32> to vector<1x128xf32>
    %302 = tpu.reciprocal %301 {approx = true} : vector<1x128xf32> -> vector<1x128xf32>
    %303 = vector.broadcast %302 : vector<1x128xf32> to vector<8x128xf32>
    %304 = arith.mulf %299, %303 : vector<8x128xf32>
    %305 = vector.extract_strided_slice %59 {offsets = [0, 0], sizes = [1, 128], strides = [1, 1]} : vector<8x128xf32> to vector<1x128xf32>
    %306 = vector.broadcast %305 : vector<1x128xf32> to vector<32x128xf32>
    %307 = arith.mulf %306, %9 : vector<32x128xf32>
    %cst_88 = arith.constant 0.000000e+00 : f32
    %308 = vector.broadcast %cst_88 : f32 to vector<32x128xf32>
    %309 = arith.addf %308, %307 : vector<32x128xf32>
    %310 = vector.extract_strided_slice %59 {offsets = [1, 0], sizes = [1, 128], strides = [1, 1]} : vector<8x128xf32> to vector<1x128xf32>
    %311 = vector.broadcast %310 : vector<1x128xf32> to vector<32x128xf32>
    %312 = arith.mulf %311, %10 : vector<32x128xf32>
    %313 = arith.addf %309, %312 : vector<32x128xf32>
    %314 = vector.extract_strided_slice %59 {offsets = [2, 0], sizes = [1, 128], strides = [1, 1]} : vector<8x128xf32> to vector<1x128xf32>
    %315 = vector.broadcast %314 : vector<1x128xf32> to vector<32x128xf32>
    %316 = arith.mulf %315, %11 : vector<32x128xf32>
    %317 = arith.addf %313, %316 : vector<32x128xf32>
    %318 = vector.extract_strided_slice %59 {offsets = [3, 0], sizes = [1, 128], strides = [1, 1]} : vector<8x128xf32> to vector<1x128xf32>
    %319 = vector.broadcast %318 : vector<1x128xf32> to vector<32x128xf32>
    %320 = arith.mulf %319, %12 : vector<32x128xf32>
    %321 = arith.addf %317, %320 : vector<32x128xf32>
    %322 = vector.extract_strided_slice %59 {offsets = [4, 0], sizes = [1, 128], strides = [1, 1]} : vector<8x128xf32> to vector<1x128xf32>
    %323 = vector.broadcast %322 : vector<1x128xf32> to vector<32x128xf32>
    %324 = arith.mulf %323, %13 : vector<32x128xf32>
    %325 = arith.addf %321, %324 : vector<32x128xf32>
    %326 = vector.extract_strided_slice %59 {offsets = [5, 0], sizes = [1, 128], strides = [1, 1]} : vector<8x128xf32> to vector<1x128xf32>
    %327 = vector.broadcast %326 : vector<1x128xf32> to vector<32x128xf32>
    %328 = arith.mulf %327, %14 : vector<32x128xf32>
    %329 = arith.addf %325, %328 : vector<32x128xf32>
    %330 = vector.extract_strided_slice %59 {offsets = [6, 0], sizes = [1, 128], strides = [1, 1]} : vector<8x128xf32> to vector<1x128xf32>
    %331 = vector.broadcast %330 : vector<1x128xf32> to vector<32x128xf32>
    %332 = arith.mulf %331, %15 : vector<32x128xf32>
    %333 = arith.addf %329, %332 : vector<32x128xf32>
    %334 = vector.extract_strided_slice %59 {offsets = [7, 0], sizes = [1, 128], strides = [1, 1]} : vector<8x128xf32> to vector<1x128xf32>
    %335 = vector.broadcast %334 : vector<1x128xf32> to vector<32x128xf32>
    %336 = arith.mulf %335, %16 : vector<32x128xf32>
    %337 = arith.addf %333, %336 : vector<32x128xf32>
    %338 = vector.extract_strided_slice %94 {offsets = [0, 0], sizes = [1, 128], strides = [1, 1]} : vector<8x128xf32> to vector<1x128xf32>
    %339 = vector.broadcast %338 : vector<1x128xf32> to vector<32x128xf32>
    %340 = arith.mulf %339, %9 : vector<32x128xf32>
    %cst_89 = arith.constant 0.000000e+00 : f32
    %341 = vector.broadcast %cst_89 : f32 to vector<32x128xf32>
    %342 = arith.addf %341, %340 : vector<32x128xf32>
    %343 = vector.extract_strided_slice %94 {offsets = [1, 0], sizes = [1, 128], strides = [1, 1]} : vector<8x128xf32> to vector<1x128xf32>
    %344 = vector.broadcast %343 : vector<1x128xf32> to vector<32x128xf32>
    %345 = arith.mulf %344, %10 : vector<32x128xf32>
    %346 = arith.addf %342, %345 : vector<32x128xf32>
    %347 = vector.extract_strided_slice %94 {offsets = [2, 0], sizes = [1, 128], strides = [1, 1]} : vector<8x128xf32> to vector<1x128xf32>
    %348 = vector.broadcast %347 : vector<1x128xf32> to vector<32x128xf32>
    %349 = arith.mulf %348, %11 : vector<32x128xf32>
    %350 = arith.addf %346, %349 : vector<32x128xf32>
    %351 = vector.extract_strided_slice %94 {offsets = [3, 0], sizes = [1, 128], strides = [1, 1]} : vector<8x128xf32> to vector<1x128xf32>
    %352 = vector.broadcast %351 : vector<1x128xf32> to vector<32x128xf32>
    %353 = arith.mulf %352, %12 : vector<32x128xf32>
    %354 = arith.addf %350, %353 : vector<32x128xf32>
    %355 = vector.extract_strided_slice %94 {offsets = [4, 0], sizes = [1, 128], strides = [1, 1]} : vector<8x128xf32> to vector<1x128xf32>
    %356 = vector.broadcast %355 : vector<1x128xf32> to vector<32x128xf32>
    %357 = arith.mulf %356, %13 : vector<32x128xf32>
    %358 = arith.addf %354, %357 : vector<32x128xf32>
    %359 = vector.extract_strided_slice %94 {offsets = [5, 0], sizes = [1, 128], strides = [1, 1]} : vector<8x128xf32> to vector<1x128xf32>
    %360 = vector.broadcast %359 : vector<1x128xf32> to vector<32x128xf32>
    %361 = arith.mulf %360, %14 : vector<32x128xf32>
    %362 = arith.addf %358, %361 : vector<32x128xf32>
    %363 = vector.extract_strided_slice %94 {offsets = [6, 0], sizes = [1, 128], strides = [1, 1]} : vector<8x128xf32> to vector<1x128xf32>
    %364 = vector.broadcast %363 : vector<1x128xf32> to vector<32x128xf32>
    %365 = arith.mulf %364, %15 : vector<32x128xf32>
    %366 = arith.addf %362, %365 : vector<32x128xf32>
    %367 = vector.extract_strided_slice %94 {offsets = [7, 0], sizes = [1, 128], strides = [1, 1]} : vector<8x128xf32> to vector<1x128xf32>
    %368 = vector.broadcast %367 : vector<1x128xf32> to vector<32x128xf32>
    %369 = arith.mulf %368, %16 : vector<32x128xf32>
    %370 = arith.addf %366, %369 : vector<32x128xf32>
    %371 = vector.extract_strided_slice %129 {offsets = [0, 0], sizes = [1, 128], strides = [1, 1]} : vector<8x128xf32> to vector<1x128xf32>
    %372 = vector.broadcast %371 : vector<1x128xf32> to vector<32x128xf32>
    %373 = arith.mulf %372, %9 : vector<32x128xf32>
    %cst_90 = arith.constant 0.000000e+00 : f32
    %374 = vector.broadcast %cst_90 : f32 to vector<32x128xf32>
    %375 = arith.addf %374, %373 : vector<32x128xf32>
    %376 = vector.extract_strided_slice %129 {offsets = [1, 0], sizes = [1, 128], strides = [1, 1]} : vector<8x128xf32> to vector<1x128xf32>
    %377 = vector.broadcast %376 : vector<1x128xf32> to vector<32x128xf32>
    %378 = arith.mulf %377, %10 : vector<32x128xf32>
    %379 = arith.addf %375, %378 : vector<32x128xf32>
    %380 = vector.extract_strided_slice %129 {offsets = [2, 0], sizes = [1, 128], strides = [1, 1]} : vector<8x128xf32> to vector<1x128xf32>
    %381 = vector.broadcast %380 : vector<1x128xf32> to vector<32x128xf32>
    %382 = arith.mulf %381, %11 : vector<32x128xf32>
    %383 = arith.addf %379, %382 : vector<32x128xf32>
    %384 = vector.extract_strided_slice %129 {offsets = [3, 0], sizes = [1, 128], strides = [1, 1]} : vector<8x128xf32> to vector<1x128xf32>
    %385 = vector.broadcast %384 : vector<1x128xf32> to vector<32x128xf32>
    %386 = arith.mulf %385, %12 : vector<32x128xf32>
    %387 = arith.addf %383, %386 : vector<32x128xf32>
    %388 = vector.extract_strided_slice %129 {offsets = [4, 0], sizes = [1, 128], strides = [1, 1]} : vector<8x128xf32> to vector<1x128xf32>
    %389 = vector.broadcast %388 : vector<1x128xf32> to vector<32x128xf32>
    %390 = arith.mulf %389, %13 : vector<32x128xf32>
    %391 = arith.addf %387, %390 : vector<32x128xf32>
    %392 = vector.extract_strided_slice %129 {offsets = [5, 0], sizes = [1, 128], strides = [1, 1]} : vector<8x128xf32> to vector<1x128xf32>
    %393 = vector.broadcast %392 : vector<1x128xf32> to vector<32x128xf32>
    %394 = arith.mulf %393, %14 : vector<32x128xf32>
    %395 = arith.addf %391, %394 : vector<32x128xf32>
    %396 = vector.extract_strided_slice %129 {offsets = [6, 0], sizes = [1, 128], strides = [1, 1]} : vector<8x128xf32> to vector<1x128xf32>
    %397 = vector.broadcast %396 : vector<1x128xf32> to vector<32x128xf32>
    %398 = arith.mulf %397, %15 : vector<32x128xf32>
    %399 = arith.addf %395, %398 : vector<32x128xf32>
    %400 = vector.extract_strided_slice %129 {offsets = [7, 0], sizes = [1, 128], strides = [1, 1]} : vector<8x128xf32> to vector<1x128xf32>
    %401 = vector.broadcast %400 : vector<1x128xf32> to vector<32x128xf32>
    %402 = arith.mulf %401, %16 : vector<32x128xf32>
    %403 = arith.addf %399, %402 : vector<32x128xf32>
    %404 = vector.extract_strided_slice %164 {offsets = [0, 0], sizes = [1, 128], strides = [1, 1]} : vector<8x128xf32> to vector<1x128xf32>
    %405 = vector.broadcast %404 : vector<1x128xf32> to vector<32x128xf32>
    %406 = arith.mulf %405, %9 : vector<32x128xf32>
    %cst_91 = arith.constant 0.000000e+00 : f32
    %407 = vector.broadcast %cst_91 : f32 to vector<32x128xf32>
    %408 = arith.addf %407, %406 : vector<32x128xf32>
    %409 = vector.extract_strided_slice %164 {offsets = [1, 0], sizes = [1, 128], strides = [1, 1]} : vector<8x128xf32> to vector<1x128xf32>
    %410 = vector.broadcast %409 : vector<1x128xf32> to vector<32x128xf32>
    %411 = arith.mulf %410, %10 : vector<32x128xf32>
    %412 = arith.addf %408, %411 : vector<32x128xf32>
    %413 = vector.extract_strided_slice %164 {offsets = [2, 0], sizes = [1, 128], strides = [1, 1]} : vector<8x128xf32> to vector<1x128xf32>
    %414 = vector.broadcast %413 : vector<1x128xf32> to vector<32x128xf32>
    %415 = arith.mulf %414, %11 : vector<32x128xf32>
    %416 = arith.addf %412, %415 : vector<32x128xf32>
    %417 = vector.extract_strided_slice %164 {offsets = [3, 0], sizes = [1, 128], strides = [1, 1]} : vector<8x128xf32> to vector<1x128xf32>
    %418 = vector.broadcast %417 : vector<1x128xf32> to vector<32x128xf32>
    %419 = arith.mulf %418, %12 : vector<32x128xf32>
    %420 = arith.addf %416, %419 : vector<32x128xf32>
    %421 = vector.extract_strided_slice %164 {offsets = [4, 0], sizes = [1, 128], strides = [1, 1]} : vector<8x128xf32> to vector<1x128xf32>
    %422 = vector.broadcast %421 : vector<1x128xf32> to vector<32x128xf32>
    %423 = arith.mulf %422, %13 : vector<32x128xf32>
    %424 = arith.addf %420, %423 : vector<32x128xf32>
    %425 = vector.extract_strided_slice %164 {offsets = [5, 0], sizes = [1, 128], strides = [1, 1]} : vector<8x128xf32> to vector<1x128xf32>
    %426 = vector.broadcast %425 : vector<1x128xf32> to vector<32x128xf32>
    %427 = arith.mulf %426, %14 : vector<32x128xf32>
    %428 = arith.addf %424, %427 : vector<32x128xf32>
    %429 = vector.extract_strided_slice %164 {offsets = [6, 0], sizes = [1, 128], strides = [1, 1]} : vector<8x128xf32> to vector<1x128xf32>
    %430 = vector.broadcast %429 : vector<1x128xf32> to vector<32x128xf32>
    %431 = arith.mulf %430, %15 : vector<32x128xf32>
    %432 = arith.addf %428, %431 : vector<32x128xf32>
    %433 = vector.extract_strided_slice %164 {offsets = [7, 0], sizes = [1, 128], strides = [1, 1]} : vector<8x128xf32> to vector<1x128xf32>
    %434 = vector.broadcast %433 : vector<1x128xf32> to vector<32x128xf32>
    %435 = arith.mulf %434, %16 : vector<32x128xf32>
    %436 = arith.addf %432, %435 : vector<32x128xf32>
    %437 = vector.extract_strided_slice %199 {offsets = [0, 0], sizes = [1, 128], strides = [1, 1]} : vector<8x128xf32> to vector<1x128xf32>
    %438 = vector.broadcast %437 : vector<1x128xf32> to vector<32x128xf32>
    %439 = arith.mulf %438, %9 : vector<32x128xf32>
    %cst_92 = arith.constant 0.000000e+00 : f32
    %440 = vector.broadcast %cst_92 : f32 to vector<32x128xf32>
    %441 = arith.addf %440, %439 : vector<32x128xf32>
    %442 = vector.extract_strided_slice %199 {offsets = [1, 0], sizes = [1, 128], strides = [1, 1]} : vector<8x128xf32> to vector<1x128xf32>
    %443 = vector.broadcast %442 : vector<1x128xf32> to vector<32x128xf32>
    %444 = arith.mulf %443, %10 : vector<32x128xf32>
    %445 = arith.addf %441, %444 : vector<32x128xf32>
    %446 = vector.extract_strided_slice %199 {offsets = [2, 0], sizes = [1, 128], strides = [1, 1]} : vector<8x128xf32> to vector<1x128xf32>
    %447 = vector.broadcast %446 : vector<1x128xf32> to vector<32x128xf32>
    %448 = arith.mulf %447, %11 : vector<32x128xf32>
    %449 = arith.addf %445, %448 : vector<32x128xf32>
    %450 = vector.extract_strided_slice %199 {offsets = [3, 0], sizes = [1, 128], strides = [1, 1]} : vector<8x128xf32> to vector<1x128xf32>
    %451 = vector.broadcast %450 : vector<1x128xf32> to vector<32x128xf32>
    %452 = arith.mulf %451, %12 : vector<32x128xf32>
    %453 = arith.addf %449, %452 : vector<32x128xf32>
    %454 = vector.extract_strided_slice %199 {offsets = [4, 0], sizes = [1, 128], strides = [1, 1]} : vector<8x128xf32> to vector<1x128xf32>
    %455 = vector.broadcast %454 : vector<1x128xf32> to vector<32x128xf32>
    %456 = arith.mulf %455, %13 : vector<32x128xf32>
    %457 = arith.addf %453, %456 : vector<32x128xf32>
    %458 = vector.extract_strided_slice %199 {offsets = [5, 0], sizes = [1, 128], strides = [1, 1]} : vector<8x128xf32> to vector<1x128xf32>
    %459 = vector.broadcast %458 : vector<1x128xf32> to vector<32x128xf32>
    %460 = arith.mulf %459, %14 : vector<32x128xf32>
    %461 = arith.addf %457, %460 : vector<32x128xf32>
    %462 = vector.extract_strided_slice %199 {offsets = [6, 0], sizes = [1, 128], strides = [1, 1]} : vector<8x128xf32> to vector<1x128xf32>
    %463 = vector.broadcast %462 : vector<1x128xf32> to vector<32x128xf32>
    %464 = arith.mulf %463, %15 : vector<32x128xf32>
    %465 = arith.addf %461, %464 : vector<32x128xf32>
    %466 = vector.extract_strided_slice %199 {offsets = [7, 0], sizes = [1, 128], strides = [1, 1]} : vector<8x128xf32> to vector<1x128xf32>
    %467 = vector.broadcast %466 : vector<1x128xf32> to vector<32x128xf32>
    %468 = arith.mulf %467, %16 : vector<32x128xf32>
    %469 = arith.addf %465, %468 : vector<32x128xf32>
    %470 = vector.extract_strided_slice %234 {offsets = [0, 0], sizes = [1, 128], strides = [1, 1]} : vector<8x128xf32> to vector<1x128xf32>
    %471 = vector.broadcast %470 : vector<1x128xf32> to vector<32x128xf32>
    %472 = arith.mulf %471, %9 : vector<32x128xf32>
    %cst_93 = arith.constant 0.000000e+00 : f32
    %473 = vector.broadcast %cst_93 : f32 to vector<32x128xf32>
    %474 = arith.addf %473, %472 : vector<32x128xf32>
    %475 = vector.extract_strided_slice %234 {offsets = [1, 0], sizes = [1, 128], strides = [1, 1]} : vector<8x128xf32> to vector<1x128xf32>
    %476 = vector.broadcast %475 : vector<1x128xf32> to vector<32x128xf32>
    %477 = arith.mulf %476, %10 : vector<32x128xf32>
    %478 = arith.addf %474, %477 : vector<32x128xf32>
    %479 = vector.extract_strided_slice %234 {offsets = [2, 0], sizes = [1, 128], strides = [1, 1]} : vector<8x128xf32> to vector<1x128xf32>
    %480 = vector.broadcast %479 : vector<1x128xf32> to vector<32x128xf32>
    %481 = arith.mulf %480, %11 : vector<32x128xf32>
    %482 = arith.addf %478, %481 : vector<32x128xf32>
    %483 = vector.extract_strided_slice %234 {offsets = [3, 0], sizes = [1, 128], strides = [1, 1]} : vector<8x128xf32> to vector<1x128xf32>
    %484 = vector.broadcast %483 : vector<1x128xf32> to vector<32x128xf32>
    %485 = arith.mulf %484, %12 : vector<32x128xf32>
    %486 = arith.addf %482, %485 : vector<32x128xf32>
    %487 = vector.extract_strided_slice %234 {offsets = [4, 0], sizes = [1, 128], strides = [1, 1]} : vector<8x128xf32> to vector<1x128xf32>
    %488 = vector.broadcast %487 : vector<1x128xf32> to vector<32x128xf32>
    %489 = arith.mulf %488, %13 : vector<32x128xf32>
    %490 = arith.addf %486, %489 : vector<32x128xf32>
    %491 = vector.extract_strided_slice %234 {offsets = [5, 0], sizes = [1, 128], strides = [1, 1]} : vector<8x128xf32> to vector<1x128xf32>
    %492 = vector.broadcast %491 : vector<1x128xf32> to vector<32x128xf32>
    %493 = arith.mulf %492, %14 : vector<32x128xf32>
    %494 = arith.addf %490, %493 : vector<32x128xf32>
    %495 = vector.extract_strided_slice %234 {offsets = [6, 0], sizes = [1, 128], strides = [1, 1]} : vector<8x128xf32> to vector<1x128xf32>
    %496 = vector.broadcast %495 : vector<1x128xf32> to vector<32x128xf32>
    %497 = arith.mulf %496, %15 : vector<32x128xf32>
    %498 = arith.addf %494, %497 : vector<32x128xf32>
    %499 = vector.extract_strided_slice %234 {offsets = [7, 0], sizes = [1, 128], strides = [1, 1]} : vector<8x128xf32> to vector<1x128xf32>
    %500 = vector.broadcast %499 : vector<1x128xf32> to vector<32x128xf32>
    %501 = arith.mulf %500, %16 : vector<32x128xf32>
    %502 = arith.addf %498, %501 : vector<32x128xf32>
    %503 = vector.extract_strided_slice %269 {offsets = [0, 0], sizes = [1, 128], strides = [1, 1]} : vector<8x128xf32> to vector<1x128xf32>
    %504 = vector.broadcast %503 : vector<1x128xf32> to vector<32x128xf32>
    %505 = arith.mulf %504, %9 : vector<32x128xf32>
    %cst_94 = arith.constant 0.000000e+00 : f32
    %506 = vector.broadcast %cst_94 : f32 to vector<32x128xf32>
    %507 = arith.addf %506, %505 : vector<32x128xf32>
    %508 = vector.extract_strided_slice %269 {offsets = [1, 0], sizes = [1, 128], strides = [1, 1]} : vector<8x128xf32> to vector<1x128xf32>
    %509 = vector.broadcast %508 : vector<1x128xf32> to vector<32x128xf32>
    %510 = arith.mulf %509, %10 : vector<32x128xf32>
    %511 = arith.addf %507, %510 : vector<32x128xf32>
    %512 = vector.extract_strided_slice %269 {offsets = [2, 0], sizes = [1, 128], strides = [1, 1]} : vector<8x128xf32> to vector<1x128xf32>
    %513 = vector.broadcast %512 : vector<1x128xf32> to vector<32x128xf32>
    %514 = arith.mulf %513, %11 : vector<32x128xf32>
    %515 = arith.addf %511, %514 : vector<32x128xf32>
    %516 = vector.extract_strided_slice %269 {offsets = [3, 0], sizes = [1, 128], strides = [1, 1]} : vector<8x128xf32> to vector<1x128xf32>
    %517 = vector.broadcast %516 : vector<1x128xf32> to vector<32x128xf32>
    %518 = arith.mulf %517, %12 : vector<32x128xf32>
    %519 = arith.addf %515, %518 : vector<32x128xf32>
    %520 = vector.extract_strided_slice %269 {offsets = [4, 0], sizes = [1, 128], strides = [1, 1]} : vector<8x128xf32> to vector<1x128xf32>
    %521 = vector.broadcast %520 : vector<1x128xf32> to vector<32x128xf32>
    %522 = arith.mulf %521, %13 : vector<32x128xf32>
    %523 = arith.addf %519, %522 : vector<32x128xf32>
    %524 = vector.extract_strided_slice %269 {offsets = [5, 0], sizes = [1, 128], strides = [1, 1]} : vector<8x128xf32> to vector<1x128xf32>
    %525 = vector.broadcast %524 : vector<1x128xf32> to vector<32x128xf32>
    %526 = arith.mulf %525, %14 : vector<32x128xf32>
    %527 = arith.addf %523, %526 : vector<32x128xf32>
    %528 = vector.extract_strided_slice %269 {offsets = [6, 0], sizes = [1, 128], strides = [1, 1]} : vector<8x128xf32> to vector<1x128xf32>
    %529 = vector.broadcast %528 : vector<1x128xf32> to vector<32x128xf32>
    %530 = arith.mulf %529, %15 : vector<32x128xf32>
    %531 = arith.addf %527, %530 : vector<32x128xf32>
    %532 = vector.extract_strided_slice %269 {offsets = [7, 0], sizes = [1, 128], strides = [1, 1]} : vector<8x128xf32> to vector<1x128xf32>
    %533 = vector.broadcast %532 : vector<1x128xf32> to vector<32x128xf32>
    %534 = arith.mulf %533, %16 : vector<32x128xf32>
    %535 = arith.addf %531, %534 : vector<32x128xf32>
    %536 = vector.extract_strided_slice %304 {offsets = [0, 0], sizes = [1, 128], strides = [1, 1]} : vector<8x128xf32> to vector<1x128xf32>
    %537 = vector.broadcast %536 : vector<1x128xf32> to vector<32x128xf32>
    %538 = arith.mulf %537, %9 : vector<32x128xf32>
    %cst_95 = arith.constant 0.000000e+00 : f32
    %539 = vector.broadcast %cst_95 : f32 to vector<32x128xf32>
    %540 = arith.addf %539, %538 : vector<32x128xf32>
    %541 = vector.extract_strided_slice %304 {offsets = [1, 0], sizes = [1, 128], strides = [1, 1]} : vector<8x128xf32> to vector<1x128xf32>
    %542 = vector.broadcast %541 : vector<1x128xf32> to vector<32x128xf32>
    %543 = arith.mulf %542, %10 : vector<32x128xf32>
    %544 = arith.addf %540, %543 : vector<32x128xf32>
    %545 = vector.extract_strided_slice %304 {offsets = [2, 0], sizes = [1, 128], strides = [1, 1]} : vector<8x128xf32> to vector<1x128xf32>
    %546 = vector.broadcast %545 : vector<1x128xf32> to vector<32x128xf32>
    %547 = arith.mulf %546, %11 : vector<32x128xf32>
    %548 = arith.addf %544, %547 : vector<32x128xf32>
    %549 = vector.extract_strided_slice %304 {offsets = [3, 0], sizes = [1, 128], strides = [1, 1]} : vector<8x128xf32> to vector<1x128xf32>
    %550 = vector.broadcast %549 : vector<1x128xf32> to vector<32x128xf32>
    %551 = arith.mulf %550, %12 : vector<32x128xf32>
    %552 = arith.addf %548, %551 : vector<32x128xf32>
    %553 = vector.extract_strided_slice %304 {offsets = [4, 0], sizes = [1, 128], strides = [1, 1]} : vector<8x128xf32> to vector<1x128xf32>
    %554 = vector.broadcast %553 : vector<1x128xf32> to vector<32x128xf32>
    %555 = arith.mulf %554, %13 : vector<32x128xf32>
    %556 = arith.addf %552, %555 : vector<32x128xf32>
    %557 = vector.extract_strided_slice %304 {offsets = [5, 0], sizes = [1, 128], strides = [1, 1]} : vector<8x128xf32> to vector<1x128xf32>
    %558 = vector.broadcast %557 : vector<1x128xf32> to vector<32x128xf32>
    %559 = arith.mulf %558, %14 : vector<32x128xf32>
    %560 = arith.addf %556, %559 : vector<32x128xf32>
    %561 = vector.extract_strided_slice %304 {offsets = [6, 0], sizes = [1, 128], strides = [1, 1]} : vector<8x128xf32> to vector<1x128xf32>
    %562 = vector.broadcast %561 : vector<1x128xf32> to vector<32x128xf32>
    %563 = arith.mulf %562, %15 : vector<32x128xf32>
    %564 = arith.addf %560, %563 : vector<32x128xf32>
    %565 = vector.extract_strided_slice %304 {offsets = [7, 0], sizes = [1, 128], strides = [1, 1]} : vector<8x128xf32> to vector<1x128xf32>
    %566 = vector.broadcast %565 : vector<1x128xf32> to vector<32x128xf32>
    %567 = arith.mulf %566, %16 : vector<32x128xf32>
    %568 = arith.addf %564, %567 : vector<32x128xf32>
    %569 = tpu.concatenate %337, %370, %403, %436, %469, %502, %535, %568 in 0 : vector<32x128xf32>, vector<32x128xf32>, vector<32x128xf32>, vector<32x128xf32>, vector<32x128xf32>, vector<32x128xf32>, vector<32x128xf32>, vector<32x128xf32> -> vector<256x128xf32>
    %c0_96 = arith.constant 0 : index
    %c0_97 = arith.constant 0 : index
    %570 = vector.load %arg5[%c0_96, %c0_97] : memref<256x256xbf16, #tpu.memory_space<vmem>>, vector<256x256xbf16>
    %571 = arith.truncf %569 : vector<256x128xf32> to vector<256x128xbf16>
    %cst_98 = arith.constant dense<0.000000e+00> : vector<256x128xf32>
    %572 = tpu.matmul %570, %571, %cst_98 {dimension_numbers = #tpu.dot_dimension_numbers<[1], [0], [0], [1], [0, 0, 1, 1], [], []>} : vector<256x256xbf16>, vector<256x128xbf16>, vector<256x128xf32> -> vector<256x128xf32>
    %cst_99 = arith.constant 0.000000e+00 : f32
    %573 = vector.broadcast %cst_99 : f32 to vector<256x128xf32>
    %574 = arith.maximumf %572, %573 : vector<256x128xf32>
    %575 = arith.addf %574, %5 : vector<256x128xf32>
    %576 = vector.extract_strided_slice %575 {offsets = [0, 0], sizes = [32, 128], strides = [1, 1]} : vector<256x128xf32> to vector<32x128xf32>
    %577 = vector.extract_strided_slice %575 {offsets = [32, 0], sizes = [32, 128], strides = [1, 1]} : vector<256x128xf32> to vector<32x128xf32>
    %578 = vector.extract_strided_slice %575 {offsets = [64, 0], sizes = [32, 128], strides = [1, 1]} : vector<256x128xf32> to vector<32x128xf32>
    %579 = vector.extract_strided_slice %575 {offsets = [96, 0], sizes = [32, 128], strides = [1, 1]} : vector<256x128xf32> to vector<32x128xf32>
    %580 = vector.extract_strided_slice %575 {offsets = [128, 0], sizes = [32, 128], strides = [1, 1]} : vector<256x128xf32> to vector<32x128xf32>
    %581 = vector.extract_strided_slice %575 {offsets = [160, 0], sizes = [32, 128], strides = [1, 1]} : vector<256x128xf32> to vector<32x128xf32>
    %582 = vector.extract_strided_slice %575 {offsets = [192, 0], sizes = [32, 128], strides = [1, 1]} : vector<256x128xf32> to vector<32x128xf32>
    %583 = vector.extract_strided_slice %575 {offsets = [224, 0], sizes = [32, 128], strides = [1, 1]} : vector<256x128xf32> to vector<32x128xf32>
    %584 = vector.extract_strided_slice %59 {offsets = [0, 0], sizes = [1, 128], strides = [1, 1]} : vector<8x128xf32> to vector<1x128xf32>
    %585 = vector.broadcast %584 : vector<1x128xf32> to vector<32x128xf32>
    %586 = arith.mulf %585, %576 : vector<32x128xf32>
    %cst_100 = arith.constant 0.000000e+00 : f32
    %587 = vector.broadcast %cst_100 : f32 to vector<32x128xf32>
    %588 = arith.addf %587, %586 : vector<32x128xf32>
    %589 = vector.extract_strided_slice %59 {offsets = [1, 0], sizes = [1, 128], strides = [1, 1]} : vector<8x128xf32> to vector<1x128xf32>
    %590 = vector.broadcast %589 : vector<1x128xf32> to vector<32x128xf32>
    %591 = arith.mulf %590, %577 : vector<32x128xf32>
    %592 = arith.addf %588, %591 : vector<32x128xf32>
    %593 = vector.extract_strided_slice %59 {offsets = [2, 0], sizes = [1, 128], strides = [1, 1]} : vector<8x128xf32> to vector<1x128xf32>
    %594 = vector.broadcast %593 : vector<1x128xf32> to vector<32x128xf32>
    %595 = arith.mulf %594, %578 : vector<32x128xf32>
    %596 = arith.addf %592, %595 : vector<32x128xf32>
    %597 = vector.extract_strided_slice %59 {offsets = [3, 0], sizes = [1, 128], strides = [1, 1]} : vector<8x128xf32> to vector<1x128xf32>
    %598 = vector.broadcast %597 : vector<1x128xf32> to vector<32x128xf32>
    %599 = arith.mulf %598, %579 : vector<32x128xf32>
    %600 = arith.addf %596, %599 : vector<32x128xf32>
    %601 = vector.extract_strided_slice %59 {offsets = [4, 0], sizes = [1, 128], strides = [1, 1]} : vector<8x128xf32> to vector<1x128xf32>
    %602 = vector.broadcast %601 : vector<1x128xf32> to vector<32x128xf32>
    %603 = arith.mulf %602, %580 : vector<32x128xf32>
    %604 = arith.addf %600, %603 : vector<32x128xf32>
    %605 = vector.extract_strided_slice %59 {offsets = [5, 0], sizes = [1, 128], strides = [1, 1]} : vector<8x128xf32> to vector<1x128xf32>
    %606 = vector.broadcast %605 : vector<1x128xf32> to vector<32x128xf32>
    %607 = arith.mulf %606, %581 : vector<32x128xf32>
    %608 = arith.addf %604, %607 : vector<32x128xf32>
    %609 = vector.extract_strided_slice %59 {offsets = [6, 0], sizes = [1, 128], strides = [1, 1]} : vector<8x128xf32> to vector<1x128xf32>
    %610 = vector.broadcast %609 : vector<1x128xf32> to vector<32x128xf32>
    %611 = arith.mulf %610, %582 : vector<32x128xf32>
    %612 = arith.addf %608, %611 : vector<32x128xf32>
    %613 = vector.extract_strided_slice %59 {offsets = [7, 0], sizes = [1, 128], strides = [1, 1]} : vector<8x128xf32> to vector<1x128xf32>
    %614 = vector.broadcast %613 : vector<1x128xf32> to vector<32x128xf32>
    %615 = arith.mulf %614, %583 : vector<32x128xf32>
    %616 = arith.addf %612, %615 : vector<32x128xf32>
    %617 = vector.extract_strided_slice %94 {offsets = [0, 0], sizes = [1, 128], strides = [1, 1]} : vector<8x128xf32> to vector<1x128xf32>
    %618 = vector.broadcast %617 : vector<1x128xf32> to vector<32x128xf32>
    %619 = arith.mulf %618, %576 : vector<32x128xf32>
    %cst_101 = arith.constant 0.000000e+00 : f32
    %620 = vector.broadcast %cst_101 : f32 to vector<32x128xf32>
    %621 = arith.addf %620, %619 : vector<32x128xf32>
    %622 = vector.extract_strided_slice %94 {offsets = [1, 0], sizes = [1, 128], strides = [1, 1]} : vector<8x128xf32> to vector<1x128xf32>
    %623 = vector.broadcast %622 : vector<1x128xf32> to vector<32x128xf32>
    %624 = arith.mulf %623, %577 : vector<32x128xf32>
    %625 = arith.addf %621, %624 : vector<32x128xf32>
    %626 = vector.extract_strided_slice %94 {offsets = [2, 0], sizes = [1, 128], strides = [1, 1]} : vector<8x128xf32> to vector<1x128xf32>
    %627 = vector.broadcast %626 : vector<1x128xf32> to vector<32x128xf32>
    %628 = arith.mulf %627, %578 : vector<32x128xf32>
    %629 = arith.addf %625, %628 : vector<32x128xf32>
    %630 = vector.extract_strided_slice %94 {offsets = [3, 0], sizes = [1, 128], strides = [1, 1]} : vector<8x128xf32> to vector<1x128xf32>
    %631 = vector.broadcast %630 : vector<1x128xf32> to vector<32x128xf32>
    %632 = arith.mulf %631, %579 : vector<32x128xf32>
    %633 = arith.addf %629, %632 : vector<32x128xf32>
    %634 = vector.extract_strided_slice %94 {offsets = [4, 0], sizes = [1, 128], strides = [1, 1]} : vector<8x128xf32> to vector<1x128xf32>
    %635 = vector.broadcast %634 : vector<1x128xf32> to vector<32x128xf32>
    %636 = arith.mulf %635, %580 : vector<32x128xf32>
    %637 = arith.addf %633, %636 : vector<32x128xf32>
    %638 = vector.extract_strided_slice %94 {offsets = [5, 0], sizes = [1, 128], strides = [1, 1]} : vector<8x128xf32> to vector<1x128xf32>
    %639 = vector.broadcast %638 : vector<1x128xf32> to vector<32x128xf32>
    %640 = arith.mulf %639, %581 : vector<32x128xf32>
    %641 = arith.addf %637, %640 : vector<32x128xf32>
    %642 = vector.extract_strided_slice %94 {offsets = [6, 0], sizes = [1, 128], strides = [1, 1]} : vector<8x128xf32> to vector<1x128xf32>
    %643 = vector.broadcast %642 : vector<1x128xf32> to vector<32x128xf32>
    %644 = arith.mulf %643, %582 : vector<32x128xf32>
    %645 = arith.addf %641, %644 : vector<32x128xf32>
    %646 = vector.extract_strided_slice %94 {offsets = [7, 0], sizes = [1, 128], strides = [1, 1]} : vector<8x128xf32> to vector<1x128xf32>
    %647 = vector.broadcast %646 : vector<1x128xf32> to vector<32x128xf32>
    %648 = arith.mulf %647, %583 : vector<32x128xf32>
    %649 = arith.addf %645, %648 : vector<32x128xf32>
    %650 = vector.extract_strided_slice %129 {offsets = [0, 0], sizes = [1, 128], strides = [1, 1]} : vector<8x128xf32> to vector<1x128xf32>
    %651 = vector.broadcast %650 : vector<1x128xf32> to vector<32x128xf32>
    %652 = arith.mulf %651, %576 : vector<32x128xf32>
    %cst_102 = arith.constant 0.000000e+00 : f32
    %653 = vector.broadcast %cst_102 : f32 to vector<32x128xf32>
    %654 = arith.addf %653, %652 : vector<32x128xf32>
    %655 = vector.extract_strided_slice %129 {offsets = [1, 0], sizes = [1, 128], strides = [1, 1]} : vector<8x128xf32> to vector<1x128xf32>
    %656 = vector.broadcast %655 : vector<1x128xf32> to vector<32x128xf32>
    %657 = arith.mulf %656, %577 : vector<32x128xf32>
    %658 = arith.addf %654, %657 : vector<32x128xf32>
    %659 = vector.extract_strided_slice %129 {offsets = [2, 0], sizes = [1, 128], strides = [1, 1]} : vector<8x128xf32> to vector<1x128xf32>
    %660 = vector.broadcast %659 : vector<1x128xf32> to vector<32x128xf32>
    %661 = arith.mulf %660, %578 : vector<32x128xf32>
    %662 = arith.addf %658, %661 : vector<32x128xf32>
    %663 = vector.extract_strided_slice %129 {offsets = [3, 0], sizes = [1, 128], strides = [1, 1]} : vector<8x128xf32> to vector<1x128xf32>
    %664 = vector.broadcast %663 : vector<1x128xf32> to vector<32x128xf32>
    %665 = arith.mulf %664, %579 : vector<32x128xf32>
    %666 = arith.addf %662, %665 : vector<32x128xf32>
    %667 = vector.extract_strided_slice %129 {offsets = [4, 0], sizes = [1, 128], strides = [1, 1]} : vector<8x128xf32> to vector<1x128xf32>
    %668 = vector.broadcast %667 : vector<1x128xf32> to vector<32x128xf32>
    %669 = arith.mulf %668, %580 : vector<32x128xf32>
    %670 = arith.addf %666, %669 : vector<32x128xf32>
    %671 = vector.extract_strided_slice %129 {offsets = [5, 0], sizes = [1, 128], strides = [1, 1]} : vector<8x128xf32> to vector<1x128xf32>
    %672 = vector.broadcast %671 : vector<1x128xf32> to vector<32x128xf32>
    %673 = arith.mulf %672, %581 : vector<32x128xf32>
    %674 = arith.addf %670, %673 : vector<32x128xf32>
    %675 = vector.extract_strided_slice %129 {offsets = [6, 0], sizes = [1, 128], strides = [1, 1]} : vector<8x128xf32> to vector<1x128xf32>
    %676 = vector.broadcast %675 : vector<1x128xf32> to vector<32x128xf32>
    %677 = arith.mulf %676, %582 : vector<32x128xf32>
    %678 = arith.addf %674, %677 : vector<32x128xf32>
    %679 = vector.extract_strided_slice %129 {offsets = [7, 0], sizes = [1, 128], strides = [1, 1]} : vector<8x128xf32> to vector<1x128xf32>
    %680 = vector.broadcast %679 : vector<1x128xf32> to vector<32x128xf32>
    %681 = arith.mulf %680, %583 : vector<32x128xf32>
    %682 = arith.addf %678, %681 : vector<32x128xf32>
    %683 = vector.extract_strided_slice %164 {offsets = [0, 0], sizes = [1, 128], strides = [1, 1]} : vector<8x128xf32> to vector<1x128xf32>
    %684 = vector.broadcast %683 : vector<1x128xf32> to vector<32x128xf32>
    %685 = arith.mulf %684, %576 : vector<32x128xf32>
    %cst_103 = arith.constant 0.000000e+00 : f32
    %686 = vector.broadcast %cst_103 : f32 to vector<32x128xf32>
    %687 = arith.addf %686, %685 : vector<32x128xf32>
    %688 = vector.extract_strided_slice %164 {offsets = [1, 0], sizes = [1, 128], strides = [1, 1]} : vector<8x128xf32> to vector<1x128xf32>
    %689 = vector.broadcast %688 : vector<1x128xf32> to vector<32x128xf32>
    %690 = arith.mulf %689, %577 : vector<32x128xf32>
    %691 = arith.addf %687, %690 : vector<32x128xf32>
    %692 = vector.extract_strided_slice %164 {offsets = [2, 0], sizes = [1, 128], strides = [1, 1]} : vector<8x128xf32> to vector<1x128xf32>
    %693 = vector.broadcast %692 : vector<1x128xf32> to vector<32x128xf32>
    %694 = arith.mulf %693, %578 : vector<32x128xf32>
    %695 = arith.addf %691, %694 : vector<32x128xf32>
    %696 = vector.extract_strided_slice %164 {offsets = [3, 0], sizes = [1, 128], strides = [1, 1]} : vector<8x128xf32> to vector<1x128xf32>
    %697 = vector.broadcast %696 : vector<1x128xf32> to vector<32x128xf32>
    %698 = arith.mulf %697, %579 : vector<32x128xf32>
    %699 = arith.addf %695, %698 : vector<32x128xf32>
    %700 = vector.extract_strided_slice %164 {offsets = [4, 0], sizes = [1, 128], strides = [1, 1]} : vector<8x128xf32> to vector<1x128xf32>
    %701 = vector.broadcast %700 : vector<1x128xf32> to vector<32x128xf32>
    %702 = arith.mulf %701, %580 : vector<32x128xf32>
    %703 = arith.addf %699, %702 : vector<32x128xf32>
    %704 = vector.extract_strided_slice %164 {offsets = [5, 0], sizes = [1, 128], strides = [1, 1]} : vector<8x128xf32> to vector<1x128xf32>
    %705 = vector.broadcast %704 : vector<1x128xf32> to vector<32x128xf32>
    %706 = arith.mulf %705, %581 : vector<32x128xf32>
    %707 = arith.addf %703, %706 : vector<32x128xf32>
    %708 = vector.extract_strided_slice %164 {offsets = [6, 0], sizes = [1, 128], strides = [1, 1]} : vector<8x128xf32> to vector<1x128xf32>
    %709 = vector.broadcast %708 : vector<1x128xf32> to vector<32x128xf32>
    %710 = arith.mulf %709, %582 : vector<32x128xf32>
    %711 = arith.addf %707, %710 : vector<32x128xf32>
    %712 = vector.extract_strided_slice %164 {offsets = [7, 0], sizes = [1, 128], strides = [1, 1]} : vector<8x128xf32> to vector<1x128xf32>
    %713 = vector.broadcast %712 : vector<1x128xf32> to vector<32x128xf32>
    %714 = arith.mulf %713, %583 : vector<32x128xf32>
    %715 = arith.addf %711, %714 : vector<32x128xf32>
    %716 = vector.extract_strided_slice %199 {offsets = [0, 0], sizes = [1, 128], strides = [1, 1]} : vector<8x128xf32> to vector<1x128xf32>
    %717 = vector.broadcast %716 : vector<1x128xf32> to vector<32x128xf32>
    %718 = arith.mulf %717, %576 : vector<32x128xf32>
    %cst_104 = arith.constant 0.000000e+00 : f32
    %719 = vector.broadcast %cst_104 : f32 to vector<32x128xf32>
    %720 = arith.addf %719, %718 : vector<32x128xf32>
    %721 = vector.extract_strided_slice %199 {offsets = [1, 0], sizes = [1, 128], strides = [1, 1]} : vector<8x128xf32> to vector<1x128xf32>
    %722 = vector.broadcast %721 : vector<1x128xf32> to vector<32x128xf32>
    %723 = arith.mulf %722, %577 : vector<32x128xf32>
    %724 = arith.addf %720, %723 : vector<32x128xf32>
    %725 = vector.extract_strided_slice %199 {offsets = [2, 0], sizes = [1, 128], strides = [1, 1]} : vector<8x128xf32> to vector<1x128xf32>
    %726 = vector.broadcast %725 : vector<1x128xf32> to vector<32x128xf32>
    %727 = arith.mulf %726, %578 : vector<32x128xf32>
    %728 = arith.addf %724, %727 : vector<32x128xf32>
    %729 = vector.extract_strided_slice %199 {offsets = [3, 0], sizes = [1, 128], strides = [1, 1]} : vector<8x128xf32> to vector<1x128xf32>
    %730 = vector.broadcast %729 : vector<1x128xf32> to vector<32x128xf32>
    %731 = arith.mulf %730, %579 : vector<32x128xf32>
    %732 = arith.addf %728, %731 : vector<32x128xf32>
    %733 = vector.extract_strided_slice %199 {offsets = [4, 0], sizes = [1, 128], strides = [1, 1]} : vector<8x128xf32> to vector<1x128xf32>
    %734 = vector.broadcast %733 : vector<1x128xf32> to vector<32x128xf32>
    %735 = arith.mulf %734, %580 : vector<32x128xf32>
    %736 = arith.addf %732, %735 : vector<32x128xf32>
    %737 = vector.extract_strided_slice %199 {offsets = [5, 0], sizes = [1, 128], strides = [1, 1]} : vector<8x128xf32> to vector<1x128xf32>
    %738 = vector.broadcast %737 : vector<1x128xf32> to vector<32x128xf32>
    %739 = arith.mulf %738, %581 : vector<32x128xf32>
    %740 = arith.addf %736, %739 : vector<32x128xf32>
    %741 = vector.extract_strided_slice %199 {offsets = [6, 0], sizes = [1, 128], strides = [1, 1]} : vector<8x128xf32> to vector<1x128xf32>
    %742 = vector.broadcast %741 : vector<1x128xf32> to vector<32x128xf32>
    %743 = arith.mulf %742, %582 : vector<32x128xf32>
    %744 = arith.addf %740, %743 : vector<32x128xf32>
    %745 = vector.extract_strided_slice %199 {offsets = [7, 0], sizes = [1, 128], strides = [1, 1]} : vector<8x128xf32> to vector<1x128xf32>
    %746 = vector.broadcast %745 : vector<1x128xf32> to vector<32x128xf32>
    %747 = arith.mulf %746, %583 : vector<32x128xf32>
    %748 = arith.addf %744, %747 : vector<32x128xf32>
    %749 = vector.extract_strided_slice %234 {offsets = [0, 0], sizes = [1, 128], strides = [1, 1]} : vector<8x128xf32> to vector<1x128xf32>
    %750 = vector.broadcast %749 : vector<1x128xf32> to vector<32x128xf32>
    %751 = arith.mulf %750, %576 : vector<32x128xf32>
    %cst_105 = arith.constant 0.000000e+00 : f32
    %752 = vector.broadcast %cst_105 : f32 to vector<32x128xf32>
    %753 = arith.addf %752, %751 : vector<32x128xf32>
    %754 = vector.extract_strided_slice %234 {offsets = [1, 0], sizes = [1, 128], strides = [1, 1]} : vector<8x128xf32> to vector<1x128xf32>
    %755 = vector.broadcast %754 : vector<1x128xf32> to vector<32x128xf32>
    %756 = arith.mulf %755, %577 : vector<32x128xf32>
    %757 = arith.addf %753, %756 : vector<32x128xf32>
    %758 = vector.extract_strided_slice %234 {offsets = [2, 0], sizes = [1, 128], strides = [1, 1]} : vector<8x128xf32> to vector<1x128xf32>
    %759 = vector.broadcast %758 : vector<1x128xf32> to vector<32x128xf32>
    %760 = arith.mulf %759, %578 : vector<32x128xf32>
    %761 = arith.addf %757, %760 : vector<32x128xf32>
    %762 = vector.extract_strided_slice %234 {offsets = [3, 0], sizes = [1, 128], strides = [1, 1]} : vector<8x128xf32> to vector<1x128xf32>
    %763 = vector.broadcast %762 : vector<1x128xf32> to vector<32x128xf32>
    %764 = arith.mulf %763, %579 : vector<32x128xf32>
    %765 = arith.addf %761, %764 : vector<32x128xf32>
    %766 = vector.extract_strided_slice %234 {offsets = [4, 0], sizes = [1, 128], strides = [1, 1]} : vector<8x128xf32> to vector<1x128xf32>
    %767 = vector.broadcast %766 : vector<1x128xf32> to vector<32x128xf32>
    %768 = arith.mulf %767, %580 : vector<32x128xf32>
    %769 = arith.addf %765, %768 : vector<32x128xf32>
    %770 = vector.extract_strided_slice %234 {offsets = [5, 0], sizes = [1, 128], strides = [1, 1]} : vector<8x128xf32> to vector<1x128xf32>
    %771 = vector.broadcast %770 : vector<1x128xf32> to vector<32x128xf32>
    %772 = arith.mulf %771, %581 : vector<32x128xf32>
    %773 = arith.addf %769, %772 : vector<32x128xf32>
    %774 = vector.extract_strided_slice %234 {offsets = [6, 0], sizes = [1, 128], strides = [1, 1]} : vector<8x128xf32> to vector<1x128xf32>
    %775 = vector.broadcast %774 : vector<1x128xf32> to vector<32x128xf32>
    %776 = arith.mulf %775, %582 : vector<32x128xf32>
    %777 = arith.addf %773, %776 : vector<32x128xf32>
    %778 = vector.extract_strided_slice %234 {offsets = [7, 0], sizes = [1, 128], strides = [1, 1]} : vector<8x128xf32> to vector<1x128xf32>
    %779 = vector.broadcast %778 : vector<1x128xf32> to vector<32x128xf32>
    %780 = arith.mulf %779, %583 : vector<32x128xf32>
    %781 = arith.addf %777, %780 : vector<32x128xf32>
    %782 = vector.extract_strided_slice %269 {offsets = [0, 0], sizes = [1, 128], strides = [1, 1]} : vector<8x128xf32> to vector<1x128xf32>
    %783 = vector.broadcast %782 : vector<1x128xf32> to vector<32x128xf32>
    %784 = arith.mulf %783, %576 : vector<32x128xf32>
    %cst_106 = arith.constant 0.000000e+00 : f32
    %785 = vector.broadcast %cst_106 : f32 to vector<32x128xf32>
    %786 = arith.addf %785, %784 : vector<32x128xf32>
    %787 = vector.extract_strided_slice %269 {offsets = [1, 0], sizes = [1, 128], strides = [1, 1]} : vector<8x128xf32> to vector<1x128xf32>
    %788 = vector.broadcast %787 : vector<1x128xf32> to vector<32x128xf32>
    %789 = arith.mulf %788, %577 : vector<32x128xf32>
    %790 = arith.addf %786, %789 : vector<32x128xf32>
    %791 = vector.extract_strided_slice %269 {offsets = [2, 0], sizes = [1, 128], strides = [1, 1]} : vector<8x128xf32> to vector<1x128xf32>
    %792 = vector.broadcast %791 : vector<1x128xf32> to vector<32x128xf32>
    %793 = arith.mulf %792, %578 : vector<32x128xf32>
    %794 = arith.addf %790, %793 : vector<32x128xf32>
    %795 = vector.extract_strided_slice %269 {offsets = [3, 0], sizes = [1, 128], strides = [1, 1]} : vector<8x128xf32> to vector<1x128xf32>
    %796 = vector.broadcast %795 : vector<1x128xf32> to vector<32x128xf32>
    %797 = arith.mulf %796, %579 : vector<32x128xf32>
    %798 = arith.addf %794, %797 : vector<32x128xf32>
    %799 = vector.extract_strided_slice %269 {offsets = [4, 0], sizes = [1, 128], strides = [1, 1]} : vector<8x128xf32> to vector<1x128xf32>
    %800 = vector.broadcast %799 : vector<1x128xf32> to vector<32x128xf32>
    %801 = arith.mulf %800, %580 : vector<32x128xf32>
    %802 = arith.addf %798, %801 : vector<32x128xf32>
    %803 = vector.extract_strided_slice %269 {offsets = [5, 0], sizes = [1, 128], strides = [1, 1]} : vector<8x128xf32> to vector<1x128xf32>
    %804 = vector.broadcast %803 : vector<1x128xf32> to vector<32x128xf32>
    %805 = arith.mulf %804, %581 : vector<32x128xf32>
    %806 = arith.addf %802, %805 : vector<32x128xf32>
    %807 = vector.extract_strided_slice %269 {offsets = [6, 0], sizes = [1, 128], strides = [1, 1]} : vector<8x128xf32> to vector<1x128xf32>
    %808 = vector.broadcast %807 : vector<1x128xf32> to vector<32x128xf32>
    %809 = arith.mulf %808, %582 : vector<32x128xf32>
    %810 = arith.addf %806, %809 : vector<32x128xf32>
    %811 = vector.extract_strided_slice %269 {offsets = [7, 0], sizes = [1, 128], strides = [1, 1]} : vector<8x128xf32> to vector<1x128xf32>
    %812 = vector.broadcast %811 : vector<1x128xf32> to vector<32x128xf32>
    %813 = arith.mulf %812, %583 : vector<32x128xf32>
    %814 = arith.addf %810, %813 : vector<32x128xf32>
    %815 = vector.extract_strided_slice %304 {offsets = [0, 0], sizes = [1, 128], strides = [1, 1]} : vector<8x128xf32> to vector<1x128xf32>
    %816 = vector.broadcast %815 : vector<1x128xf32> to vector<32x128xf32>
    %817 = arith.mulf %816, %576 : vector<32x128xf32>
    %cst_107 = arith.constant 0.000000e+00 : f32
    %818 = vector.broadcast %cst_107 : f32 to vector<32x128xf32>
    %819 = arith.addf %818, %817 : vector<32x128xf32>
    %820 = vector.extract_strided_slice %304 {offsets = [1, 0], sizes = [1, 128], strides = [1, 1]} : vector<8x128xf32> to vector<1x128xf32>
    %821 = vector.broadcast %820 : vector<1x128xf32> to vector<32x128xf32>
    %822 = arith.mulf %821, %577 : vector<32x128xf32>
    %823 = arith.addf %819, %822 : vector<32x128xf32>
    %824 = vector.extract_strided_slice %304 {offsets = [2, 0], sizes = [1, 128], strides = [1, 1]} : vector<8x128xf32> to vector<1x128xf32>
    %825 = vector.broadcast %824 : vector<1x128xf32> to vector<32x128xf32>
    %826 = arith.mulf %825, %578 : vector<32x128xf32>
    %827 = arith.addf %823, %826 : vector<32x128xf32>
    %828 = vector.extract_strided_slice %304 {offsets = [3, 0], sizes = [1, 128], strides = [1, 1]} : vector<8x128xf32> to vector<1x128xf32>
    %829 = vector.broadcast %828 : vector<1x128xf32> to vector<32x128xf32>
    %830 = arith.mulf %829, %579 : vector<32x128xf32>
    %831 = arith.addf %827, %830 : vector<32x128xf32>
    %832 = vector.extract_strided_slice %304 {offsets = [4, 0], sizes = [1, 128], strides = [1, 1]} : vector<8x128xf32> to vector<1x128xf32>
    %833 = vector.broadcast %832 : vector<1x128xf32> to vector<32x128xf32>
    %834 = arith.mulf %833, %580 : vector<32x128xf32>
    %835 = arith.addf %831, %834 : vector<32x128xf32>
    %836 = vector.extract_strided_slice %304 {offsets = [5, 0], sizes = [1, 128], strides = [1, 1]} : vector<8x128xf32> to vector<1x128xf32>
    %837 = vector.broadcast %836 : vector<1x128xf32> to vector<32x128xf32>
    %838 = arith.mulf %837, %581 : vector<32x128xf32>
    %839 = arith.addf %835, %838 : vector<32x128xf32>
    %840 = vector.extract_strided_slice %304 {offsets = [6, 0], sizes = [1, 128], strides = [1, 1]} : vector<8x128xf32> to vector<1x128xf32>
    %841 = vector.broadcast %840 : vector<1x128xf32> to vector<32x128xf32>
    %842 = arith.mulf %841, %582 : vector<32x128xf32>
    %843 = arith.addf %839, %842 : vector<32x128xf32>
    %844 = vector.extract_strided_slice %304 {offsets = [7, 0], sizes = [1, 128], strides = [1, 1]} : vector<8x128xf32> to vector<1x128xf32>
    %845 = vector.broadcast %844 : vector<1x128xf32> to vector<32x128xf32>
    %846 = arith.mulf %845, %583 : vector<32x128xf32>
    %847 = arith.addf %843, %846 : vector<32x128xf32>
    %848 = tpu.concatenate %616, %649, %682, %715, %748, %781, %814, %847 in 0 : vector<32x128xf32>, vector<32x128xf32>, vector<32x128xf32>, vector<32x128xf32>, vector<32x128xf32>, vector<32x128xf32>, vector<32x128xf32>, vector<32x128xf32> -> vector<256x128xf32>
    %c0_108 = arith.constant 0 : index
    %c0_109 = arith.constant 0 : index
    %849 = vector.load %arg6[%c0_108, %c0_109] : memref<256x256xbf16, #tpu.memory_space<vmem>>, vector<256x256xbf16>
    %850 = arith.truncf %848 : vector<256x128xf32> to vector<256x128xbf16>
    %cst_110 = arith.constant dense<0.000000e+00> : vector<256x128xf32>
    %851 = tpu.matmul %849, %850, %cst_110 {dimension_numbers = #tpu.dot_dimension_numbers<[1], [0], [0], [1], [0, 0, 1, 1], [], []>} : vector<256x256xbf16>, vector<256x128xbf16>, vector<256x128xf32> -> vector<256x128xf32>
    %cst_111 = arith.constant 0.000000e+00 : f32
    %852 = vector.broadcast %cst_111 : f32 to vector<256x128xf32>
    %853 = arith.maximumf %851, %852 : vector<256x128xf32>
    %854 = arith.addf %853, %575 : vector<256x128xf32>
    %855 = vector.extract_strided_slice %854 {offsets = [0, 0], sizes = [32, 128], strides = [1, 1]} : vector<256x128xf32> to vector<32x128xf32>
    %c0_112 = arith.constant 0 : index
    %c0_113 = arith.constant 0 : index
    %856 = vector.load %arg7[%c0_112, %c0_113] : memref<32x32xbf16, #tpu.memory_space<vmem>>, vector<32x32xbf16>
    %857 = arith.truncf %855 : vector<32x128xf32> to vector<32x128xbf16>
    %cst_114 = arith.constant dense<0.000000e+00> : vector<32x128xf32>
    %858 = tpu.matmul %856, %857, %cst_114 {dimension_numbers = #tpu.dot_dimension_numbers<[1], [0], [0], [1], [0, 0, 1, 1], [], []>} : vector<32x32xbf16>, vector<32x128xbf16>, vector<32x128xf32> -> vector<32x128xf32>
    %c0_115 = arith.constant 0 : index
    %c0_116 = arith.constant 0 : index
    %859 = vector.load %arg8[%c0_115, %c0_116] : memref<32x1xf32, #tpu.memory_space<vmem>>, vector<32x1xf32>
    %860 = vector.broadcast %859 : vector<32x1xf32> to vector<32x128xf32>
    %861 = arith.addf %858, %860 : vector<32x128xf32>
    %cst_117 = arith.constant 0.000000e+00 : f32
    %862 = vector.broadcast %cst_117 : f32 to vector<32x128xf32>
    %863 = arith.maximumf %861, %862 : vector<32x128xf32>
    %c0_118 = arith.constant 0 : index
    %c0_119 = arith.constant 0 : index
    %864 = vector.load %arg9[%c0_118, %c0_119] : memref<128x32xbf16, #tpu.memory_space<vmem>>, vector<128x32xbf16>
    %865 = arith.truncf %863 : vector<32x128xf32> to vector<32x128xbf16>
    %cst_120 = arith.constant dense<0.000000e+00> : vector<128x128xf32>
    %866 = tpu.matmul %864, %865, %cst_120 {dimension_numbers = #tpu.dot_dimension_numbers<[1], [0], [0], [1], [0, 0, 1, 1], [], []>} : vector<128x32xbf16>, vector<32x128xbf16>, vector<128x128xf32> -> vector<128x128xf32>
    %c0_121 = arith.constant 0 : index
    %c0_122 = arith.constant 0 : index
    %867 = vector.load %arg10[%c0_121, %c0_122] : memref<128x1xf32, #tpu.memory_space<vmem>>, vector<128x1xf32>
    %868 = vector.broadcast %867 : vector<128x1xf32> to vector<128x128xf32>
    %869 = arith.addf %866, %868 : vector<128x128xf32>
    %cst_123 = arith.constant 0.000000e+00 : f32
    %870 = vector.broadcast %cst_123 : f32 to vector<128x128xf32>
    %871 = arith.maximumf %869, %870 : vector<128x128xf32>
    %c0_124 = arith.constant 0 : index
    %c0_125 = arith.constant 0 : index
    %872 = vector.load %arg11[%c0_124, %c0_125] : memref<1x128xbf16, #tpu.memory_space<vmem>>, vector<1x128xbf16>
    %873 = arith.truncf %871 : vector<128x128xf32> to vector<128x128xbf16>
    %cst_126 = arith.constant dense<0.000000e+00> : vector<1x128xf32>
    %874 = tpu.matmul %872, %873, %cst_126 {dimension_numbers = #tpu.dot_dimension_numbers<[1], [0], [0], [1], [0, 0, 1, 1], [], []>} : vector<1x128xbf16>, vector<128x128xbf16>, vector<1x128xf32> -> vector<1x128xf32>
    %c0_127 = arith.constant 0 : index
    %c0_128 = arith.constant 0 : index
    %875 = vector.load %arg12[%c0_127, %c0_128] : memref<1x1xf32, #tpu.memory_space<vmem>>, vector<1x1xf32>
    %876 = vector.broadcast %875 : vector<1x1xf32> to vector<1x128xf32>
    %877 = arith.addf %874, %876 : vector<1x128xf32>
    %c0_129 = arith.constant 0 : index
    %c0_130 = arith.constant 0 : index
    %878 = vector.load %arg13[%c0_129, %c0_130] : memref<1x128xf32, #tpu.memory_space<vmem>>, vector<1x128xf32>
    tpu.vector_store %arg13[%c0_129, %c0_130], %877 {strides = array<i32>} : memref<1x128xf32, #tpu.memory_space<vmem>>, vector<1x128xf32>,
    return
  }
  func.func @transform_0(%arg0: i32) -> (i32, i32) {
    %c0_i32 = arith.constant 0 : i32
    %c0_i32_0 = arith.constant 0 : i32
    return %c0_i32, %arg0 : i32, i32
  }
  func.func @transform_1(%arg0: i32) -> (i32, i32) {
    %c0_i32 = arith.constant 0 : i32
    %c0_i32_0 = arith.constant 0 : i32
    %c0_i32_1 = arith.constant 0 : i32
    return %c0_i32, %c0_i32_0 : i32, i32
  }
  func.func @transform_2(%arg0: i32) -> (i32, i32) {
    %c0_i32 = arith.constant 0 : i32
    %c0_i32_0 = arith.constant 0 : i32
    %c0_i32_1 = arith.constant 0 : i32
    return %c0_i32, %c0_i32_0 : i32, i32
  }
  func.func @transform_3(%arg0: i32) -> (i32, i32) {
    %c0_i32 = arith.constant 0 : i32
    %c0_i32_0 = arith.constant 0 : i32
    %c0_i32_1 = arith.constant 0 : i32
    return %c0_i32, %c0_i32_0 : i32, i32
  }
  func.func @transform_4(%arg0: i32) -> (i32, i32) {
    %c0_i32 = arith.constant 0 : i32
    %c0_i32_0 = arith.constant 0 : i32
    %c0_i32_1 = arith.constant 0 : i32
    return %c0_i32, %c0_i32_0 : i32, i32
  }
  func.func @transform_5(%arg0: i32) -> (i32, i32) {
    %c0_i32 = arith.constant 0 : i32
    %c0_i32_0 = arith.constant 0 : i32
    %c0_i32_1 = arith.constant 0 : i32
    return %c0_i32, %c0_i32_0 : i32, i32
  }
  func.func @transform_6(%arg0: i32) -> (i32, i32) {
    %c0_i32 = arith.constant 0 : i32
    %c0_i32_0 = arith.constant 0 : i32
    %c0_i32_1 = arith.constant 0 : i32
    return %c0_i32, %c0_i32_0 : i32, i32
  }
  func.func @transform_7(%arg0: i32) -> (i32, i32) {
    %c0_i32 = arith.constant 0 : i32
    %c0_i32_0 = arith.constant 0 : i32
    %c0_i32_1 = arith.constant 0 : i32
    return %c0_i32, %c0_i32_0 : i32, i32
  }
  func.func @transform_8(%arg0: i32) -> (i32, i32) {
    %c0_i32 = arith.constant 0 : i32
    %c0_i32_0 = arith.constant 0 : i32
    %c0_i32_1 = arith.constant 0 : i32
    return %c0_i32, %c0_i32_0 : i32, i32
  }
  func.func @transform_9(%arg0: i32) -> (i32, i32) {
    %c0_i32 = arith.constant 0 : i32
    %c0_i32_0 = arith.constant 0 : i32
    %c0_i32_1 = arith.constant 0 : i32
    return %c0_i32, %c0_i32_0 : i32, i32
  }
  func.func @transform_10(%arg0: i32) -> (i32, i32) {
    %c0_i32 = arith.constant 0 : i32
    %c0_i32_0 = arith.constant 0 : i32
    %c0_i32_1 = arith.constant 0 : i32
    return %c0_i32, %c0_i32_0 : i32, i32
  }
  func.func @transform_11(%arg0: i32) -> (i32, i32) {
    %c0_i32 = arith.constant 0 : i32
    %c0_i32_0 = arith.constant 0 : i32
    %c0_i32_1 = arith.constant 0 : i32
    return %c0_i32, %c0_i32_0 : i32, i32
  }
  func.func @transform_12(%arg0: i32) -> (i32, i32) {
    %c0_i32 = arith.constant 0 : i32
    %c0_i32_0 = arith.constant 0 : i32
    return %c0_i32, %arg0 : i32, i32
  }
}

</mosaic_0001>

<bundles_post_ra>
// kernel: tpu_custom_call.1
= control target key start
LH: loop header
LB: loop body
LE: loop exit
PB: predicated region body
PF: predicated region fallthrough
CT: control target
= control target key end

     0   :  { %s7948_s0 = inlined_call_operand.vmem [shape: bf16[128,128], index: 0, kind: input, shape index: {}]   ;;  %s7949_s1 = inlined_call_operand.vmem [shape: bf16[256,128], index: 1, kind: input, shape index: {}]   ;;  %s7950_s2 = inlined_call_operand.vmem [shape: f32[256,1], index: 2, kind: input, shape index: {}]   ;;  %s7951_s3 = inlined_call_operand.vmem [shape: bf16[256,256], index: 3, kind: input, shape index: {}]   ;;  %s7952_s4 = inlined_call_operand.hbm [shape: bf16[256,256], index: 4, kind: input, shape index: {}]   ;;  %s7953_s5 = inlined_call_operand.hbm [shape: bf16[256,256], index: 5, kind: input, shape index: {}]   ;;  %s7954_s6 = inlined_call_operand.vmem [shape: bf16[32,32], index: 6, kind: input, shape index: {}]   ;;  %s7955_s7 = inlined_call_operand.vmem [shape: f32[32,1], index: 7, kind: input, shape index: {}]   ;;  %s7956_s8 = inlined_call_operand.vmem [shape: bf16[128,32], index: 8, kind: input, shape index: {}]   ;;  %s7957_s9 = inlined_call_operand.vmem [shape: f32[128,1], index: 9, kind: input, shape index: {}]   ;;  %s7958_s10 = inlined_call_operand.vmem [shape: bf16[1,128], index: 10, kind: input, shape index: {}]   ;;  %s7959_s11 = inlined_call_operand.<no memory space> [shape: f32[1,1], index: 11, kind: input, shape index: {}]   ;;  %s7960_s12 = inlined_call_operand.hbm [shape: f32[1,128], index: 12, kind: output, shape index: {}]  }
   0x1   :  { %v17_v0 = vstv %s7959_s11 }
   0x2   :  { %18 = vst [vmem:[#allocation2] sm:$0x1] %v17_v0 }
   0x3   :  { %19 = vsyncpa [#allocation4], 0 }
   0x4   :  { %20 = vsyncpa [#allocation7], 0 }
   0x5   :  { %21 = vsyncpa [#allocation5], 0  ;;  %s34_s25 = sshll.u32 %s7952_s4, 4  ;;  %s4999_s26 = smov [#allocation3]   ;;  %s35_s25 = int_to_ptr.hbm [resolvable:$true] %s34_s25 }
   0x6   :  { %s36_s27 = sshll.u32 %s4999_s26, 4  ;;  %s47_s30 = sshll.u32 %s7953_s5, 4  ;;  %s37_s27 = int_to_ptr.vmem [resolvable:$true] %s36_s27  ;;  %s48_s30 = int_to_ptr.hbm [resolvable:$true] %s47_s30 }
   0x7   :  { %s5000_s13 = smov 128   ;;  %s5001_s14 = smov 8  }
   0x8   :  { %42 = dma.hbm_to_vmem [thread:$0]  %s35_s25, 4096, %s37_s27, [#allocation4], %s5000_s13, %s5000_s13, %s5001_s14  }
   0x9   :  { %s5002_s11 = smov [#allocation6]  }
   0xa   :  { %s49_s15 = sshll.u32 %s5002_s11, 4  ;;  %s50_s15 = int_to_ptr.vmem [resolvable:$true] %s49_s15 }
   0xb   :  { %55 = dma.hbm_to_vmem [thread:$0]  %s48_s30, 4096, %s50_s15, [#allocation7], %s5000_s13, %s5000_s13, %s5001_s14  }
   0xc   :  { %4993 = dma.done.wait [#allocation4], 4096  }
   0xd   :  { %4994 = vsyncadd [#allocation4], 4294963200 }
   0xe   :  { %4995 = dma.done.wait [#allocation7], 4096  }
   0xf   :  { %4996 = vsyncadd [#allocation7], 4294963200  ;;  %v5003_v1 = vmov 0   ;;  %v155_v2 = vld [vmem:[%s7950_s2 + $0xf0] sm:$0xff]  ;;  %v153_v3 = vld [vmem:[%s7950_s2 + $0xe0] sm:$0xff]  ;;  %vm1040_vm0 = vcmask 1040384  }
  0x10   :  { %4887 = vset.pattern.permute.xlu1 %v5003_v1  ;;  %4886 = vset.pattern.permute.xlu0 %v5003_v1  ;;  %v4757_v4 = vld [vmem:[%s7948_s0 + $0x38] sm:$0xff]  ;;  %v4756_v5 = vld [vmem:[%s7948_s0 + $0x30] sm:$0xff]  ;;  %v154_v8 = vld [vmem:[%s7950_s2 + $0xe8] sm:$0xff]  ;;  %vm1042_vm1 = vcmask 1041408   ;;  %vm1044_vm2 = vcmask 1042432   ;;  %vm1046_vm3 = vcmask 1043456  }
  0x11   :  { %4888 = vset.pattern.permute.xlu2 %v5003_v1  ;;  %309 = vperm.xlu0 %4886, %v155_v2   ;;  %v139_v6 = vld [vmem:[%s7950_s2 + $0x70] sm:$0xff]  ;;  %v156_v7 = vld [vmem:[%s7950_s2 + $0xf8] sm:$0xff]  ;;  %v4755_v9 = vld [vmem:[%s7948_s0 + $0x28] sm:$0xff]  ;;  %vm1048_vm4 = vcmask 1044480   ;;  %vm1050_vm5 = vcmask 1045504   ;;  %vm1052_vm6 = vcmask 1046528  }
  0x12   :  { %299 = vperm.xlu1 %4887, %v153_v3   ;;  %461 = vmatpush.bf16.msra.mxu0 %v4757_v4  ;;  %v140_v10 = vld [vmem:[%s7950_s2 + $0x78] sm:$0xff]  ;;  %v4754_v11 = vld [vmem:[%s7948_s0 + $0x20] sm:$0xff]  ;;  %v151_v13 = vld [vmem:[%s7950_s2 + $0xd0] sm:$0xff]  ;;  %vm3883_vm7 = vcmask 261120   ;;  %s4193_s23 = sshll.u32 %s7960_s12, 4  ;;  %s5004_s24 = smov [#allocation8]   ;;  %s4194_s23 = int_to_ptr.hbm [resolvable:$true] %s4193_s23 }
  0x13   :  { %229 = vperm.xlu2 %4888, %v139_v6   ;;  %v152_v12 = vld [vmem:[%s7950_s2 + $0xd8] sm:$0xff]  ;;  %v137_v15 = vld [vmem:[%s7950_s2 + $0x60] sm:$0xff]  ;;  %v4752_v16 = vld [vmem:[%s7948_s0 + $0x10] sm:$0xff]  ;;  %s4191_s25 = sshll.u32 %s5004_s24, 4  ;;  %s4192_s25 = int_to_ptr.vmem [resolvable:$true] %s4191_s25 }
  0x14   :  { %v4753_v14 = vld [vmem:[%s7948_s0 + $0x18] sm:$0xff]  ;;  %v149_v17 = vld [vmem:[%s7950_s2 + $0xc0] sm:$0xff]  ;;  %v138_v18 = vld [vmem:[%s7950_s2 + $0x68] sm:$0xff] }
  0x15   :  { %v4751_v19 = vld [vmem:[%s7948_s0 + $0x8] sm:$0xff]  ;;  %v4750_v21 = vld [vmem:[%s7948_s0] sm:$0xff]  ;;  %v136_v22 = vld [vmem:[%s7950_s2 + $0x58] sm:$0xff] }
  0x16   :  { %462 = vmatpush.bf16.msra.mxu0 %v4756_v5  ;;  %v150_v20 = vld [vmem:[%s7950_s2 + $0xc8] sm:$0xff]  ;;  %v135_v23 = vld [vmem:[%s7950_s2 + $0x50] sm:$0xff]  ;;  %v4734_v24 = vld [vmem:[%s7949_s1] sm:$0xff] }
  0x17   :  { %v147_v25 = vld [vmem:[%s7950_s2 + $0xb0] sm:$0xff]  ;;  %v148_v26 = vld [vmem:[%s7950_s2 + $0xb8] sm:$0xff]  ;;  %v133_v27 = vld [vmem:[%s7950_s2 + $0x40] sm:$0xff] }
  0x18   :  { %v134_v28 = vld [vmem:[%s7950_s2 + $0x48] sm:$0xff]  ;;  %v145_v29 = vld [vmem:[%s7950_s2 + $0xa0] sm:$0xff]  ;;  %v131_v32 = vld [vmem:[%s7950_s2 + $0x30] sm:$0xff] }
  0x19   :  { %314 = vperm.xlu0 %4886, %v156_v7   ;;  %v146_v30 = vld [vmem:[%s7950_s2 + $0xa8] sm:$0xff]  ;;  %v143_v33 = vld [vmem:[%s7950_s2 + $0x90] sm:$0xff]  ;;  %v132_v34 = vld [vmem:[%s7950_s2 + $0x38] sm:$0xff] }
  0x1a   :  { %304 = vperm.xlu1 %4887, %v154_v8   ;;  %463 = vmatpush.bf16.msra.mxu0 %v4755_v9  ;;  %v4735_v31 = vld [vmem:[%s7949_s1 + $0x8] sm:$0xff]  ;;  %v144_v35 = vld [vmem:[%s7950_s2 + $0x98] sm:$0xff]  ;;  %v129_v37 = vld [vmem:[%s7950_s2 + $0x20] sm:$0xff] }
  0x1b   :  { %234 = vperm.xlu2 %4888, %v140_v10   ;;  %v130_v36 = vld [vmem:[%s7950_s2 + $0x28] sm:$0xff]  ;;  %v4736_v38 = vld [vmem:[%s7949_s1 + $0x10] sm:$0xff]  ;;  %v141_v39 = vld [vmem:[%s7950_s2 + $0x80] sm:$0xff] }
  0x1c   :  { %v142_v40 = vld [vmem:[%s7950_s2 + $0x88] sm:$0xff]  ;;  %v127_v41 = vld [vmem:[%s7950_s2 + $0x10] sm:$0xff]  ;;  %v128_v42 = vld [vmem:[%s7950_s2 + $0x18] sm:$0xff] }
  0x1d   :  { %v126_v43 = vld [vmem:[%s7950_s2 + $0x8] sm:$0xff]  ;;  %v125_v44 = vld [vmem:[%s7950_s2] sm:$0xff]  ;;  %v4737_v45 = vld [vmem:[%s7949_s1 + $0x18] sm:$0xff] }
  0x1e   :  { %464 = vmatpush.bf16.msra.mxu0 %v4754_v11  ;;  %v4738_v46 = vld [vmem:[%s7949_s1 + $0x20] sm:$0xff]  ;;  %v4739_v47 = vld [vmem:[%s7949_s1 + $0x28] sm:$0xff]  ;;  %v4740_v48 = vld [vmem:[%s7949_s1 + $0x30] sm:$0xff] }
  0x1f   :  { %v4741_v49 = vld [vmem:[%s7949_s1 + $0x38] sm:$0xff]  ;;  %v4742_v50 = vld [vmem:[%s7949_s1 + $0x40] sm:$0xff]  ;;  %v3945_v56 = vld [vmem:[%s7957_s9 + $0x70] sm:$0xff] }
  0x20   :  { %v3849_v52 = vld [vmem:[%s7955_s7] sm:$0xff]  ;;  %v3852_v53 = vld [vmem:[%s7955_s7 + $0x18] sm:$0xff]  ;;  %v4743_v57 = vld [vmem:[%s7949_s1 + $0x48] sm:$0xff] }
  0x21   :  { %289 = vperm.xlu0 %4886, %v151_v13   ;;  %v3946_v55 = vld [vmem:[%s7957_s9 + $0x78] sm:$0xff]  ;;  %v3941_v59 = vld [vmem:[%s7957_s9 + $0x50] sm:$0xff]  ;;  %v3944_v60 = vld [vmem:[%s7957_s9 + $0x68] sm:$0xff] }
  0x22   :  { %294 = vperm.xlu1 %4887, %v152_v12   ;;  %465 = vmatpush.bf16.msra.mxu0 %v4753_v14  ;;  %v3940_v62 = vld [vmem:[%s7957_s9 + $0x48] sm:$0xff]  ;;  %v3939_v63 = vld [vmem:[%s7957_s9 + $0x40] sm:$0xff]  ;;  %v4744_v0 = vld [vmem:[%s7949_s1 + $0x50] sm:$0xff] }
  0x23   :  { %219 = vperm.xlu2 %4888, %v137_v15   ;;  %v3851_v2 = vld [vmem:[%s7955_s7 + $0x10] sm:$0xff]  ;;  %v3935_v3 = vld [vmem:[%s7957_s9 + $0x20] sm:$0xff]  ;;  %v3938_v4 = vld [vmem:[%s7957_s9 + $0x38] sm:$0xff] }
  0x24   :  { %v3850_v6 = vld [vmem:[%s7955_s7 + $0x8] sm:$0xff]  ;;  %v3934_v8 = vld [vmem:[%s7957_s9 + $0x18] sm:$0xff]  ;;  %v3933_v9 = vld [vmem:[%s7957_s9 + $0x10] sm:$0xff] }
  0x25   :  { %v4745_v11 = vld [vmem:[%s7949_s1 + $0x58] sm:$0xff]  ;;  %v3943_v13 = vld [vmem:[%s7957_s9 + $0x60] sm:$0xff]  ;;  %v3932_v15 = vld [vmem:[%s7957_s9 + $0x8] sm:$0xff] }
  0x26   :  { %466 = vmatpush.bf16.msra.mxu0 %v4752_v16  ;;  %v4165_v14 = vld [vmem:[#allocation2] sm:$0x1] }
  0x29   :  { %224 = vperm.xlu0 %4886, %v138_v18  }
  0x2a   :  { %279 = vperm.xlu1 %4887, %v149_v17   ;;  %467 = vmatpush.bf16.msra.mxu0 %v4751_v19 }
  0x2b   :  { %284 = vperm.xlu2 %4888, %v150_v20   ;;  %v3942_v20 = vld [vmem:[%s7957_s9 + $0x58] sm:$0xff] }
  0x2e   :  { %468 = vmatpush.bf16.msra.mxu0 %v4750_v21 }
  0x31   :  { %209 = vperm.xlu0 %4886, %v135_v23   ;;  %469 = vmatmul.bf16.vlgmr.msra.gmra.mxu0 %v4734_v24  ;;  %v4746_v23 = vld [vmem:[%s7949_s1 + $0x60] sm:$0xff] }
  0x32   :  { %214 = vperm.xlu1 %4887, %v136_v22  }
  0x33   :  { %269 = vperm.xlu2 %4888, %v147_v25  }
  0x39   :  { %274 = vperm.xlu0 %4886, %v148_v26   ;;  %v3937_v26 = vld [vmem:[%s7957_s9 + $0x30] sm:$0xff] }
  0x3a   :  { %199 = vperm.xlu1 %4887, %v133_v27  }
  0x3b   :  { %204 = vperm.xlu2 %4888, %v134_v28  }
  0x41   :  { %259 = vperm.xlu0 %4886, %v145_v29   ;;  %474 = vmatmul.bf16.gmra.mxu0 %v4735_v31 }
  0x42   :  { %264 = vperm.xlu1 %4887, %v146_v30   ;;  %v3936_v30 = vld [vmem:[%s7957_s9 + $0x28] sm:$0xff] }
  0x43   :  { %189 = vperm.xlu2 %4888, %v131_v32   ;;  %v4747_v32 = vld [vmem:[%s7949_s1 + $0x68] sm:$0xff] }
  0x49   :  { %194 = vperm.xlu0 %4886, %v132_v34  }
  0x4a   :  { %249 = vperm.xlu1 %4887, %v143_v33  }
  0x4b   :  { %254 = vperm.xlu2 %4888, %v144_v35  }
  0x51   :  { %179 = vperm.xlu0 %4886, %v129_v37   ;;  %479 = vmatmul.bf16.gmra.mxu0 %v4736_v38 }
  0x52   :  { %184 = vperm.xlu1 %4887, %v130_v36   ;;  %v3931_v36 = vld [vmem:[%s7957_s9] sm:$0xff] }
  0x53   :  { %239 = vperm.xlu2 %4888, %v141_v39  }
  0x59   :  { %244 = vperm.xlu0 %4886, %v142_v40  }
  0x5a   :  { %169 = vperm.xlu1 %4887, %v127_v41  }
  0x5b   :  { %174 = vperm.xlu2 %4888, %v128_v42   ;;  %v4748_v42 = vld [vmem:[%s7949_s1 + $0x70] sm:$0xff] }
  0x61   :  { %159 = vperm.xlu0 %4886, %v125_v44   ;;  %484 = vmatmul.bf16.gmra.mxu0 %v4737_v45 }
  0x62   :  { %164 = vperm.xlu1 %4887, %v126_v43  }
  0x63   :  { %3865 = vperm.xlu2 %4888, %v3851_v2  }
  0x69   :  { %3870 = vperm.xlu0 %4886, %v3852_v53  }
  0x6a   :  { %3855 = vperm.xlu1 %4887, %v3849_v52  }
  0x6b   :  { %3860 = vperm.xlu2 %4888, %v3850_v6  }
  0x6d   :  { %v230_v16 = vpop.permute.xlu2 %229 }
  0x71   :  { %489 = vmatmul.bf16.gmra.mxu0 %v4738_v46  ;;  %4019 = vperm.xlu0 %4886, %v3945_v56  }
  0x72   :  { %4024 = vperm.xlu1 %4887, %v3946_v55  }
  0x73   :  { %4009 = vperm.xlu2 %4888, %v3943_v13  }
  0x75   :  { %v235_v21 = vpop.permute.xlu2 %234 }
  0x79   :  { %4014 = vperm.xlu0 %4886, %v3944_v60  }
  0x7a   :  { %3999 = vperm.xlu1 %4887, %v3941_v59  }
  0x7b   :  { %4004 = vperm.xlu2 %4888, %v3942_v20  }
  0x7d   :  { %v220_v27 = vpop.permute.xlu2 %219 }
  0x81   :  { %494 = vmatmul.bf16.gmra.mxu0 %v4739_v47  ;;  %3989 = vperm.xlu0 %4886, %v3939_v63  }
  0x82   :  { %3994 = vperm.xlu1 %4887, %v3940_v62  }
  0x83   :  { %v5288_v10 = vpop.permute.xlu0 %309  ;;  %3979 = vperm.xlu2 %4888, %v3937_v26  }
  0x84   :  { %v5280_v7 = vpop.permute.xlu1 %299 }
  0x85   :  { %v5328_v34 = vpop.permute.xlu2 %284 }
  0x89   :  { %3984 = vperm.xlu0 %4886, %v3938_v4  }
  0x8a   :  { %3969 = vperm.xlu1 %4887, %v3935_v3  }
  0x8b   :  { %v5303_v18 = vpop.permute.xlu0 %314  ;;  %3974 = vperm.xlu2 %4888, %v3936_v30  }
  0x8c   :  { %v5301_v17 = vpop.permute.xlu1 %304 }
  0x8d   :  { %v5333_v39 = vpop.permute.xlu2 %269 }
  0x91   :  { %499 = vmatmul.bf16.gmra.mxu0 %v4740_v48  ;;  %3959 = vperm.xlu0 %4886, %v3933_v9   ;;  %v4749_v48 = vld [vmem:[%s7949_s1 + $0x78] sm:$0xff] }
  0x92   :  { %3964 = vperm.xlu1 %4887, %v3934_v8  }
  0x93   :  { %v5315_v24 = vpop.permute.xlu0 %289  ;;  %3949 = vperm.xlu2 %4888, %v3931_v36  }
  0x94   :  { %v5310_v22 = vpop.permute.xlu1 %294 }
  0x95   :  { %v205_v44 = vpop.permute.xlu2 %204 }
  0x99   :  { %3954 = vperm.xlu0 %4886, %v3932_v15  }
  0x9a   :  { %4168 = vperm.xlu1 %4887, %v4165_v14  }
  0x9b   :  { %v225_v31 = vpop.permute.xlu0 %224 }
  0x9c   :  { %v5320_v29 = vpop.permute.xlu1 %279 }
  0xa1   :  { %504 = vmatmul.bf16.gmra.mxu0 %v4741_v49  ;;  %v190_v49 = vpop.permute.xlu2 %189 }
  0xa3   :  { %v210_v37 = vpop.permute.xlu0 %209 }
  0xa4   :  { %v215_v35 = vpop.permute.xlu1 %214 }
  0xa9   :  { %v5353_v59 = vpop.permute.xlu2 %254 }
  0xab   :  { %v5335_v41 = vpop.permute.xlu0 %274 }
  0xac   :  { %v200_v40 = vpop.permute.xlu1 %199 }
  0xae   :  { %v5226_v51 = vpop.f32.mrf.mxu0 }
  0xb1   :  { %509 = vmatmul.bf16.gmra.mxu0 %v4742_v50  ;;  %v5373_v13 = vpop.permute.xlu2 %239 }
  0xb3   :  { %v5342_v46 = vpop.permute.xlu0 %259 }
  0xb4   :  { %v5340_v45 = vpop.permute.xlu1 %264 }
  0xb6   :  { %v5234_v54 = vpop.f32.mrf.mxu0 }
  0xbb   :  { %v195_v53 = vpop.permute.xlu0 %194 }
  0xbc   :  { %v5347_v52 = vpop.permute.xlu1 %249 }
  0xbe   :  { %v5245_v58 = vpop.f32.mrf.mxu0 }
  0xc1   :  { %514 = vmatmul.bf16.gmra.mxu0 %v4743_v57 }
  0xc4   :  { %v185_v60 = vpop.permute.xlu1 %184 }
  0xc6   :  { %v5253_v61 = vpop.f32.mrf.mxu0 }
  0xcc   :  { %v170_v14 = vpop.permute.xlu1 %169 }
  0xcd   :  { %v5398_v30 = vadd.f32 %v5245_v58, %v170_v14 }
  0xce   :  { %v5264_v1 = vpop.f32.mrf.mxu0 }
  0xcf   :  { %8241 = vst [vmem:[#allocation22_spill] sm:$0xff] %v5398_v30 }
  0xd1   :  { %519 = vmatmul.bf16.gmra.mxu0 %v4744_v0  ;;  %v180_v0 = vpop.permute.xlu0 %179 }
  0xd6   :  { %v5275_v5 = vpop.f32.mrf.mxu0 }
  0xde   :  { %v5293_v12 = vpop.f32.mrf.mxu0 }
  0xdf   :  { %v5387_v26 = vadd.f32 %v5293_v12, %v190_v49 }
  0xe1   :  { %524 = vmatmul.bf16.gmra.mxu0 %v4745_v11  ;;  %8238 = vst [vmem:[#allocation19_spill] sm:$0xff] %v5387_v26 }
  0xe6   :  { %v5305_v19 = vpop.f32.mrf.mxu0 }
  0xe7   :  { %v5380_v20 = vadd.f32 %v5305_v19, %v195_v53  ;;  %v175_v19 = vpop.permute.xlu2 %174  ;;  %v4759_v53 = vld [vmem:[%s7951_s3 + $0x4] sm:$0xf0] }
  0xe9   :  { %8237 = vst [vmem:[#allocation18_spill] sm:$0xff] %v5380_v20 }
  0xee   :  { %v490_v25 = vpop.f32.mrf.mxu0 }
  0xef   :  { %v5375_v15 = vadd.f32 %v490_v25, %v200_v40  ;;  %v553_v25 = vpack.c.bf16 %v5380_v20, %v5387_v26 }
  0xf1   :  { %529 = vmatmul.bf16.gmra.mxu0 %v4746_v23  ;;  %8236 = vst [vmem:[#allocation17_spill] sm:$0xff] %v5375_v15 }
  0xf6   :  { %v492_v28 = vpop.f32.mrf.mxu0 }
  0xf7   :  { %v5369_v9 = vadd.f32 %v492_v28, %v205_v44  ;;  %v5395_v28 = vadd.f32 %v5264_v1, %v180_v0 }
  0xf9   :  { %8240 = vst [vmem:[#allocation21_spill] sm:$0xff] %v5395_v28 }
  0xfe   :  { %v495_v33 = vpop.f32.mrf.mxu0 }
  0xff   :  { %v5367_v8 = vadd.f32 %v495_v33, %v210_v37 }
 0x101   :  { %534 = vmatmul.bf16.gmra.mxu0 %v4747_v32  ;;  %8235 = vst [vmem:[#allocation16_spill] sm:$0xff] %v5367_v8 }
 0x106   :  { %v497_v38 = vpop.f32.mrf.mxu0 }
 0x107   :  { %v5361_v3 = vadd.f32 %v497_v38, %v215_v35 }
 0x109   :  { %8234 = vst [vmem:[#allocation15_spill] sm:$0xff] %v5361_v3  ;;  %v555_v11 = vpack.c.bf16 %v5361_v3, %v5367_v8 }
 0x10e   :  { %v500_v43 = vpop.f32.mrf.mxu0 }
 0x10f   :  { %v5359_v2 = vadd.f32 %v500_v43, %v220_v27  ;;  %v5390_v27 = vadd.f32 %v5275_v5, %v185_v60  ;;  %v5403_v5 = vadd.f32 %v5253_v61, %v175_v19 }
 0x111   :  { %539 = vmatmul.bf16.gmra.mxu0 %v4748_v42  ;;  %8239 = vst [vmem:[#allocation20_spill] sm:$0xff] %v5390_v27  ;;  %v552_v12 = vpack.c.bf16 %v5390_v27, %v5395_v28  ;;  %v551_v58 = vpack.c.bf16 %v5403_v5, %v5398_v30 }
 0x112   :  { %8242 = vst [vmem:[#allocation23_spill] sm:$0xff] %v5403_v5 }
 0x116   :  { %v502_v47 = vpop.f32.mrf.mxu0 }
 0x117   :  { %v5355_v62 = vadd.f32 %v502_v47, %v225_v31  ;;  %v165_v31 = vpop.permute.xlu1 %164 }
 0x118   :  { %v5406_v35 = vadd.f32 %v5234_v54, %v165_v31 }
 0x119   :  { %8233 = vst [vmem:[#allocation14_spill] sm:$0xff] %v5355_v62  ;;  %v556_v4 = vpack.c.bf16 %v5355_v62, %v5359_v2 }
 0x11a   :  { %8243 = vst [vmem:[#allocation24_spill] sm:$0xff] %v5406_v35 }
 0x11e   :  { %v505_v50 = vpop.f32.mrf.mxu0 }
 0x11f   :  { %v5349_v56 = vadd.f32 %v505_v50, %v230_v16  ;;  %v5377_v16 = vpop.permute.xlu0 %244  ;;  %v4302_v50 = vld [vmem:[%s7951_s3] sm:$0xf] }
 0x120   :  { %v4303_v60 = vor.u32 %v4759_v53, %v4302_v50  ;;  %v4342_v53 = vld [vmem:[%s7951_s3 + $0x50] sm:$0xf] }
 0x121   :  { %544 = vmatmul.bf16.gmra.mxu0 %v4749_v48  ;;  %8231 = vst [vmem:[#allocation12_spill] sm:$0xff] %v5349_v56 }
 0x126   :  { %v507_v55 = vpop.f32.mrf.mxu0 }
 0x127   :  { %v5351_v57 = vadd.f32 %v507_v55, %v235_v21  ;;  %v554_v21 = vpack.c.bf16 %v5369_v9, %v5375_v15  ;;  %v160_v32 = vpop.permute.xlu0 %159 }
 0x128   :  { %v5409_v1 = vadd.f32 %v5226_v51, %v160_v32 }
 0x129   :  { %8232 = vst [vmem:[#allocation13_spill] sm:$0xff] %v5351_v57  ;;  %v557_v63 = vpack.c.bf16 %v5351_v57, %v5349_v56 }
 0x12a   :  { %8244 = vst [vmem:[#allocation25_spill] sm:$0xff] %v5409_v1  ;;  %v550_v36 = vpack.c.bf16 %v5406_v35, %v5409_v1 }
 0x12b   :  { %758 = vmatpush.bf16.msra.mxu1 %v557_v63 }
 0x12e   :  { %v5365_v6 = vpop.f32.mrf.mxu0 }
 0x12f   :  { %759 = vmatpush.bf16.msra.mxu1 %v556_v4 }
 0x133   :  { %760 = vmatpush.bf16.msra.mxu1 %v555_v11 }
 0x136   :  { %v5384_v23 = vpop.f32.mrf.mxu0 }
 0x137   :  { %761 = vmatpush.bf16.msra.mxu1 %v554_v21 }
 0x13b   :  { %762 = vmatpush.bf16.msra.mxu1 %v553_v25 }
 0x13e   :  { %v515_v33 = vpop.f32.mrf.mxu0 }
 0x13f   :  { %763 = vmatpush.bf16.msra.mxu1 %v552_v12 }
 0x143   :  { %764 = vmatpush.bf16.msra.mxu1 %v551_v58 }
 0x146   :  { %v517_v37 = vpop.f32.mrf.mxu0 }
 0x147   :  { %765 = vmatpush.bf16.msra.mxu1 %v550_v36 }
 0x14a   :  { %766 = vmatmul.bf16.vlgmr.msra.gmra.mxu1 %v4303_v60  ;;  %v4764_v60 = vld [vmem:[%s7951_s3 + $0x34] sm:$0xf] }
 0x14e   :  { %v520_v38 = vpop.f32.mrf.mxu0 }
 0x14f   :  { %v5471_v58 = vadd.f32 %v520_v38, %v5342_v46  ;;  %v4318_v46 = vld [vmem:[%s7951_s3 + $0x20] sm:$0xf] }
 0x151   :  { %8256 = vst [vmem:[#allocation37_spill] sm:$0xff] %v5471_v58 }
 0x156   :  { %v522_v40 = vpop.f32.mrf.mxu0 }
 0x157   :  { %v5466_v32 = vadd.f32 %v522_v40, %v5340_v45  ;;  %v5483_v45 = vadd.f32 %v5384_v23, %v5377_v16  ;;  %v4758_v16 = vld [vmem:[%s7951_s3 + $0x4] sm:$0xf]  ;;  %v4304_v23 = vld [vmem:[%s7951_s3 + $0x8] sm:$0xf0] }
 0x158   :  { %v4307_v38 = vor.u32 %v4758_v16, %v4304_v23  ;;  %v4344_v16 = vld [vmem:[%s7951_s3 + $0x58] sm:$0xf0] }
 0x159   :  { %8255 = vst [vmem:[#allocation36_spill] sm:$0xff] %v5466_v32  ;;  %v560_v36 = vpack.c.bf16 %v5466_v32, %v5471_v58 }
 0x15a   :  { %8259 = vst [vmem:[#allocation40_spill] sm:$0xff] %v5483_v45 }
 0x15e   :  { %v525_v61 = vpop.f32.mrf.mxu0 }
 0x15f   :  { %v5463_v12 = vadd.f32 %v525_v61, %v5333_v39  ;;  %v5479_v39 = vadd.f32 %v515_v33, %v5347_v52  ;;  %v5495_v52 = vadd.f32 %v5365_v6, %v5373_v13  ;;  %v4326_v6 = vld [vmem:[%s7951_s3 + $0x30] sm:$0xf]  ;;  %v4765_v13 = vld [vmem:[%s7951_s3 + $0x34] sm:$0xf0]  ;;  %v4760_v61 = vld [vmem:[%s7951_s3 + $0x14] sm:$0xf] }
 0x161   :  { %8254 = vst [vmem:[#allocation35_spill] sm:$0xff] %v5463_v12 }
 0x162   :  { %8258 = vst [vmem:[#allocation39_spill] sm:$0xff] %v5479_v39 }
 0x163   :  { %8260 = vst [vmem:[#allocation41_spill] sm:$0xff] %v5495_v52 }
 0x166   :  { %v527_v42 = vpop.f32.mrf.mxu0 }
 0x167   :  { %v5458_v31 = vadd.f32 %v527_v42, %v5335_v41  ;;  %v5474_v41 = vadd.f32 %v517_v37, %v5353_v59  ;;  %v4763_v59 = vld [vmem:[%s7951_s3 + $0x24] sm:$0xf0]  ;;  %v558_v37 = vpack.c.bf16 %v5483_v45, %v5495_v52  ;;  %v4312_v42 = vld [vmem:[%s7951_s3 + $0x18] sm:$0xf0] }
 0x168   :  { %v4319_v33 = vor.u32 %v4763_v59, %v4318_v46  ;;  %v4773_v46 = vld [vmem:[%s7951_s3 + $0x74] sm:$0xf0]  ;;  %v4768_v59 = vld [vmem:[%s7951_s3 + $0x54] sm:$0xf] }
 0x169   :  { %8253 = vst [vmem:[#allocation34_spill] sm:$0xff] %v5458_v31  ;;  %v559_v40 = vpack.c.bf16 %v5474_v41, %v5479_v39 }
 0x16a   :  { %8257 = vst [vmem:[#allocation38_spill] sm:$0xff] %v5474_v41 }
 0x16e   :  { %v530_v43 = vpop.f32.mrf.mxu0 }
 0x16f   :  { %v5455_v19 = vadd.f32 %v530_v43, %v5320_v29  ;;  %v561_v29 = vpack.c.bf16 %v5458_v31, %v5463_v12  ;;  %v4327_v43 = vor.u32 %v4765_v13, %v4326_v6  ;;  %v4770_v6 = vld [vmem:[%s7951_s3 + $0x64] sm:$0xf]  ;;  %v4352_v13 = vld [vmem:[%s7951_s3 + $0x68] sm:$0xf0] }
 0x171   :  { %8252 = vst [vmem:[#allocation33_spill] sm:$0xff] %v5455_v19 }
 0x176   :  { %v532_v44 = vpop.f32.mrf.mxu0 }
 0x17e   :  { %v535_v54 = vpop.f32.mrf.mxu0 }
 0x186   :  { %v537_v47 = vpop.f32.mrf.mxu0 }
 0x187   :  { %v5436_v21 = vadd.f32 %v537_v47, %v5310_v22  ;;  %v4761_v22 = vld [vmem:[%s7951_s3 + $0x14] sm:$0xf0]  ;;  %v4767_v47 = vld [vmem:[%s7951_s3 + $0x44] sm:$0xf0] }
 0x189   :  { %8249 = vst [vmem:[#allocation30_spill] sm:$0xff] %v5436_v21 }
 0x18e   :  { %v540_v48 = vpop.f32.mrf.mxu0 }
 0x18f   :  { %v5433_v14 = vadd.f32 %v540_v48, %v5280_v7  ;;  %v4310_v7 = vld [vmem:[%s7951_s3 + $0x10] sm:$0xf]  ;;  %v4762_v48 = vld [vmem:[%s7951_s3 + $0x24] sm:$0xf] }
 0x191   :  { %8248 = vst [vmem:[#allocation29_spill] sm:$0xff] %v5433_v14 }
 0x196   :  { %v542_v51 = vpop.f32.mrf.mxu0 }
 0x197   :  { %v5428_v4 = vadd.f32 %v542_v51, %v5301_v17  ;;  %v5444_v17 = vadd.f32 %v532_v44, %v5328_v34  ;;  %v4315_v44 = vor.u32 %v4760_v61, %v4312_v42  ;;  %v4320_v51 = vld [vmem:[%s7951_s3 + $0x28] sm:$0xf0] }
 0x198   :  { %v4323_v50 = vor.u32 %v4762_v48, %v4320_v51  ;;  %v4374_v51 = vld [vmem:[%s7951_s3 + $0x90] sm:$0xf] }
 0x199   :  { %8247 = vst [vmem:[#allocation28_spill] sm:$0xff] %v5428_v4  ;;  %v562_v34 = vpack.c.bf16 %v5444_v17, %v5455_v19 }
 0x19a   :  { %8251 = vst [vmem:[#allocation32_spill] sm:$0xff] %v5444_v17 }
 0x19e   :  { %v545_v49 = vpop.f32.mrf.mxu0 }
 0x19f   :  { %v5422_v63 = vadd.f32 %v545_v49, %v5288_v10  ;;  %v564_v10 = vpack.c.bf16 %v5428_v4, %v5433_v14 }
 0x1a1   :  { %8245 = vst [vmem:[#allocation26_spill] sm:$0xff] %v5422_v63 }
 0x1a6   :  { %v547_v55 = vpop.f32.mrf.mxu0 }
 0x1a7   :  { %v5425_v0 = vadd.f32 %v547_v55, %v5303_v18  ;;  %v5441_v18 = vadd.f32 %v535_v54, %v5315_v24  ;;  %v4311_v24 = vor.u32 %v4761_v22, %v4310_v7  ;;  %v4334_v54 = vld [vmem:[%s7951_s3 + $0x40] sm:$0xf]  ;;  %v4769_v55 = vld [vmem:[%s7951_s3 + $0x54] sm:$0xf0]  ;;  %v4771_v22 = vld [vmem:[%s7951_s3 + $0x64] sm:$0xf0] }
 0x1a8   :  { %v4335_v49 = vor.u32 %v4767_v47, %v4334_v54  ;;  %v4350_v7 = vld [vmem:[%s7951_s3 + $0x60] sm:$0xf]  ;;  %v4772_v54 = vld [vmem:[%s7951_s3 + $0x74] sm:$0xf]  ;;  %v4360_v47 = vld [vmem:[%s7951_s3 + $0x78] sm:$0xf0] }
 0x1a9   :  { %8246 = vst [vmem:[#allocation27_spill] sm:$0xff] %v5425_v0  ;;  %v565_v11 = vpack.c.bf16 %v5425_v0, %v5422_v63  ;;  %v563_v25 = vpack.c.bf16 %v5436_v21, %v5441_v18  ;;  %771 = vmatmul.bf16.gmra.mxu1 %v4311_v24  ;;  %v4766_v24 = vld [vmem:[%s7951_s3 + $0x44] sm:$0xf]  ;;  %v4363_v48 = vor.u32 %v4772_v54, %v4360_v47 }
 0x1aa   :  { %8250 = vst [vmem:[#allocation31_spill] sm:$0xff] %v5441_v18 }
 0x1ab   :  { %847 = vmatpush.bf16.msra.mxu2 %v565_v11  ;;  %v4328_v11 = vld [vmem:[%s7951_s3 + $0x38] sm:$0xf0] }
 0x1af   :  { %848 = vmatpush.bf16.msra.mxu2 %v564_v10  ;;  %v4343_v10 = vor.u32 %v4769_v55, %v4342_v53  ;;  %v4774_v55 = vld [vmem:[%s7951_s3 + $0x84] sm:$0xf] }
 0x1b3   :  { %849 = vmatpush.bf16.msra.mxu2 %v563_v25  ;;  %v4331_v25 = vor.u32 %v4764_v60, %v4328_v11  ;;  %v4368_v60 = vld [vmem:[%s7951_s3 + $0x88] sm:$0xf0] }
 0x1b7   :  { %850 = vmatpush.bf16.msra.mxu2 %v562_v34  ;;  %v4336_v34 = vld [vmem:[%s7951_s3 + $0x48] sm:$0xf0] }
 0x1b9   :  { %776 = vmatmul.bf16.gmra.mxu1 %v4319_v33  ;;  %v4347_v33 = vor.u32 %v4768_v59, %v4344_v16 }
 0x1bb   :  { %851 = vmatpush.bf16.msra.mxu2 %v561_v29  ;;  %v4351_v29 = vor.u32 %v4771_v22, %v4350_v7  ;;  %v4779_v7 = vld [vmem:[%s7951_s3 + $0xa4] sm:$0xf0] }
 0x1bf   :  { %852 = vmatpush.bf16.msra.mxu2 %v560_v36  ;;  %v4339_v36 = vor.u32 %v4766_v24, %v4336_v34 }
 0x1c3   :  { %853 = vmatpush.bf16.msra.mxu2 %v559_v40  ;;  %v4358_v40 = vld [vmem:[%s7951_s3 + $0x70] sm:$0xf] }
 0x1c4   :  { %v4359_v23 = vor.u32 %v4773_v46, %v4358_v40  ;;  %v4376_v40 = vld [vmem:[%s7951_s3 + $0x98] sm:$0xf0] }
 0x1c7   :  { %854 = vmatpush.bf16.msra.mxu2 %v558_v37  ;;  %v4366_v37 = vld [vmem:[%s7951_s3 + $0x80] sm:$0xf]  ;;  %v767_v42 = vpop.f32.mrf.mxu1 }
 0x1c9   :  { %781 = vmatmul.bf16.gmra.mxu1 %v4327_v43  ;;  %v4355_v43 = vor.u32 %v4770_v6, %v4352_v13 }
 0x1ca   :  { %855 = vmatmul.bf16.vlgmr.msra.gmra.mxu2 %v4307_v38  ;;  %v4775_v38 = vld [vmem:[%s7951_s3 + $0x84] sm:$0xf0] }
 0x1cb   :  { %v4367_v61 = vor.u32 %v4775_v38, %v4366_v37 }
 0x1d9   :  { %786 = vmatmul.bf16.gmra.mxu1 %v4335_v49  ;;  %v4777_v49 = vld [vmem:[%s7951_s3 + $0x94] sm:$0xf0] }
 0x1da   :  { %860 = vmatmul.bf16.gmra.mxu2 %v4315_v44  ;;  %v769_v44 = vpop.f32.mrf.mxu1 }
 0x1e9   :  { %791 = vmatmul.bf16.gmra.mxu1 %v4343_v10  ;;  %v4371_v10 = vor.u32 %v4774_v55, %v4368_v60 }
 0x1ea   :  { %865 = vmatmul.bf16.gmra.mxu2 %v4323_v50  ;;  %v4375_v50 = vor.u32 %v4777_v49, %v4374_v51 }
 0x1f9   :  { %796 = vmatmul.bf16.gmra.mxu1 %v4351_v29 }
 0x1fa   :  { %870 = vmatmul.bf16.gmra.mxu2 %v4331_v25  ;;  %v4382_v25 = vld [vmem:[%s7951_s3 + $0xa0] sm:$0xf] }
 0x1fb   :  { %v4383_v22 = vor.u32 %v4779_v7, %v4382_v25 }
 0x209   :  { %801 = vmatmul.bf16.gmra.mxu1 %v4359_v23 }
 0x20a   :  { %875 = vmatmul.bf16.gmra.mxu2 %v4339_v36  ;;  %v4776_v36 = vld [vmem:[%s7951_s3 + $0x94] sm:$0xf] }
 0x20b   :  { %v4379_v16 = vor.u32 %v4776_v36, %v4376_v40 }
 0x219   :  { %806 = vmatmul.bf16.gmra.mxu1 %v4367_v61 }
 0x21a   :  { %880 = vmatmul.bf16.gmra.mxu2 %v4347_v33 }
 0x226   :  { %v772_v53 = vpop.f32.mrf.mxu1 }
 0x229   :  { %811 = vmatmul.bf16.gmra.mxu1 %v4375_v50 }
 0x22a   :  { %885 = vmatmul.bf16.gmra.mxu2 %v4355_v43 }
 0x22e   :  { %v5595_v11 = vpop.f32.mrf.mxu1 }
 0x236   :  { %v5603_v34 = vpop.f32.mrf.mxu1 }
 0x239   :  { %816 = vmatmul.bf16.gmra.mxu1 %v4383_v22 }
 0x23a   :  { %890 = vmatmul.bf16.gmra.mxu2 %v4363_v48 }
 0x23e   :  { %v5619_v43 = vpop.f32.mrf.mxu1 }
 0x24a   :  { %895 = vmatmul.bf16.gmra.mxu2 %v4371_v10 }
 0x24d   :  { %v856_v24 = vpop.f32.mrf.mxu2 }
 0x24e   :  { %v857_v29 = vadd.f32 %v856_v24, %v767_v42 }
 0x250   :  { %v936_v46 = vmul.f32 %v857_v29, %v5409_v1  ;;  %v949_v23 = vmul.f32 %v857_v29, %v5395_v28  ;;  %v962_v33 = vmul.f32 %v857_v29, %v5375_v15  ;;  %v975_v37 = vmul.f32 %v857_v29, %v5359_v2 }
 0x251   :  { %v988_v6 = vmul.f32 %v857_v29, %v5495_v52  ;;  %v1001_v13 = vmul.f32 %v857_v29, %v5471_v58  ;;  %v1014_v61 = vmul.f32 %v857_v29, %v5455_v19  ;;  %v1027_v42 = vmul.f32 %v857_v29, %v5433_v14 }
 0x255   :  { %v858_v59 = vpop.f32.mrf.mxu2 }
 0x256   :  { %v859_v38 = vadd.f32 %v858_v59, %v769_v44 }
 0x258   :  { %v937_v54 = vmul.f32 %v859_v38, %v5406_v35  ;;  %v950_v47 = vmul.f32 %v859_v38, %v5390_v27  ;;  %v963_v48 = vmul.f32 %v859_v38, %v5369_v9  ;;  %v976_v51 = vmul.f32 %v859_v38, %v5355_v62 }
 0x259   :  { %v989_v44 = vmul.f32 %v859_v38, %v5483_v45  ;;  %v1002_v49 = vmul.f32 %v859_v38, %v5466_v32  ;;  %v1015_v50 = vmul.f32 %v859_v38, %v5444_v17  ;;  %v1028_v55 = vmul.f32 %v859_v38, %v5428_v4  ;;  %v4781_v38 = vld [vmem:[%s7951_s3 + $0xb4] sm:$0xf0] }
 0x25a   :  { %v940_v60 = vadd.f32 %v937_v54, %v936_v46  ;;  %v953_v10 = vadd.f32 %v950_v47, %v949_v23  ;;  %v966_v25 = vadd.f32 %v963_v48, %v962_v33  ;;  %v979_v7 = vadd.f32 %v976_v51, %v975_v37  ;;  %900 = vmatmul.bf16.gmra.mxu2 %v4379_v16  ;;  %v5637_v37 = vpop.f32.mrf.mxu1 }
 0x25b   :  { %v992_v22 = vadd.f32 %v989_v44, %v988_v6  ;;  %v1005_v24 = vadd.f32 %v1002_v49, %v1001_v13  ;;  %v1018_v29 = vadd.f32 %v1015_v50, %v1014_v61  ;;  %v1031_v36 = vadd.f32 %v1028_v55, %v1027_v42  ;;  %v4778_v44 = vld [vmem:[%s7951_s3 + $0xa4] sm:$0xf]  ;;  %v4384_v49 = vld [vmem:[%s7951_s3 + $0xa8] sm:$0xf0] }
 0x25d   :  { %v861_v40 = vpop.f32.mrf.mxu2 }
 0x25e   :  { %v862_v59 = vadd.f32 %v861_v40, %v772_v53  ;;  %v4390_v53 = vld [vmem:[%s7951_s3 + $0xb0] sm:$0xf] }
 0x25f   :  { %v4391_v50 = vor.u32 %v4781_v38, %v4390_v53 }
 0x260   :  { %v938_v62 = vmul.f32 %v862_v59, %v5398_v30  ;;  %v951_v45 = vmul.f32 %v862_v59, %v5387_v26  ;;  %v964_v32 = vmul.f32 %v862_v59, %v5367_v8  ;;  %v977_v17 = vmul.f32 %v862_v59, %v5349_v56 }
 0x261   :  { %v990_v46 = vmul.f32 %v862_v59, %v5479_v39  ;;  %v1003_v23 = vmul.f32 %v862_v59, %v5463_v12  ;;  %v1016_v16 = vmul.f32 %v862_v59, %v5441_v18  ;;  %v1029_v33 = vmul.f32 %v862_v59, %v5422_v63  ;;  %821 = vmatmul.bf16.gmra.mxu1 %v4391_v50 }
 0x262   :  { %v941_v6 = vadd.f32 %v940_v60, %v938_v62  ;;  %v954_v13 = vadd.f32 %v953_v10, %v951_v45  ;;  %v967_v61 = vadd.f32 %v966_v25, %v964_v32  ;;  %v980_v42 = vadd.f32 %v979_v7, %v977_v17 }
 0x263   :  { %v993_v54 = vadd.f32 %v992_v22, %v990_v46  ;;  %v1006_v47 = vadd.f32 %v1005_v24, %v1003_v23  ;;  %v1019_v48 = vadd.f32 %v1018_v29, %v1016_v16  ;;  %v1032_v51 = vadd.f32 %v1031_v36, %v1029_v33  ;;  %v5660_v24 = vpop.f32.mrf.mxu1 }
 0x264   :  { %v4387_v62 = vor.u32 %v4778_v44, %v4384_v49 }
 0x265   :  { %v863_v55 = vpop.f32.mrf.mxu2 }
 0x266   :  { %v864_v40 = vadd.f32 %v863_v55, %v5595_v11 }
 0x268   :  { %v939_v17 = vmul.f32 %v864_v40, %v5403_v5  ;;  %v952_v32 = vmul.f32 %v864_v40, %v5380_v20  ;;  %v965_v45 = vmul.f32 %v864_v40, %v5361_v3  ;;  %v978_v60 = vmul.f32 %v864_v40, %v5351_v57 }
 0x269   :  { %v991_v10 = vmul.f32 %v864_v40, %v5474_v41  ;;  %v1004_v25 = vmul.f32 %v864_v40, %v5458_v31  ;;  %v1017_v7 = vmul.f32 %v864_v40, %v5436_v21  ;;  %v1030_v22 = vmul.f32 %v864_v40, %v5425_v0 }
 0x26a   :  { %v942_v11 = vadd.f32 %v941_v6, %v939_v17  ;;  %v955_v29 = vadd.f32 %v954_v13, %v952_v32  ;;  %v968_v36 = vadd.f32 %v967_v61, %v965_v45  ;;  %v981_v59 = vadd.f32 %v980_v42, %v978_v60  ;;  %905 = vmatmul.bf16.gmra.mxu2 %v4387_v62 }
 0x26b   :  { %v994_v46 = vadd.f32 %v993_v54, %v991_v10  ;;  %v1007_v23 = vadd.f32 %v1006_v47, %v1004_v25  ;;  %v1020_v16 = vadd.f32 %v1019_v48, %v1017_v7  ;;  %v1033_v33 = vadd.f32 %v1032_v51, %v1030_v22  ;;  %v5662_v7 = vpop.f32.mrf.mxu1 }
 0x26c   :  { %v943_v53 = vrot.slane %v942_v11, 4  ;;  %v956_v38 = vrot.slane %v955_v29, 4  ;;  %v969_v44 = vrot.slane %v968_v36, 4  ;;  %v982_v49 = vrot.slane %v981_v59, 4  ;;  %8261 = vst [vmem:[#allocation42_spill] sm:$0xff] %v5662_v7 }
 0x26d   :  { %v995_v50 = vrot.slane %v994_v46, 4  ;;  %v1008_v55 = vrot.slane %v1007_v23, 4  ;;  %v1021_v21 = vrot.slane %v1020_v16, 4  ;;  %v1034_v31 = vrot.slane %v1033_v33, 4  ;;  %v866_v40 = vpop.f32.mrf.mxu2 }
 0x26e   :  { %v944_v0 = vadd.f32 %v943_v53, %v942_v11  ;;  %v957_v6 = vadd.f32 %v956_v38, %v955_v29  ;;  %v970_v13 = vadd.f32 %v969_v44, %v968_v36  ;;  %v983_v61 = vadd.f32 %v982_v49, %v981_v59 }
 0x26f   :  { %v996_v42 = vadd.f32 %v995_v50, %v994_v46  ;;  %v1009_v54 = vadd.f32 %v1008_v55, %v1007_v23  ;;  %v1022_v47 = vadd.f32 %v1021_v21, %v1020_v16  ;;  %v1035_v48 = vadd.f32 %v1034_v31, %v1033_v33  ;;  %v4780_v23 = vld [vmem:[%s7951_s3 + $0xb4] sm:$0xf]  ;;  %v4392_v16 = vld [vmem:[%s7951_s3 + $0xb8] sm:$0xf0] }
 0x270   :  { %v945_v51 = vrot.slane %v944_v0, 2  ;;  %v958_v62 = vrot.slane %v957_v6, 2  ;;  %v971_v17 = vrot.slane %v970_v13, 2  ;;  %v984_v32 = vrot.slane %v983_v61, 2 }
 0x271   :  { %v997_v45 = vrot.slane %v996_v42, 2  ;;  %v1010_v60 = vrot.slane %v1009_v54, 2  ;;  %v1023_v10 = vrot.slane %v1022_v47, 2  ;;  %v1036_v25 = vrot.slane %v1035_v48, 2 }
 0x272   :  { %v946_v22 = vadd.f32 %v945_v51, %v944_v0  ;;  %v959_v11 = vadd.f32 %v958_v62, %v957_v6  ;;  %v972_v29 = vadd.f32 %v971_v17, %v970_v13  ;;  %v985_v36 = vadd.f32 %v984_v32, %v983_v61  ;;  %v4398_v0 = vld [vmem:[%s7951_s3 + $0xc0] sm:$0xf]  ;;  %v4783_v61 = vld [vmem:[%s7951_s3 + $0xc4] sm:$0xf0] }
 0x273   :  { %v998_v59 = vadd.f32 %v997_v45, %v996_v42  ;;  %v1011_v21 = vadd.f32 %v1010_v60, %v1009_v54  ;;  %v1024_v31 = vadd.f32 %v1023_v10, %v1022_v47  ;;  %v1037_v46 = vadd.f32 %v1036_v25, %v1035_v48 }
 0x274   :  { %v947_v33 = vrot.slane %v946_v22, 1  ;;  %v960_v53 = vrot.slane %v959_v11, 1  ;;  %v973_v38 = vrot.slane %v972_v29, 1  ;;  %v986_v44 = vrot.slane %v985_v36, 1 }
 0x275   :  { %v999_v49 = vrot.slane %v998_v59, 1  ;;  %v1012_v50 = vrot.slane %v1011_v21, 1  ;;  %v1025_v55 = vrot.slane %v1024_v31, 1  ;;  %v1038_v6 = vrot.slane %v1037_v46, 1  ;;  %v868_v13 = vpop.f32.mrf.mxu2 }
 0x276   :  { %v948_v42 = vadd.f32 %v947_v33, %v946_v22  ;;  %v961_v54 = vadd.f32 %v960_v53, %v959_v11  ;;  %v974_v47 = vadd.f32 %v973_v38, %v972_v29  ;;  %v4395_v48 = vor.u32 %v4780_v23, %v4392_v16  ;;  %v8262_v38 = vld [vmem:[#allocation14_spill] sm:$0xff] }
 0x277   :  { %v987_v51 = vadd.f32 %v986_v44, %v985_v36  ;;  %v1000_v62 = vadd.f32 %v999_v49, %v998_v59  ;;  %v867_v32 = vadd.f32 %v866_v40, %v5603_v34  ;;  %v869_v45 = vadd.f32 %v868_v13, %v5619_v43  ;;  %v5684_v59 = vpop.f32.mrf.mxu1  ;;  %v8264_v13 = vld [vmem:[#allocation36_spill] sm:$0xff] }
 0x278   :  { %v1041_v17 = vsel %vm1040_vm0, %v948_v42, %v961_v54  ;;  %v4399_v60 = vor.u32 %v4783_v61, %v4398_v0  ;;  %v1013_v10 = vadd.f32 %v1012_v50, %v1011_v21  ;;  %v1026_v25 = vadd.f32 %v1025_v55, %v1024_v31  ;;  %v8263_v55 = vld [vmem:[#allocation40_spill] sm:$0xff] }
 0x279   :  { %v1039_v7 = vadd.f32 %v1038_v6, %v1037_v46  ;;  %v1043_v41 = vsel %vm1042_vm1, %v1041_v17, %v974_v47  ;;  %v1071_v11 = vmul.f32 %v867_v32, %v5409_v1  ;;  %v1084_v29 = vmul.f32 %v867_v32, %v5395_v28  ;;  %v8265_v17 = vld [vmem:[#allocation32_spill] sm:$0xff] }
 0x27a   :  { %v1045_v22 = vsel %vm1044_vm2, %v1043_v41, %v987_v51  ;;  %v1097_v36 = vmul.f32 %v867_v32, %v5375_v15  ;;  %910 = vmatmul.bf16.gmra.mxu2 %v4395_v48  ;;  %v1110_v43 = vmul.f32 %v867_v32, %v5359_v2  ;;  %v1123_v40 = vmul.f32 %v867_v32, %v5495_v52 }
 0x27b   :  { %v1047_v34 = vsel %vm1046_vm3, %v1045_v22, %v1000_v62  ;;  %v1136_v21 = vmul.f32 %v867_v32, %v5471_v58  ;;  %826 = vmatmul.bf16.gmra.mxu1 %v4399_v60  ;;  %v1149_v31 = vmul.f32 %v867_v32, %v5455_v19  ;;  %v1162_v46 = vmul.f32 %v867_v32, %v5433_v14  ;;  %v4782_v22 = vld [vmem:[%s7951_s3 + $0xc4] sm:$0xf] }
 0x27c   :  { %v1049_v41 = vsel %vm1048_vm4, %v1047_v34, %v1013_v10  ;;  %v1072_v23 = vmul.f32 %v869_v45, %v5406_v35  ;;  %v1085_v33 = vmul.f32 %v869_v45, %v5390_v27  ;;  %v1098_v53 = vmul.f32 %v869_v45, %v5369_v9 }
 0x27d   :  { %v1051_v16 = vsel %vm1050_vm5, %v1049_v41, %v1026_v25  ;;  %v1111_v44 = vmul.f32 %v869_v45, %v8262_v38  ;;  %v871_v0 = vpop.f32.mrf.mxu2  ;;  %v1124_v6 = vmul.f32 %v869_v45, %v8263_v55  ;;  %v1137_v61 = vmul.f32 %v869_v45, %v8264_v13 }
 0x27e   :  { %v5699_v49 = vsel %vm1052_vm6, %v1051_v16, %v1039_v7  ;;  %v1075_v50 = vadd.f32 %v1072_v23, %v1071_v11  ;;  %v1088_v54 = vadd.f32 %v1085_v33, %v1084_v29  ;;  %v1101_v47 = vadd.f32 %v1098_v53, %v1097_v36  ;;  %v4400_v11 = vld [vmem:[%s7951_s3 + $0xc8] sm:$0xf0] }
 0x27f   :  { %v1054_v42 = vrot.slane %v5699_v49, 4  ;;  %v1114_v48 = vadd.f32 %v1111_v44, %v1110_v43  ;;  %v1127_v51 = vadd.f32 %v1124_v6, %v1123_v40  ;;  %v1140_v62 = vadd.f32 %v1137_v61, %v1136_v21  ;;  %v5721_v41 = vpop.f32.mrf.mxu1 }
 0x280   :  { %v1150_v32 = vmul.f32 %v869_v45, %v8265_v17  ;;  %v1163_v60 = vmul.f32 %v869_v45, %v5428_v4  ;;  %v872_v10 = vadd.f32 %v871_v0, %v5637_v37  ;;  %v4403_v44 = vor.u32 %v4782_v22, %v4400_v11 }
 0x281   :  { %v1055_v29 = vmax.f32 %v5699_v49, %v1054_v42 }
 0x282   :  { %v1153_v7 = vadd.f32 %v1150_v32, %v1149_v31  ;;  %v1166_v25 = vadd.f32 %v1163_v60, %v1162_v46  ;;  %v1073_v36 = vmul.f32 %v872_v10, %v5398_v30  ;;  %v1086_v34 = vmul.f32 %v872_v10, %v5387_v26  ;;  %v4406_v31 = vld [vmem:[%s7951_s3 + $0xd0] sm:$0xf]  ;;  %v4785_v46 = vld [vmem:[%s7951_s3 + $0xd4] sm:$0xf0] }
 0x283   :  { %v1099_v45 = vmul.f32 %v872_v10, %v5367_v8  ;;  %v1112_v37 = vmul.f32 %v872_v10, %v5349_v56  ;;  %v1125_v43 = vmul.f32 %v872_v10, %v5479_v39  ;;  %v1138_v40 = vmul.f32 %v872_v10, %v5463_v12 }
 0x284   :  { %v1151_v21 = vmul.f32 %v872_v10, %v5441_v18  ;;  %v1076_v23 = vadd.f32 %v1075_v50, %v1073_v36  ;;  %v1089_v16 = vadd.f32 %v1088_v54, %v1086_v34  ;;  %v1056_v32 = vrot.slane %v1055_v29, 2 }
 0x285   :  { %v1102_v33 = vadd.f32 %v1101_v47, %v1099_v45  ;;  %v873_v53 = vpop.f32.mrf.mxu2  ;;  %v1115_v0 = vadd.f32 %v1114_v48, %v1112_v37  ;;  %v1128_v6 = vadd.f32 %v1127_v51, %v1125_v43  ;;  %v1141_v61 = vadd.f32 %v1140_v62, %v1138_v40  ;;  %v8266_v47 = vld [vmem:[#allocation38_spill] sm:$0xff] }
 0x286   :  { %v1154_v42 = vadd.f32 %v1153_v7, %v1151_v21  ;;  %v1164_v60 = vmul.f32 %v872_v10, %v5422_v63  ;;  %v874_v18 = vadd.f32 %v873_v53, %v5660_v24  ;;  %v4407_v12 = vor.u32 %v4785_v46, %v4406_v31  ;;  %v8267_v51 = vld [vmem:[#allocation34_spill] sm:$0xff] }
 0x287   :  { %v5737_v7 = vmax.f32 %v1055_v29, %v1056_v32  ;;  %v8268_v24 = vld [vmem:[#allocation30_spill] sm:$0xff]  ;;  %v5740_v37 = vpop.f32.mrf.mxu1 }
 0x288   :  { %v1167_v39 = vadd.f32 %v1166_v25, %v1164_v60  ;;  %v1074_v56 = vmul.f32 %v874_v18, %v5403_v5  ;;  %v1087_v8 = vmul.f32 %v874_v18, %v5380_v20  ;;  %v1100_v50 = vmul.f32 %v874_v18, %v5361_v3 }
 0x289   :  { %v1113_v54 = vmul.f32 %v874_v18, %v5351_v57  ;;  %v1126_v48 = vmul.f32 %v874_v18, %v8266_v47  ;;  %v1139_v62 = vmul.f32 %v874_v18, %v8267_v51  ;;  %v1152_v11 = vmul.f32 %v874_v18, %v8268_v24 }
 0x28a   :  { %915 = vmatmul.bf16.gmra.mxu2 %v4403_v44  ;;  %v1077_v10 = vadd.f32 %v1076_v23, %v1074_v56  ;;  %v1090_v22 = vadd.f32 %v1089_v16, %v1087_v8  ;;  %v1103_v25 = vadd.f32 %v1102_v33, %v1100_v50  ;;  %v1058_v56 = vrot.slane %v5737_v7, 1  ;;  %v8269_v50 = vld [vmem:[#allocation27_spill] sm:$0xff] }
 0x28b   :  { %831 = vmatmul.bf16.gmra.mxu1 %v4407_v12  ;;  %v1116_v36 = vadd.f32 %v1115_v0, %v1113_v54  ;;  %v1129_v34 = vadd.f32 %v1128_v6, %v1126_v48  ;;  %v1142_v45 = vadd.f32 %v1141_v61, %v1139_v62  ;;  %v1155_v21 = vadd.f32 %v1154_v42, %v1152_v11 }
 0x28c   :  { %v1078_v43 = vrot.slane %v1077_v10, 4  ;;  %v1091_v40 = vrot.slane %v1090_v22, 4  ;;  %v1104_v46 = vrot.slane %v1103_v25, 4  ;;  %v1165_v54 = vmul.f32 %v874_v18, %v8269_v50 }
 0x28d   :  { %v876_v31 = vpop.f32.mrf.mxu2  ;;  %v1117_v53 = vrot.slane %v1116_v36, 4  ;;  %v1130_v44 = vrot.slane %v1129_v34, 4  ;;  %v1143_v29 = vrot.slane %v1142_v45, 4  ;;  %v1156_v16 = vrot.slane %v1155_v21, 4 }
 0x28e   :  { %v1079_v8 = vadd.f32 %v1078_v43, %v1077_v10  ;;  %v1092_v23 = vadd.f32 %v1091_v40, %v1090_v22  ;;  %v1105_v12 = vadd.f32 %v1104_v46, %v1103_v25  ;;  %v1168_v57 = vadd.f32 %v1167_v39, %v1165_v54  ;;  %v4784_v10 = vld [vmem:[%s7951_s3 + $0xd4] sm:$0xf]  ;;  %v4408_v22 = vld [vmem:[%s7951_s3 + $0xd8] sm:$0xf0] }
 0x28f   :  { %v1118_v33 = vadd.f32 %v1117_v53, %v1116_v36  ;;  %v1131_v0 = vadd.f32 %v1130_v44, %v1129_v34  ;;  %v1144_v6 = vadd.f32 %v1143_v29, %v1142_v45  ;;  %v1157_v60 = vadd.f32 %v1156_v16, %v1155_v21 }
 0x290   :  { %v1080_v61 = vrot.slane %v1079_v8, 2  ;;  %v1093_v32 = vrot.slane %v1092_v23, 2  ;;  %v1106_v42 = vrot.slane %v1105_v12, 2  ;;  %v1169_v21 = vrot.slane %v1168_v57, 4 }
 0x291   :  { %v1119_v48 = vrot.slane %v1118_v33, 2  ;;  %v1132_v62 = vrot.slane %v1131_v0, 2  ;;  %v1145_v11 = vrot.slane %v1144_v6, 2  ;;  %v1158_v47 = vrot.slane %v1157_v60, 2 }
 0x292   :  { %v1081_v24 = vadd.f32 %v1080_v61, %v1079_v8  ;;  %v1094_v51 = vadd.f32 %v1093_v32, %v1092_v23  ;;  %v1107_v25 = vadd.f32 %v1106_v42, %v1105_v12  ;;  %v4411_v29 = vor.u32 %v4784_v10, %v4408_v22  ;;  %v5750_v8 = vpop.f32.mrf.mxu1  ;;  %v4414_v12 = vld [vmem:[%s7951_s3 + $0xe0] sm:$0xf]  ;;  %v8270_v42 = vld [vmem:[#allocation42_spill] sm:$0xff] }
 0x293   :  { %v1120_v36 = vadd.f32 %v1119_v48, %v1118_v33  ;;  %v1133_v34 = vadd.f32 %v1132_v62, %v1131_v0  ;;  %v1146_v18 = vadd.f32 %v1145_v11, %v1144_v6  ;;  %v1159_v40 = vadd.f32 %v1158_v47, %v1157_v60  ;;  %v4787_v47 = vld [vmem:[%s7951_s3 + $0xe4] sm:$0xf0] }
 0x294   :  { %v1082_v45 = vrot.slane %v1081_v24, 1  ;;  %v1095_v43 = vrot.slane %v1094_v51, 1  ;;  %v1108_v53 = vrot.slane %v1107_v25, 1  ;;  %v1170_v0 = vadd.f32 %v1169_v21, %v1168_v57 }
 0x295   :  { %v878_v46 = vpop.f32.mrf.mxu2  ;;  %v1121_v44 = vrot.slane %v1120_v36, 1  ;;  %v1134_v39 = vrot.slane %v1133_v34, 1  ;;  %v1147_v61 = vrot.slane %v1146_v18, 1  ;;  %v1160_v54 = vrot.slane %v1159_v40, 1 }
 0x296   :  { %v1083_v23 = vadd.f32 %v1082_v45, %v1081_v24  ;;  %v1096_v16 = vadd.f32 %v1095_v43, %v1094_v51  ;;  %v1109_v32 = vadd.f32 %v1108_v53, %v1107_v25  ;;  %v5760_v60 = vmax.f32 %v5737_v7, %v1058_v56 }
 0x297   :  { %v1122_v33 = vadd.f32 %v1121_v44, %v1120_v36  ;;  %v1135_v24 = vadd.f32 %v1134_v39, %v1133_v34  ;;  %v877_v48 = vadd.f32 %v876_v31, %v8270_v42  ;;  %v1148_v62 = vadd.f32 %v1147_v61, %v1146_v18  ;;  %v4786_v31 = vld [vmem:[%s7951_s3 + $0xe4] sm:$0xf]  ;;  %v4416_v34 = vld [vmem:[%s7951_s3 + $0xe8] sm:$0xf0] }
 0x298   :  { %v1175_v6 = vsel %vm1040_vm0, %v1083_v23, %v1096_v16  ;;  %v1171_v11 = vrot.slane %v1170_v0, 2  ;;  %v4415_v22 = vor.u32 %v4787_v47, %v4414_v12  ;;  %v1161_v25 = vadd.f32 %v1160_v54, %v1159_v40 }
 0x299   :  { %v1176_v51 = vsel %vm1042_vm1, %v1175_v6, %v1109_v32  ;;  %v879_v57 = vadd.f32 %v878_v46, %v5684_v59  ;;  %v1060_v43 = vsub.f32 %v5699_v49, %v5760_v60  ;;  %v1199_v59 = vmul.f32 %v877_v48, %v5409_v1 }
 0x29a   :  { %920 = vmatmul.bf16.gmra.mxu2 %v4411_v29  ;;  %v1177_v10 = vsel %vm1044_vm2, %v1176_v51, %v1122_v33  ;;  %v1172_v45 = vadd.f32 %v1171_v11, %v1170_v0  ;;  %v4419_v53 = vor.u32 %v4786_v31, %v4416_v34  ;;  %v5780_v44 = vpop.f32.mrf.mxu1  ;;  %v1212_v61 = vmul.f32 %v877_v48, %v5395_v28  ;;  %v8272_v31 = vld [vmem:[#allocation16_spill] sm:$0xff] }
 0x29b   :  { %v1178_v36 = vsel %vm1046_vm3, %v1177_v10, %v1135_v24  ;;  %836 = vmatmul.bf16.gmra.mxu1 %v4415_v22  ;;  %v1200_v21 = vmul.f32 %v879_v57, %v5406_v35  ;;  %v1213_v46 = vmul.f32 %v879_v57, %v5390_v27  ;;  %v1226_v29 = vmul.f32 %v879_v57, %v5369_v9 }
 0x29c   :  { %v1179_v7 = vsel %vm1048_vm4, %v1178_v36, %v1148_v62  ;;  %v1173_v40 = vrot.slane %v1172_v45, 1  ;;  %v1239_v23 = vmul.f32 %v879_v57, %v8262_v38  ;;  %v1252_v16 = vmul.f32 %v879_v57, %v8263_v55 }
 0x29d   :  { %v881_v56 = vpop.f32.mrf.mxu2  ;;  %v1180_v18 = vsel %vm1050_vm5, %v1179_v7, %v1161_v25  ;;  %v1225_v49 = vmul.f32 %v877_v48, %v5375_v15  ;;  %v1238_v32 = vmul.f32 %v877_v48, %v5359_v2  ;;  %v1265_v54 = vmul.f32 %v879_v57, %v8264_v13 }
 0x29e   :  { %v1174_v39 = vadd.f32 %v1173_v40, %v1172_v45  ;;  %v1251_v47 = vmul.f32 %v877_v48, %v5495_v52  ;;  %v1264_v33 = vmul.f32 %v877_v48, %v5471_v58  ;;  %v1277_v0 = vmul.f32 %v877_v48, %v5455_v19  ;;  %v8274_v40 = vld [vmem:[#allocation39_spill] sm:$0xff] }
 0x29f   :  { %v1290_v6 = vmul.f32 %v877_v48, %v5433_v14  ;;  %v1203_v60 = vadd.f32 %v1200_v21, %v1199_v59  ;;  %v1278_v24 = vmul.f32 %v879_v57, %v8265_v17  ;;  %v882_v51 = vadd.f32 %v881_v56, %v5721_v41  ;;  %v8273_v48 = vld [vmem:[#allocation12_spill] sm:$0xff]  ;;  %v8275_v21 = vld [vmem:[#allocation35_spill] sm:$0xff] }
 0x2a0   :  { %v5790_v12 = vsel %vm1052_vm6, %v1180_v18, %v1174_v39  ;;  %v1216_v42 = vadd.f32 %v1213_v46, %v1212_v61  ;;  %v1229_v62 = vadd.f32 %v1226_v29, %v1225_v49  ;;  %v1242_v11 = vadd.f32 %v1239_v23, %v1238_v32  ;;  %v8276_v29 = vld [vmem:[#allocation31_spill] sm:$0xff] }
 0x2a1   :  { %8271 = vst [vmem:[#allocation14_spill] sm:$0xff] %v5790_v12  ;;  %v1255_v10 = vadd.f32 %v1252_v16, %v1251_v47  ;;  %v1268_v25 = vadd.f32 %v1265_v54, %v1264_v33  ;;  %v1291_v36 = vmul.f32 %v879_v57, %v5428_v4  ;;  %v1201_v45 = vmul.f32 %v882_v51, %v5398_v30  ;;  %v4422_v57 = vld [vmem:[%s7951_s3 + $0xf0] sm:$0xf]  ;;  %v4789_v16 = vld [vmem:[%s7951_s3 + $0xf4] sm:$0xf0] }
 0x2a2   :  { %v1214_v7 = vmul.f32 %v882_v51, %v5387_v26  ;;  %v1227_v34 = vmul.f32 %v882_v51, %v8272_v31  ;;  %v1240_v18 = vmul.f32 %v882_v51, %v8273_v48  ;;  %v1253_v59 = vmul.f32 %v882_v51, %v8274_v40 }
 0x2a3   :  { %v1266_v41 = vmul.f32 %v882_v51, %v8275_v21  ;;  %v1281_v56 = vadd.f32 %v1278_v24, %v1277_v0  ;;  %v1204_v46 = vadd.f32 %v1203_v60, %v1201_v45  ;;  %v1279_v23 = vmul.f32 %v882_v51, %v8276_v29  ;;  %v5813_v60 = vpop.f32.mrf.mxu1 }
 0x2a4   :  { %v1217_v39 = vadd.f32 %v1216_v42, %v1214_v7  ;;  %v1230_v61 = vadd.f32 %v1229_v62, %v1227_v34  ;;  %v1243_v49 = vadd.f32 %v1242_v11, %v1240_v18  ;;  %v1256_v32 = vadd.f32 %v1255_v10, %v1253_v59  ;;  %v8277_v11 = vld [vmem:[#allocation13_spill] sm:$0xff] }
 0x2a5   :  { %v883_v22 = vpop.f32.mrf.mxu2  ;;  %v1294_v54 = vadd.f32 %v1291_v36, %v1290_v6  ;;  %v1269_v47 = vadd.f32 %v1268_v25, %v1266_v41  ;;  %v1282_v33 = vadd.f32 %v1281_v56, %v1279_v23  ;;  %v1292_v0 = vmul.f32 %v882_v51, %v5422_v63  ;;  %v8278_v51 = vld [vmem:[#allocation38_spill] sm:$0xff] }
 0x2a6   :  { %v884_v24 = vadd.f32 %v883_v22, %v5740_v37  ;;  %v4423_v42 = vor.u32 %v4789_v16, %v4422_v57  ;;  %v1061_v45 = vmul.f32 1.442695, %v1060_v43  ;;  %v8279_v36 = vld [vmem:[#allocation34_spill] sm:$0xff] }
 0x2a7   :  { %v1295_v7 = vadd.f32 %v1294_v54, %v1292_v0  ;;  %v8280_v22 = vld [vmem:[#allocation30_spill] sm:$0xff] }
 0x2a8   :  { %v1202_v29 = vmul.f32 %v884_v24, %v5403_v5  ;;  %v1215_v21 = vmul.f32 %v884_v24, %v5380_v20  ;;  %v1228_v62 = vmul.f32 %v884_v24, %v5361_v3  ;;  %v1241_v6 = vmul.f32 %v884_v24, %v8277_v11  ;;  %v4788_v16 = vld [vmem:[%s7951_s3 + $0xf4] sm:$0xf] }
 0x2a9   :  { %v1254_v25 = vmul.f32 %v884_v24, %v8278_v51  ;;  %v1267_v37 = vmul.f32 %v884_v24, %v8279_v36  ;;  %v1280_v43 = vmul.f32 %v884_v24, %v8280_v22  ;;  %4889 = vpow2.f32 %v1061_v45  ;;  %v4424_v22 = vld [vmem:[%s7951_s3 + $0xf8] sm:$0xf0] }
 0x2aa   :  { %925 = vmatmul.bf16.gmra.mxu2 %v4419_v53  ;;  %v1182_v53 = vrot.slane %v5790_v12, 4  ;;  %v1205_v34 = vadd.f32 %v1204_v46, %v1202_v29  ;;  %v1218_v18 = vadd.f32 %v1217_v39, %v1215_v21  ;;  %v1231_v59 = vadd.f32 %v1230_v61, %v1228_v62 }
 0x2ab   :  { %841 = vmatmul.bf16.gmra.mxu1 %v4423_v42  ;;  %v1244_v41 = vadd.f32 %v1243_v49, %v1241_v6  ;;  %v1257_v56 = vadd.f32 %v1256_v32, %v1254_v25  ;;  %v1270_v23 = vadd.f32 %v1269_v47, %v1267_v37  ;;  %v1283_v57 = vadd.f32 %v1282_v33, %v1280_v43  ;;  %v5833_v25 = vpop.f32.mrf.mxu1 }
 0x2ac   :  { %v1206_v54 = vrot.slane %v1205_v34, 4  ;;  %v1219_v0 = vrot.slane %v1218_v18, 4  ;;  %v1232_v42 = vrot.slane %v1231_v59, 4  ;;  %v1183_v21 = vmax.f32 %v5790_v12, %v1182_v53  ;;  %8281 = vst [vmem:[#allocation42_spill] sm:$0xff] %v5833_v25 }
 0x2ad   :  { %v5820_v10 = vpop.f32.mrf.mxu2  ;;  %v1245_v63 = vrot.slane %v1244_v41, 4  ;;  %v1258_v46 = vrot.slane %v1257_v56, 4  ;;  %v1271_v39 = vrot.slane %v1270_v23, 4  ;;  %v1284_v29 = vrot.slane %v1283_v57, 4 }
 0x2ae   :  { %v1207_v61 = vadd.f32 %v1206_v54, %v1205_v34  ;;  %v1220_v49 = vadd.f32 %v1219_v0, %v1218_v18  ;;  %v1233_v32 = vadd.f32 %v1232_v42, %v1231_v59  ;;  %v4427_v6 = vor.u32 %v4788_v16, %v4424_v22 }
 0x2af   :  { %v1246_v47 = vadd.f32 %v1245_v63, %v1244_v41  ;;  %v1259_v33 = vadd.f32 %v1258_v46, %v1257_v56  ;;  %v1272_v45 = vadd.f32 %v1271_v39, %v1270_v23  ;;  %v1285_v62 = vadd.f32 %v1284_v29, %v1283_v57  ;;  %v5835_v3 = vpop.eup %4889 }
 0x2b0   :  { %v1208_v37 = vrot.slane %v1207_v61, 2  ;;  %v1221_v43 = vrot.slane %v1220_v49, 2  ;;  %v1234_v36 = vrot.slane %v1233_v32, 2  ;;  %8282 = vst [vmem:[#allocation43_spill] sm:$0xff] %v5835_v3  ;;  %v1293_v34 = vmul.f32 %v884_v24, %v8269_v50 }
 0x2b1   :  { %v1247_v51 = vrot.slane %v1246_v47, 2  ;;  %v1260_v53 = vrot.slane %v1259_v33, 2  ;;  %v1273_v12 = vrot.slane %v1272_v45, 2  ;;  %v1286_v20 = vrot.slane %v1285_v62, 2 }
 0x2b2   :  { %v1209_v18 = vadd.f32 %v1208_v37, %v1207_v61  ;;  %v1222_v63 = vadd.f32 %v1221_v43, %v1220_v49  ;;  %v1235_v59 = vadd.f32 %v1234_v36, %v1233_v32  ;;  %v1296_v57 = vadd.f32 %v1295_v7, %v1293_v34 }
 0x2b3   :  { %v1248_v41 = vadd.f32 %v1247_v51, %v1246_v47  ;;  %v1261_v56 = vadd.f32 %v1260_v53, %v1259_v33  ;;  %v1274_v22 = vadd.f32 %v1273_v12, %v1272_v45  ;;  %v1287_v23 = vadd.f32 %v1286_v20, %v1285_v62  ;;  %v5842_v33 = vpop.f32.mrf.mxu1  ;;  %v8286_v53 = vld [vmem:[#allocation42_spill] sm:$0xff] }
 0x2b4   :  { %v1210_v16 = vrot.slane %v1209_v18, 1  ;;  %v1223_v54 = vrot.slane %v1222_v63, 1  ;;  %v1236_v0 = vrot.slane %v1235_v59, 1  ;;  %v1184_v46 = vrot.slane %v1183_v21, 2 }
 0x2b5   :  { %v888_v11 = vpop.f32.mrf.mxu2  ;;  %v1249_v42 = vrot.slane %v1248_v41, 1  ;;  %v1262_v39 = vrot.slane %v1261_v56, 1  ;;  %v1275_v29 = vrot.slane %v1274_v22, 1  ;;  %v1297_v5 = vrot.slane %v1296_v57, 4 }
 0x2b6   :  { %v1211_v25 = vadd.f32 %v1210_v16, %v1209_v18  ;;  %v1224_v40 = vadd.f32 %v1223_v54, %v1222_v63  ;;  %v1237_v24 = vadd.f32 %v1236_v0, %v1235_v59  ;;  %v1288_v61 = vrot.slane %v1287_v23, 1 }
 0x2b7   :  { %v1250_v49 = vadd.f32 %v1249_v42, %v1248_v41  ;;  %v1298_v36 = vadd.f32 %v1297_v5, %v1296_v57  ;;  %v5839_v20 = vmax.f32 %v1183_v21, %v1184_v46  ;;  %v1263_v7 = vadd.f32 %v1262_v39, %v1261_v56 }
 0x2b8   :  { %v1303_v51 = vsel %vm1040_vm0, %v1211_v25, %v1224_v40  ;;  %v1276_v32 = vadd.f32 %v1275_v29, %v1274_v22  ;;  %v889_v37 = vadd.f32 %v888_v11, %v5780_v44  ;;  %v1289_v5 = vadd.f32 %v1288_v61, %v1287_v23 }
 0x2b9   :  { %v1304_v47 = vsel %vm1042_vm1, %v1303_v51, %v1237_v24  ;;  %v1299_v45 = vrot.slane %v1298_v36, 2 }
 0x2ba   :  { %930 = vmatmul.bf16.gmra.mxu2 %v4427_v6  ;;  %v1305_v62 = vsel %vm1044_vm2, %v1304_v47, %v1250_v49  ;;  %v887_v6 = vadd.f32 %v5820_v10, %v5750_v8  ;;  %v1328_v59 = vmul.f32 %v889_v37, %v5406_v35  ;;  %v1341_v41 = vmul.f32 %v889_v37, %v5390_v27 }
 0x2bb   :  { %v1306_v40 = vsel %vm1046_vm3, %v1305_v62, %v1263_v7  ;;  %v1300_v25 = vadd.f32 %v1299_v45, %v1298_v36  ;;  %v1367_v0 = vmul.f32 %v889_v37, %v8262_v38  ;;  %v1380_v42 = vmul.f32 %v889_v37, %v8263_v55  ;;  %v8283_v45 = vld [vmem:[#allocation39_spill] sm:$0xff] }
 0x2bc   :  { %v1307_v21 = vsel %vm1048_vm4, %v1306_v40, %v1276_v32  ;;  %v1327_v63 = vmul.f32 %v887_v6, %v5409_v1  ;;  %v1340_v44 = vmul.f32 %v887_v6, %v5395_v28  ;;  %v1353_v11 = vmul.f32 %v887_v6, %v5375_v15 }
 0x2bd   :  { %v891_v12 = vpop.f32.mrf.mxu2  ;;  %v1308_v34 = vsel %vm1050_vm5, %v1307_v21, %v1289_v5  ;;  %v1301_v18 = vrot.slane %v1300_v25, 1  ;;  %v1366_v10 = vmul.f32 %v887_v6, %v5359_v2  ;;  %v1379_v22 = vmul.f32 %v887_v6, %v5495_v52 }
 0x2be   :  { %v892_v8 = vadd.f32 %v891_v12, %v5813_v60  ;;  %v1392_v23 = vmul.f32 %v887_v6, %v5471_v58  ;;  %v1405_v57 = vmul.f32 %v887_v6, %v5455_v19  ;;  %v1418_v54 = vmul.f32 %v887_v6, %v5433_v14  ;;  %v5875_v12 = vpop.f32.mrf.mxu1 }
 0x2bf   :  { %v1302_v56 = vadd.f32 %v1301_v18, %v1300_v25  ;;  %v1354_v60 = vmul.f32 %v889_v37, %v5369_v9  ;;  %v1331_v39 = vadd.f32 %v1328_v59, %v1327_v63  ;;  %v1393_v29 = vmul.f32 %v889_v37, %v8264_v13  ;;  %v8285_v63 = vld [vmem:[#allocation31_spill] sm:$0xff] }
 0x2c0   :  { %v1406_v24 = vmul.f32 %v889_v37, %v8265_v17  ;;  %v1344_v49 = vadd.f32 %v1341_v41, %v1340_v44  ;;  %v1419_v36 = vmul.f32 %v889_v37, %v5428_v4  ;;  %v1329_v51 = vmul.f32 %v892_v8, %v5398_v30  ;;  %v8284_v37 = vld [vmem:[#allocation35_spill] sm:$0xff] }
 0x2c1   :  { %v5868_v46 = vsel %vm1052_vm6, %v1308_v34, %v1302_v56  ;;  %v1342_v7 = vmul.f32 %v892_v8, %v5387_v26  ;;  %v1355_v32 = vmul.f32 %v892_v8, %v8272_v31  ;;  %v1368_v47 = vmul.f32 %v892_v8, %v8273_v48 }
 0x2c2   :  { %v1310_v61 = vrot.slane %v5868_v46, 4  ;;  %v1381_v62 = vmul.f32 %v892_v8, %v8283_v45  ;;  %v1357_v5 = vadd.f32 %v1354_v60, %v1353_v11  ;;  %v1370_v40 = vadd.f32 %v1367_v0, %v1366_v10  ;;  %v8288_v60 = vld [vmem:[#allocation18_spill] sm:$0xff] }
 0x2c3   :  { %v1383_v25 = vadd.f32 %v1380_v42, %v1379_v22  ;;  %v1396_v21 = vadd.f32 %v1393_v29, %v1392_v23  ;;  %v1409_v34 = vadd.f32 %v1406_v24, %v1405_v57  ;;  %v1394_v18 = vmul.f32 %v892_v8, %v8284_v37  ;;  %v8287_v23 = vld [vmem:[#allocation23_spill] sm:$0xff]  ;;  %v8290_v24 = vld [vmem:[#allocation13_spill] sm:$0xff] }
 0x2c4   :  { %v1311_v6 = vmax.f32 %v5868_v46, %v1310_v61  ;;  %v1407_v59 = vmul.f32 %v892_v8, %v8285_v63  ;;  %v1422_v41 = vadd.f32 %v1419_v36, %v1418_v54  ;;  %v1332_v56 = vadd.f32 %v1331_v39, %v1329_v51  ;;  %v8289_v42 = vld [vmem:[#allocation15_spill] sm:$0xff]  ;;  %v8291_v39 = vld [vmem:[#allocation38_spill] sm:$0xff] }
 0x2c5   :  { %v893_v16 = vpop.f32.mrf.mxu2  ;;  %v1345_v31 = vadd.f32 %v1344_v49, %v1342_v7  ;;  %v1358_v48 = vadd.f32 %v1357_v5, %v1355_v32  ;;  %v1371_v26 = vadd.f32 %v1370_v40, %v1368_v47  ;;  %v1384_v45 = vadd.f32 %v1383_v25, %v1381_v62  ;;  %v8292_v49 = vld [vmem:[#allocation34_spill] sm:$0xff] }
 0x2c6   :  { %v1312_v44 = vrot.slane %v1311_v6, 2  ;;  %v894_v43 = vadd.f32 %v893_v16, %v8286_v53  ;;  %v1397_v10 = vadd.f32 %v1396_v21, %v1394_v18  ;;  %v1410_v22 = vadd.f32 %v1409_v34, %v1407_v59  ;;  %v8293_v51 = vld [vmem:[#allocation30_spill] sm:$0xff]  ;;  %v812_v18 = vpop.f32.mrf.mxu1 }
 0x2c7   :  { %v8294_v5 = vld [vmem:[#allocation26_spill] sm:$0xff] }
 0x2c8   :  { %v1313_v11 = vmax.f32 %v1311_v6, %v1312_v44  ;;  %v1330_v57 = vmul.f32 %v894_v43, %v8287_v23  ;;  %v1343_v0 = vmul.f32 %v894_v43, %v8288_v60  ;;  %v1356_v29 = vmul.f32 %v894_v43, %v8289_v42 }
 0x2c9   :  { %v1369_v54 = vmul.f32 %v894_v43, %v8290_v24  ;;  %v1382_v61 = vmul.f32 %v894_v43, %v8291_v39  ;;  %v1395_v36 = vmul.f32 %v894_v43, %v8292_v49  ;;  %v1408_v7 = vmul.f32 %v894_v43, %v8293_v51 }
 0x2ca   :  { %v1314_v53 = vrot.slane %v1313_v11, 1  ;;  %v1333_v16 = vadd.f32 %v1332_v56, %v1330_v57  ;;  %v1346_v32 = vadd.f32 %v1345_v31, %v1343_v0  ;;  %v1359_v47 = vadd.f32 %v1358_v48, %v1356_v29 }
 0x2cb   :  { %v1372_v62 = vadd.f32 %v1371_v26, %v1369_v54  ;;  %v1385_v6 = vadd.f32 %v1384_v45, %v1382_v61  ;;  %v1420_v40 = vmul.f32 %v892_v8, %v8294_v5  ;;  %v1398_v21 = vadd.f32 %v1397_v10, %v1395_v36 }
 0x2cc   :  { %v1334_v25 = vrot.slane %v1333_v16, 4  ;;  %v1411_v34 = vadd.f32 %v1410_v22, %v1408_v7  ;;  %v1347_v59 = vrot.slane %v1346_v32, 4  ;;  %v1360_v44 = vrot.slane %v1359_v47, 4 }
 0x2cd   :  { %v5885_v30 = vpop.f32.mrf.mxu2  ;;  %v1373_v24 = vrot.slane %v1372_v62, 4  ;;  %v1386_v39 = vrot.slane %v1385_v6, 4  ;;  %v1315_v42 = vmax.f32 %v1313_v11, %v1314_v53  ;;  %v1399_v57 = vrot.slane %v1398_v21, 4 }
 0x2ce   :  { %v1335_v56 = vadd.f32 %v1334_v25, %v1333_v16  ;;  %v1412_v49 = vrot.slane %v1411_v34, 4  ;;  %v1348_v60 = vadd.f32 %v1347_v59, %v1346_v32  ;;  %v1361_v51 = vadd.f32 %v1360_v44, %v1359_v47  ;;  %v5907_v44 = vpop.f32.mrf.mxu1 }
 0x2cf   :  { %v1374_v31 = vadd.f32 %v1373_v24, %v1372_v62  ;;  %v1387_v48 = vadd.f32 %v1386_v39, %v1385_v6  ;;  %v1423_v45 = vadd.f32 %v1422_v41, %v1420_v40  ;;  %v1400_v8 = vadd.f32 %v1399_v57, %v1398_v21 }
 0x2d0   :  { %v1336_v0 = vrot.slane %v1335_v56, 2  ;;  %v1413_v29 = vadd.f32 %v1412_v49, %v1411_v34  ;;  %v1349_v10 = vrot.slane %v1348_v60, 2  ;;  %v1362_v22 = vrot.slane %v1361_v51, 2 }
 0x2d1   :  { %v1375_v54 = vrot.slane %v1374_v31, 2  ;;  %v1388_v61 = vrot.slane %v1387_v48, 2  ;;  %v1316_v36 = vsub.f32 %v5868_v46, %v1315_v42  ;;  %v1401_v11 = vrot.slane %v1400_v8, 2 }
 0x2d2   :  { %v1337_v7 = vadd.f32 %v1336_v0, %v1335_v56  ;;  %v1414_v53 = vrot.slane %v1413_v29, 2  ;;  %v1350_v16 = vadd.f32 %v1349_v10, %v1348_v60  ;;  %v1363_v25 = vadd.f32 %v1362_v22, %v1361_v51 }
 0x2d3   :  { %v1376_v32 = vadd.f32 %v1375_v54, %v1374_v31  ;;  %v1389_v47 = vadd.f32 %v1388_v61, %v1387_v48  ;;  %v1402_v39 = vadd.f32 %v1401_v11, %v1400_v8  ;;  %v1421_v41 = vmul.f32 %v894_v43, %v8269_v50  ;;  %v8297_v11 = vld [vmem:[#allocation14_spill] sm:$0xff] }
 0x2d4   :  { %v1338_v24 = vrot.slane %v1337_v7, 1  ;;  %v1415_v62 = vadd.f32 %v1414_v53, %v1413_v29  ;;  %v8295_v49 = vrot.slane %v5835_v3, 4  ;;  %v1351_v40 = vrot.slane %v1350_v16, 1 }
 0x2d5   :  { %v898_v26 = vpop.f32.mrf.mxu2  ;;  %v1364_v21 = vrot.slane %v1363_v25, 1  ;;  %v1377_v46 = vrot.slane %v1376_v32, 1  ;;  %v8296_v42 = vrot.slane %v5839_v20, 1  ;;  %v1390_v34 = vrot.slane %v1389_v47, 1 }
 0x2d6   :  { %v5900_v6 = vadd.f32 %v5835_v3, %v8295_v49  ;;  %v1339_v51 = vadd.f32 %v1338_v24, %v1337_v7  ;;  %v1424_v59 = vadd.f32 %v1423_v45, %v1421_v41  ;;  %v1317_v56 = vmul.f32 1.442695, %v1316_v36 }
 0x2d7   :  { %v5905_v60 = vmax.f32 %v5839_v20, %v8296_v42  ;;  %v1352_v43 = vadd.f32 %v1351_v40, %v1350_v16  ;;  %v1365_v57 = vadd.f32 %v1364_v21, %v1363_v25  ;;  %v1403_v31 = vrot.slane %v1402_v39, 1 }
 0x2d8   :  { %v1416_v0 = vrot.slane %v1415_v62, 1  ;;  %v1425_v8 = vrot.slane %v1424_v59, 4  ;;  %v897_v29 = vadd.f32 %v5885_v30, %v5842_v33  ;;  %v1378_v22 = vadd.f32 %v1377_v46, %v1376_v32 }
 0x2d9   :  { %v1431_v20 = vsel %vm1040_vm0, %v1339_v51, %v1352_v43  ;;  %v1391_v61 = vadd.f32 %v1390_v34, %v1389_v47  ;;  %v899_v36 = vadd.f32 %v898_v26, %v5875_v12  ;;  %v1188_v53 = vsub.f32 %v8297_v11, %v5905_v60  ;;  %v817_v43 = vpop.f32.mrf.mxu1  ;;  %v8298_v11 = vld [vmem:[#allocation22_spill] sm:$0xff] }
 0x2da   :  { %v1426_v45 = vadd.f32 %v1425_v8, %v1424_v59  ;;  %v1432_v7 = vsel %vm1042_vm1, %v1431_v20, %v1365_v57  ;;  %4891 = vpow2.f32 %v1317_v56  ;;  %v1404_v16 = vadd.f32 %v1403_v31, %v1402_v39 }
 0x2db   :  { %v1433_v25 = vsel %vm1044_vm2, %v1432_v7, %v1378_v22  ;;  %v1417_v30 = vadd.f32 %v1416_v0, %v1415_v62  ;;  %v1455_v24 = vmul.f32 %v897_v29, %v5409_v1  ;;  %v1481_v47 = vmul.f32 %v897_v29, %v5375_v15 }
 0x2dc   :  { %v1427_v33 = vrot.slane %v1426_v45, 2  ;;  %v1434_v32 = vsel %vm1046_vm3, %v1433_v25, %v1391_v61  ;;  %v1494_v41 = vmul.f32 %v897_v29, %v5359_v2  ;;  %v1507_v12 = vmul.f32 %v897_v29, %v5495_v52 }
 0x2dd   :  { %v901_v48 = vpop.f32.mrf.mxu2  ;;  %v1435_v49 = vsel %vm1048_vm4, %v1434_v32, %v1404_v16  ;;  %v1456_v39 = vmul.f32 %v899_v36, %v5406_v35  ;;  %v1469_v62 = vmul.f32 %v899_v36, %v5390_v27  ;;  %v1520_v40 = vmul.f32 %v897_v29, %v5471_v58 }
 0x2de   :  { %v902_v54 = vadd.f32 %v901_v48, %v812_v18  ;;  %v1468_v18 = vmul.f32 %v897_v29, %v5395_v28  ;;  %v1428_v26 = vadd.f32 %v1427_v33, %v1426_v45  ;;  %v1482_v21 = vmul.f32 %v899_v36, %v5369_v9  ;;  %v8300_v33 = vld [vmem:[#allocation16_spill] sm:$0xff] }
 0x2df   :  { %v1495_v46 = vmul.f32 %v899_v36, %v8262_v38  ;;  %v1508_v42 = vmul.f32 %v899_v36, %v8263_v55  ;;  %v1533_v34 = vmul.f32 %v897_v29, %v5455_v19  ;;  %v1546_v59 = vmul.f32 %v897_v29, %v5433_v14  ;;  %v8299_v29 = vld [vmem:[#allocation19_spill] sm:$0xff] }
 0x2e0   :  { %v1429_v51 = vrot.slane %v1428_v26, 1  ;;  %v1521_v56 = vmul.f32 %v899_v36, %v8264_v13  ;;  %v5934_v57 = vpop.eup %4891  ;;  %v1436_v31 = vsel %vm1050_vm5, %v1435_v49, %v1417_v30  ;;  %v1459_v48 = vadd.f32 %v1456_v39, %v1455_v24 }
 0x2e1   :  { %v1472_v0 = vadd.f32 %v1469_v62, %v1468_v18  ;;  %v1485_v8 = vadd.f32 %v1482_v21, %v1481_v47  ;;  %v1498_v20 = vadd.f32 %v1495_v46, %v1494_v41  ;;  %v1534_v61 = vmul.f32 %v899_v36, %v8265_v17  ;;  %v8301_v18 = vld [vmem:[#allocation12_spill] sm:$0xff]  ;;  %v8302_v62 = vld [vmem:[#allocation39_spill] sm:$0xff] }
 0x2e2   :  { %v1430_v22 = vadd.f32 %v1429_v51, %v1428_v26  ;;  %v1547_v45 = vmul.f32 %v899_v36, %v5428_v4  ;;  %v1511_v7 = vadd.f32 %v1508_v42, %v1507_v12  ;;  %v1457_v16 = vmul.f32 %v902_v54, %v8298_v11 }
 0x2e3   :  { %v1470_v25 = vmul.f32 %v902_v54, %v8299_v29  ;;  %v1483_v32 = vmul.f32 %v902_v54, %v8300_v33  ;;  %v1524_v30 = vadd.f32 %v1521_v56, %v1520_v40  ;;  %v1537_v24 = vadd.f32 %v1534_v61, %v1533_v34 }
 0x2e4   :  { %v5943_v10 = vsel %vm1052_vm6, %v1436_v31, %v1430_v22  ;;  %v1496_v47 = vmul.f32 %v902_v54, %v8301_v18  ;;  %v1550_v26 = vadd.f32 %v1547_v45, %v1546_v59  ;;  %v1460_v49 = vadd.f32 %v1459_v48, %v1457_v16  ;;  %v8303_v45 = vld [vmem:[#allocation18_spill] sm:$0xff]  ;;  %v8304_v16 = vld [vmem:[#allocation15_spill] sm:$0xff] }
 0x2e5   :  { %v903_v60 = vpop.f32.mrf.mxu2  ;;  %v1438_v41 = vrot.slane %v5943_v10, 4  ;;  %v1473_v39 = vadd.f32 %v1472_v0, %v1470_v25  ;;  %v1486_v36 = vadd.f32 %v1485_v8, %v1483_v32  ;;  %v1509_v21 = vmul.f32 %v902_v54, %v8302_v62  ;;  %v5971_v25 = vpop.f32.mrf.mxu1 }
 0x2e6   :  { %v1499_v12 = vadd.f32 %v1498_v20, %v1496_v47  ;;  %v1522_v46 = vmul.f32 %v902_v54, %v8284_v37  ;;  %v1535_v51 = vmul.f32 %v902_v54, %v8285_v63  ;;  %v1548_v40 = vmul.f32 %v902_v54, %v8294_v5 }
 0x2e7   :  { %v1439_v42 = vmax.f32 %v5943_v10, %v1438_v41  ;;  %v5953_v34 = vadd.f32 %v903_v60, %v5907_v44  ;;  %v5955_v31 = vmul.f32 1.442695, %v1188_v53  ;;  %v1512_v59 = vadd.f32 %v1511_v7, %v1509_v21  ;;  %v8305_v60 = vld [vmem:[#allocation13_spill] sm:$0xff]  ;;  %v8306_v7 = vld [vmem:[#allocation38_spill] sm:$0xff] }
 0x2e8   :  { %v1525_v48 = vadd.f32 %v1524_v30, %v1522_v46  ;;  %v1538_v22 = vadd.f32 %v1537_v24, %v1535_v51  ;;  %v5959_v20 = vadd.f32 %v1550_v26, %v1548_v40  ;;  %v8307_v24 = vld [vmem:[#allocation34_spill] sm:$0xff]  ;;  %v1319_v21 = vrot.slane %v5934_v57, 4 }
 0x2e9   :  { %v1440_v8 = vrot.slane %v1439_v42, 2  ;;  %v1458_v61 = vmul.f32 %v5953_v34, %v8287_v23  ;;  %v1471_v54 = vmul.f32 %v5953_v34, %v8303_v45  ;;  %v1484_v44 = vmul.f32 %v5953_v34, %v8304_v16  ;;  %v8308_v41 = vld [vmem:[#allocation30_spill] sm:$0xff] }
 0x2ea   :  { %v1497_v53 = vmul.f32 %v5953_v34, %v8305_v60  ;;  %v1523_v47 = vmul.f32 %v5953_v34, %v8307_v24  ;;  %v1536_v26 = vmul.f32 %v5953_v34, %v8308_v41 }
 0x2eb   :  { %v1441_v32 = vmax.f32 %v1439_v42, %v1440_v8  ;;  %v1461_v30 = vadd.f32 %v1460_v49, %v1458_v61  ;;  %v1474_v46 = vadd.f32 %v1473_v39, %v1471_v54  ;;  %v1487_v51 = vadd.f32 %v1486_v36, %v1484_v44 }
 0x2ec   :  { %v1500_v40 = vadd.f32 %v1499_v12, %v1497_v53  ;;  %v1526_v16 = vadd.f32 %v1525_v48, %v1523_v47  ;;  %v1539_v42 = vadd.f32 %v1538_v22, %v1536_v26 }
 0x2ed   :  { %v906_v56 = vpop.f32.mrf.mxu2  ;;  %v1462_v3 = vrot.slane %v1461_v30, 4  ;;  %v1488_v45 = vrot.slane %v1487_v51, 4 }
 0x2ee   :  { %v5957_v0 = vadd.f32 %v906_v56, %v817_v43  ;;  %v1510_v43 = vmul.f32 %v5953_v34, %v8306_v7  ;;  %v1442_v56 = vrot.slane %v1441_v32, 1  ;;  %v1475_v7 = vrot.slane %v1474_v46, 4 }
 0x2ef   :  { %v1501_v23 = vrot.slane %v1500_v40, 4  ;;  %v1463_v8 = vadd.f32 %v1462_v3, %v1461_v30  ;;  %v1527_v24 = vrot.slane %v1526_v16, 4  ;;  %v1489_v41 = vadd.f32 %v1488_v45, %v1487_v51  ;;  %v822_v45 = vpop.f32.mrf.mxu1 }
 0x2f0   :  { %v1513_v60 = vadd.f32 %v1512_v59, %v1510_v43  ;;  %v1443_v49 = vmax.f32 %v1441_v32, %v1442_v56  ;;  %v1476_v63 = vadd.f32 %v1475_v7, %v1474_v46  ;;  %v1540_v62 = vrot.slane %v1539_v42, 4 }
 0x2f1   :  { %v1502_v37 = vadd.f32 %v1501_v23, %v1500_v40  ;;  %v1464_v36 = vrot.slane %v1463_v8, 2  ;;  %v1528_v54 = vadd.f32 %v1527_v24, %v1526_v16  ;;  %v1490_v48 = vrot.slane %v1489_v41, 2 }
 0x2f2   :  { %v1514_v61 = vrot.slane %v1513_v60, 4  ;;  %v1444_v39 = vsub.f32 %v5943_v10, %v1443_v49  ;;  %v1477_v59 = vrot.slane %v1476_v63, 2  ;;  %v1541_v53 = vadd.f32 %v1540_v62, %v1539_v42 }
 0x2f3   :  { %v1503_v44 = vrot.slane %v1502_v37, 2  ;;  %v1465_v22 = vadd.f32 %v1464_v36, %v1463_v8  ;;  %v1529_v3 = vrot.slane %v1528_v54, 2  ;;  %v1491_v47 = vadd.f32 %v1490_v48, %v1489_v41 }
 0x2f4   :  { %v1515_v12 = vadd.f32 %v1514_v61, %v1513_v60  ;;  %v1445_v43 = vmul.f32 1.442695, %v1444_v39  ;;  %v1478_v30 = vadd.f32 %v1477_v59, %v1476_v63  ;;  %v1542_v7 = vrot.slane %v1541_v53, 2 }
 0x2f5   :  { %v908_v5 = vpop.f32.mrf.mxu2  ;;  %v1504_v26 = vadd.f32 %v1503_v44, %v1502_v37  ;;  %v1466_v23 = vrot.slane %v1465_v22, 1  ;;  %v1530_v10 = vadd.f32 %v1529_v3, %v1528_v54  ;;  %v1492_v60 = vrot.slane %v1491_v47, 1 }
 0x2f6   :  { %v1516_v32 = vrot.slane %v1515_v12, 2  ;;  %4893 = vpow2.f32 %v1445_v43  ;;  %v1479_v51 = vrot.slane %v1478_v30, 1  ;;  %v1543_v24 = vadd.f32 %v1542_v7, %v1541_v53 }
 0x2f7   :  { %v1505_v16 = vrot.slane %v1504_v26, 1  ;;  %v5980_v40 = vadd.f32 %v5934_v57, %v1319_v21  ;;  %v1467_v62 = vadd.f32 %v1466_v23, %v1465_v22  ;;  %v1549_v63 = vmul.f32 %v5953_v34, %v8269_v50  ;;  %v824_v7 = vpop.f32.mrf.mxu1 }
 0x2f8   :  { %v1517_v46 = vadd.f32 %v1516_v32, %v1515_v12  ;;  %v1480_v37 = vadd.f32 %v1479_v51, %v1478_v30  ;;  %v1493_v42 = vadd.f32 %v1492_v60, %v1491_v47  ;;  %v1531_v49 = vrot.slane %v1530_v10, 1 }
 0x2f9   :  { %v1544_v8 = vrot.slane %v1543_v24, 1  ;;  %v1552_v61 = vadd.f32 %v5959_v20, %v1549_v63  ;;  %v8309_v39 = vrot.slane %v5900_v6, 2  ;;  %4895 = vpow2.f32 %v5955_v31 }
 0x2fa   :  { %v1518_v56 = vrot.slane %v1517_v46, 1  ;;  %v1506_v21 = vadd.f32 %v1505_v16, %v1504_v26  ;;  %v1559_v12 = vsel %vm1040_vm0, %v1467_v62, %v1480_v37  ;;  %v1532_v53 = vadd.f32 %v1531_v49, %v1530_v10 }
 0x2fb   :  { %v5988_v36 = vadd.f32 %v8309_v39, %v5900_v6  ;;  %v1553_v48 = vrot.slane %v1552_v61, 4  ;;  %v1560_v44 = vsel %vm1042_vm1, %v1559_v12, %v1493_v42  ;;  %v1545_v20 = vadd.f32 %v1544_v8, %v1543_v24 }
 0x2fc   :  { %v5992_v54 = vpop.eup %4893  ;;  %v1519_v59 = vadd.f32 %v1518_v56, %v1517_v46  ;;  %v1561_v43 = vsel %vm1044_vm2, %v1560_v44, %v1506_v21  ;;  %v1583_v6 = vmul.f32 %v5957_v0, %v5409_v1  ;;  %v1596_v32 = vmul.f32 %v5957_v0, %v5395_v28 }
 0x2fd   :  { %v911_v41 = vpop.f32.mrf.mxu2  ;;  %v1554_v22 = vadd.f32 %v1553_v48, %v1552_v61  ;;  %v909_v3 = vadd.f32 %v908_v5, %v5971_v25  ;;  %v1447_v30 = vrot.slane %v5992_v54, 4  ;;  %v1609_v26 = vmul.f32 %v5957_v0, %v5375_v15 }
 0x2fe   :  { %v1562_v31 = vsel %vm1046_vm3, %v1561_v43, %v1519_v59  ;;  %v912_v23 = vadd.f32 %v911_v41, %v822_v45  ;;  %v1622_v5 = vmul.f32 %v5957_v0, %v5359_v2  ;;  %v1635_v25 = vmul.f32 %v5957_v0, %v5495_v52 }
 0x2ff   :  { %v1563_v47 = vsel %vm1048_vm4, %v1562_v31, %v1532_v53  ;;  %v1555_v46 = vrot.slane %v1554_v22, 2  ;;  %v1584_v51 = vmul.f32 %v909_v3, %v5406_v35  ;;  %v1597_v60 = vmul.f32 %v909_v3, %v5390_v27  ;;  %v6010_v24 = vpop.eup %4895 }
 0x300   :  { %v1564_v10 = vsel %vm1050_vm5, %v1563_v47, %v1545_v20  ;;  %8310 = vst [vmem:[#allocation42_spill] sm:$0xff] %v6010_v24  ;;  %v1648_v62 = vmul.f32 %v5957_v0, %v5471_v58  ;;  %v1610_v45 = vmul.f32 %v909_v3, %v5369_v9  ;;  %v1661_v63 = vmul.f32 %v5957_v0, %v5455_v19 }
 0x301   :  { %v1556_v56 = vadd.f32 %v1555_v46, %v1554_v22  ;;  %v1623_v41 = vmul.f32 %v909_v3, %v8262_v38  ;;  %v1636_v37 = vmul.f32 %v909_v3, %v8263_v55  ;;  %v1448_v42 = vadd.f32 %v5992_v54, %v1447_v30 }
 0x302   :  { %v1674_v49 = vmul.f32 %v5957_v0, %v5433_v14  ;;  %v1587_v8 = vadd.f32 %v1584_v51, %v1583_v6  ;;  %v1649_v61 = vmul.f32 %v909_v3, %v8264_v13  ;;  %v1600_v21 = vadd.f32 %v1597_v60, %v1596_v32  ;;  %v8313_v60 = vld [vmem:[#allocation35_spill] sm:$0xff] }
 0x303   :  { %v1557_v39 = vrot.slane %v1556_v56, 1  ;;  %v1613_v12 = vadd.f32 %v1610_v45, %v1609_v26  ;;  %v1662_v59 = vmul.f32 %v909_v3, %v8265_v17  ;;  %v1675_v48 = vmul.f32 %v909_v3, %v5428_v4  ;;  %v8312_v3 = vld [vmem:[#allocation39_spill] sm:$0xff] }
 0x304   :  { %v1585_v44 = vmul.f32 %v912_v23, %v8298_v11  ;;  %v1598_v53 = vmul.f32 %v912_v23, %v8299_v29  ;;  %v1611_v20 = vmul.f32 %v912_v23, %v8300_v33  ;;  %v1626_v22 = vadd.f32 %v1623_v41, %v1622_v5 }
 0x305   :  { %v913_v16 = vpop.f32.mrf.mxu2  ;;  %v1558_v43 = vadd.f32 %v1557_v39, %v1556_v56  ;;  %v1639_v31 = vadd.f32 %v1636_v37, %v1635_v25  ;;  %v1624_v0 = vmul.f32 %v912_v23, %v8301_v18  ;;  %v1652_v6 = vadd.f32 %v1649_v61, %v1648_v62  ;;  %v8314_v56 = vld [vmem:[#allocation31_spill] sm:$0xff]  ;;  %v8315_v25 = vld [vmem:[#allocation26_spill] sm:$0xff]  ;;  %v827_v37 = vpop.f32.mrf.mxu1 }
 0x306   :  { %v1588_v30 = vadd.f32 %v1587_v8, %v1585_v44  ;;  %v1601_v47 = vadd.f32 %v1600_v21, %v1598_v53  ;;  %v1614_v32 = vadd.f32 %v1613_v12, %v1611_v20  ;;  %v1637_v51 = vmul.f32 %v912_v23, %v8312_v3  ;;  %v8316_v53 = vld [vmem:[#allocation23_spill] sm:$0xff]  ;;  %v8319_v20 = vld [vmem:[#allocation13_spill] sm:$0xff] }
 0x307   :  { %v6034_v26 = vsel %vm1052_vm6, %v1564_v10, %v1558_v43  ;;  %v1627_v46 = vadd.f32 %v1626_v22, %v1624_v0  ;;  %v1650_v45 = vmul.f32 %v912_v23, %v8313_v60  ;;  %v1665_v14 = vadd.f32 %v1662_v59, %v1661_v63  ;;  %v8321_v43 = vld [vmem:[#allocation38_spill] sm:$0xff] }
 0x308   :  { %8311 = vst [vmem:[#allocation14_spill] sm:$0xff] %v6034_v26  ;;  %v1678_v4 = vadd.f32 %v1675_v48, %v1674_v49  ;;  %v1663_v5 = vmul.f32 %v912_v23, %v8314_v56  ;;  %v1676_v41 = vmul.f32 %v912_v23, %v8315_v25  ;;  %v1640_v62 = vadd.f32 %v1639_v31, %v1637_v51  ;;  %v8317_v49 = vld [vmem:[#allocation18_spill] sm:$0xff]  ;;  %v8318_v23 = vld [vmem:[#allocation15_spill] sm:$0xff] }
 0x309   :  { %v1653_v8 = vadd.f32 %v1652_v6, %v1650_v45  ;;  %v6040_v61 = vadd.f32 %v913_v16, %v824_v7  ;;  %v1191_v10 = vrot.slane %v6010_v24, 4  ;;  %v1449_v21 = vrot.slane %v1448_v42, 2  ;;  %v8323_v31 = vld [vmem:[#allocation30_spill] sm:$0xff] }
 0x30a   :  { %v1666_v12 = vadd.f32 %v1665_v14, %v1663_v5  ;;  %v6045_v44 = vadd.f32 %v1678_v4, %v1676_v41  ;;  %v8322_v14 = vld [vmem:[#allocation34_spill] sm:$0xff] }
 0x30b   :  { %v1586_v63 = vmul.f32 %v6040_v61, %v8316_v53  ;;  %v1599_v59 = vmul.f32 %v6040_v61, %v8317_v49  ;;  %v1612_v48 = vmul.f32 %v6040_v61, %v8318_v23  ;;  %v1625_v7 = vmul.f32 %v6040_v61, %v8319_v20 }
 0x30c   :  { %v1638_v4 = vmul.f32 %v6040_v61, %v8321_v43  ;;  %v1651_v22 = vmul.f32 %v6040_v61, %v8322_v14  ;;  %v1664_v0 = vmul.f32 %v6040_v61, %v8323_v31  ;;  %v1450_v41 = vadd.f32 %v1449_v21, %v1448_v42 }
 0x30d   :  { %v916_v34 = vpop.f32.mrf.mxu2  ;;  %v1589_v6 = vadd.f32 %v1588_v30, %v1586_v63  ;;  %v1602_v51 = vadd.f32 %v1601_v47, %v1599_v59  ;;  %v1615_v45 = vadd.f32 %v1614_v32, %v1612_v48  ;;  %v1628_v5 = vadd.f32 %v1627_v46, %v1625_v7 }
 0x30e   :  { %v6042_v39 = vadd.f32 %v916_v34, %v827_v37  ;;  %v8320_v34 = vrot.slane %v5980_v40, 2  ;;  %v1641_v37 = vadd.f32 %v1640_v62, %v1638_v4  ;;  %v1654_v26 = vadd.f32 %v1653_v8, %v1651_v22 }
 0x30f   :  { %v1667_v25 = vadd.f32 %v1666_v12, %v1664_v0  ;;  %v1192_v56 = vadd.f32 %v6010_v24, %v1191_v10  ;;  %v1616_v20 = vrot.slane %v1615_v45, 4  ;;  %v1629_v60 = vrot.slane %v1628_v5, 4 }
 0x310   :  { %v1322_v16 = vadd.f32 %v8320_v34, %v5980_v40  ;;  %v1590_v40 = vrot.slane %v1589_v6, 4  ;;  %v1603_v34 = vrot.slane %v1602_v51, 4  ;;  %v1642_v23 = vrot.slane %v1641_v37, 4 }
 0x311   :  { %v1655_v14 = vrot.slane %v1654_v26, 4  ;;  %v1617_v31 = vadd.f32 %v1616_v20, %v1615_v45  ;;  %v1668_v30 = vrot.slane %v1667_v25, 4  ;;  %v1451_v47 = vrot.slane %v1450_v41, 1 }
 0x312   :  { %v1323_v43 = vrot.slane %v1322_v16, 1  ;;  %v1591_v3 = vadd.f32 %v1590_v40, %v1589_v6  ;;  %v1604_v49 = vadd.f32 %v1603_v34, %v1602_v51  ;;  %v1630_v32 = vadd.f32 %v1629_v60, %v1628_v5 }
 0x313   :  { %v1643_v46 = vadd.f32 %v1642_v23, %v1641_v37  ;;  %v1656_v42 = vadd.f32 %v1655_v14, %v1654_v26  ;;  %v1618_v21 = vrot.slane %v1617_v31, 2  ;;  %v1669_v12 = vadd.f32 %v1668_v30, %v1667_v25 }
 0x314   :  { %v1592_v62 = vrot.slane %v1591_v3, 2  ;;  %v1605_v8 = vrot.slane %v1604_v49, 2  ;;  %v1324_v10 = vadd.f32 %v1323_v43, %v1322_v16  ;;  %v1631_v63 = vrot.slane %v1630_v32, 2 }
 0x315   :  { %v1644_v59 = vrot.slane %v1643_v46, 2  ;;  %v1657_v48 = vrot.slane %v1656_v42, 2  ;;  %v1619_v22 = vadd.f32 %v1618_v21, %v1617_v31  ;;  %v1670_v0 = vrot.slane %v1669_v12, 2  ;;  %v918_v16 = vpop.f32.mrf.mxu2 }
 0x316   :  { %v1593_v7 = vadd.f32 %v1592_v62, %v1591_v3  ;;  %v1606_v4 = vadd.f32 %v1605_v8, %v1604_v49  ;;  %v1452_v6 = vadd.f32 %v1451_v47, %v1450_v41  ;;  %v1632_v51 = vadd.f32 %v1631_v63, %v1630_v32  ;;  %v829_v41 = vpop.f32.mrf.mxu1 }
 0x317   :  { %v1645_v20 = vadd.f32 %v1644_v59, %v1643_v46  ;;  %v1658_v45 = vadd.f32 %v1657_v48, %v1656_v42  ;;  %v1620_v23 = vrot.slane %v1619_v22, 1  ;;  %v1671_v26 = vadd.f32 %v1670_v0, %v1669_v12 }
 0x318   :  { %v1594_v40 = vrot.slane %v1593_v7, 1  ;;  %v1607_v60 = vrot.slane %v1606_v4, 1  ;;  %v1193_v14 = vrot.slane %v1192_v56, 2  ;;  %4897 = vrcp.f32 %v1324_v10 }
 0x319   :  { %v1633_v5 = vrot.slane %v1632_v51, 1  ;;  %v1646_v25 = vrot.slane %v1645_v20, 1  ;;  %v1621_v34 = vadd.f32 %v1620_v23, %v1619_v22  ;;  %v1659_v3 = vrot.slane %v1658_v45, 1 }
 0x31a   :  { %v1595_v43 = vadd.f32 %v1594_v40, %v1593_v7  ;;  %v1608_v37 = vadd.f32 %v1607_v60, %v1606_v4  ;;  %v1672_v49 = vrot.slane %v1671_v26, 1  ;;  %v1677_v31 = vmul.f32 %v6040_v61, %v8269_v50 }
 0x31b   :  { %v1067_v30 = vrot.slane %v5988_v36, 1  ;;  %4899 = vrcp.f32 %v1452_v6  ;;  %v1634_v47 = vadd.f32 %v1633_v5, %v1632_v51  ;;  %v1194_v46 = vadd.f32 %v1193_v14, %v1192_v56 }
 0x31c   :  { %v1687_v32 = vsel %vm1040_vm0, %v1595_v43, %v1608_v37  ;;  %v1647_v42 = vadd.f32 %v1646_v25, %v1645_v20  ;;  %v1680_v62 = vadd.f32 %v6045_v44, %v1677_v31  ;;  %v1660_v21 = vadd.f32 %v1659_v3, %v1658_v45 }
 0x31d   :  { %v1688_v8 = vsel %vm1042_vm1, %v1687_v32, %v1621_v34  ;;  %v1673_v63 = vadd.f32 %v1672_v49, %v1671_v26  ;;  %v1068_v7 = vadd.f32 %v1067_v30, %v5988_v36  ;;  %v1195_v4 = vrot.slane %v1194_v46, 1  ;;  %v921_v20 = vpop.f32.mrf.mxu2 }
 0x31e   :  { %v1689_v12 = vsel %vm1044_vm2, %v1688_v8, %v1634_v47  ;;  %v4898_v10 = vpop.eup %4897  ;;  %v1681_v59 = vrot.slane %v1680_v62, 4  ;;  %v919_v6 = vadd.f32 %v918_v16, %v829_v41  ;;  %v832_v23 = vpop.f32.mrf.mxu1  ;;  %v1711_v36 = vmul.f32 %v6042_v39, %v5409_v1 }
 0x31f   :  { %v1690_v61 = vsel %vm1046_vm3, %v1689_v12, %v1647_v42  ;;  %v6077_v44 = vmul.f32 %v4898_v10, %v5934_v57  ;;  %4901 = vrcp.f32 %v1068_v7  ;;  %v6079_v45 = vadd.f32 %v1195_v4, %v1194_v46 }
 0x320   :  { %v1691_v48 = vsel %vm1048_vm4, %v1690_v61, %v1660_v21  ;;  %v1682_v22 = vadd.f32 %v1681_v59, %v1680_v62  ;;  %v1712_v26 = vmul.f32 %v919_v6, %v5406_v35  ;;  %v6085_v14 = vadd.f32 %v921_v20, %v832_v23  ;;  %v8331_v20 = vld [vmem:[#allocation28_spill] sm:$0xff] }
 0x321   :  { %v1692_v56 = vsel %vm1050_vm5, %v1691_v48, %v1673_v63  ;;  %v4900_v0 = vpop.eup %4899  ;;  %8324 = vst [vmem:[#allocation22_spill] sm:$0xff] %v6079_v45  ;;  %v6088_v57 = vperm.slane %v6077_v44, 0  ;;  %v1724_v25 = vmul.f32 %v6042_v39, %v5395_v28  ;;  %v1725_v16 = vmul.f32 %v919_v6, %v5390_v27 }
 0x322   :  { %v1683_v51 = vrot.slane %v1682_v22, 2  ;;  %v1454_v40 = vmul.f32 %v4900_v0, %v5992_v54  ;;  %v1738_v54 = vmul.f32 %v919_v6, %v5369_v9  ;;  %v1737_v43 = vmul.f32 %v6042_v39, %v5375_v15 }
 0x323   :  { %8325 = vst [vmem:[#allocation44_spill] sm:$0xff] %v6088_v57  ;;  %v1750_v37 = vmul.f32 %v6042_v39, %v5359_v2  ;;  %v1751_v34 = vmul.f32 %v919_v6, %v8262_v38  ;;  %v1764_v3 = vmul.f32 %v919_v6, %v8263_v55  ;;  %v1763_v31 = vmul.f32 %v6042_v39, %v5495_v52 }
 0x324   :  { %v1684_v60 = vadd.f32 %v1683_v51, %v1682_v22  ;;  %v1776_v41 = vmul.f32 %v6042_v39, %v5471_v58  ;;  %v6104_v30 = vperm.slane %v1454_v40, 0  ;;  %v6108_v47 = vmul.f32 %v6042_v39, %v5455_v19 }
 0x325   :  { %v1715_v32 = vadd.f32 %v1712_v26, %v1711_v36  ;;  %v1777_v46 = vmul.f32 %v919_v6, %v8264_v13  ;;  %v1713_v42 = vmul.f32 %v6085_v14, %v8298_v11  ;;  %v6113_v62 = vpop.eup %4901  ;;  %v1728_v21 = vadd.f32 %v1725_v16, %v1724_v25 }
 0x326   :  { %v1685_v5 = vrot.slane %v1684_v60, 1  ;;  %8326 = vst [vmem:[#allocation45_spill] sm:$0xff] %v6104_v30  ;;  %v1741_v12 = vadd.f32 %v1738_v54, %v1737_v43  ;;  %v1726_v10 = vmul.f32 %v6085_v14, %v8299_v29  ;;  %v1754_v63 = vadd.f32 %v1751_v34, %v1750_v37  ;;  %v8334_v37 = vld [vmem:[#allocation39_spill] sm:$0xff] }
 0x327   :  { %8327 = vst [vmem:[#allocation46_spill] sm:$0xff] %v6113_v62  ;;  %v6120_v59 = vadd.f32 %v1764_v3, %v1763_v31  ;;  %v1739_v61 = vmul.f32 %v6085_v14, %v8300_v33  ;;  %v1752_v48 = vmul.f32 %v6085_v14, %v8301_v18  ;;  %v2186_v7 = vmul.f32 %v6104_v30, %v8298_v11 }
 0x328   :  { %v1686_v49 = vadd.f32 %v1685_v5, %v1684_v60  ;;  %v2187_v4 = vmul.f32 %v6104_v30, %v8316_v53  ;;  %v6130_v22 = vperm.slane %v1454_v40, 1  ;;  %v6134_v0 = vadd.f32 %v1777_v46, %v1776_v41  ;;  %v8332_v5 = vld [vmem:[#allocation18_spill] sm:$0xff]  ;;  %v8336_v41 = vld [vmem:[#allocation15_spill] sm:$0xff] }
 0x329   :  { %v6137_v51 = vmul.f32 %v919_v6, %v8265_v17  ;;  %v6140_v60 = vmul.f32 %v919_v6, %v8331_v20  ;;  %v6142_v23 = vadd.f32 %v1715_v32, %v1713_v42  ;;  %v6144_v36 = vadd.f32 %v1728_v21, %v1726_v10  ;;  %v8337_v46 = vld [vmem:[#allocation35_spill] sm:$0xff] }
 0x32a   :  { %v6116_v8 = vsel %vm1052_vm6, %v1692_v56, %v1686_v49  ;;  %8329 = vst [vmem:[#allocation48_spill] sm:$0xff] %v6130_v22  ;;  %v6132_v56 = vperm.slane %v1454_v40, 2  ;;  %v2195_v26 = vmul.f32 %v6130_v22, %v8299_v29  ;;  %v2196_v25 = vmul.f32 %v6130_v22, %v8332_v5 }
 0x32b   :  { %8328 = vst [vmem:[#allocation47_spill] sm:$0xff] %v6116_v8  ;;  %v6150_v16 = vperm.slane %v1454_v40, 3  ;;  %v6152_v54 = vadd.f32 %v1741_v12, %v1739_v61  ;;  %v6154_v43 = vadd.f32 %v1754_v63, %v1752_v48  ;;  %v1765_v6 = vmul.f32 %v6085_v14, %v8334_v37 }
 0x32c   :  { %8330 = vst [vmem:[#allocation49_spill] sm:$0xff] %v6132_v56  ;;  %v6158_v34 = vperm.slane %v1454_v40, 4  ;;  %v2199_v3 = vadd.f32 %v2195_v26, %v2186_v7  ;;  %v2200_v49 = vadd.f32 %v2196_v25, %v2187_v4  ;;  %v2204_v31 = vmul.f32 %v6132_v56, %v8300_v33  ;;  %v8341_v7 = vld [vmem:[#allocation13_spill] sm:$0xff]  ;;  %v8342_v25 = vld [vmem:[#allocation38_spill] sm:$0xff] }
 0x32d   :  { %8333 = vst [vmem:[#allocation50_spill] sm:$0xff] %v6150_v16  ;;  %v2205_v32 = vmul.f32 %v6132_v56, %v8336_v41  ;;  %v6166_v42 = vmul.f32 %v6085_v14, %v8337_v46  ;;  %v6168_v21 = vperm.slane %v1454_v40, 5  ;;  %v6170_v12 = vperm.slane %v1454_v40, 6 }
 0x32e   :  { %8335 = vst [vmem:[#allocation51_spill] sm:$0xff] %v6158_v34  ;;  %v6172_v10 = vperm.slane %v1454_v40, 7  ;;  %v2208_v63 = vadd.f32 %v2204_v31, %v2199_v3  ;;  %v2213_v48 = vmul.f32 %v6150_v16, %v8301_v18  ;;  %v2214_v4 = vmul.f32 %v6150_v16, %v8341_v7 }
 0x32f   :  { %8338 = vst [vmem:[#allocation52_spill] sm:$0xff] %v6168_v21  ;;  %v2209_v61 = vadd.f32 %v2205_v32, %v2200_v49  ;;  %v2222_v26 = vmul.f32 %v6158_v34, %v8334_v37  ;;  %v2223_v62 = vmul.f32 %v6158_v34, %v8342_v25  ;;  %v2184_v8 = vmul.f32 %v6104_v30, %v5409_v1  ;;  %v8343_v37 = vld [vmem:[#allocation34_spill] sm:$0xff] }
 0x330   :  { %8339 = vst [vmem:[#allocation53_spill] sm:$0xff] %v6170_v12  ;;  %v2185_v40 = vmul.f32 %v6104_v30, %v5406_v35  ;;  %v2217_v3 = vadd.f32 %v2213_v48, %v2208_v63  ;;  %v2193_v31 = vmul.f32 %v6130_v22, %v5395_v28  ;;  %v2194_v32 = vmul.f32 %v6130_v22, %v5390_v27  ;;  %v8344_v28 = vld [vmem:[#allocation31_spill] sm:$0xff]  ;;  %v8345_v22 = vld [vmem:[#allocation30_spill] sm:$0xff] }
 0x331   :  { %8340 = vst [vmem:[#allocation54_spill] sm:$0xff] %v6172_v10  ;;  %v2218_v49 = vadd.f32 %v2214_v4, %v2209_v61  ;;  %v2231_v24 = vmul.f32 %v6168_v21, %v8337_v46  ;;  %v2232_v18 = vmul.f32 %v6168_v21, %v8343_v37  ;;  %v2202_v1 = vmul.f32 %v6132_v56, %v5375_v15 }
 0x332   :  { %v2203_v30 = vmul.f32 %v6132_v56, %v5369_v9  ;;  %v2226_v63 = vadd.f32 %v2222_v26, %v2217_v3  ;;  %v2197_v48 = vadd.f32 %v2193_v31, %v2184_v8  ;;  %v2198_v4 = vadd.f32 %v2194_v32, %v2185_v40  ;;  %v8346_v26 = vld [vmem:[#allocation26_spill] sm:$0xff] }
 0x333   :  { %v2227_v61 = vadd.f32 %v2223_v62, %v2218_v49  ;;  %v2240_v35 = vmul.f32 %v6170_v12, %v8344_v28  ;;  %v2241_v27 = vmul.f32 %v6170_v12, %v8345_v22  ;;  %v2211_v46 = vmul.f32 %v6150_v16, %v5359_v2 }
 0x334   :  { %v2212_v33 = vmul.f32 %v6150_v16, %v8262_v38  ;;  %v2235_v15 = vadd.f32 %v2231_v24, %v2226_v63  ;;  %v2206_v29 = vadd.f32 %v2202_v1, %v2197_v48  ;;  %v2207_v56 = vadd.f32 %v2203_v30, %v2198_v4  ;;  %v923_v24 = vpop.f32.mrf.mxu2 }
 0x335   :  { %v2236_v45 = vadd.f32 %v2232_v18, %v2227_v61  ;;  %v2249_v62 = vmul.f32 %v6172_v10, %v8346_v26  ;;  %v2250_v8 = vmul.f32 %v6172_v10, %v8269_v50  ;;  %v2220_v40 = vmul.f32 %v6158_v34, %v5495_v52  ;;  %v834_v61 = vpop.f32.mrf.mxu1 }
 0x336   :  { %v2221_v3 = vmul.f32 %v6158_v34, %v8263_v55  ;;  %v2244_v49 = vadd.f32 %v2240_v35, %v2235_v15  ;;  %v2215_v32 = vadd.f32 %v2211_v46, %v2206_v29  ;;  %v2216_v16 = vadd.f32 %v2212_v33, %v2207_v56  ;;  %v8347_v29 = vld [vmem:[#allocation29_spill] sm:$0xff] }
 0x337   :  { %v2245_v31 = vadd.f32 %v2241_v27, %v2236_v45  ;;  %v1768_v1 = vadd.f32 %v6120_v59, %v1765_v6  ;;  %v1791_v18 = vmul.f32 %v6085_v14, %v8344_v28  ;;  %v2229_v30 = vmul.f32 %v6168_v21, %v5471_v58 }
 0x338   :  { %v2230_v63 = vmul.f32 %v6168_v21, %v8264_v13  ;;  %v2253_v48 = vadd.f32 %v2249_v62, %v2244_v49  ;;  %v2224_v34 = vadd.f32 %v2220_v40, %v2215_v32  ;;  %v2225_v15 = vadd.f32 %v2221_v3, %v2216_v16 }
 0x339   :  { %v2254_v4 = vadd.f32 %v2250_v8, %v2245_v31  ;;  %v2238_v27 = vmul.f32 %v6170_v12, %v5455_v19  ;;  %v2239_v35 = vmul.f32 %v6170_v12, %v8265_v17  ;;  %v2247_v33 = vmul.f32 %v6172_v10, %v8347_v29  ;;  %v8365_v12 = vld [vmem:[#allocation17_spill] sm:$0xff] }
 0x33a   :  { %v6227_v45 = vadd.f32 %v923_v24, %v834_v61  ;;  %v2233_v56 = vadd.f32 %v2229_v30, %v2224_v34  ;;  %v2234_v6 = vadd.f32 %v2230_v63, %v2225_v15  ;;  %v2248_v46 = vmul.f32 %v6172_v10, %v8331_v20 }
 0x33b   :  { %v2582_v59 = vpack.c.bf16 %v2254_v4, %v2253_v48  ;;  %v1781_v61 = vadd.f32 %v6134_v0, %v6166_v42 }
 0x33c   :  { %v1714_v16 = vmul.f32 %v6227_v45, %v8316_v53  ;;  %v1727_v62 = vmul.f32 %v6227_v45, %v8332_v5  ;;  %v1740_v8 = vmul.f32 %v6227_v45, %v8336_v41  ;;  %v1753_v40 = vmul.f32 %v6227_v45, %v8341_v7 }
 0x33d   :  { %2751 = vmatpush.bf16.msra.mxu3 %v2582_v59  ;;  %v2242_v3 = vadd.f32 %v2238_v27, %v2233_v56  ;;  %v2243_v49 = vadd.f32 %v2239_v35, %v2234_v6  ;;  %v1766_v34 = vmul.f32 %v6227_v45, %v8342_v25  ;;  %v1779_v31 = vmul.f32 %v6227_v45, %v8343_v37 }
 0x33e   :  { %v1717_v32 = vadd.f32 %v6142_v23, %v1714_v16  ;;  %v1730_v24 = vadd.f32 %v6144_v36, %v1727_v62  ;;  %v1743_v30 = vadd.f32 %v6152_v54, %v1740_v8  ;;  %v1756_v63 = vadd.f32 %v6154_v43, %v1753_v40 }
 0x33f   :  { %v2251_v48 = vadd.f32 %v2247_v33, %v2242_v3  ;;  %v2252_v4 = vadd.f32 %v2248_v46, %v2243_v49  ;;  %v1769_v15 = vadd.f32 %v1768_v1, %v1766_v34  ;;  %v1793_v6 = vadd.f32 %v6137_v51, %v6108_v47 }
 0x340   :  { %v1718_v27 = vrot.slane %v1717_v32, 4  ;;  %v1731_v35 = vrot.slane %v1730_v24, 4  ;;  %v1744_v59 = vrot.slane %v1743_v30, 4  ;;  %v1757_v56 = vrot.slane %v1756_v63, 4 }
 0x341   :  { %v2581_v23 = vpack.c.bf16 %v2252_v4, %v2251_v48  ;;  %v1770_v16 = vrot.slane %v1769_v15, 4  ;;  %v1782_v36 = vadd.f32 %v1781_v61, %v1779_v31  ;;  %v1794_v40 = vadd.f32 %v1793_v6, %v1791_v18 }
 0x342   :  { %v1719_v62 = vadd.f32 %v1718_v27, %v1717_v32  ;;  %v1732_v54 = vadd.f32 %v1731_v35, %v1730_v24  ;;  %v1745_v8 = vadd.f32 %v1744_v59, %v1743_v30  ;;  %v1758_v43 = vadd.f32 %v1757_v56, %v1756_v63 }
 0x343   :  { %2752 = vmatpush.bf16.msra.mxu3 %v2581_v23  ;;  %v1771_v0 = vadd.f32 %v1770_v16, %v1769_v15  ;;  %v1783_v42 = vrot.slane %v1782_v36, 4  ;;  %v1792_v1 = vmul.f32 %v6227_v45, %v8345_v22  ;;  %v1802_v47 = vmul.f32 %v6042_v39, %v8347_v29 }
 0x344   :  { %v1720_v33 = vrot.slane %v1719_v62, 2  ;;  %v1733_v46 = vrot.slane %v1732_v54, 2  ;;  %v1746_v3 = vrot.slane %v1745_v8, 2  ;;  %v1759_v49 = vrot.slane %v1758_v43, 2 }
 0x345   :  { %v1804_v51 = vmul.f32 %v6085_v14, %v8346_v26  ;;  %v1772_v34 = vrot.slane %v1771_v0, 2  ;;  %v1795_v31 = vadd.f32 %v1794_v40, %v1792_v1  ;;  %v2114_v30 = vmul.f32 %v6088_v57, %v8298_v11 }
 0x346   :  { %v1721_v32 = vadd.f32 %v1720_v33, %v1719_v62  ;;  %v1734_v18 = vadd.f32 %v1733_v46, %v1732_v54  ;;  %v1747_v24 = vadd.f32 %v1746_v3, %v1745_v8  ;;  %v1806_v63 = vadd.f32 %v6140_v60, %v1802_v47  ;;  %v8352_v46 = vld [vmem:[#allocation22_spill] sm:$0xff] }
 0x347   :  { %v1760_v61 = vadd.f32 %v1759_v49, %v1758_v43  ;;  %v1784_v48 = vadd.f32 %v1783_v42, %v1782_v36  ;;  %v1796_v4 = vrot.slane %v1795_v31, 4  ;;  %v6261_v39 = vperm.slane %v6077_v44, 1  ;;  %v8351_v42 = vld [vmem:[#allocation19_spill] sm:$0xff] }
 0x348   :  { %v1722_v15 = vrot.slane %v1721_v32, 1  ;;  %v1735_v27 = vrot.slane %v1734_v18, 1  ;;  %v1748_v35 = vrot.slane %v1747_v24, 1  ;;  %v1807_v14 = vadd.f32 %v1806_v63, %v1804_v51 }
 0x349   :  { %8348 = vst [vmem:[#allocation55_spill] sm:$0xff] %v6261_v39  ;;  %v1773_v59 = vadd.f32 %v1772_v34, %v1771_v0  ;;  %v1797_v56 = vadd.f32 %v1796_v4, %v1795_v31  ;;  %v2115_v6 = vmul.f32 %v6088_v57, %v8316_v53  ;;  %v6266_v62 = vperm.slane %v6077_v44, 2  ;;  %v8353_v34 = vld [vmem:[#allocation16_spill] sm:$0xff] }
 0x34a   :  { %v1723_v23 = vadd.f32 %v1722_v15, %v1721_v32  ;;  %v1736_v16 = vadd.f32 %v1735_v27, %v1734_v18  ;;  %v6269_v60 = vperm.slane %v6077_v44, 3  ;;  %v1749_v36 = vadd.f32 %v1748_v35, %v1747_v24  ;;  %v8354_v27 = vld [vmem:[#allocation12_spill] sm:$0xff] }
 0x34b   :  { %8349 = vst [vmem:[#allocation56_spill] sm:$0xff] %v6266_v62  ;;  %v1761_v54 = vrot.slane %v1760_v61, 1  ;;  %v1785_v8 = vrot.slane %v1784_v48, 2  ;;  %v1798_v43 = vrot.slane %v1797_v56, 2  ;;  %v1805_v40 = vmul.f32 %v6227_v45, %v8269_v50 }
 0x34c   :  { %8350 = vst [vmem:[#allocation57_spill] sm:$0xff] %v6269_v60  ;;  %v1815_v0 = vsel %vm1040_vm0, %v1723_v23, %v1736_v16  ;;  %v2123_v1 = vmul.f32 %v6261_v39, %v8351_v42  ;;  %v2124_v33 = vmul.f32 %v6261_v39, %v8332_v5  ;;  %4903 = vrcp.f32 %v8352_v46 }
 0x34d   :  { %v1774_v3 = vrot.slane %v1773_v59, 1  ;;  %v1808_v49 = vadd.f32 %v1807_v14, %v1805_v40  ;;  %v2132_v31 = vmul.f32 %v6266_v62, %v8353_v34  ;;  %v1762_v32 = vadd.f32 %v1761_v54, %v1760_v61 }
 0x34e   :  { %v2127_v47 = vadd.f32 %v2123_v1, %v2114_v30  ;;  %v2128_v51 = vadd.f32 %v2124_v33, %v2115_v6  ;;  %v1786_v18 = vadd.f32 %v1785_v8, %v1784_v48  ;;  %v1816_v45 = vsel %vm1042_vm1, %v1815_v0, %v1749_v36  ;;  %v8357_v8 = vld [vmem:[#allocation39_spill] sm:$0xff] }
 0x34f   :  { %v2133_v24 = vmul.f32 %v6266_v62, %v8336_v41  ;;  %v1799_v63 = vadd.f32 %v1798_v43, %v1797_v56  ;;  %v1809_v4 = vrot.slane %v1808_v49, 4  ;;  %v2141_v35 = vmul.f32 %v6269_v60, %v8354_v27 }
 0x350   :  { %v2136_v15 = vadd.f32 %v2132_v31, %v2127_v47  ;;  %v2142_v30 = vmul.f32 %v6269_v60, %v8341_v7  ;;  %v6289_v14 = vperm.slane %v6077_v44, 4  ;;  %v6292_v61 = vperm.slane %v6077_v44, 5  ;;  %v8359_v47 = vld [vmem:[#allocation35_spill] sm:$0xff] }
 0x351   :  { %v2137_v23 = vadd.f32 %v2133_v24, %v2128_v51  ;;  %v1775_v48 = vadd.f32 %v1774_v3, %v1773_v59  ;;  %v1810_v6 = vadd.f32 %v1809_v4, %v1808_v49  ;;  %v1817_v16 = vsel %vm1044_vm2, %v1816_v45, %v1762_v32  ;;  %v8361_v45 = vld [vmem:[#allocation25_spill] sm:$0xff]  ;;  %v8362_v4 = vld [vmem:[#allocation24_spill] sm:$0xff] }
 0x352   :  { %8355 = vst [vmem:[#allocation19_spill] sm:$0xff] %v6289_v14  ;;  %v2145_v56 = vadd.f32 %v2141_v35, %v2136_v15  ;;  %v4904_v36 = vpop.eup %4903  ;;  %v2150_v43 = vmul.f32 %v6289_v14, %v8357_v8  ;;  %v2151_v40 = vmul.f32 %v6289_v14, %v8342_v25  ;;  %v6300_v0 = vperm.slane %v6077_v44, 6  ;;  %v8363_v35 = vld [vmem:[#allocation21_spill] sm:$0xff] }
 0x353   :  { %8356 = vst [vmem:[#allocation22_spill] sm:$0xff] %v6292_v61  ;;  %v2146_v54 = vadd.f32 %v2142_v30, %v2137_v23  ;;  %v1787_v1 = vrot.slane %v1786_v18, 1  ;;  %v1800_v33 = vrot.slane %v1799_v63, 1  ;;  %v1811_v46 = vrot.slane %v1810_v6, 2 }
 0x354   :  { %8358 = vst [vmem:[#allocation16_spill] sm:$0xff] %v6300_v0  ;;  %v2159_v59 = vmul.f32 %v6292_v61, %v8359_v47  ;;  %v2154_v3 = vadd.f32 %v2150_v43, %v2145_v56  ;;  %v2160_v51 = vmul.f32 %v6292_v61, %v8343_v37  ;;  %v6307_v31 = vperm.slane %v6077_v44, 7 }
 0x355   :  { %v2155_v49 = vadd.f32 %v2151_v40, %v2146_v54  ;;  %v1818_v32 = vsel %vm1046_vm3, %v1817_v16, %v1775_v48  ;;  %v2112_v24 = vmul.f32 %v6088_v57, %v8361_v45  ;;  %v2113_v15 = vmul.f32 %v6088_v57, %v8362_v4  ;;  %v8364_v40 = vld [vmem:[#allocation20_spill] sm:$0xff] }
 0x356   :  { %8360 = vst [vmem:[#allocation12_spill] sm:$0xff] %v6307_v31  ;;  %v2121_v23 = vmul.f32 %v6261_v39, %v8363_v35  ;;  %v2163_v30 = vadd.f32 %v2159_v59, %v2154_v3  ;;  %v2168_v54 = vmul.f32 %v6300_v0, %v8344_v28  ;;  %v2169_v44 = vmul.f32 %v6300_v0, %v8345_v22 }
 0x357   :  { %v2164_v56 = vadd.f32 %v2160_v51, %v2155_v49  ;;  %v1812_v43 = vadd.f32 %v1811_v46, %v1810_v6  ;;  %v2122_v48 = vmul.f32 %v6261_v39, %v8364_v40  ;;  %v2130_v10 = vmul.f32 %v6266_v62, %v8365_v12 }
 0x358   :  { %v2125_v16 = vadd.f32 %v2121_v23, %v2112_v24  ;;  %v2172_v21 = vadd.f32 %v2168_v54, %v2163_v30  ;;  %v2177_v59 = vmul.f32 %v6307_v31, %v8346_v26  ;;  %v2178_v3 = vmul.f32 %v6307_v31, %v8269_v50  ;;  %v8366_v24 = vld [vmem:[#allocation42_spill] sm:$0xff] }
 0x359   :  { %v2173_v57 = vadd.f32 %v2169_v44, %v2164_v56  ;;  %v2126_v49 = vadd.f32 %v2122_v48, %v2113_v15  ;;  %v2131_v51 = vmul.f32 %v6266_v62, %v5369_v9  ;;  %v2139_v46 = vmul.f32 %v6269_v60, %v5359_v2 }
 0x35a   :  { %v2134_v6 = vadd.f32 %v2130_v10, %v2125_v16  ;;  %v1198_v23 = vmul.f32 %v4904_v36, %v8366_v24  ;;  %v1788_v39 = vadd.f32 %v1787_v1, %v1786_v18  ;;  %v2181_v12 = vadd.f32 %v2177_v59, %v2172_v21 }
 0x35b   :  { %v2182_v30 = vadd.f32 %v2178_v3, %v2173_v57  ;;  %v2135_v56 = vadd.f32 %v2131_v51, %v2126_v49  ;;  %v2140_v54 = vmul.f32 %v6269_v60, %v8262_v38  ;;  %v2148_v15 = vmul.f32 %v6289_v14, %v5495_v52 }
 0x35c   :  { %v2143_v44 = vadd.f32 %v2139_v46, %v2134_v6  ;;  %v1801_v48 = vadd.f32 %v1800_v33, %v1799_v63  ;;  %v1813_v40 = vrot.slane %v1812_v43, 1  ;;  %v1819_v10 = vsel %vm1048_vm4, %v1818_v32, %v1788_v39 }
 0x35d   :  { %v2580_v16 = vpack.c.bf16 %v2182_v30, %v2181_v12  ;;  %v2144_v62 = vadd.f32 %v2140_v54, %v2135_v56  ;;  %v2149_v36 = vmul.f32 %v6289_v14, %v8263_v55  ;;  %v2157_v57 = vmul.f32 %v6292_v61, %v5471_v58 }
 0x35e   :  { %v2152_v18 = vadd.f32 %v2148_v15, %v2143_v44  ;;  %v2158_v21 = vmul.f32 %v6292_v61, %v8264_v13  ;;  %v2166_v1 = vmul.f32 %v6300_v0, %v5455_v19  ;;  %v6346_v63 = vperm.slane %v1198_v23, 0 }
 0x35f   :  { %2753 = vmatpush.bf16.msra.mxu3 %v2580_v16  ;;  %v6348_v33 = vperm.slane %v1198_v23, 1  ;;  %v2153_v12 = vadd.f32 %v2149_v36, %v2144_v62  ;;  %v2167_v32 = vmul.f32 %v6300_v0, %v8265_v17  ;;  %v6352_v59 = vperm.slane %v1198_v23, 2  ;;  %v8383_v0 = vld [vmem:[#allocation20_spill] sm:$0xff] }
 0x360   :  { %8367 = vst [vmem:[#allocation42_spill] sm:$0xff] %v6346_v63  ;;  %v2161_v39 = vadd.f32 %v2157_v57, %v2152_v18  ;;  %v2042_v3 = vmul.f32 %v6346_v63, %v8298_v11  ;;  %v2043_v49 = vmul.f32 %v6346_v63, %v8316_v53  ;;  %v6360_v6 = vperm.slane %v1198_v23, 3 }
 0x361   :  { %8368 = vst [vmem:[#allocation58_spill] sm:$0xff] %v6348_v33  ;;  %v2051_v51 = vmul.f32 %v6348_v33, %v8351_v42  ;;  %v2162_v46 = vadd.f32 %v2158_v21, %v2153_v12  ;;  %v2175_v62 = vmul.f32 %v6307_v31, %v8347_v29  ;;  %v2052_v30 = vmul.f32 %v6348_v33, %v8332_v5 }
 0x362   :  { %8369 = vst [vmem:[#allocation59_spill] sm:$0xff] %v6352_v59  ;;  %v2170_v24 = vadd.f32 %v2166_v1, %v2161_v39  ;;  %v1820_v56 = vsel %vm1050_vm5, %v1819_v10, %v1801_v48  ;;  %v2176_v54 = vmul.f32 %v6307_v31, %v8331_v20  ;;  %v2060_v15 = vmul.f32 %v6352_v59, %v8353_v34  ;;  %v8378_v31 = vld [vmem:[#allocation43_spill] sm:$0xff] }
 0x363   :  { %8370 = vst [vmem:[#allocation60_spill] sm:$0xff] %v6360_v6  ;;  %v2055_v44 = vadd.f32 %v2051_v51, %v2042_v3  ;;  %v2171_v16 = vadd.f32 %v2167_v32, %v2162_v46  ;;  %v2056_v18 = vadd.f32 %v2052_v30, %v2043_v49  ;;  %v2061_v57 = vmul.f32 %v6352_v59, %v8336_v41  ;;  %v8373_v32 = vld [vmem:[#allocation14_spill] sm:$0xff]  ;;  %v926_v49 = vpop.f32.mrf.mxu2 }
 0x364   :  { %v2179_v36 = vadd.f32 %v2175_v62, %v2170_v24  ;;  %v1814_v21 = vadd.f32 %v1813_v40, %v1812_v43  ;;  %v2069_v12 = vmul.f32 %v6360_v6, %v8354_v27  ;;  %v6375_v39 = vperm.slane %v1198_v23, 4 }
 0x365   :  { %v2064_v1 = vadd.f32 %v2060_v15, %v2055_v44  ;;  %v2180_v48 = vadd.f32 %v2176_v54, %v2171_v16  ;;  %v2065_v10 = vadd.f32 %v2061_v57, %v2056_v18  ;;  %v2070_v3 = vmul.f32 %v6360_v6, %v8341_v7  ;;  %v8376_v54 = vld [vmem:[#allocation47_spill] sm:$0xff]  ;;  %v837_v16 = vpop.f32.mrf.mxu1 }
 0x366   :  { %8371 = vst [vmem:[#allocation61_spill] sm:$0xff] %v6375_v39  ;;  %v6379_v51 = vperm.slane %v1198_v23, 5  ;;  %v1566_v46 = vrot.slane %v8373_v32, 4  ;;  %v2078_v43 = vmul.f32 %v6375_v39, %v8357_v8  ;;  %v6385_v40 = vsel %vm1052_vm6, %v1820_v56, %v1814_v21  ;;  %v8379_v56 = vld [vmem:[#allocation46_spill] sm:$0xff] }
 0x367   :  { %v2073_v24 = vadd.f32 %v2069_v12, %v2064_v1  ;;  %8374 = vst [vmem:[#allocation63_spill] sm:$0xff] %v6385_v40  ;;  %v2579_v62 = vpack.c.bf16 %v2180_v48, %v2179_v36  ;;  %v2074_v30 = vadd.f32 %v2070_v3, %v2065_v10  ;;  %v6387_v44 = vperm.slane %v1198_v23, 6 }
 0x368   :  { %8372 = vst [vmem:[#allocation62_spill] sm:$0xff] %v6379_v51  ;;  %v1694_v15 = vrot.slane %v8376_v54, 4  ;;  %v6390_v57 = vperm.slane %v1198_v23, 7  ;;  %v2079_v1 = vmul.f32 %v6375_v39, %v8342_v25  ;;  %v2087_v12 = vmul.f32 %v6379_v51, %v8359_v47 }
 0x369   :  { %8375 = vst [vmem:[#allocation64_spill] sm:$0xff] %v6387_v44  ;;  %v2082_v18 = vadd.f32 %v2078_v43, %v2073_v24  ;;  %2754 = vmatpush.bf16.msra.mxu3 %v2579_v62  ;;  %v6398_v21 = vmul.f32 %v8379_v56, %v8378_v31  ;;  %v6401_v36 = vmax.f32 %v8373_v32, %v1566_v46  ;;  %v1822_v48 = vrot.slane %v6385_v40, 4 }
 0x36a   :  { %8377 = vst [vmem:[#allocation65_spill] sm:$0xff] %v6390_v57  ;;  %v927_v10 = vadd.f32 %v926_v49, %v837_v16  ;;  %v2083_v3 = vadd.f32 %v2079_v1, %v2074_v30  ;;  %v2088_v23 = vmul.f32 %v6379_v51, %v8343_v37  ;;  %v2096_v43 = vmul.f32 %v6387_v44, %v8344_v28 }
 0x36b   :  { %8380 = vst [vmem:[#allocation43_spill] sm:$0xff] %v6401_v36  ;;  %v2091_v24 = vadd.f32 %v2087_v12, %v2082_v18  ;;  %v6409_v62 = vmax.f32 %v8376_v54, %v1694_v15  ;;  %v2097_v31 = vmul.f32 %v6387_v44, %v8345_v22  ;;  %v2105_v46 = vmul.f32 %v6390_v57, %v8346_v26  ;;  %v928_v54 = vpop.f32.mrf.mxu2 }
 0x36c   :  { %v2040_v49 = vmul.f32 %v6346_v63, %v8361_v45  ;;  %v2092_v30 = vadd.f32 %v2088_v23, %v2083_v3  ;;  %v2041_v18 = vmul.f32 %v6346_v63, %v8362_v4  ;;  %v2049_v1 = vmul.f32 %v6348_v33, %v8363_v35 }
 0x36d   :  { %8381 = vst [vmem:[#allocation46_spill] sm:$0xff] %v6409_v62  ;;  %v2100_v16 = vadd.f32 %v2096_v43, %v2091_v24  ;;  %v6422_v15 = vmax.f32 %v6385_v40, %v1822_v48  ;;  %v1839_v12 = vmul.f32 %v927_v10, %v8361_v45  ;;  %v2106_v56 = vmul.f32 %v6390_v57, %v8269_v50  ;;  %v8384_v24 = vld [vmem:[#allocation17_spill] sm:$0xff] }
 0x36e   :  { %v2050_v61 = vmul.f32 %v6348_v33, %v8383_v0  ;;  %v2101_v14 = vadd.f32 %v2097_v31, %v2092_v30  ;;  %v2053_v23 = vadd.f32 %v2049_v1, %v2040_v49  ;;  %v2058_v43 = vmul.f32 %v6352_v59, %v8384_v24 }
 0x36f   :  { %8382 = vst [vmem:[#allocation66_spill] sm:$0xff] %v6422_v15  ;;  %v2109_v3 = vadd.f32 %v2105_v46, %v2100_v16  ;;  %v1852_v60 = vmul.f32 %v927_v10, %v8363_v35  ;;  %v1865_v63 = vmul.f32 %v927_v10, %v8384_v24  ;;  %v2059_v40 = vmul.f32 %v6352_v59, %v5369_v9  ;;  %v839_v46 = vpop.f32.mrf.mxu1 }
 0x370   :  { %v2054_v48 = vadd.f32 %v2050_v61, %v2041_v18  ;;  %v1878_v32 = vmul.f32 %v927_v10, %v5359_v2  ;;  %v2110_v15 = vadd.f32 %v2106_v56, %v2101_v14  ;;  %v2062_v62 = vadd.f32 %v2058_v43, %v2053_v23 }
 0x371   :  { %v2067_v31 = vmul.f32 %v6360_v6, %v5359_v2  ;;  %v1891_v49 = vmul.f32 %v927_v10, %v5495_v52  ;;  %v1904_v30 = vmul.f32 %v927_v10, %v5471_v58  ;;  %v2068_v61 = vmul.f32 %v6360_v6, %v8262_v38 }
 0x372   :  { %v2063_v16 = vadd.f32 %v2059_v40, %v2054_v48  ;;  %v2578_v18 = vpack.c.bf16 %v2110_v15, %v2109_v3  ;;  %v2076_v59 = vmul.f32 %v6375_v39, %v5495_v52  ;;  %v929_v33 = vadd.f32 %v928_v54, %v839_v46 }
 0x373   :  { %v2071_v1 = vadd.f32 %v2067_v31, %v2062_v62  ;;  %v1917_v14 = vmul.f32 %v927_v10, %v5455_v19  ;;  %v1930_v56 = vmul.f32 %v927_v10, %v8347_v29  ;;  %v2077_v43 = vmul.f32 %v6375_v39, %v8263_v55 }
 0x374   :  { %v2072_v23 = vadd.f32 %v2068_v61, %v2063_v16  ;;  %2755 = vmatpush.bf16.msra.mxu3 %v2578_v18  ;;  %v2085_v40 = vmul.f32 %v6379_v51, %v5471_v58  ;;  %v2086_v62 = vmul.f32 %v6379_v51, %v8264_v13  ;;  %v1840_v15 = vmul.f32 %v929_v33, %v8362_v4 }
 0x375   :  { %v2080_v36 = vadd.f32 %v2076_v59, %v2071_v1  ;;  %v2094_v54 = vmul.f32 %v6387_v44, %v5455_v19  ;;  %v1853_v10 = vmul.f32 %v929_v33, %v8383_v0  ;;  %v6457_v48 = vperm.slane %v6398_v21, 0 }
 0x376   :  { %v2081_v3 = vadd.f32 %v2077_v43, %v2072_v23  ;;  %v2095_v59 = vmul.f32 %v6387_v44, %v8265_v17  ;;  %v2103_v46 = vmul.f32 %v6390_v57, %v8347_v29  ;;  %v1866_v16 = vmul.f32 %v929_v33, %v5369_v9 }
 0x377   :  { %8385 = vst [vmem:[#allocation67_spill] sm:$0xff] %v6457_v48  ;;  %v2089_v31 = vadd.f32 %v2085_v40, %v2080_v36  ;;  %v2104_v18 = vmul.f32 %v6390_v57, %v8331_v20  ;;  %v1879_v1 = vmul.f32 %v929_v33, %v8262_v38  ;;  %v6468_v23 = vperm.slane %v6398_v21, 1 }
 0x378   :  { %v2090_v61 = vadd.f32 %v2086_v62, %v2081_v3  ;;  %v6470_v51 = vadd.f32 %v1840_v15, %v1839_v12  ;;  %v1892_v36 = vmul.f32 %v929_v33, %v8263_v55  ;;  %v6474_v40 = vperm.slane %v6398_v21, 2 }
 0x379   :  { %8386 = vst [vmem:[#allocation68_spill] sm:$0xff] %v6468_v23  ;;  %v2098_v43 = vadd.f32 %v2094_v54, %v2089_v31  ;;  %v6476_v39 = vadd.f32 %v1853_v10, %v1852_v60  ;;  %v1970_v62 = vmul.f32 %v6457_v48, %v8298_v11  ;;  %v1971_v3 = vmul.f32 %v6457_v48, %v8316_v53  ;;  %v931_v53 = vpop.f32.mrf.mxu2 }
 0x37a   :  { %8387 = vst [vmem:[#allocation69_spill] sm:$0xff] %v6474_v40  ;;  %v2099_v44 = vadd.f32 %v2095_v59, %v2090_v61  ;;  %v6482_v6 = vadd.f32 %v1866_v16, %v1865_v63  ;;  %v1905_v12 = vmul.f32 %v929_v33, %v8264_v13  ;;  %v1918_v15 = vmul.f32 %v929_v33, %v8265_v17 }
 0x37b   :  { %v2107_v57 = vadd.f32 %v2103_v46, %v2098_v43  ;;  %v6486_v31 = vadd.f32 %v1879_v1, %v1878_v32  ;;  %v1979_v60 = vmul.f32 %v6468_v23, %v8351_v42  ;;  %v1980_v10 = vmul.f32 %v6468_v23, %v8332_v5 }
 0x37c   :  { %v2108_v54 = vadd.f32 %v2104_v18, %v2099_v44  ;;  %v1931_v59 = vmul.f32 %v929_v33, %v8331_v20  ;;  %v1988_v46 = vmul.f32 %v6474_v40, %v8353_v34  ;;  %v1989_v63 = vmul.f32 %v6474_v40, %v8336_v41 }
 0x37d   :  { %8388 = vst [vmem:[#allocation70_spill] sm:$0xff] %v6486_v31  ;;  %v6498_v16 = vperm.slane %v6398_v21, 3  ;;  %v1983_v32 = vadd.f32 %v1979_v60, %v1970_v62  ;;  %v1984_v61 = vadd.f32 %v1980_v10, %v1971_v3  ;;  %v6501_v18 = vperm.slane %v6398_v21, 4  ;;  %v842_v3 = vpop.f32.mrf.mxu1 }
 0x37e   :  { %v2577_v44 = vpack.c.bf16 %v2108_v54, %v2107_v57  ;;  %v6503_v1 = vadd.f32 %v1892_v36, %v1891_v49  ;;  %v6505_v43 = vadd.f32 %v1905_v12, %v1904_v30  ;;  %v6507_v33 = vadd.f32 %v1918_v15, %v1917_v14 }
 0x37f   :  { %8389 = vst [vmem:[#allocation71_spill] sm:$0xff] %v6498_v16  ;;  %v6510_v5 = vperm.slane %v6398_v21, 5  ;;  %v1992_v41 = vadd.f32 %v1988_v46, %v1983_v32  ;;  %v1993_v31 = vadd.f32 %v1989_v63, %v1984_v61  ;;  %v1997_v57 = vmul.f32 %v6498_v16, %v8354_v27 }
 0x380   :  { %8390 = vst [vmem:[#allocation72_spill] sm:$0xff] %v6501_v18  ;;  %2756 = vmatpush.bf16.msra.mxu3 %v2577_v44  ;;  %v1998_v62 = vmul.f32 %v6498_v16, %v8341_v7  ;;  %v6516_v49 = vadd.f32 %v1931_v59, %v1930_v56  ;;  %v2006_v30 = vmul.f32 %v6501_v18, %v8357_v8  ;;  %v6521_v14 = vperm.slane %v6398_v21, 6 }
 0x381   :  { %8391 = vst [vmem:[#allocation73_spill] sm:$0xff] %v6510_v5  ;;  %v6524_v36 = vperm.slane %v6398_v21, 7  ;;  %v2001_v12 = vadd.f32 %v1997_v57, %v1992_v41  ;;  %v2007_v54 = vmul.f32 %v6501_v18, %v8342_v25  ;;  %v1968_v60 = vmul.f32 %v6457_v48, %v8361_v45 }
 0x382   :  { %8392 = vst [vmem:[#allocation74_spill] sm:$0xff] %v6521_v14  ;;  %v2002_v15 = vadd.f32 %v1998_v62, %v1993_v31  ;;  %v2015_v56 = vmul.f32 %v6510_v5, %v8359_v47  ;;  %v2016_v10 = vmul.f32 %v6510_v5, %v8343_v37  ;;  %v2024_v59 = vmul.f32 %v6521_v14, %v8344_v28 }
 0x383   :  { %8393 = vst [vmem:[#allocation75_spill] sm:$0xff] %v6524_v36  ;;  %v1969_v21 = vmul.f32 %v6457_v48, %v8362_v4  ;;  %v2010_v41 = vadd.f32 %v2006_v30, %v2001_v12  ;;  %v1977_v46 = vmul.f32 %v6468_v23, %v8363_v35  ;;  %v1978_v63 = vmul.f32 %v6468_v23, %v8383_v0 }
 0x384   :  { %v2011_v31 = vadd.f32 %v2007_v54, %v2002_v15  ;;  %v2025_v44 = vmul.f32 %v6521_v14, %v8345_v22  ;;  %v2033_v32 = vmul.f32 %v6524_v36, %v8346_v26  ;;  %v2034_v61 = vmul.f32 %v6524_v36, %v8269_v50 }
 0x385   :  { %v1986_v57 = vmul.f32 %v6474_v40, %v8384_v24  ;;  %v2019_v62 = vadd.f32 %v2015_v56, %v2010_v41  ;;  %v1981_v12 = vadd.f32 %v1977_v46, %v1968_v60  ;;  %v1987_v15 = vmul.f32 %v6474_v40, %v5369_v9  ;;  %v6568_v46 = vld [vmem:[#allocation3 + $0x4] sm:$0xf0] }
 0x386   :  { %v2020_v30 = vadd.f32 %v2016_v10, %v2011_v31  ;;  %v1982_v54 = vadd.f32 %v1978_v63, %v1969_v21  ;;  %v1995_v23 = vmul.f32 %v6498_v16, %v5359_v2  ;;  %v1996_v48 = vmul.f32 %v6498_v16, %v8262_v38  ;;  %v6566_v31 = vld [vmem:[#allocation3] sm:$0xf] }
 0x387   :  { %v2004_v0 = vmul.f32 %v6501_v18, %v5495_v52  ;;  %v2028_v35 = vadd.f32 %v2024_v59, %v2019_v62  ;;  %v1990_v45 = vadd.f32 %v1986_v57, %v1981_v12  ;;  %v2005_v56 = vmul.f32 %v6501_v18, %v8263_v55  ;;  %v933_v59 = vpop.f32.mrf.mxu2 }
 0x388   :  { %v2029_v4 = vadd.f32 %v2025_v44, %v2020_v30  ;;  %v1991_v60 = vadd.f32 %v1987_v15, %v1982_v54  ;;  %v2013_v10 = vmul.f32 %v6510_v5, %v5471_v58  ;;  %v2014_v21 = vmul.f32 %v6510_v5, %v8264_v13  ;;  %v844_v54 = vpop.f32.mrf.mxu1 }
 0x389   :  { %v2022_v41 = vmul.f32 %v6521_v14, %v5455_v19  ;;  %v2037_v63 = vadd.f32 %v2033_v32, %v2028_v35  ;;  %v1999_v57 = vadd.f32 %v1995_v23, %v1990_v45  ;;  %v2023_v62 = vmul.f32 %v6521_v14, %v8265_v17  ;;  %v8418_v14 = vld [vmem:[#allocation21_spill] sm:$0xff] }
 0x38a   :  { %v2038_v44 = vadd.f32 %v2034_v61, %v2029_v4  ;;  %v2000_v30 = vadd.f32 %v1996_v48, %v1991_v60  ;;  %v2031_v12 = vmul.f32 %v6524_v36, %v8347_v29  ;;  %v2032_v15 = vmul.f32 %v6524_v36, %v8331_v20 }
 0x38b   :  { %v932_v5 = vadd.f32 %v931_v53, %v842_v3  ;;  %v2008_v16 = vadd.f32 %v2004_v0, %v1999_v57  ;;  %v4431_v40 = vor.u32 %v6568_v46, %v6566_v31  ;;  %v934_v35 = vadd.f32 %v933_v59, %v844_v54  ;;  %v8394_v59 = vld [vmem:[#allocation70_spill] sm:$0xff] }
 0x38c   :  { %v2576_v18 = vpack.c.bf16 %v2038_v44, %v2037_v63  ;;  %v2009_v4 = vadd.f32 %v2005_v56, %v2000_v30  ;;  %v8395_v30 = vld [vmem:[#allocation23_spill] sm:$0xff] }
 0x38d   :  { %v1841_v45 = vmul.f32 %v932_v5, %v8298_v11  ;;  %v1854_v23 = vmul.f32 %v932_v5, %v8351_v42  ;;  %v1867_v48 = vmul.f32 %v932_v5, %v8353_v34  ;;  %v2017_v32 = vadd.f32 %v2013_v10, %v2008_v16 }
 0x38e   :  { %2757 = vmatpush.bf16.msra.mxu3 %v2576_v18  ;;  %v1880_v61 = vmul.f32 %v932_v5, %v8354_v27  ;;  %v1893_v60 = vmul.f32 %v932_v5, %v8357_v8  ;;  %v1906_v53 = vmul.f32 %v932_v5, %v8359_v47  ;;  %v2018_v0 = vadd.f32 %v2014_v21, %v2009_v4 }
 0x38f   :  { %v1844_v3 = vadd.f32 %v6470_v51, %v1841_v45  ;;  %v1857_v31 = vadd.f32 %v6476_v39, %v1854_v23  ;;  %v1870_v56 = vadd.f32 %v6482_v6, %v1867_v48  ;;  %v2026_v46 = vadd.f32 %v2022_v41, %v2017_v32  ;;  %v8396_v51 = vld [vmem:[#allocation18_spill] sm:$0xff]  ;;  %v8397_v39 = vld [vmem:[#allocation15_spill] sm:$0xff] }
 0x390   :  { %v1883_v63 = vadd.f32 %v8394_v59, %v1880_v61  ;;  %v1896_v44 = vadd.f32 %v6503_v1, %v1893_v60  ;;  %v1909_v16 = vadd.f32 %v6505_v43, %v1906_v53  ;;  %v2027_v18 = vadd.f32 %v2023_v62, %v2018_v0 }
 0x391   :  { %v1919_v10 = vmul.f32 %v932_v5, %v8344_v28  ;;  %v1932_v57 = vmul.f32 %v932_v5, %v8346_v26  ;;  %v1842_v21 = vmul.f32 %v934_v35, %v8395_v30  ;;  %v2035_v54 = vadd.f32 %v2031_v12, %v2026_v46 }
 0x392   :  { %v1855_v4 = vmul.f32 %v934_v35, %v8396_v51  ;;  %v1868_v45 = vmul.f32 %v934_v35, %v8397_v39  ;;  %v1881_v6 = vmul.f32 %v934_v35, %v8341_v7  ;;  %v2036_v41 = vadd.f32 %v2032_v15, %v2027_v18 }
 0x393   :  { %v1922_v23 = vadd.f32 %v6507_v33, %v1919_v10  ;;  %v1935_v1 = vadd.f32 %v6516_v49, %v1932_v57  ;;  %v1845_v43 = vadd.f32 %v1844_v3, %v1842_v21  ;;  %v1894_v5 = vmul.f32 %v934_v35, %v8342_v25 }
 0x394   :  { %v1858_v62 = vadd.f32 %v1857_v31, %v1855_v4  ;;  %v1871_v48 = vadd.f32 %v1870_v56, %v1868_v45  ;;  %v1884_v32 = vadd.f32 %v1883_v63, %v1881_v6  ;;  %v2575_v61 = vpack.c.bf16 %v2036_v41, %v2035_v54 }
 0x395   :  { %v1846_v60 = vrot.slane %v1845_v43, 4  ;;  %v1907_v12 = vmul.f32 %v934_v35, %v8343_v37  ;;  %v1920_v53 = vmul.f32 %v934_v35, %v8345_v22  ;;  %v1897_v15 = vadd.f32 %v1896_v44, %v1894_v5 }
 0x396   :  { %v1859_v0 = vrot.slane %v1858_v62, 4  ;;  %v1872_v46 = vrot.slane %v1871_v48, 4  ;;  %v1885_v59 = vrot.slane %v1884_v32, 4  ;;  %2758 = vmatpush.bf16.msra.mxu3 %v2575_v61  ;;  %v1933_v3 = vmul.f32 %v934_v35, %v8269_v50 }
 0x397   :  { %v1847_v33 = vadd.f32 %v1846_v60, %v1845_v43  ;;  %v1910_v18 = vadd.f32 %v1909_v16, %v1907_v12  ;;  %v1923_v49 = vadd.f32 %v1922_v23, %v1920_v53  ;;  %v1898_v10 = vrot.slane %v1897_v15, 4 }
 0x398   :  { %v1860_v31 = vadd.f32 %v1859_v0, %v1858_v62  ;;  %v1873_v56 = vadd.f32 %v1872_v46, %v1871_v48  ;;  %v1886_v63 = vadd.f32 %v1885_v59, %v1884_v32  ;;  %v1936_v4 = vadd.f32 %v1935_v1, %v1933_v3 }
 0x399   :  { %v1848_v57 = vrot.slane %v1847_v33, 2  ;;  %v1911_v21 = vrot.slane %v1910_v18, 4  ;;  %v1924_v54 = vrot.slane %v1923_v49, 4  ;;  %2759 = vmatmul.bf16.vlgmr.msra.gmra.mxu3 %v4431_v40  ;;  %v1899_v36 = vadd.f32 %v1898_v10, %v1897_v15 }
 0x39a   :  { %v1861_v45 = vrot.slane %v1860_v31, 2  ;;  %v1874_v6 = vrot.slane %v1873_v56, 2  ;;  %v1887_v41 = vrot.slane %v1886_v63, 2  ;;  %v1937_v16 = vrot.slane %v1936_v4, 4 }
 0x39b   :  { %v1849_v44 = vadd.f32 %v1848_v57, %v1847_v33  ;;  %v1912_v5 = vadd.f32 %v1911_v21, %v1910_v18  ;;  %v1925_v43 = vadd.f32 %v1924_v54, %v1923_v49  ;;  %v1900_v62 = vrot.slane %v1899_v36, 2  ;;  %v8398_v33 = vld [vmem:[#allocation43_spill] sm:$0xff]  ;;  %v8399_v21 = vld [vmem:[#allocation46_spill] sm:$0xff] }
 0x39c   :  { %v1862_v23 = vadd.f32 %v1861_v45, %v1860_v31  ;;  %v1875_v61 = vadd.f32 %v1874_v6, %v1873_v56  ;;  %v1888_v35 = vadd.f32 %v1887_v41, %v1886_v63  ;;  %v1938_v12 = vadd.f32 %v1937_v16, %v1936_v4  ;;  %v8400_v6 = vld [vmem:[#allocation66_spill] sm:$0xff] }
 0x39d   :  { %v1850_v48 = vrot.slane %v1849_v44, 1  ;;  %v1913_v32 = vrot.slane %v1912_v5, 2  ;;  %v1926_v60 = vrot.slane %v1925_v43, 2  ;;  %v1901_v40 = vadd.f32 %v1900_v62, %v1899_v36 }
 0x39e   :  { %v1863_v53 = vrot.slane %v1862_v23, 1  ;;  %v1876_v0 = vrot.slane %v1875_v61, 1  ;;  %v1889_v1 = vrot.slane %v1888_v35, 1  ;;  %v1939_v15 = vrot.slane %v1938_v12, 2 }
 0x39f   :  { %v1851_v46 = vadd.f32 %v1850_v48, %v1849_v44  ;;  %v1914_v59 = vadd.f32 %v1913_v32, %v1912_v5  ;;  %v1927_v3 = vadd.f32 %v1926_v60, %v1925_v43  ;;  %v1568_v18 = vrot.slane %v8398_v33, 2 }
 0x3a0   :  { %v1864_v49 = vadd.f32 %v1863_v53, %v1862_v23  ;;  %v1877_v10 = vadd.f32 %v1876_v0, %v1875_v61  ;;  %v1902_v31 = vrot.slane %v1901_v40, 1  ;;  %v1940_v57 = vadd.f32 %v1939_v15, %v1938_v12 }
 0x3a1   :  { %v1915_v56 = vrot.slane %v1914_v59, 1  ;;  %v1928_v63 = vrot.slane %v1927_v3, 1  ;;  %v1696_v54 = vrot.slane %v8399_v21, 2  ;;  %v1890_v45 = vadd.f32 %v1889_v1, %v1888_v35 }
 0x3a2   :  { %v1943_v4 = vsel %vm1040_vm0, %v1851_v46, %v1864_v49  ;;  %v1824_v41 = vrot.slane %v8400_v6, 2  ;;  %v1903_v36 = vadd.f32 %v1902_v31, %v1901_v40  ;;  %v1941_v44 = vrot.slane %v1940_v57, 1 }
 0x3a3   :  { %v1944_v5 = vsel %vm1042_vm1, %v1943_v4, %v1877_v10  ;;  %v1569_v43 = vmax.f32 %v8398_v33, %v1568_v18  ;;  %v1916_v16 = vadd.f32 %v1915_v56, %v1914_v59  ;;  %v1929_v61 = vadd.f32 %v1928_v63, %v1927_v3  ;;  %v8401_v10 = vld [vmem:[#allocation14_spill] sm:$0xff]  ;;  %v8402_v63 = vld [vmem:[#allocation47_spill] sm:$0xff] }
 0x3a4   :  { %v1945_v23 = vsel %vm1044_vm2, %v1944_v5, %v1890_v45  ;;  %v1697_v48 = vmax.f32 %v8399_v21, %v1696_v54  ;;  %v1942_v32 = vadd.f32 %v1941_v44, %v1940_v57  ;;  %v1825_v60 = vmax.f32 %v8400_v6, %v1824_v41  ;;  %v8403_v21 = vld [vmem:[#allocation63_spill] sm:$0xff]  ;;  %v4438_v4 = vld [vmem:[#allocation3 + $0x10] sm:$0xf] }
 0x3a5   :  { %v1946_v62 = vsel %vm1046_vm3, %v1945_v23, %v1903_v36  ;;  %v1570_v53 = vrot.slane %v1569_v43, 1  ;;  %v4793_v6 = vld [vmem:[#allocation3 + $0x14] sm:$0xf0] }
 0x3a6   :  { %v1947_v35 = vsel %vm1048_vm4, %v1946_v62, %v1916_v16  ;;  %v1698_v40 = vrot.slane %v1697_v48, 1  ;;  %v1826_v46 = vrot.slane %v1825_v60, 1  ;;  %v4439_v36 = vor.u32 %v4793_v6, %v4438_v4  ;;  %v4446_v62 = vld [vmem:[#allocation3 + $0x20] sm:$0xf] }
 0x3a7   :  { %v1948_v12 = vsel %vm1050_vm5, %v1947_v35, %v1929_v61  ;;  %v1571_v15 = vmax.f32 %v1569_v43, %v1570_v53 }
 0x3a8   :  { %v1949_v0 = vsel %vm1052_vm6, %v1948_v12, %v1942_v32  ;;  %v1699_v33 = vmax.f32 %v1697_v48, %v1698_v40  ;;  %v1827_v18 = vmax.f32 %v1825_v60, %v1826_v46  ;;  %v4795_v48 = vld [vmem:[#allocation3 + $0x24] sm:$0xf0] }
 0x3a9   :  { %v1950_v1 = vrot.slane %v1949_v0, 4  ;;  %v1572_v31 = vsub.f32 %v8401_v10, %v1571_v15  ;;  %2764 = vmatmul.bf16.gmra.mxu3 %v4439_v36  ;;  %v4447_v53 = vor.u32 %v4795_v48, %v4446_v62  ;;  %v4462_v62 = vld [vmem:[#allocation3 + $0x40] sm:$0xf]  ;;  %v4799_v48 = vld [vmem:[#allocation3 + $0x44] sm:$0xf0] }
 0x3aa   :  { %v1700_v57 = vsub.f32 %v8402_v63, %v1699_v33  ;;  %v1828_v54 = vsub.f32 %v8403_v21, %v1827_v18  ;;  %v4454_v63 = vld [vmem:[#allocation3 + $0x30] sm:$0xf] }
 0x3ab   :  { %v1951_v59 = vmax.f32 %v1949_v0, %v1950_v1  ;;  %v1573_v41 = vmul.f32 1.442695, %v1572_v31 }
 0x3ac   :  { %v1701_v5 = vmul.f32 1.442695, %v1700_v57  ;;  %v1829_v43 = vmul.f32 1.442695, %v1828_v54  ;;  %v4797_v57 = vld [vmem:[#allocation3 + $0x34] sm:$0xf0] }
 0x3ad   :  { %v1952_v3 = vrot.slane %v1951_v59, 2  ;;  %4905 = vpow2.f32 %v1573_v41  ;;  %v4455_v4 = vor.u32 %v4797_v57, %v4454_v63 }
 0x3af   :  { %v1953_v49 = vmax.f32 %v1951_v59, %v1952_v3 }
 0x3b1   :  { %v1954_v56 = vrot.slane %v1953_v49, 1 }
 0x3b3   :  { %v1955_v45 = vmax.f32 %v1953_v49, %v1954_v56  ;;  %v4906_v23 = vpop.eup %4905 }
 0x3b4   :  { %v1575_v12 = vrot.slane %v4906_v23, 4 }
 0x3b5   :  { %v1956_v44 = vsub.f32 %v1949_v0, %v1955_v45 }
 0x3b6   :  { %v1576_v46 = vadd.f32 %v4906_v23, %v1575_v12 }
 0x3b7   :  { %v1957_v16 = vmul.f32 1.442695, %v1956_v44 }
 0x3b8   :  { %v1577_v33 = vrot.slane %v1576_v46, 2 }
 0x3b9   :  { %4907 = vpow2.f32 %v1957_v16  ;;  %2769 = vmatmul.bf16.gmra.mxu3 %v4447_v53  ;;  %v6618_v53 = vld [vmem:[#allocation3 + $0x50] sm:$0xf] }
 0x3ba   :  { %4909 = vpow2.f32 %v1701_v5  ;;  %v1578_v31 = vadd.f32 %v1577_v33, %v1576_v46  ;;  %v6620_v46 = vld [vmem:[#allocation3 + $0x54] sm:$0xf0] }
 0x3bb   :  { %4911 = vpow2.f32 %v1829_v43 }
 0x3bc   :  { %v1579_v45 = vrot.slane %v1578_v31, 1 }
 0x3be   :  { %v1580_v44 = vadd.f32 %v1579_v45, %v1578_v31 }
 0x3bf   :  { %v4908_v61 = vpop.eup %4907 }
 0x3c0   :  { %v4910_v32 = vpop.eup %4909  ;;  %v1959_v60 = vrot.slane %v4908_v61, 4 }
 0x3c1   :  { %v4912_v35 = vpop.eup %4911  ;;  %v1703_v1 = vrot.slane %v4910_v32, 4 }
 0x3c2   :  { %v1831_v40 = vrot.slane %v4912_v35, 4  ;;  %v1960_v0 = vadd.f32 %v4908_v61, %v1959_v60 }
 0x3c3   :  { %v1704_v59 = vadd.f32 %v4910_v32, %v1703_v1 }
 0x3c4   :  { %v1832_v15 = vadd.f32 %v4912_v35, %v1831_v40  ;;  %v1961_v3 = vrot.slane %v1960_v0, 2 }
 0x3c5   :  { %v1705_v18 = vrot.slane %v1704_v59, 2 }
 0x3c6   :  { %v1833_v49 = vrot.slane %v1832_v15, 2  ;;  %v1962_v10 = vadd.f32 %v1961_v3, %v1960_v0  ;;  %v4463_v0 = vor.u32 %v4799_v48, %v4462_v62 }
 0x3c7   :  { %v1706_v56 = vadd.f32 %v1705_v18, %v1704_v59  ;;  %v6622_v59 = vld [vmem:[#allocation3 + $0x60] sm:$0xf] }
 0x3c8   :  { %v1834_v21 = vadd.f32 %v1833_v49, %v1832_v15  ;;  %v1963_v54 = vrot.slane %v1962_v10, 1  ;;  %8404 = vst [vmem:[#allocation70_spill] sm:$0xff] %v6622_v59  ;;  %v6624_v15 = vld [vmem:[#allocation3 + $0x64] sm:$0xf0] }
 0x3c9   :  { %v1707_v6 = vrot.slane %v1706_v56, 1  ;;  %2774 = vmatmul.bf16.gmra.mxu3 %v4455_v4  ;;  %8405 = vst [vmem:[#allocation23_spill] sm:$0xff] %v6624_v15  ;;  %v8419_v59 = vld [vmem:[#allocation20_spill] sm:$0xff] }
 0x3ca   :  { %v1835_v41 = vrot.slane %v1834_v21, 1  ;;  %v1964_v36 = vadd.f32 %v1963_v54, %v1962_v10  ;;  %v8417_v10 = vld [vmem:[#allocation24_spill] sm:$0xff] }
 0x3cb   :  { %v1708_v5 = vadd.f32 %v1707_v6, %v1706_v56 }
 0x3cc   :  { %v1836_v43 = vadd.f32 %v1835_v41, %v1834_v21  ;;  %4913 = vrcp.f32 %v1964_v36 }
 0x3cd   :  { %4915 = vrcp.f32 %v1580_v44 }
 0x3ce   :  { %4917 = vrcp.f32 %v1708_v5 }
 0x3cf   :  { %4919 = vrcp.f32 %v1836_v43 }
 0x3d2   :  { %v4914_v16 = vpop.eup %4913 }
 0x3d3   :  { %v4916_v60 = vpop.eup %4915  ;;  %v1966_v40 = vmul.f32 %v4914_v16, %v4908_v61 }
 0x3d4   :  { %v4918_v12 = vpop.eup %4917  ;;  %v6626_v3 = vmul.f32 %v4916_v60, %v4906_v23 }
 0x3d5   :  { %v4920_v1 = vpop.eup %4919  ;;  %v6628_v33 = vmul.f32 %v4918_v12, %v4910_v32  ;;  %v6636_v61 = vperm.slane %v1966_v40, 0  ;;  %v6638_v31 = vperm.slane %v1966_v40, 1  ;;  %v6640_v56 = vperm.slane %v1966_v40, 2 }
 0x3d6   :  { %8406 = vst [vmem:[#allocation18_spill] sm:$0xff] %v6626_v3  ;;  %v6630_v18 = vmul.f32 %v4920_v1, %v4912_v35  ;;  %v6642_v63 = vperm.slane %v1966_v40, 3  ;;  %v6644_v23 = vperm.slane %v1966_v40, 4  ;;  %v6646_v32 = vperm.slane %v1966_v40, 5 }
 0x3d7   :  { %8407 = vst [vmem:[#allocation15_spill] sm:$0xff] %v6628_v33  ;;  %v6648_v35 = vperm.slane %v1966_v40, 6  ;;  %v6650_v57 = vperm.slane %v1966_v40, 7  ;;  %v2474_v21 = vmul.f32 %v6636_v61, %v8298_v11  ;;  %v2475_v54 = vmul.f32 %v6636_v61, %v8395_v30 }
 0x3d8   :  { %8408 = vst [vmem:[#allocation43_spill] sm:$0xff] %v6636_v61  ;;  %v2483_v45 = vmul.f32 %v6638_v31, %v8351_v42  ;;  %v2484_v4 = vmul.f32 %v6638_v31, %v8396_v51  ;;  %v2492_v6 = vmul.f32 %v6640_v56, %v8353_v34  ;;  %v2493_v41 = vmul.f32 %v6640_v56, %v8397_v39 }
 0x3d9   :  { %2779 = vmatmul.bf16.gmra.mxu3 %v4463_v0  ;;  %8409 = vst [vmem:[#allocation46_spill] sm:$0xff] %v6638_v31  ;;  %v2501_v36 = vmul.f32 %v6642_v63, %v8354_v27  ;;  %v2502_v44 = vmul.f32 %v6642_v63, %v8341_v7  ;;  %v2510_v16 = vmul.f32 %v6644_v23, %v8357_v8 }
 0x3da   :  { %8410 = vst [vmem:[#allocation66_spill] sm:$0xff] %v6640_v56  ;;  %v2487_v5 = vadd.f32 %v2483_v45, %v2474_v21  ;;  %v2488_v43 = vadd.f32 %v2484_v4, %v2475_v54  ;;  %v2511_v62 = vmul.f32 %v6644_v23, %v8342_v25  ;;  %v2519_v48 = vmul.f32 %v6646_v32, %v8359_v47  ;;  %v8416_v45 = vld [vmem:[#allocation25_spill] sm:$0xff] }
 0x3db   :  { %8411 = vst [vmem:[#allocation14_spill] sm:$0xff] %v6642_v63  ;;  %v2520_v60 = vmul.f32 %v6646_v32, %v8343_v37  ;;  %v2528_v12 = vmul.f32 %v6648_v35, %v8344_v28  ;;  %v2529_v1 = vmul.f32 %v6648_v35, %v8345_v22  ;;  %v2537_v21 = vmul.f32 %v6650_v57, %v8346_v26 }
 0x3dc   :  { %8412 = vst [vmem:[#allocation47_spill] sm:$0xff] %v6644_v23  ;;  %v2496_v40 = vadd.f32 %v2492_v6, %v2487_v5  ;;  %v2497_v0 = vadd.f32 %v2493_v41, %v2488_v43  ;;  %v2538_v54 = vmul.f32 %v6650_v57, %v8269_v50  ;;  %v2472_v4 = vmul.f32 %v6636_v61, %v8416_v45 }
 0x3dd   :  { %8413 = vst [vmem:[#allocation63_spill] sm:$0xff] %v6646_v32  ;;  %v2473_v49 = vmul.f32 %v6636_v61, %v8417_v10  ;;  %v2481_v3 = vmul.f32 %v6638_v31, %v8418_v14  ;;  %v2482_v15 = vmul.f32 %v6638_v31, %v8419_v59  ;;  %v2490_v5 = vmul.f32 %v6640_v56, %v8384_v24 }
 0x3de   :  { %8414 = vst [vmem:[#allocation76_spill] sm:$0xff] %v6648_v35  ;;  %v2505_v6 = vadd.f32 %v2501_v36, %v2496_v40  ;;  %v2506_v41 = vadd.f32 %v2502_v44, %v2497_v0  ;;  %v2491_v43 = vmul.f32 %v6640_v56, %v5369_v9  ;;  %v2499_v26 = vmul.f32 %v6642_v63, %v5359_v2 }
 0x3df   :  { %8415 = vst [vmem:[#allocation77_spill] sm:$0xff] %v6650_v57  ;;  %v2485_v33 = vadd.f32 %v2481_v3, %v2472_v4  ;;  %v2486_v50 = vadd.f32 %v2482_v15, %v2473_v49  ;;  %v2500_v61 = vmul.f32 %v6642_v63, %v8262_v38  ;;  %v2508_v36 = vmul.f32 %v6644_v23, %v5495_v52 }
 0x3e0   :  { %v2514_v14 = vadd.f32 %v2510_v16, %v2505_v6  ;;  %v2515_v10 = vadd.f32 %v2511_v62, %v2506_v41  ;;  %v2509_v44 = vmul.f32 %v6644_v23, %v8263_v55  ;;  %v2517_v3 = vmul.f32 %v6646_v32, %v5471_v58 }
 0x3e1   :  { %v2494_v40 = vadd.f32 %v2490_v5, %v2485_v33  ;;  %v2495_v0 = vadd.f32 %v2491_v43, %v2486_v50  ;;  %v2518_v15 = vmul.f32 %v6646_v32, %v8264_v13  ;;  %v2526_v16 = vmul.f32 %v6648_v35, %v5455_v19 }
 0x3e2   :  { %v2523_v49 = vadd.f32 %v2519_v48, %v2514_v14  ;;  %v2524_v4 = vadd.f32 %v2520_v60, %v2515_v10  ;;  %v2527_v62 = vmul.f32 %v6648_v35, %v8265_v17  ;;  %v2535_v33 = vmul.f32 %v6650_v57, %v8347_v29 }
 0x3e3   :  { %v2503_v6 = vadd.f32 %v2499_v26, %v2494_v40  ;;  %v2504_v41 = vadd.f32 %v2500_v61, %v2495_v0  ;;  %v2536_v50 = vmul.f32 %v6650_v57, %v8331_v20  ;;  %v6717_v32 = vperm.slane %v6630_v18, 0 }
 0x3e4   :  { %v2532_v5 = vadd.f32 %v2528_v12, %v2523_v49  ;;  %v2533_v43 = vadd.f32 %v2529_v1, %v2524_v4  ;;  %v6720_v14 = vperm.slane %v6630_v18, 1  ;;  %v6723_v60 = vperm.slane %v6630_v18, 2 }
 0x3e5   :  { %8420 = vst [vmem:[#allocation25_spill] sm:$0xff] %v6717_v32  ;;  %v2512_v10 = vadd.f32 %v2508_v36, %v2503_v6  ;;  %v2513_v48 = vadd.f32 %v2509_v44, %v2504_v41  ;;  %v6726_v26 = vperm.slane %v6630_v18, 3  ;;  %v8424_v61 = vor.u32 %v6620_v46, %v6618_v53 }
 0x3e6   :  { %8421 = vst [vmem:[#allocation20_spill] sm:$0xff] %v6720_v14  ;;  %v2541_v12 = vadd.f32 %v2537_v21, %v2532_v5  ;;  %v2542_v1 = vadd.f32 %v2538_v54, %v2533_v43  ;;  %v2402_v40 = vmul.f32 %v6717_v32, %v8298_v11  ;;  %v2403_v0 = vmul.f32 %v6717_v32, %v8395_v30 }
 0x3e7   :  { %8422 = vst [vmem:[#allocation78_spill] sm:$0xff] %v6723_v60  ;;  %v2521_v36 = vadd.f32 %v2517_v3, %v2512_v10  ;;  %v2522_v44 = vadd.f32 %v2518_v15, %v2513_v48  ;;  %v2411_v49 = vmul.f32 %v6720_v14, %v8351_v42  ;;  %v2412_v4 = vmul.f32 %v6720_v14, %v8396_v51 }
 0x3e8   :  { %8423 = vst [vmem:[#allocation79_spill] sm:$0xff] %v6726_v26  ;;  %v2590_v6 = vpack.c.bf16 %v2542_v1, %v2541_v12  ;;  %v2420_v53 = vmul.f32 %v6723_v60, %v8353_v34  ;;  %v2421_v46 = vmul.f32 %v6723_v60, %v8397_v39  ;;  %v2429_v21 = vmul.f32 %v6726_v26, %v8354_v27 }
 0x3e9   :  { %2784 = vmatmul.bf16.gmra.mxu3 %v8424_v61  ;;  %v2530_v54 = vadd.f32 %v2526_v16, %v2521_v36  ;;  %v2531_v41 = vadd.f32 %v2527_v62, %v2522_v44  ;;  %v2415_v3 = vadd.f32 %v2411_v49, %v2402_v40  ;;  %v2416_v15 = vadd.f32 %v2412_v4, %v2403_v0 }
 0x3ea   :  { %2840 = vmatpush.bf16.msrb.mxu0 %v2590_v6  ;;  %4864 = vmatpush.bf16.msrb.mxu3 %v2590_v6  ;;  %v2430_v5 = vmul.f32 %v6726_v26, %v8341_v7  ;;  %v6748_v43 = vperm.slane %v6630_v18, 4  ;;  %v6751_v10 = vperm.slane %v6630_v18, 5  ;;  %v6754_v48 = vperm.slane %v6630_v18, 6 }
 0x3eb   :  { %v2539_v61 = vadd.f32 %v2535_v33, %v2530_v54  ;;  %v2540_v12 = vadd.f32 %v2536_v50, %v2531_v41  ;;  %v2424_v16 = vadd.f32 %v2420_v53, %v2415_v3  ;;  %v2425_v62 = vadd.f32 %v2421_v46, %v2416_v15  ;;  %v8429_v46 = vld [vmem:[#allocation24_spill] sm:$0xff]  ;;  %v8430_v3 = vld [vmem:[#allocation21_spill] sm:$0xff] }
 0x3ec   :  { %8425 = vst [vmem:[#allocation80_spill] sm:$0xff] %v6748_v43  ;;  %v2438_v1 = vmul.f32 %v6748_v43, %v8357_v8  ;;  %v2439_v40 = vmul.f32 %v6748_v43, %v8342_v25  ;;  %v2447_v0 = vmul.f32 %v6751_v10, %v8359_v47  ;;  %v2448_v36 = vmul.f32 %v6751_v10, %v8343_v37 }
 0x3ed   :  { %8426 = vst [vmem:[#allocation81_spill] sm:$0xff] %v6751_v10  ;;  %v2589_v44 = vpack.c.bf16 %v2540_v12, %v2539_v61  ;;  %v2433_v49 = vadd.f32 %v2429_v21, %v2424_v16  ;;  %v2434_v4 = vadd.f32 %v2430_v5, %v2425_v62  ;;  %v2456_v33 = vmul.f32 %v6754_v48, %v8344_v28  ;;  %v8431_v5 = vld [vmem:[#allocation26_spill] sm:$0xff]  ;;  %v8432_v12 = vld [vmem:[#allocation27_spill] sm:$0xff] }
 0x3ee   :  { %8427 = vst [vmem:[#allocation82_spill] sm:$0xff] %v6754_v48  ;;  %v2457_v50 = vmul.f32 %v6754_v48, %v8345_v22  ;;  %v6769_v6 = vperm.slane %v6630_v18, 7  ;;  %v2400_v53 = vmul.f32 %v6717_v32, %v8416_v45  ;;  %v2401_v54 = vmul.f32 %v6717_v32, %v8429_v46  ;;  %v8433_v62 = vld [vmem:[#allocation15_spill] sm:$0xff] }
 0x3ef   :  { %2841 = vmatpush.bf16.msrb.mxu0 %v2589_v44  ;;  %4865 = vmatpush.bf16.msrb.mxu3 %v2589_v44  ;;  %v2442_v41 = vadd.f32 %v2438_v1, %v2433_v49  ;;  %v2443_v21 = vadd.f32 %v2439_v40, %v2434_v4  ;;  %v2409_v15 = vmul.f32 %v6720_v14, %v8430_v3  ;;  %v6784_v35 = vperm.slane %v8433_v62, 0 }
 0x3f0   :  { %8428 = vst [vmem:[#allocation83_spill] sm:$0xff] %v6769_v6  ;;  %v2465_v61 = vmul.f32 %v6769_v6, %v8431_v5  ;;  %v2466_v18 = vmul.f32 %v6769_v6, %v8432_v12  ;;  %v2410_v16 = vmul.f32 %v6720_v14, %v8419_v59  ;;  %v2418_v1 = vmul.f32 %v6723_v60, %v8384_v24 }
 0x3f1   :  { %8434 = vst [vmem:[#allocation24_spill] sm:$0xff] %v6784_v35  ;;  %v2451_v57 = vadd.f32 %v2447_v0, %v2442_v41  ;;  %v2452_v23 = vadd.f32 %v2448_v36, %v2443_v21  ;;  %v2413_v44 = vadd.f32 %v2409_v15, %v2400_v53  ;;  %v2419_v49 = vmul.f32 %v6723_v60, %v5369_v9 }
 0x3f2   :  { %v2414_v40 = vadd.f32 %v2410_v16, %v2401_v54  ;;  %v2427_v4 = vmul.f32 %v6726_v26, %v5359_v2  ;;  %v2428_v63 = vmul.f32 %v6726_v26, %v8262_v38  ;;  %v2436_v0 = vmul.f32 %v6748_v43, %v5495_v52 }
 0x3f3   :  { %v2460_v56 = vadd.f32 %v2456_v33, %v2451_v57  ;;  %v2461_v14 = vadd.f32 %v2457_v50, %v2452_v23  ;;  %v2422_v31 = vadd.f32 %v2418_v1, %v2413_v44  ;;  %v2437_v53 = vmul.f32 %v6748_v43, %v8263_v55  ;;  %v8435_v57 = vld [vmem:[#allocation23_spill] sm:$0xff]  ;;  %v8436_v33 = vld [vmem:[#allocation70_spill] sm:$0xff] }
 0x3f4   :  { %v2423_v36 = vadd.f32 %v2419_v49, %v2414_v40  ;;  %v2445_v54 = vmul.f32 %v6751_v10, %v5471_v58  ;;  %v2446_v41 = vmul.f32 %v6751_v10, %v8264_v13  ;;  %v2454_v23 = vmul.f32 %v6754_v48, %v5455_v19 }
 0x3f5   :  { %v2469_v21 = vadd.f32 %v2465_v61, %v2460_v56  ;;  %v2470_v15 = vadd.f32 %v2466_v18, %v2461_v14  ;;  %v2431_v16 = vadd.f32 %v2427_v4, %v2422_v31  ;;  %v8437_v50 = vor.u32 %v8435_v57, %v8436_v33  ;;  %v6813_v56 = vld [vmem:[#allocation3 + $0x70] sm:$0xf]  ;;  %v6815_v31 = vld [vmem:[#allocation3 + $0x74] sm:$0xf0] }
 0x3f6   :  { %v2432_v44 = vadd.f32 %v2428_v63, %v2423_v36  ;;  %v2455_v1 = vmul.f32 %v6754_v48, %v8265_v17  ;;  %v2463_v40 = vmul.f32 %v6769_v6, %v8347_v29  ;;  %v2464_v49 = vmul.f32 %v6769_v6, %v8331_v20 }
 0x3f7   :  { %v2588_v14 = vpack.c.bf16 %v2470_v15, %v2469_v21  ;;  %v2440_v61 = vadd.f32 %v2436_v0, %v2431_v16  ;;  %v2330_v18 = vmul.f32 %v6784_v35, %v8298_v11  ;;  %v2331_v63 = vmul.f32 %v6784_v35, %v8395_v30 }
 0x3f8   :  { %v2441_v4 = vadd.f32 %v2437_v53, %v2432_v44  ;;  %v6822_v36 = vperm.slane %v8433_v62, 1  ;;  %v6825_v57 = vperm.slane %v8433_v62, 2  ;;  %v6828_v33 = vperm.slane %v8433_v62, 3 }
 0x3f9   :  { %2789 = vmatmul.bf16.gmra.mxu3 %v8437_v50  ;;  %2842 = vmatpush.bf16.msrb.mxu0 %v2588_v14  ;;  %v2449_v21 = vadd.f32 %v2445_v54, %v2440_v61  ;;  %v4487_v0 = vor.u32 %v6815_v31, %v6813_v56  ;;  %v6833_v15 = vperm.slane %v8433_v62, 4  ;;  %v6836_v53 = vperm.slane %v8433_v62, 5 }
 0x3fa   :  { %8438 = vst [vmem:[#allocation21_spill] sm:$0xff] %v6822_v36  ;;  %4866 = vmatpush.bf16.msrb.mxu3 %v2588_v14  ;;  %v2450_v16 = vadd.f32 %v2446_v41, %v2441_v4  ;;  %v2339_v50 = vmul.f32 %v6822_v36, %v8351_v42  ;;  %v2340_v44 = vmul.f32 %v6822_v36, %v8396_v51  ;;  %v6843_v6 = vperm.slane %v8433_v62, 6 }
 0x3fb   :  { %8439 = vst [vmem:[#allocation15_spill] sm:$0xff] %v6825_v57  ;;  %v2458_v54 = vadd.f32 %v2454_v23, %v2449_v21  ;;  %v2348_v56 = vmul.f32 %v6825_v57, %v8353_v34  ;;  %v2349_v31 = vmul.f32 %v6825_v57, %v8397_v39  ;;  %v2357_v14 = vmul.f32 %v6828_v33, %v8354_v27 }
 0x3fc   :  { %8440 = vst [vmem:[#allocation23_spill] sm:$0xff] %v6828_v33  ;;  %v2459_v41 = vadd.f32 %v2455_v1, %v2450_v16  ;;  %v2343_v61 = vadd.f32 %v2339_v50, %v2330_v18  ;;  %v2344_v4 = vadd.f32 %v2340_v44, %v2331_v63  ;;  %v2358_v48 = vmul.f32 %v6828_v33, %v8341_v7 }
 0x3fd   :  { %8441 = vst [vmem:[#allocation70_spill] sm:$0xff] %v6833_v15  ;;  %v2467_v10 = vadd.f32 %v2463_v40, %v2458_v54  ;;  %v2366_v43 = vmul.f32 %v6833_v15, %v8357_v8  ;;  %v2367_v23 = vmul.f32 %v6833_v15, %v8342_v25  ;;  %v2375_v21 = vmul.f32 %v6836_v53, %v8359_v47 }
 0x3fe   :  { %8442 = vst [vmem:[#allocation84_spill] sm:$0xff] %v6836_v53  ;;  %v2468_v26 = vadd.f32 %v2464_v49, %v2459_v41  ;;  %v2352_v60 = vadd.f32 %v2348_v56, %v2343_v61  ;;  %v2353_v32 = vadd.f32 %v2349_v31, %v2344_v4  ;;  %v2376_v1 = vmul.f32 %v6836_v53, %v8343_v37  ;;  %v8445_v61 = vld [vmem:[#allocation18_spill] sm:$0xff] }
 0x3ff   :  { %8443 = vst [vmem:[#allocation85_spill] sm:$0xff] %v6843_v6  ;;  %v2384_v18 = vmul.f32 %v6843_v6, %v8344_v28  ;;  %v6864_v40 = vperm.slane %v8433_v62, 7  ;;  %v2328_v63 = vmul.f32 %v6784_v35, %v8416_v45  ;;  %v2329_v16 = vmul.f32 %v6784_v35, %v8429_v46 }
 0x400   :  { %v2587_v50 = vpack.c.bf16 %v2468_v26, %v2467_v10  ;;  %v2361_v44 = vadd.f32 %v2357_v14, %v2352_v60  ;;  %v2362_v49 = vadd.f32 %v2358_v48, %v2353_v32  ;;  %v2337_v54 = vmul.f32 %v6822_v36, %v8430_v3 }
 0x401   :  { %8444 = vst [vmem:[#allocation86_spill] sm:$0xff] %v6864_v40  ;;  %v2385_v56 = vmul.f32 %v6843_v6, %v8345_v22  ;;  %v2393_v31 = vmul.f32 %v6864_v40, %v8431_v5  ;;  %v2338_v62 = vmul.f32 %v6822_v36, %v8419_v59  ;;  %v2346_v41 = vmul.f32 %v6825_v57, %v8384_v24 }
 0x402   :  { %2843 = vmatpush.bf16.msrb.mxu0 %v2587_v50  ;;  %4867 = vmatpush.bf16.msrb.mxu3 %v2587_v50  ;;  %v2370_v26 = vadd.f32 %v2366_v43, %v2361_v44  ;;  %v2371_v60 = vadd.f32 %v2367_v23, %v2362_v49  ;;  %v2341_v32 = vadd.f32 %v2337_v54, %v2328_v63  ;;  %v6885_v4 = vperm.slane %v8445_v61, 0 }
 0x403   :  { %v2394_v10 = vmul.f32 %v6864_v40, %v8432_v12  ;;  %v2342_v48 = vadd.f32 %v2338_v62, %v2329_v16  ;;  %v2347_v14 = vmul.f32 %v6825_v57, %v5369_v9  ;;  %v2355_v24 = vmul.f32 %v6828_v33, %v5359_v2  ;;  %v4536_v57 = vld [vmem:[#allocation3 + $0xd8] sm:$0xf0] }
 0x404   :  { %8446 = vst [vmem:[#allocation18_spill] sm:$0xff] %v6885_v4  ;;  %v2379_v35 = vadd.f32 %v2375_v21, %v2370_v26  ;;  %v2380_v36 = vadd.f32 %v2376_v1, %v2371_v60  ;;  %v2350_v5 = vadd.f32 %v2346_v41, %v2341_v32  ;;  %v2356_v43 = vmul.f32 %v6828_v33, %v8262_v38 }
 0x405   :  { %v2351_v50 = vadd.f32 %v2347_v14, %v2342_v48  ;;  %v2364_v23 = vmul.f32 %v6833_v15, %v5495_v52  ;;  %v2365_v63 = vmul.f32 %v6833_v15, %v8263_v55  ;;  %v2373_v21 = vmul.f32 %v6836_v53, %v5471_v58 }
 0x406   :  { %v2388_v16 = vadd.f32 %v2384_v18, %v2379_v35  ;;  %v2389_v44 = vadd.f32 %v2385_v56, %v2380_v36  ;;  %v2359_v49 = vadd.f32 %v2355_v24, %v2350_v5  ;;  %v2374_v54 = vmul.f32 %v6836_v53, %v8264_v13 }
 0x407   :  { %v2360_v1 = vadd.f32 %v2356_v43, %v2351_v50  ;;  %v2382_v62 = vmul.f32 %v6843_v6, %v5455_v19  ;;  %v2383_v41 = vmul.f32 %v6843_v6, %v8265_v17  ;;  %v2258_v35 = vmul.f32 %v6885_v4, %v8298_v11 }
 0x408   :  { %v2397_v26 = vadd.f32 %v2393_v31, %v2388_v16  ;;  %v2398_v60 = vadd.f32 %v2394_v10, %v2389_v44  ;;  %v2368_v32 = vadd.f32 %v2364_v23, %v2359_v49  ;;  %v2259_v5 = vmul.f32 %v6885_v4, %v8395_v30 }
 0x409   :  { %2794 = vmatmul.bf16.gmra.mxu3 %v4487_v0  ;;  %v2369_v24 = vadd.f32 %v2365_v63, %v2360_v1  ;;  %v6908_v36 = vperm.slane %v8445_v61, 1  ;;  %v6911_v0 = vperm.slane %v8445_v61, 2  ;;  %v2391_v31 = vmul.f32 %v6864_v40, %v8347_v29 }
 0x40a   :  { %v2586_v18 = vpack.c.bf16 %v2398_v60, %v2397_v26  ;;  %v2377_v56 = vadd.f32 %v2373_v21, %v2368_v32  ;;  %v6916_v10 = vperm.slane %v8445_v61, 3  ;;  %v6923_v43 = vperm.slane %v8445_v61, 4 }
 0x40b   :  { %8447 = vst [vmem:[#allocation87_spill] sm:$0xff] %v6908_v36  ;;  %v2378_v48 = vadd.f32 %v2374_v54, %v2369_v24  ;;  %v2267_v14 = vmul.f32 %v6908_v36, %v8351_v42  ;;  %v2268_v50 = vmul.f32 %v6908_v36, %v8396_v51  ;;  %v2392_v63 = vmul.f32 %v6864_v40, %v8331_v20 }
 0x40c   :  { %8448 = vst [vmem:[#allocation88_spill] sm:$0xff] %v6911_v0  ;;  %2844 = vmatpush.bf16.msrb.mxu0 %v2586_v18  ;;  %4868 = vmatpush.bf16.msrb.mxu3 %v2586_v18  ;;  %v2386_v23 = vadd.f32 %v2382_v62, %v2377_v56  ;;  %v2276_v16 = vmul.f32 %v6911_v0, %v8353_v34  ;;  %v6936_v62 = vperm.slane %v8445_v61, 5 }
 0x40d   :  { %8449 = vst [vmem:[#allocation89_spill] sm:$0xff] %v6916_v10  ;;  %v2387_v44 = vadd.f32 %v2383_v41, %v2378_v48  ;;  %v2271_v49 = vadd.f32 %v2267_v14, %v2258_v35  ;;  %v2272_v21 = vadd.f32 %v2268_v50, %v2259_v5  ;;  %v2277_v1 = vmul.f32 %v6911_v0, %v8397_v39 }
 0x40e   :  { %8450 = vst [vmem:[#allocation90_spill] sm:$0xff] %v6923_v43  ;;  %v2395_v54 = vadd.f32 %v2391_v31, %v2386_v23  ;;  %v2285_v26 = vmul.f32 %v6916_v10, %v8354_v27  ;;  %v2286_v60 = vmul.f32 %v6916_v10, %v8341_v7  ;;  %v2294_v41 = vmul.f32 %v6923_v43, %v8357_v8 }
 0x40f   :  { %8451 = vst [vmem:[#allocation91_spill] sm:$0xff] %v6936_v62  ;;  %v2396_v32 = vadd.f32 %v2392_v63, %v2387_v44  ;;  %v2280_v24 = vadd.f32 %v2276_v16, %v2271_v49  ;;  %v2281_v18 = vadd.f32 %v2277_v1, %v2272_v21  ;;  %v2295_v35 = vmul.f32 %v6923_v43, %v8342_v25 }
 0x410   :  { %v6943_v5 = vperm.slane %v8445_v61, 6  ;;  %v2256_v56 = vmul.f32 %v6885_v4, %v8416_v45  ;;  %v2257_v31 = vmul.f32 %v6885_v4, %v8429_v46  ;;  %v2265_v23 = vmul.f32 %v6908_v36, %v8430_v3  ;;  %v4814_v4 = vld [vmem:[#allocation3 + $0xc4] sm:$0xf] }
 0x411   :  { %v2585_v48 = vpack.c.bf16 %v2396_v32, %v2395_v54  ;;  %v2289_v14 = vadd.f32 %v2285_v26, %v2280_v24  ;;  %v2290_v50 = vadd.f32 %v2286_v60, %v2281_v18  ;;  %v2303_v63 = vmul.f32 %v6936_v62, %v8359_v47  ;;  %v8454_v32 = vld [vmem:[#allocation17_spill] sm:$0xff] }
 0x412   :  { %8452 = vst [vmem:[#allocation92_spill] sm:$0xff] %v6943_v5  ;;  %v2304_v16 = vmul.f32 %v6936_v62, %v8343_v37  ;;  %v6956_v44 = vperm.slane %v8445_v61, 7  ;;  %v2266_v1 = vmul.f32 %v6908_v36, %v8419_v59  ;;  %v2312_v54 = vmul.f32 %v6943_v5, %v8344_v28 }
 0x413   :  { %2845 = vmatpush.bf16.msrb.mxu0 %v2585_v48  ;;  %4869 = vmatpush.bf16.msrb.mxu3 %v2585_v48  ;;  %v2298_v49 = vadd.f32 %v2294_v41, %v2289_v14  ;;  %v2299_v21 = vadd.f32 %v2295_v35, %v2290_v50  ;;  %v2313_v26 = vmul.f32 %v6943_v5, %v8345_v22  ;;  %v8455_v48 = vld [vmem:[#allocation26_spill] sm:$0xff] }
 0x414   :  { %8453 = vst [vmem:[#allocation93_spill] sm:$0xff] %v6956_v44  ;;  %v2269_v60 = vadd.f32 %v2265_v23, %v2256_v56  ;;  %v2274_v24 = vmul.f32 %v6911_v0, %v8454_v32  ;;  %v2270_v40 = vadd.f32 %v2266_v1, %v2257_v31  ;;  %v2275_v41 = vmul.f32 %v6911_v0, %v5369_v9 }
 0x415   :  { %v2307_v18 = vadd.f32 %v2303_v63, %v2298_v49  ;;  %v2308_v61 = vadd.f32 %v2304_v16, %v2299_v21  ;;  %v2321_v14 = vmul.f32 %v6956_v44, %v8455_v48  ;;  %v2322_v50 = vmul.f32 %v6956_v44, %v8432_v12  ;;  %v4494_v16 = vld [vmem:[#allocation3 + $0x80] sm:$0xf]  ;;  %v4807_v49 = vld [vmem:[#allocation3 + $0x84] sm:$0xf0] }
 0x416   :  { %v2278_v36 = vadd.f32 %v2274_v24, %v2269_v60  ;;  %v2283_v56 = vmul.f32 %v6916_v10, %v5359_v2  ;;  %v2279_v63 = vadd.f32 %v2275_v41, %v2270_v40  ;;  %v2284_v31 = vmul.f32 %v6916_v10, %v8262_v38 }
 0x417   :  { %v2316_v23 = vadd.f32 %v2312_v54, %v2307_v18  ;;  %v2317_v6 = vadd.f32 %v2313_v26, %v2308_v61  ;;  %v2292_v1 = vmul.f32 %v6923_v43, %v5495_v52  ;;  %v2293_v60 = vmul.f32 %v6923_v43, %v8263_v55 }
 0x418   :  { %v2287_v21 = vadd.f32 %v2283_v56, %v2278_v36  ;;  %v2288_v15 = vadd.f32 %v2284_v31, %v2279_v63  ;;  %v2301_v54 = vmul.f32 %v6936_v62, %v5471_v58  ;;  %v4495_v40 = vor.u32 %v4807_v49, %v4494_v16  ;;  %v4790_v31 = vld [vmem:[#allocation3 + $0x4] sm:$0xf]  ;;  %v4432_v16 = vld [vmem:[#allocation3 + $0x8] sm:$0xf0] }
 0x419   :  { %v2325_v0 = vadd.f32 %v2321_v14, %v2316_v23  ;;  %v2326_v53 = vadd.f32 %v2322_v50, %v2317_v6  ;;  %v2302_v61 = vmul.f32 %v6936_v62, %v8264_v13  ;;  %v2310_v41 = vmul.f32 %v6943_v5, %v5455_v19  ;;  %v4520_v19 = vld [vmem:[#allocation3 + $0xb8] sm:$0xf0]  ;;  %v4528_v13 = vld [vmem:[#allocation3 + $0xc8] sm:$0xf0] }
 0x41a   :  { %v2296_v24 = vadd.f32 %v2292_v1, %v2287_v21  ;;  %v2297_v18 = vadd.f32 %v2293_v60, %v2288_v15  ;;  %2799 = vmatmul.bf16.gmra.mxu3 %v4495_v40  ;;  %v2311_v14 = vmul.f32 %v6943_v5, %v8265_v17  ;;  %v2319_v56 = vmul.f32 %v6956_v44, %v8347_v29  ;;  %v4502_v1 = vld [vmem:[#allocation3 + $0x90] sm:$0xf]  ;;  %v4809_v60 = vld [vmem:[#allocation3 + $0x94] sm:$0xf0]  ;;  %v4792_v40 = vld [vmem:[#allocation3 + $0x14] sm:$0xf] }
 0x41b   :  { %v2584_v26 = vpack.c.bf16 %v2326_v53, %v2325_v0  ;;  %v2320_v15 = vmul.f32 %v6956_v44, %v8331_v20  ;;  %v4435_v21 = vor.u32 %v4790_v31, %v4432_v16  ;;  %v4812_v17 = vld [vmem:[#allocation3 + $0xb4] sm:$0xf]  ;;  %v4531_v58 = vor.u32 %v4814_v4, %v4528_v13 }
 0x41c   :  { %v6968_v35 = vpop.f32.mrf.mxu3  ;;  %v2305_v36 = vadd.f32 %v2301_v54, %v2296_v24  ;;  %v2306_v6 = vadd.f32 %v2302_v61, %v2297_v18  ;;  %v4503_v24 = vor.u32 %v4809_v60, %v4502_v1 }
 0x41d   :  { %2846 = vmatpush.bf16.msrb.mxu0 %v2584_v26  ;;  %4870 = vmatpush.bf16.msrb.mxu3 %v2584_v26  ;;  %v4440_v26 = vld [vmem:[#allocation3 + $0x18] sm:$0xf0] }
 0x41e   :  { %v2314_v50 = vadd.f32 %v2310_v41, %v2305_v36  ;;  %v2315_v53 = vadd.f32 %v2311_v14, %v2306_v6  ;;  %v4443_v61 = vor.u32 %v4792_v40, %v4440_v26  ;;  %v4510_v36 = vld [vmem:[#allocation3 + $0xa0] sm:$0xf]  ;;  %v4811_v41 = vld [vmem:[#allocation3 + $0xa4] sm:$0xf0] }
 0x41f   :  { %v4511_v6 = vor.u32 %v4811_v41, %v4510_v36  ;;  %v4815_v40 = vld [vmem:[#allocation3 + $0xc4] sm:$0xf0]  ;;  %v4798_v36 = vld [vmem:[#allocation3 + $0x44] sm:$0xf]  ;;  %v4464_v41 = vld [vmem:[#allocation3 + $0x48] sm:$0xf0] }
 0x420   :  { %v2323_v23 = vadd.f32 %v2319_v56, %v2314_v50  ;;  %v2324_v63 = vadd.f32 %v2320_v15, %v2315_v53  ;;  %v4794_v50 = vld [vmem:[#allocation3 + $0x24] sm:$0xf]  ;;  %v4448_v56 = vld [vmem:[#allocation3 + $0x28] sm:$0xf0] }
 0x421   :  { %v4451_v15 = vor.u32 %v4794_v50, %v4448_v56  ;;  %v4467_v50 = vor.u32 %v4798_v36, %v4464_v41  ;;  %v4534_v56 = vld [vmem:[#allocation3 + $0xd0] sm:$0xf]  ;;  %v4802_v36 = vld [vmem:[#allocation3 + $0x64] sm:$0xf]  ;;  %v4480_v41 = vld [vmem:[#allocation3 + $0x68] sm:$0xf0] }
 0x422   :  { %v2583_v49 = vpack.c.bf16 %v2324_v63, %v2323_v23  ;;  %v4518_v23 = vld [vmem:[#allocation3 + $0xb0] sm:$0xf]  ;;  %v4813_v63 = vld [vmem:[#allocation3 + $0xb4] sm:$0xf0] }
 0x423   :  { %v4519_v31 = vor.u32 %v4813_v63, %v4518_v23 }
 0x424   :  { %v6994_v0 = vpop.f32.mrf.mxu3  ;;  %2847 = vmatpush.bf16.msrb.mxu0 %v2583_v49  ;;  %4871 = vmatpush.bf16.msrb.mxu3 %v2583_v49  ;;  %v4796_v49 = vld [vmem:[#allocation3 + $0x34] sm:$0xf] }
 0x427   :  { %2848 = vmatmul.bf16.vlgmr.msrb.gmra.mxu0 %v4435_v21  ;;  %v4456_v21 = vld [vmem:[#allocation3 + $0x38] sm:$0xf0] }
 0x428   :  { %v4459_v60 = vor.u32 %v4796_v49, %v4456_v21  ;;  %v4472_v49 = vld [vmem:[#allocation3 + $0x58] sm:$0xf0] }
 0x42a   :  { %2804 = vmatmul.bf16.gmra.mxu3 %v4503_v24  ;;  %v4526_v24 = vld [vmem:[#allocation3 + $0xc0] sm:$0xf] }
 0x42b   :  { %v4527_v26 = vor.u32 %v4815_v40, %v4526_v24  ;;  %v4542_v24 = vld [vmem:[#allocation3 + $0xe0] sm:$0xf]  ;;  %v4819_v40 = vld [vmem:[#allocation3 + $0xe4] sm:$0xf0] }
 0x42c   :  { %v6996_v54 = vpop.f32.mrf.mxu3 }
 0x434   :  { %v6998_v18 = vpop.f32.mrf.mxu3 }
 0x437   :  { %2853 = vmatmul.bf16.gmra.mxu0 %v4443_v61 }
 0x43a   :  { %2809 = vmatmul.bf16.gmra.mxu3 %v4511_v6 }
 0x43c   :  { %v7000_v14 = vpop.f32.mrf.mxu3 }
 0x444   :  { %v7002_v53 = vpop.f32.mrf.mxu3 }
 0x447   :  { %2858 = vmatmul.bf16.gmra.mxu0 %v4451_v15  ;;  %v4817_v15 = vld [vmem:[#allocation3 + $0xd4] sm:$0xf0] }
 0x448   :  { %v4535_v23 = vor.u32 %v4817_v15, %v4534_v56  ;;  %v4550_v56 = vld [vmem:[#allocation3 + $0xf0] sm:$0xf]  ;;  %v4821_v15 = vld [vmem:[#allocation3 + $0xf4] sm:$0xf0] }
 0x44a   :  { %2814 = vmatmul.bf16.gmra.mxu3 %v4519_v31  ;;  %v4800_v31 = vld [vmem:[#allocation3 + $0x54] sm:$0xf] }
 0x44c   :  { %v7004_v16 = vpop.f32.mrf.mxu3 }
 0x454   :  { %v7006_v1 = vpop.f32.mrf.mxu3 }
 0x457   :  { %2863 = vmatmul.bf16.gmra.mxu0 %v4459_v60  ;;  %v4475_v60 = vor.u32 %v4800_v31, %v4472_v49  ;;  %v4804_v31 = vld [vmem:[#allocation3 + $0x74] sm:$0xf]  ;;  %v4488_v49 = vld [vmem:[#allocation3 + $0x78] sm:$0xf0] }
 0x458   :  { %v4491_v43 = vor.u32 %v4804_v31, %v4488_v49  ;;  %v4808_v31 = vld [vmem:[#allocation3 + $0x94] sm:$0xf]  ;;  %v4504_v49 = vld [vmem:[#allocation3 + $0x98] sm:$0xf0] }
 0x459   :  { %v4507_v20 = vor.u32 %v4808_v31, %v4504_v49  ;;  %v4523_v31 = vor.u32 %v4812_v17, %v4520_v19 }
 0x45a   :  { %2819 = vmatmul.bf16.gmra.mxu3 %v4527_v26  ;;  %v4543_v26 = vor.u32 %v4819_v40, %v4542_v24  ;;  %v4820_v24 = vld [vmem:[#allocation3 + $0xf4] sm:$0xf]  ;;  %v4552_v40 = vld [vmem:[#allocation3 + $0xf8] sm:$0xf0] }
 0x45c   :  { %v7008_v61 = vpop.f32.mrf.mxu3 }
 0x464   :  { %v7010_v6 = vpop.f32.mrf.mxu3 }
 0x467   :  { %2868 = vmatmul.bf16.gmra.mxu0 %v4467_v50  ;;  %v4483_v50 = vor.u32 %v4802_v36, %v4480_v41  ;;  %v4806_v36 = vld [vmem:[#allocation3 + $0x84] sm:$0xf]  ;;  %v4496_v41 = vld [vmem:[#allocation3 + $0x88] sm:$0xf0] }
 0x468   :  { %v4499_v33 = vor.u32 %v4806_v36, %v4496_v41 }
 0x46a   :  { %2824 = vmatmul.bf16.gmra.mxu3 %v4535_v23  ;;  %v4551_v23 = vor.u32 %v4821_v15, %v4550_v56 }
 0x46c   :  { %v7012_v63 = vpop.f32.mrf.mxu3 }
 0x474   :  { %v7014_v21 = vpop.f32.mrf.mxu3 }
 0x477   :  { %2873 = vmatmul.bf16.gmra.mxu0 %v4475_v60 }
 0x47a   :  { %2829 = vmatmul.bf16.gmra.mxu3 %v4543_v26  ;;  %v4555_v26 = vor.u32 %v4820_v24, %v4552_v40  ;;  %v4810_v40 = vld [vmem:[#allocation3 + $0xa4] sm:$0xf] }
 0x47c   :  { %v7016_v44 = vpop.f32.mrf.mxu3 }
 0x484   :  { %v7018_v5 = vpop.f32.mrf.mxu3 }
 0x487   :  { %2878 = vmatmul.bf16.gmra.mxu0 %v4483_v50 }
 0x48a   :  { %2834 = vmatmul.bf16.gmra.mxu3 %v4551_v23 }
 0x48c   :  { %v7020_v62 = vpop.f32.mrf.mxu3 }
 0x494   :  { %v7022_v60 = vpop.f32.mrf.mxu3 }
 0x497   :  { %2883 = vmatmul.bf16.gmra.mxu0 %v4491_v43 }
 0x49a   :  { %2923 = vmatmul.bf16.vlgmr.msrb.gmra.mxu3 %v4555_v26  ;;  %v4512_v26 = vld [vmem:[#allocation3 + $0xa8] sm:$0xf0] }
 0x49b   :  { %v4515_v36 = vor.u32 %v4810_v40, %v4512_v26 }
 0x49d   :  { %v7024_v10 = vpop.f32.mrf.mxu3 }
 0x4a4   :  { %v2849_v50 = vpop.f32.mrf.mxu0 }
 0x4a5   :  { %v7026_v56 = vpop.f32.mrf.mxu3 }
 0x4a7   :  { %2888 = vmatmul.bf16.gmra.mxu0 %v4499_v33 }
 0x4ac   :  { %v2851_v15 = vpop.f32.mrf.mxu0 }
 0x4ad   :  { %v7028_v23 = vpop.f32.mrf.mxu3  ;;  %v2852_v12 = vadd.f32 %v2851_v15, %v6994_v0 }
 0x4ae   :  { %8456 = vst [vmem:[#allocation17_spill] sm:$0xff] %v7028_v23 }
 0x4b4   :  { %v2854_v29 = vpop.f32.mrf.mxu0 }
 0x4b5   :  { %v7030_v22 = vpop.f32.mrf.mxu3 }
 0x4b6   :  { %8457 = vst [vmem:[#allocation94_spill] sm:$0xff] %v7030_v22 }
 0x4b7   :  { %2893 = vmatmul.bf16.gmra.mxu0 %v4507_v20 }
 0x4bc   :  { %v2856_v43 = vpop.f32.mrf.mxu0 }
 0x4bd   :  { %v7032_v24 = vpop.f32.mrf.mxu3 }
 0x4be   :  { %8458 = vst [vmem:[#allocation95_spill] sm:$0xff] %v7032_v24 }
 0x4c4   :  { %v2859_v41 = vpop.f32.mrf.mxu0 }
 0x4c5   :  { %v7034_v28 = vpop.f32.mrf.mxu3 }
 0x4c6   :  { %8459 = vst [vmem:[#allocation96_spill] sm:$0xff] %v7034_v28  ;;  %v4816_v28 = vld [vmem:[#allocation3 + $0xd4] sm:$0xf] }
 0x4c7   :  { %2898 = vmatmul.bf16.gmra.mxu0 %v4515_v36  ;;  %v4539_v24 = vor.u32 %v4816_v28, %v4536_v57 }
 0x4cc   :  { %v2861_v33 = vpop.f32.mrf.mxu0 }
 0x4cd   :  { %v7036_v37 = vpop.f32.mrf.mxu3 }
 0x4ce   :  { %8460 = vst [vmem:[#allocation97_spill] sm:$0xff] %v7036_v37 }
 0x4d4   :  { %v2864_v49 = vpop.f32.mrf.mxu0 }
 0x4d5   :  { %v7038_v47 = vpop.f32.mrf.mxu3 }
 0x4d6   :  { %8461 = vst [vmem:[#allocation98_spill] sm:$0xff] %v7038_v47  ;;  %v4544_v47 = vld [vmem:[#allocation3 + $0xe8] sm:$0xf0] }
 0x4d7   :  { %2903 = vmatmul.bf16.gmra.mxu0 %v4523_v31  ;;  %v4818_v31 = vld [vmem:[#allocation3 + $0xe4] sm:$0xf] }
 0x4d8   :  { %v4547_v13 = vor.u32 %v4818_v31, %v4544_v47  ;;  %v2855_v47 = vadd.f32 %v2854_v29, %v6996_v54  ;;  %v2857_v31 = vadd.f32 %v2856_v43, %v6998_v18 }
 0x4da   :  { %v2932_v15 = vmax.f32 %v2857_v31, 0.0 }
 0x4dc   :  { %v2866_v20 = vpop.f32.mrf.mxu0 }
 0x4dd   :  { %v7040_v40 = vpop.f32.mrf.mxu3  ;;  %v2867_v52 = vadd.f32 %v2866_v20, %v7006_v1  ;;  %v8481_v20 = vld [vmem:[#allocation45_spill] sm:$0xff] }
 0x4de   :  { %8462 = vst [vmem:[#allocation99_spill] sm:$0xff] %v7040_v40 }
 0x4e4   :  { %v2869_v25 = vpop.f32.mrf.mxu0 }
 0x4e5   :  { %v7042_v36 = vpop.f32.mrf.mxu3  ;;  %v2870_v7 = vadd.f32 %v2869_v25, %v7008_v61 }
 0x4e6   :  { %8463 = vst [vmem:[#allocation100_spill] sm:$0xff] %v7042_v36 }
 0x4e7   :  { %2908 = vmatmul.bf16.gmra.mxu0 %v4531_v58 }
 0x4ec   :  { %v2871_v26 = vpop.f32.mrf.mxu0 }
 0x4ed   :  { %v7044_v19 = vpop.f32.mrf.mxu3 }
 0x4ee   :  { %8464 = vst [vmem:[#allocation101_spill] sm:$0xff] %v7044_v19  ;;  %v2850_v19 = vadd.f32 %v2849_v50, %v6968_v35  ;;  %v2872_v35 = vadd.f32 %v2871_v26, %v7010_v6  ;;  %v2931_v50 = vmax.f32 %v2855_v47, 0.0  ;;  %v8482_v26 = vld [vmem:[#allocation43_spill] sm:$0xff] }
 0x4f0   :  { %v2929_v54 = vmax.f32 %v2850_v19, 0.0  ;;  %v2938_v25 = vmax.f32 %v2872_v35, 0.0  ;;  %v8484_v19 = vld [vmem:[#allocation25_spill] sm:$0xff] }
 0x4f4   :  { %v2874_v37 = vpop.f32.mrf.mxu0 }
 0x4f5   :  { %v7046_v8 = vpop.f32.mrf.mxu3  ;;  %v2875_v0 = vadd.f32 %v2874_v37, %v7012_v63  ;;  %v7071_v37 = vadd.f32 %v2929_v54, %v8416_v45 }
 0x4f6   :  { %8465 = vst [vmem:[#allocation102_spill] sm:$0xff] %v7046_v8  ;;  %v2865_v8 = vadd.f32 %v2864_v49, %v7004_v16 }
 0x4f7   :  { %2913 = vmatmul.bf16.gmra.mxu0 %v4539_v24  ;;  %v2939_v61 = vmax.f32 %v2875_v0, 0.0  ;;  %8468 = vst [vmem:[#allocation105_spill] sm:$0xff] %v7071_v37  ;;  %v8488_v0 = vld [vmem:[#allocation24_spill] sm:$0xff] }
 0x4f8   :  { %v2935_v16 = vmax.f32 %v2865_v8, 0.0 }
 0x4fc   :  { %v2876_v17 = vpop.f32.mrf.mxu0 }
 0x4fd   :  { %v7048_v58 = vpop.f32.mrf.mxu3  ;;  %v2877_v29 = vadd.f32 %v2876_v17, %v7014_v21 }
 0x4fe   :  { %8466 = vst [vmem:[#allocation103_spill] sm:$0xff] %v7048_v58 }
 0x4ff   :  { %v2940_v6 = vmax.f32 %v2877_v29, 0.0  ;;  %v3313_v29 = vmul.f32 %v7071_v37, %v8488_v0 }
 0x504   :  { %v2879_v4 = vpop.f32.mrf.mxu0 }
 0x505   :  { %v7050_v36 = vpop.f32.mrf.mxu3  ;;  %v2880_v18 = vadd.f32 %v2879_v4, %v7016_v44  ;;  %v7078_v44 = vadd.f32 %v2931_v50, %v8298_v11 }
 0x506   :  { %8467 = vst [vmem:[#allocation104_spill] sm:$0xff] %v7050_v36  ;;  %v2862_v36 = vadd.f32 %v2861_v33, %v7002_v53  ;;  %v2937_v33 = vmax.f32 %v2870_v7, 0.0 }
 0x507   :  { %2918 = vmatmul.bf16.gmra.mxu0 %v4547_v13  ;;  %v2860_v13 = vadd.f32 %v2859_v41, %v7000_v14  ;;  %v2930_v14 = vmax.f32 %v2852_v12, 0.0  ;;  %v2936_v41 = vmax.f32 %v2867_v52, 0.0  ;;  %v2941_v63 = vmax.f32 %v2880_v18, 0.0  ;;  %8470 = vst [vmem:[#allocation107_spill] sm:$0xff] %v7078_v44 }
 0x508   :  { %v2934_v43 = vmax.f32 %v2862_v36, 0.0  ;;  %v7081_v52 = vadd.f32 %v2932_v15, %v8395_v30  ;;  %v7098_v11 = vadd.f32 %v2937_v33, %v8454_v32  ;;  %v7101_v30 = vadd.f32 %v2938_v25, %v5369_v9  ;;  %v8483_v36 = vld [vmem:[#allocation44_spill] sm:$0xff]  ;;  %v8490_v33 = vld [vmem:[#allocation13_spill] sm:$0xff] }
 0x509   :  { %v2933_v53 = vmax.f32 %v2860_v13, 0.0  ;;  %v7075_v12 = vadd.f32 %v2930_v14, %v8429_v46  ;;  %v3185_v32 = vmul.f32 %v7071_v37, %v8481_v20  ;;  %v3441_v9 = vmul.f32 %v7071_v37, %v8482_v26 }
 0x50a   :  { %8471 = vst [vmem:[#allocation108_spill] sm:$0xff] %v7081_v52  ;;  %v7089_v45 = vadd.f32 %v2934_v43, %v8419_v59  ;;  %v7110_v59 = vadd.f32 %v2941_v63, %v5359_v2  ;;  %v7158_v54 = vmul.f32 %v7078_v44, %v8482_v26  ;;  %v7166_v18 = vmul.f32 %v7078_v44, %v8484_v19  ;;  %v8493_v63 = vld [vmem:[#allocation55_spill] sm:$0xff] }
 0x50b   :  { %8469 = vst [vmem:[#allocation106_spill] sm:$0xff] %v7075_v12  ;;  %v7084_v7 = vadd.f32 %v2933_v53, %v8430_v3  ;;  %v7104_v3 = vadd.f32 %v2939_v61, %v8353_v34  ;;  %v3121_v34 = vmul.f32 %v7071_v37, %v8483_v36  ;;  %v7137_v47 = vmul.f32 %v7075_v12, %v8483_v36  ;;  %v8492_v61 = vld [vmem:[#allocation46_spill] sm:$0xff] }
 0x50c   :  { %v2881_v40 = vpop.f32.mrf.mxu0  ;;  %8473 = vst [vmem:[#allocation110_spill] sm:$0xff] %v7089_v45  ;;  %v7174_v50 = vmul.f32 %v7078_v44, %v8488_v0  ;;  %v7178_v15 = vmul.f32 %v7075_v12, %v8488_v0 }
 0x50d   :  { %v2835_v28 = vpop.f32.mrf.mxu3  ;;  %v2882_v1 = vadd.f32 %v2881_v40, %v7018_v5  ;;  %8472 = vst [vmem:[#allocation109_spill] sm:$0xff] %v7084_v7  ;;  %v7092_v5 = vadd.f32 %v2935_v16, %v8351_v42 }
 0x50e   :  { %8476 = vst [vmem:[#allocation113_spill] sm:$0xff] %v7098_v11 }
 0x50f   :  { %8474 = vst [vmem:[#allocation111_spill] sm:$0xff] %v7092_v5  ;;  %v2942_v46 = vmax.f32 %v2882_v1, 0.0 }
 0x510   :  { %8477 = vst [vmem:[#allocation114_spill] sm:$0xff] %v7101_v30 }
 0x511   :  { %8478 = vst [vmem:[#allocation115_spill] sm:$0xff] %v7104_v3  ;;  %v7122_v2 = vadd.f32 %v2942_v46, %v8262_v38  ;;  %v7141_v38 = vmul.f32 %v7075_v12, %v8484_v19  ;;  %v8494_v46 = vld [vmem:[#allocation20_spill] sm:$0xff] }
 0x512   :  { %8480 = vst [vmem:[#allocation117_spill] sm:$0xff] %v7110_v59  ;;  %v8507_v59 = vld [vmem:[#allocation17_spill] sm:$0xff] }
 0x513   :  { %8485 = vst [vmem:[#allocation45_spill] sm:$0xff] %v7122_v2 }
 0x514   :  { %v2884_v22 = vpop.f32.mrf.mxu0 }
 0x515   :  { %v2837_v24 = vpop.f32.mrf.mxu3  ;;  %v2885_v21 = vadd.f32 %v2884_v22, %v7020_v62  ;;  %v7095_v22 = vadd.f32 %v2936_v41, %v8396_v51  ;;  %v7107_v62 = vadd.f32 %v2940_v6, %v8397_v39  ;;  %v3377_v39 = vmul.f32 %v7071_v37, %v8484_v19  ;;  %v8489_v41 = vld [vmem:[#allocation48_spill] sm:$0xff] }
 0x516   :  { %v3193_v1 = vmul.f32 %v7084_v7, %v8489_v41  ;;  %v3449_v6 = vmul.f32 %v7084_v7, %v8492_v61 }
 0x517   :  { %8475 = vst [vmem:[#allocation112_spill] sm:$0xff] %v7095_v22  ;;  %v2943_v42 = vmax.f32 %v2885_v21, 0.0  ;;  %v3129_v21 = vmul.f32 %v7084_v7, %v8493_v63 }
 0x518   :  { %8479 = vst [vmem:[#allocation116_spill] sm:$0xff] %v7107_v62 }
 0x519   :  { %v7144_v31 = vadd.f32 %v2943_v42, %v8354_v27  ;;  %v7162_v27 = vmul.f32 %v7078_v44, %v8483_v36  ;;  %v3385_v42 = vmul.f32 %v7084_v7, %v8494_v46 }
 0x51b   :  { %8487 = vst [vmem:[#allocation43_spill] sm:$0xff] %v7144_v31  ;;  %v3389_v31 = vadd.f32 %v3385_v42, %v3377_v39  ;;  %v8511_v39 = vld [vmem:[#allocation78_spill] sm:$0xff]  ;;  %v8513_v42 = vld [vmem:[#allocation21_spill] sm:$0xff] }
 0x51c   :  { %v2886_v55 = vpop.f32.mrf.mxu0 }
 0x51d   :  { %v2924_v48 = vpop.f32.mrf.mxu3  ;;  %v2887_v51 = vadd.f32 %v2886_v55, %v7022_v60  ;;  %v7126_v55 = vmul.f32 %v7075_v12, %v8481_v20  ;;  %v7130_v60 = vmul.f32 %v7075_v12, %v8482_v26 }
 0x51e   :  { %v2925_v40 = vadd.f32 %v2924_v48, %v2835_v28  ;;  %v8486_v48 = vld [vmem:[#allocation42_spill] sm:$0xff] }
 0x51f   :  { %v3057_v17 = vmul.f32 %v7071_v37, %v8486_v48  ;;  %v2944_v13 = vmax.f32 %v2887_v51, 0.0  ;;  %v3058_v35 = vmul.f32 %v7075_v12, %v8486_v48  ;;  %v7170_v14 = vmul.f32 %v7078_v44, %v8486_v48  ;;  %v8495_v51 = vld [vmem:[#allocation26_spill] sm:$0xff]  ;;  %v8505_v12 = vld [vmem:[#allocation27_spill] sm:$0xff] }
 0x520   :  { %v3194_v37 = vmul.f32 %v7089_v45, %v8489_v41 }
 0x521   :  { %v7185_v25 = vadd.f32 %v2944_v13, %v8490_v33  ;;  %v7212_v13 = vmul.f32 %v7081_v52, %v8484_v19 }
 0x523   :  { %8491 = vst [vmem:[#allocation44_spill] sm:$0xff] %v7185_v25  ;;  %v3133_v25 = vadd.f32 %v3129_v21, %v3121_v34  ;;  %v3386_v34 = vmul.f32 %v7089_v45, %v8494_v46  ;;  %v8512_v21 = vld [vmem:[#allocation59_spill] sm:$0xff] }
 0x524   :  { %v2889_v57 = vpop.f32.mrf.mxu0  ;;  %8500 = vst [vmem:[#allocation48_spill] sm:$0xff] %v7212_v13  ;;  %v8517_v13 = vld [vmem:[#allocation94_spill] sm:$0xff] }
 0x525   :  { %v2926_v49 = vpop.f32.mrf.mxu3  ;;  %v2890_v4 = vadd.f32 %v2889_v57, %v7024_v10  ;;  %v2959_v10 = vmax.f32 %v2925_v40, 0.0  ;;  %v8498_v40 = vld [vmem:[#allocation58_spill] sm:$0xff] }
 0x526   :  { %v2927_v28 = vadd.f32 %v2926_v49, %v2837_v24  ;;  %v7154_v24 = vmul.f32 %v7078_v44, %v8481_v20 }
 0x527   :  { %v2945_v53 = vmax.f32 %v2890_v4, 0.0  ;;  %v7194_v49 = vadd.f32 %v2959_v10, %v8495_v51  ;;  %v3065_v4 = vmul.f32 %v7084_v7, %v8498_v40  ;;  %v7216_v10 = vmul.f32 %v7081_v52, %v8486_v48 }
 0x528   :  { %v2960_v16 = vmax.f32 %v2927_v28, 0.0  ;;  %v7208_v28 = vmul.f32 %v7081_v52, %v8483_v36  ;;  %v3197_v36 = vadd.f32 %v3193_v1, %v3185_v32  ;;  %v3393_v1 = vmul.f32 %v7098_v11, %v8511_v39 }
 0x529   :  { %8496 = vst [vmem:[#allocation25_spill] sm:$0xff] %v7194_v49  ;;  %v3453_v49 = vadd.f32 %v3449_v6, %v3441_v9  ;;  %v3066_v6 = vmul.f32 %v7089_v45, %v8498_v40 }
 0x52a   :  { %8499 = vst [vmem:[#allocation24_spill] sm:$0xff] %v7208_v28  ;;  %v7226_v2 = vadd.f32 %v2960_v16, %v8505_v12  ;;  %v8508_v12 = vld [vmem:[#allocation49_spill] sm:$0xff]  ;;  %v8509_v16 = vld [vmem:[#allocation66_spill] sm:$0xff] }
 0x52b   :  { %8501 = vst [vmem:[#allocation13_spill] sm:$0xff] %v7216_v10  ;;  %v3201_v32 = vmul.f32 %v7098_v11, %v8508_v12 }
 0x52c   :  { %v7052_v23 = vpop.f32.mrf.mxu0  ;;  %8506 = vst [vmem:[#allocation20_spill] sm:$0xff] %v7226_v2 }
 0x52d   :  { %v2892_v43 = vadd.f32 %v7052_v23, %v7026_v56  ;;  %v7198_v56 = vmul.f32 %v7081_v52, %v8481_v20  ;;  %v7202_v23 = vmul.f32 %v7081_v52, %v8482_v26  ;;  %v7220_v20 = vmul.f32 %v7081_v52, %v8488_v0  ;;  %v8503_v26 = vld [vmem:[#allocation41_spill] sm:$0xff] }
 0x52e   :  { %v7223_v33 = vadd.f32 %v2945_v53, %v8503_v26  ;;  %v3450_v0 = vmul.f32 %v7089_v45, %v8492_v61  ;;  %v3130_v53 = vmul.f32 %v7089_v45, %v8493_v63  ;;  %v7265_v52 = vadd.f32 %v3393_v1, %v3389_v31 }
 0x52f   :  { %8497 = vst [vmem:[#allocation42_spill] sm:$0xff] %v7202_v23  ;;  %v2946_v51 = vmax.f32 %v2892_v43, 0.0  ;;  %v3069_v43 = vadd.f32 %v3065_v4, %v3057_v17  ;;  %v3073_v17 = vmul.f32 %v7098_v11, %v8512_v21  ;;  %v3321_v4 = vmul.f32 %v7084_v7, %v8513_v42 }
 0x530   :  { %8502 = vst [vmem:[#allocation46_spill] sm:$0xff] %v7220_v20  ;;  %v8516_v20 = vld [vmem:[#allocation40_spill] sm:$0xff] }
 0x531   :  { %8504 = vst [vmem:[#allocation55_spill] sm:$0xff] %v7223_v33  ;;  %v7252_v33 = vadd.f32 %v3201_v32, %v3197_v36  ;;  %v7259_v10 = vadd.f32 %v2946_v51, %v8516_v20  ;;  %v7267_v23 = vadd.f32 %v3073_v17, %v3069_v43  ;;  %v3198_v36 = vadd.f32 %v3194_v37, %v7126_v55  ;;  %v8521_v51 = vld [vmem:[#allocation39_spill] sm:$0xff] }
 0x532   :  { %8518 = vst [vmem:[#allocation41_spill] sm:$0xff] %v7265_v52  ;;  %v3134_v20 = vadd.f32 %v3130_v53, %v7137_v47  ;;  %v3325_v31 = vadd.f32 %v3321_v4, %v3313_v29  ;;  %v3131_v37 = vmul.f32 %v7092_v5, %v8493_v63  ;;  %v3387_v55 = vmul.f32 %v7092_v5, %v8494_v46  ;;  %v8523_v4 = vld [vmem:[#allocation15_spill] sm:$0xff] }
 0x533   :  { %8519 = vst [vmem:[#allocation27_spill] sm:$0xff] %v7267_v23  ;;  %v3067_v47 = vmul.f32 %v7092_v5, %v8498_v40  ;;  %v3202_v53 = vmul.f32 %v7101_v30, %v8508_v12  ;;  %v3074_v17 = vmul.f32 %v7101_v30, %v8512_v21  ;;  %v8525_v23 = vld [vmem:[#allocation97_spill] sm:$0xff] }
 0x534   :  { %v7059_v58 = vpop.f32.mrf.mxu0 }
 0x535   :  { %v2895_v19 = vadd.f32 %v7059_v58, %v8507_v59  ;;  %v3457_v58 = vmul.f32 %v7098_v11, %v8509_v16  ;;  %v8510_v59 = vld [vmem:[#allocation56_spill] sm:$0xff] }
 0x536   :  { %v3137_v9 = vmul.f32 %v7098_v11, %v8510_v59 }
 0x537   :  { %v2947_v26 = vmax.f32 %v2895_v19, 0.0  ;;  %v7254_v2 = vadd.f32 %v3457_v58, %v3453_v49  ;;  %v3195_v19 = vmul.f32 %v7092_v5, %v8489_v41  ;;  %v3454_v49 = vadd.f32 %v3450_v0, %v7130_v60 }
 0x538   :  { %v7256_v62 = vadd.f32 %v3137_v9, %v3133_v25  ;;  %v8520_v25 = vld [vmem:[#allocation67_spill] sm:$0xff]  ;;  %v3451_v58 = vmul.f32 %v7092_v5, %v8492_v61  ;;  %v3458_v9 = vmul.f32 %v7101_v30, %v8509_v16 }
 0x539   :  { %8514 = vst [vmem:[#allocation26_spill] sm:$0xff] %v7254_v2  ;;  %v7275_v32 = vmul.f32 %v7078_v44, %v8520_v25  ;;  %v7280_v43 = vadd.f32 %v2947_v26, %v8521_v51  ;;  %v3199_v29 = vadd.f32 %v3195_v19, %v7154_v24  ;;  %v3329_v24 = vmul.f32 %v7098_v11, %v8523_v4  ;;  %v8524_v26 = vld [vmem:[#allocation96_spill] sm:$0xff] }
 0x53a   :  { %8515 = vst [vmem:[#allocation58_spill] sm:$0xff] %v7256_v62  ;;  %v7311_v51 = vadd.f32 %v3202_v53, %v3198_v36  ;;  %v3455_v2 = vadd.f32 %v3451_v58, %v7158_v54  ;;  %v3135_v11 = vadd.f32 %v3131_v37, %v7162_v27  ;;  %v3071_v36 = vadd.f32 %v3067_v47, %v7170_v14  ;;  %v8528_v58 = vld [vmem:[#allocation68_spill] sm:$0xff] }
 0x53b   :  { %v7322_v62 = vadd.f32 %v3329_v24, %v3325_v31  ;;  %v3388_v54 = vmul.f32 %v7095_v22, %v8494_v46  ;;  %v3068_v27 = vmul.f32 %v7095_v22, %v8498_v40  ;;  %v3459_v46 = vmul.f32 %v7104_v3, %v8509_v16 }
 0x53c   :  { %v7086_v8 = vpop.f32.mrf.mxu0  ;;  %v3139_v40 = vmul.f32 %v7104_v3, %v8510_v59 }
 0x53d   :  { %v7263_v28 = vadd.f32 %v7086_v8, %v8517_v13  ;;  %v3390_v8 = vadd.f32 %v3386_v34, %v7141_v38  ;;  %v3070_v13 = vadd.f32 %v3066_v6, %v3058_v35  ;;  %v3323_v38 = vmul.f32 %v7092_v5, %v8513_v42  ;;  %v8522_v34 = vld [vmem:[#allocation95_spill] sm:$0xff]  ;;  %8527 = vst [vmem:[#allocation49_spill] sm:$0xff] %v7322_v62 }
 0x53e   :  { %v3322_v35 = vmul.f32 %v7089_v45, %v8513_v42  ;;  %v3394_v6 = vmul.f32 %v7101_v30, %v8511_v39  ;;  %v7313_v45 = vadd.f32 %v3458_v9, %v3454_v49  ;;  %v3196_v49 = vmul.f32 %v7095_v22, %v8489_v41 }
 0x53f   :  { %v2948_v60 = vmax.f32 %v7263_v28, 0.0  ;;  %v3138_v28 = vmul.f32 %v7101_v30, %v8510_v59  ;;  %v7359_v53 = vadd.f32 %v3139_v40, %v3135_v11  ;;  %v8536_v11 = vld [vmem:[#allocation24_spill] sm:$0xff] }
 0x541   :  { %v7315_v7 = vadd.f32 %v3138_v28, %v3134_v20  ;;  %v3327_v20 = vadd.f32 %v3323_v38, %v7174_v50  ;;  %v3003_v50 = vmul.f32 %v7092_v5, %v8528_v58 }
 0x544   :  { %v7150_v57 = vpop.f32.mrf.mxu0 }
 0x545   :  { %v2900_v1 = vadd.f32 %v7150_v57, %v8522_v34  ;;  %v7318_v57 = vadd.f32 %v3394_v6, %v3390_v8  ;;  %v7320_v34 = vadd.f32 %v3074_v17, %v3070_v13  ;;  %v3326_v8 = vadd.f32 %v3322_v35, %v7178_v15  ;;  %v8529_v15 = vld [vmem:[#allocation98_spill] sm:$0xff] }
 0x546   :  { %v3132_v13 = vmul.f32 %v7095_v22, %v8493_v63  ;;  %v3203_v63 = vmul.f32 %v7104_v3, %v8508_v12  ;;  %v3463_v35 = vadd.f32 %v3459_v46, %v3455_v2  ;;  %v8533_v17 = vld [vmem:[#allocation38_spill] sm:$0xff] }
 0x547   :  { %8526 = vst [vmem:[#allocation17_spill] sm:$0xff] %v7320_v34  ;;  %v2949_v14 = vmax.f32 %v2900_v1, 0.0  ;;  %v7370_v24 = vadd.f32 %v2948_v60, %v8533_v17  ;;  %v8541_v60 = vld [vmem:[#allocation36_spill] sm:$0xff] }
 0x548   :  { %v3207_v38 = vadd.f32 %v3203_v63, %v3199_v29  ;;  %v8535_v29 = vld [vmem:[#allocation108_spill] sm:$0xff] }
 0x549   :  { %v2996_v2 = vmul.f32 %v8535_v29, %v8520_v25  ;;  %v8549_v17 = vld [vmem:[#allocation116_spill] sm:$0xff] }
 0x54c   :  { %v2901_v48 = vpop.f32.mrf.mxu0 }
 0x54d   :  { %v2902_v19 = vadd.f32 %v2901_v48, %v8524_v26  ;;  %v3391_v48 = vadd.f32 %v3387_v55, %v7166_v18  ;;  %v3324_v18 = vmul.f32 %v7095_v22, %v8513_v42  ;;  %v3395_v42 = vmul.f32 %v7104_v3, %v8511_v39 }
 0x54e   :  { %v3331_v55 = vmul.f32 %v7104_v3, %v8523_v4  ;;  %v3200_v26 = vadd.f32 %v3196_v49, %v7198_v56  ;;  %v8542_v56 = vld [vmem:[#allocation18_spill] sm:$0xff] }
 0x54f   :  { %v2950_v41 = vmax.f32 %v2902_v19, 0.0  ;;  %v7361_v9 = vadd.f32 %v3395_v42, %v3391_v48  ;;  %v8534_v19 = vld [vmem:[#allocation42_spill] sm:$0xff]  ;;  %v8537_v48 = vld [vmem:[#allocation48_spill] sm:$0xff]  ;;  %v7388_v49 = vmul.f32 %v7078_v44, %v8542_v56 }
 0x550   :  { %v7365_v1 = vadd.f32 %v3331_v55, %v3327_v20  ;;  %v8539_v20 = vld [vmem:[#allocation46_spill] sm:$0xff]  ;;  %v8548_v55 = vld [vmem:[#allocation99_spill] sm:$0xff] }
 0x551   :  { %v3328_v46 = vadd.f32 %v3324_v18, %v8539_v20  ;;  %v7384_v42 = vadd.f32 %v2950_v41, %v8541_v60  ;;  %8543 = vst [vmem:[#allocation59_spill] sm:$0xff] %v7388_v49  ;;  %v7403_v41 = vadd.f32 %v3003_v50, %v7275_v32  ;;  %v3332_v32 = vmul.f32 %v8549_v17, %v8523_v4  ;;  %v8550_v50 = vld [vmem:[#allocation105_spill] sm:$0xff] }
 0x552   :  { %8531 = vst [vmem:[#allocation56_spill] sm:$0xff] %v7365_v1 }
 0x553   :  { %8547 = vst [vmem:[#allocation40_spill] sm:$0xff] %v7403_v41 }
 0x554   :  { %v2904_v0 = vpop.f32.mrf.mxu0 }
 0x555   :  { %v2905_v52 = vadd.f32 %v2904_v0, %v8525_v23  ;;  %v3452_v23 = vmul.f32 %v7095_v22, %v8492_v61  ;;  %v3330_v0 = vmul.f32 %v7101_v30, %v8523_v4  ;;  %v8556_v4 = vld [vmem:[#allocation50_spill] sm:$0xff] }
 0x557   :  { %v2951_v31 = vmax.f32 %v2905_v52, 0.0  ;;  %v3075_v52 = vmul.f32 %v7104_v3, %v8512_v21  ;;  %v7367_v6 = vadd.f32 %v3330_v0, %v3326_v8  ;;  %v8540_v8 = vld [vmem:[#allocation37_spill] sm:$0xff] }
 0x558   :  { %v7381_v40 = vadd.f32 %v2949_v14, %v8540_v8  ;;  %v3004_v14 = vmul.f32 %v7095_v22, %v8528_v58  ;;  %v8568_v22 = vld [vmem:[#allocation77_spill] sm:$0xff] }
 0x559   :  { %v7363_v28 = vadd.f32 %v3075_v52, %v3071_v36  ;;  %8532 = vst [vmem:[#allocation78_spill] sm:$0xff] %v7367_v6  ;;  %v8538_v36 = vld [vmem:[#allocation13_spill] sm:$0xff]  ;;  %v8577_v6 = vld [vmem:[#allocation79_spill] sm:$0xff] }
 0x55a   :  { %v3072_v63 = vadd.f32 %v3068_v27, %v8538_v36  ;;  %v8546_v27 = vld [vmem:[#allocation34_spill] sm:$0xff]  ;;  %v7420_v36 = vmul.f32 %v8550_v50, %v8520_v25  ;;  %v8565_v50 = vld [vmem:[#allocation47_spill] sm:$0xff] }
 0x55b   :  { %8530 = vst [vmem:[#allocation66_spill] sm:$0xff] %v7363_v28  ;;  %v3476_v30 = vmul.f32 %v7370_v24, %v8565_v50 }
 0x55c   :  { %v2906_v61 = vpop.f32.mrf.mxu0  ;;  %8551 = vst [vmem:[#allocation94_spill] sm:$0xff] %v7420_v36  ;;  %v8566_v36 = vld [vmem:[#allocation63_spill] sm:$0xff] }
 0x55d   :  { %v2907_v37 = vadd.f32 %v2906_v61, %v8529_v15  ;;  %v3456_v61 = vadd.f32 %v3452_v23, %v8534_v19  ;;  %v3136_v15 = vadd.f32 %v3132_v13, %v8536_v11  ;;  %v7392_v23 = vmul.f32 %v8535_v29, %v8542_v56  ;;  %v8545_v13 = vld [vmem:[#allocation35_spill] sm:$0xff] }
 0x55e   :  { %v3204_v19 = vmul.f32 %v8549_v17, %v8508_v12  ;;  %v3460_v11 = vmul.f32 %v8549_v17, %v8509_v16  ;;  %v3475_v56 = vmul.f32 %v7280_v43, %v8565_v50 }
 0x55f   :  { %v2952_v47 = vmax.f32 %v2907_v37, 0.0  ;;  %v3392_v37 = vadd.f32 %v3388_v54, %v8537_v48  ;;  %8544 = vst [vmem:[#allocation21_spill] sm:$0xff] %v7392_v23  ;;  %v7395_v54 = vadd.f32 %v2951_v31, %v8545_v13  ;;  %v3140_v31 = vmul.f32 %v8549_v17, %v8510_v59 }
 0x560   :  { %v3076_v48 = vmul.f32 %v8549_v17, %v8512_v21  ;;  %v3208_v20 = vadd.f32 %v3204_v19, %v3200_v26  ;;  %v3464_v8 = vadd.f32 %v3460_v11, %v3456_v61  ;;  %v7430_v13 = vadd.f32 %v3004_v14, %v2996_v2  ;;  %v8555_v21 = vld [vmem:[#allocation33_spill] sm:$0xff]  ;;  %v8559_v61 = vld [vmem:[#allocation51_spill] sm:$0xff]  ;;  %v8561_v14 = vld [vmem:[#allocation54_spill] sm:$0xff] }
 0x561   :  { %v7398_v52 = vadd.f32 %v2952_v47, %v8546_v27  ;;  %v3396_v47 = vmul.f32 %v8549_v17, %v8511_v39  ;;  %v7422_v16 = vadd.f32 %v3140_v31, %v3136_v15  ;;  %v7428_v39 = vadd.f32 %v3332_v32, %v3328_v46  ;;  %v8562_v19 = vld [vmem:[#allocation25_spill] sm:$0xff] }
 0x562   :  { %v7426_v59 = vadd.f32 %v3076_v48, %v3072_v63  ;;  %8554 = vst [vmem:[#allocation15_spill] sm:$0xff] %v7430_v13  ;;  %v3219_v15 = vmul.f32 %v7280_v43, %v8559_v61  ;;  %v8560_v63 = vld [vmem:[#allocation52_spill] sm:$0xff]  ;;  %v7449_v11 = vmul.f32 %v8562_v19, %v8561_v14  ;;  %v7470_v5 = vmul.f32 %v8562_v19, %v8568_v22 }
 0x563   :  { %v7424_v60 = vadd.f32 %v3396_v47, %v3392_v37  ;;  %8553 = vst [vmem:[#allocation95_spill] sm:$0xff] %v7428_v39  ;;  %v3220_v37 = vmul.f32 %v7370_v24, %v8559_v61  ;;  %v3227_v46 = vmul.f32 %v7395_v54, %v8560_v63  ;;  %v3228_v2 = vmul.f32 %v7398_v52, %v8560_v63  ;;  %v8563_v48 = vld [vmem:[#allocation20_spill] sm:$0xff] }
 0x564   :  { %v2909_v18 = vpop.f32.mrf.mxu0  ;;  %8552 = vst [vmem:[#allocation39_spill] sm:$0xff] %v7426_v59  ;;  %v7453_v32 = vmul.f32 %v8563_v48, %v8561_v14  ;;  %v3484_v49 = vmul.f32 %v7398_v52, %v8566_v36  ;;  %v7474_v13 = vmul.f32 %v8563_v48, %v8568_v22 }
 0x565   :  { %v2910_v0 = vadd.f32 %v2909_v18, %v8548_v55  ;;  %v8557_v18 = vld [vmem:[#allocation43_spill] sm:$0xff] }
 0x566   :  { %v3211_v55 = vmul.f32 %v8557_v18, %v8556_v4 }
 0x567   :  { %v2953_v12 = vmax.f32 %v2910_v0, 0.0  ;;  %v8558_v0 = vld [vmem:[#allocation44_spill] sm:$0xff] }
 0x568   :  { %v3212_v26 = vmul.f32 %v8558_v0, %v8556_v4  ;;  %v3215_v31 = vadd.f32 %v3211_v55, %v3207_v38  ;;  %v3483_v38 = vmul.f32 %v7395_v54, %v8566_v36 }
 0x569   :  { %v7433_v27 = vadd.f32 %v2953_v12, %v8555_v21  ;;  %v8564_v12 = vld [vmem:[#allocation14_spill] sm:$0xff] }
 0x56a   :  { %v3216_v47 = vadd.f32 %v3212_v26, %v3208_v20  ;;  %v3467_v21 = vmul.f32 %v8557_v18, %v8564_v12  ;;  %v3468_v44 = vmul.f32 %v8558_v0, %v8564_v12  ;;  %v8567_v20 = vld [vmem:[#allocation100_spill] sm:$0xff]  ;;  %v3223_v26 = vadd.f32 %v3219_v15, %v3215_v31 }
 0x56c   :  { %v2911_v29 = vpop.f32.mrf.mxu0  ;;  %v3224_v58 = vadd.f32 %v3220_v37, %v3216_v47  ;;  %v3471_v25 = vadd.f32 %v3467_v21, %v3463_v35  ;;  %v3472_v23 = vadd.f32 %v3468_v44, %v3464_v8  ;;  %v3231_v17 = vadd.f32 %v3227_v46, %v3223_v26  ;;  %v8569_v35 = vld [vmem:[#allocation117_spill] sm:$0xff]  ;;  %v8571_v47 = vld [vmem:[#allocation32_spill] sm:$0xff] }
 0x56d   :  { %v2912_v55 = vadd.f32 %v2911_v29, %v8567_v20  ;;  %v3209_v44 = vmul.f32 %v8569_v35, %v8556_v4  ;;  %v3465_v8 = vmul.f32 %v8569_v35, %v8564_v12  ;;  %v8570_v37 = vld [vmem:[#allocation57_spill] sm:$0xff]  ;;  %v3401_v62 = vmul.f32 %v8569_v35, %v8577_v6 }
 0x56e   :  { %v7476_v3 = vadd.f32 %v3228_v2, %v3224_v58  ;;  %v3479_v29 = vadd.f32 %v3475_v56, %v3471_v25  ;;  %v3480_v15 = vadd.f32 %v3476_v30, %v3472_v23  ;;  %v3145_v31 = vmul.f32 %v8569_v35, %v8570_v37  ;;  %v8573_v58 = vld [vmem:[#allocation55_spill] sm:$0xff]  ;;  %v8574_v26 = vld [vmem:[#allocation53_spill] sm:$0xff] }
 0x56f   :  { %v2954_v41 = vmax.f32 %v2912_v55, 0.0  ;;  %v8572_v55 = vld [vmem:[#allocation45_spill] sm:$0xff]  ;;  %v3217_v25 = vmul.f32 %v8573_v58, %v8559_v61  ;;  %v3213_v56 = vadd.f32 %v3209_v44, %v7252_v33  ;;  %v3218_v23 = vmul.f32 %v7259_v10, %v8559_v61  ;;  %v8575_v33 = vld [vmem:[#allocation26_spill] sm:$0xff] }
 0x570   :  { %v3487_v20 = vadd.f32 %v3483_v38, %v3479_v29  ;;  %v3210_v46 = vmul.f32 %v8572_v55, %v8556_v4  ;;  %v7491_v30 = vadd.f32 %v3484_v49, %v3480_v15  ;;  %v3225_v2 = vmul.f32 %v7381_v40, %v8560_v63 }
 0x571   :  { %v7485_v21 = vadd.f32 %v2954_v41, %v8571_v47  ;;  %v3226_v38 = vmul.f32 %v7384_v42, %v8560_v63  ;;  %v3233_v4 = vmul.f32 %v7433_v27, %v8574_v26  ;;  %v3221_v15 = vadd.f32 %v3217_v25, %v3213_v56  ;;  %v8576_v47 = vld [vmem:[#allocation58_spill] sm:$0xff] }
 0x572   :  { %v3214_v41 = vadd.f32 %v3210_v46, %v7311_v51  ;;  %v3469_v44 = vadd.f32 %v3465_v8, %v8575_v33  ;;  %v7507_v61 = vadd.f32 %v3145_v31, %v8576_v47  ;;  %v8578_v51 = vld [vmem:[#allocation101_spill] sm:$0xff]  ;;  %v3466_v63 = vmul.f32 %v8572_v55, %v8564_v12  ;;  %v8581_v31 = vld [vmem:[#allocation60_spill] sm:$0xff] }
 0x573   :  { %v3234_v49 = vmul.f32 %v7485_v21, %v8574_v26  ;;  %v3146_v39 = vmul.f32 %v8572_v55, %v8570_v37  ;;  %v3229_v1 = vadd.f32 %v3225_v2, %v3221_v15  ;;  %v3402_v25 = vmul.f32 %v8572_v55, %v8577_v6  ;;  %v8579_v8 = vld [vmem:[#allocation41_spill] sm:$0xff] }
 0x574   :  { %v2914_v29 = vpop.f32.mrf.mxu0  ;;  %v3222_v34 = vadd.f32 %v3218_v23, %v3214_v41  ;;  %v7519_v56 = vadd.f32 %v3401_v62, %v8579_v8  ;;  %v3081_v33 = vmul.f32 %v8569_v35, %v8581_v31  ;;  %v3470_v23 = vadd.f32 %v3466_v63, %v7313_v45  ;;  %v8584_v62 = vld [vmem:[#allocation27_spill] sm:$0xff] }
 0x575   :  { %v2915_v46 = vadd.f32 %v2914_v29, %v8578_v51  ;;  %v7525_v41 = vadd.f32 %v3146_v39, %v7315_v7  ;;  %v7527_v12 = vadd.f32 %v3233_v4, %v3229_v1  ;;  %v7530_v2 = vadd.f32 %v3402_v25, %v7318_v57  ;;  %v8586_v51 = vld [vmem:[#allocation31_spill] sm:$0xff]  ;;  %v8588_v39 = vld [vmem:[#allocation76_spill] sm:$0xff] }
 0x576   :  { %8580 = vst [vmem:[#allocation96_spill] sm:$0xff] %v7519_v56  ;;  %v3230_v59 = vadd.f32 %v3226_v38, %v3222_v34  ;;  %v7534_v29 = vmul.f32 %v8572_v55, %v8581_v31  ;;  %v7537_v15 = vadd.f32 %v3081_v33, %v8584_v62  ;;  %v3473_v7 = vmul.f32 %v8573_v58, %v8565_v50  ;;  %v8589_v33 = vld [vmem:[#allocation19_spill] sm:$0xff] }
 0x577   :  { %v2955_v47 = vmax.f32 %v2915_v46, 0.0  ;;  %8582 = vst [vmem:[#allocation97_spill] sm:$0xff] %v7530_v2  ;;  %v3474_v45 = vmul.f32 %v7259_v10, %v8565_v50  ;;  %v3481_v57 = vmul.f32 %v7381_v40, %v8566_v36  ;;  %v3482_v1 = vmul.f32 %v7384_v42, %v8566_v36 }
 0x578   :  { %8583 = vst [vmem:[#allocation98_spill] sm:$0xff] %v7534_v29  ;;  %v7542_v34 = vadd.f32 %v3234_v49, %v3230_v59  ;;  %v3489_v38 = vmul.f32 %v7433_v27, %v8588_v39  ;;  %v3490_v4 = vmul.f32 %v7485_v21, %v8588_v39  ;;  %v3477_v63 = vadd.f32 %v3473_v7, %v3469_v44 }
 0x579   :  { %8585 = vst [vmem:[#allocation38_spill] sm:$0xff] %v7537_v15  ;;  %v7540_v46 = vadd.f32 %v2955_v47, %v8586_v51  ;;  %v3478_v50 = vadd.f32 %v3474_v45, %v3470_v23  ;;  %v3147_v8 = vmul.f32 %v8557_v18, %v8570_v37  ;;  %v3148_v36 = vmul.f32 %v8558_v0, %v8570_v37  ;;  %v8590_v51 = vld [vmem:[#allocation102_spill] sm:$0xff] }
 0x57a   :  { %8587 = vst [vmem:[#allocation42_spill] sm:$0xff] %v7542_v34  ;;  %v3155_v47 = vmul.f32 %v7280_v43, %v8589_v33  ;;  %v3156_v62 = vmul.f32 %v7370_v24, %v8589_v33  ;;  %v3485_v29 = vadd.f32 %v3481_v57, %v3477_v63  ;;  %v8591_v45 = vld [vmem:[#allocation22_spill] sm:$0xff]  ;;  %v8595_v63 = vld [vmem:[#allocation80_spill] sm:$0xff] }
 0x57b   :  { %v3235_v59 = vmul.f32 %v7540_v46, %v8574_v26  ;;  %v3491_v49 = vmul.f32 %v7540_v46, %v8588_v39  ;;  %v3486_v44 = vadd.f32 %v3482_v1, %v3478_v50  ;;  %v3151_v23 = vadd.f32 %v3147_v8, %v7359_v53  ;;  %v8592_v57 = vld [vmem:[#allocation30_spill] sm:$0xff] }
 0x57c   :  { %v2916_v25 = vpop.f32.mrf.mxu0  ;;  %v3152_v7 = vadd.f32 %v3148_v36, %v7422_v16  ;;  %v3163_v28 = vmul.f32 %v7395_v54, %v8591_v45  ;;  %v3493_v2 = vadd.f32 %v3489_v38, %v3485_v29  ;;  %v8593_v16 = vld [vmem:[#allocation16_spill] sm:$0xff]  ;;  %v3403_v29 = vmul.f32 %v8557_v18, %v8577_v6 }
 0x57d   :  { %v2917_v55 = vadd.f32 %v2916_v25, %v8590_v51  ;;  %v3239_v35 = vadd.f32 %v3235_v59, %v3231_v17  ;;  %v3495_v15 = vadd.f32 %v3491_v49, %v3487_v20  ;;  %v7575_v56 = vadd.f32 %v3490_v4, %v3486_v44  ;;  %v8594_v59 = vld [vmem:[#allocation12_spill] sm:$0xff] }
 0x57e   :  { %v3159_v25 = vadd.f32 %v3155_v47, %v3151_v23  ;;  %v3160_v17 = vadd.f32 %v3156_v62, %v3152_v7  ;;  %v3164_v20 = vmul.f32 %v7398_v52, %v8591_v45  ;;  %v3171_v1 = vmul.f32 %v7540_v46, %v8593_v16  ;;  %v8596_v62 = vld [vmem:[#allocation103_spill] sm:$0xff] }
 0x57f   :  { %v2956_v37 = vmax.f32 %v2917_v55, 0.0  ;;  %v3247_v31 = vadd.f32 %v7449_v11, %v3239_v35  ;;  %v3503_v34 = vadd.f32 %v7470_v5, %v3495_v15  ;;  %v3179_v55 = vmul.f32 %v8562_v19, %v8594_v59 }
 0x580   :  { %v3180_v5 = vmul.f32 %v8563_v48, %v8594_v59  ;;  %v3167_v11 = vadd.f32 %v3163_v28, %v3159_v25  ;;  %v3168_v35 = vadd.f32 %v3164_v20, %v3160_v17  ;;  %v3404_v15 = vmul.f32 %v8558_v0, %v8577_v6  ;;  %v8597_v25 = vld [vmem:[#allocation81_spill] sm:$0xff] }
 0x581   :  { %v7580_v53 = vadd.f32 %v2956_v37, %v8592_v57  ;;  %v3411_v50 = vmul.f32 %v7280_v43, %v8595_v63  ;;  %v3407_v36 = vadd.f32 %v3403_v29, %v7361_v9  ;;  %v3412_v6 = vmul.f32 %v7370_v24, %v8595_v63 }
 0x582   :  { %v3175_v8 = vadd.f32 %v3171_v1, %v3167_v11  ;;  %v3408_v47 = vadd.f32 %v3404_v15, %v7424_v60  ;;  %v3419_v17 = vmul.f32 %v7395_v54, %v8597_v25  ;;  %v3420_v1 = vmul.f32 %v7398_v52, %v8597_v25 }
 0x583   :  { %v3236_v38 = vmul.f32 %v7580_v53, %v8574_v26  ;;  %v3492_v4 = vmul.f32 %v7580_v53, %v8588_v39  ;;  %v3172_v49 = vmul.f32 %v7580_v53, %v8593_v16  ;;  %v3415_v7 = vadd.f32 %v3411_v50, %v3407_v36 }
 0x584   :  { %v2919_v28 = vpop.f32.mrf.mxu0  ;;  %v3183_v23 = vadd.f32 %v3179_v55, %v3175_v8  ;;  %v3416_v37 = vadd.f32 %v3412_v6, %v3408_v47  ;;  %v3154_v6 = vmul.f32 %v7259_v10, %v8589_v33 }
 0x585   :  { %v2920_v26 = vadd.f32 %v2919_v28, %v8596_v62  ;;  %v3240_v51 = vadd.f32 %v3236_v38, %v7476_v3  ;;  %v3496_v39 = vadd.f32 %v3492_v4, %v7491_v30  ;;  %v3176_v44 = vadd.f32 %v3172_v49, %v3168_v35  ;;  %v8598_v3 = vld [vmem:[#allocation82_spill] sm:$0xff]  ;;  %v8599_v35 = vld [vmem:[#allocation29_spill] sm:$0xff] }
 0x586   :  { %v3423_v11 = vadd.f32 %v3419_v17, %v3415_v7  ;;  %v3427_v30 = vmul.f32 %v7540_v46, %v8598_v3  ;;  %v3428_v55 = vmul.f32 %v7580_v53, %v8598_v3  ;;  %v3161_v62 = vmul.f32 %v7381_v40, %v8591_v45 }
 0x587   :  { %v2957_v20 = vmax.f32 %v2920_v26, 0.0  ;;  %v3248_v9 = vadd.f32 %v7453_v32, %v3240_v51  ;;  %v3504_v60 = vadd.f32 %v7474_v13, %v3496_v39  ;;  %v3184_v57 = vadd.f32 %v3180_v5, %v3176_v44  ;;  %v8600_v5 = vld [vmem:[#allocation83_spill] sm:$0xff]  ;;  %v8601_v26 = vld [vmem:[#allocation104_spill] sm:$0xff] }
 0x588   :  { %v3424_v32 = vadd.f32 %v3420_v1, %v3416_v37  ;;  %v3431_v13 = vadd.f32 %v3427_v30, %v3423_v11  ;;  %v3435_v49 = vmul.f32 %v8562_v19, %v8600_v5  ;;  %v3436_v50 = vmul.f32 %v8563_v48, %v8600_v5 }
 0x589   :  { %v7618_v29 = vadd.f32 %v2957_v20, %v8599_v35  ;;  %v3544_v15 = vpack.c.bf16 %v3248_v9, %v3247_v31  ;;  %v3552_v38 = vpack.c.bf16 %v3504_v60, %v3503_v34  ;;  %v7620_v4 = vpack.c.bf16 %v3184_v57, %v3183_v23  ;;  %v8602_v57 = vld [vmem:[#allocation28_spill] sm:$0xff] }
 0x58a   :  { %v3153_v31 = vmul.f32 %v8573_v58, %v8589_v33  ;;  %v3432_v36 = vadd.f32 %v3428_v55, %v3424_v32  ;;  %v7632_v47 = vadd.f32 %v3435_v49, %v3431_v13  ;;  %v3158_v37 = vadd.f32 %v3154_v6, %v7525_v41  ;;  %v8603_v35 = vld [vmem:[#allocation96_spill] sm:$0xff] }
 0x58b   :  { %3713 = vmatpush.bf16.msrb.mxu1 %v3544_v15  ;;  %4872 = vmatpush.bf16.msra.mxu3 %v3544_v15  ;;  %v3241_v28 = vmul.f32 %v7618_v29, %v8561_v14  ;;  %v3497_v8 = vmul.f32 %v7618_v29, %v8568_v22  ;;  %v3162_v17 = vmul.f32 %v7384_v42, %v8591_v45 }
 0x58c   :  { %3774 = vmatpush.bf16.msrb.mxu2 %v3552_v38  ;;  %v2921_v34 = vpop.f32.mrf.mxu0  ;;  %v3157_v23 = vadd.f32 %v3153_v31, %v7507_v61  ;;  %v7641_v7 = vadd.f32 %v3436_v50, %v3432_v36  ;;  %v3169_v33 = vmul.f32 %v7433_v27, %v8593_v16  ;;  %v3170_v60 = vmul.f32 %v7485_v21, %v8593_v16  ;;  %v8604_v38 = vld [vmem:[#allocation97_spill] sm:$0xff]  ;;  %v8605_v36 = vld [vmem:[#allocation42_spill] sm:$0xff] }
 0x58d   :  { %v2922_v51 = vadd.f32 %v2921_v34, %v8601_v26  ;;  %v3245_v39 = vadd.f32 %v3241_v28, %v7527_v12  ;;  %v3501_v44 = vadd.f32 %v3497_v8, %v3493_v2  ;;  %v3177_v12 = vmul.f32 %v7618_v29, %v8594_v59 }
 0x58e   :  { %v3165_v9 = vadd.f32 %v3161_v62, %v3157_v23  ;;  %v3550_v61 = vpack.c.bf16 %v7641_v7, %v7632_v47  ;;  %v3166_v2 = vadd.f32 %v3162_v17, %v3158_v37  ;;  %v3409_v41 = vmul.f32 %v8573_v58, %v8595_v63  ;;  %v8607_v17 = vld [vmem:[#allocation61_spill] sm:$0xff] }
 0x58f   :  { %v2958_v20 = vmax.f32 %v2922_v51, 0.0  ;;  %v3410_v45 = vmul.f32 %v7259_v10, %v8595_v63  ;;  %v3417_v16 = vmul.f32 %v7381_v40, %v8597_v25  ;;  %v3418_v30 = vmul.f32 %v7384_v42, %v8597_v25 }
 0x590   :  { %v3173_v11 = vadd.f32 %v3169_v33, %v3165_v9  ;;  %v3174_v55 = vadd.f32 %v3170_v60, %v3166_v2  ;;  %v3413_v15 = vadd.f32 %v3409_v41, %v8603_v35  ;;  %v3425_v13 = vmul.f32 %v7433_v27, %v8598_v3  ;;  %v8608_v9 = vld [vmem:[#allocation66_spill] sm:$0xff]  ;;  %v8612_v35 = vld [vmem:[#allocation65_spill] sm:$0xff] }
 0x591   :  { %v7659_v1 = vadd.f32 %v2958_v20, %v8602_v57  ;;  %v3414_v32 = vadd.f32 %v3410_v45, %v8604_v38  ;;  %v3426_v31 = vmul.f32 %v7485_v21, %v8598_v3  ;;  %v3433_v34 = vmul.f32 %v7618_v29, %v8600_v5  ;;  %v8610_v41 = vld [vmem:[#allocation62_spill] sm:$0xff] }
 0x592   :  { %v3181_v28 = vadd.f32 %v3177_v12, %v3173_v11  ;;  %v3421_v8 = vadd.f32 %v3417_v16, %v3413_v15  ;;  %v3091_v33 = vmul.f32 %v7280_v43, %v8607_v17  ;;  %v8609_v12 = vld [vmem:[#allocation39_spill] sm:$0xff]  ;;  %v3092_v2 = vmul.f32 %v7370_v24, %v8607_v17  ;;  %v8611_v11 = vld [vmem:[#allocation64_spill] sm:$0xff] }
 0x593   :  { %v3242_v63 = vmul.f32 %v7659_v1, %v8561_v14  ;;  %v3498_v49 = vmul.f32 %v7659_v1, %v8568_v22  ;;  %v3178_v50 = vmul.f32 %v7659_v1, %v8594_v59  ;;  %v3422_v25 = vadd.f32 %v3418_v30, %v3414_v32  ;;  %v8606_v59 = vld [vmem:[#allocation60_spill] sm:$0xff]  ;;  %v8613_v32 = vld [vmem:[#allocation23_spill] sm:$0xff] }
 0x594   :  { %v3434_v22 = vmul.f32 %v7659_v1, %v8600_v5  ;;  %v3429_v62 = vadd.f32 %v3425_v13, %v3421_v8  ;;  %v3083_v51 = vmul.f32 %v8557_v18, %v8606_v59  ;;  %v3084_v23 = vmul.f32 %v8558_v0, %v8606_v59 }
 0x595   :  { %v3246_v47 = vadd.f32 %v3242_v63, %v8605_v36  ;;  %v3502_v6 = vadd.f32 %v3498_v49, %v7575_v56  ;;  %v3182_v14 = vadd.f32 %v3178_v50, %v3174_v55  ;;  %v3430_v26 = vadd.f32 %v3426_v31, %v3422_v25  ;;  %v8614_v50 = vld [vmem:[#allocation70_spill] sm:$0xff]  ;;  %v8615_v31 = vld [vmem:[#allocation56_spill] sm:$0xff] }
 0x596   :  { %v3437_v20 = vadd.f32 %v3433_v34, %v3429_v62  ;;  %v3087_v60 = vadd.f32 %v3083_v51, %v8608_v9  ;;  %v3088_v5 = vadd.f32 %v3084_v23, %v8609_v12  ;;  %v3099_v45 = vmul.f32 %v7395_v54, %v8610_v41  ;;  %v8616_v36 = vld [vmem:[#allocation84_spill] sm:$0xff]  ;;  %v8621_v9 = vld [vmem:[#allocation98_spill] sm:$0xff] }
 0x597   :  { %v3543_v3 = vpack.c.bf16 %v3246_v47, %v3245_v39  ;;  %v3551_v7 = vpack.c.bf16 %v3502_v6, %v3501_v44  ;;  %v3541_v37 = vpack.c.bf16 %v3182_v14, %v3181_v28  ;;  %v3438_v56 = vadd.f32 %v3434_v22, %v3430_v26  ;;  %v8617_v14 = vld [vmem:[#allocation95_spill] sm:$0xff]  ;;  %v8618_v26 = vld [vmem:[#allocation85_spill] sm:$0xff] }
 0x598   :  { %v3100_v39 = vmul.f32 %v7398_v52, %v8610_v41  ;;  %v3095_v57 = vadd.f32 %v3091_v33, %v3087_v60  ;;  %v3107_v16 = vmul.f32 %v7540_v46, %v8611_v11  ;;  %v3108_v30 = vmul.f32 %v7580_v53, %v8611_v11 }
 0x599   :  { %3714 = vmatpush.bf16.msrb.mxu1 %v3543_v3  ;;  %4873 = vmatpush.bf16.msra.mxu3 %v3543_v3  ;;  %v3549_v44 = vpack.c.bf16 %v3438_v56, %v3437_v20  ;;  %v3096_v55 = vadd.f32 %v3092_v2, %v3088_v5  ;;  %v3115_v15 = vmul.f32 %v8562_v19, %v8612_v35  ;;  %v8619_v3 = vld [vmem:[#allocation86_spill] sm:$0xff]  ;;  %v8620_v56 = vld [vmem:[#allocation17_spill] sm:$0xff] }
 0x59a   :  { %3775 = vmatpush.bf16.msrb.mxu2 %v3551_v7  ;;  %v3116_v38 = vmul.f32 %v8563_v48, %v8612_v35  ;;  %v3339_v13 = vmul.f32 %v8557_v18, %v8613_v32  ;;  %v3103_v63 = vadd.f32 %v3099_v45, %v3095_v57  ;;  %v3340_v49 = vmul.f32 %v8558_v0, %v8613_v32 }
 0x59b   :  { %v3347_v28 = vmul.f32 %v7280_v43, %v8614_v50  ;;  %v3348_v8 = vmul.f32 %v7370_v24, %v8614_v50  ;;  %v3104_v25 = vadd.f32 %v3100_v39, %v3096_v55  ;;  %v3355_v47 = vmul.f32 %v7395_v54, %v8616_v36 }
 0x59c   :  { %v3343_v34 = vadd.f32 %v3339_v13, %v8615_v31  ;;  %v3111_v6 = vadd.f32 %v3107_v16, %v3103_v63  ;;  %v3344_v22 = vadd.f32 %v3340_v49, %v8617_v14  ;;  %v3356_v62 = vmul.f32 %v7398_v52, %v8616_v36  ;;  %v8623_v31 = vld [vmem:[#allocation117_spill] sm:$0xff] }
 0x59d   :  { %3715 = vmatpush.bf16.msrb.mxu1 %v7620_v4  ;;  %4874 = vmatpush.bf16.msra.mxu3 %v7620_v4  ;;  %v3363_v59 = vmul.f32 %v7540_v46, %v8618_v26  ;;  %v3112_v51 = vadd.f32 %v3108_v30, %v3104_v25  ;;  %v3364_v4 = vmul.f32 %v7580_v53, %v8618_v26 }
 0x59e   :  { %3776 = vmatpush.bf16.msrb.mxu2 %v3550_v61  ;;  %v3351_v23 = vadd.f32 %v3347_v28, %v3343_v34  ;;  %v3371_v7 = vmul.f32 %v8562_v19, %v8619_v3  ;;  %v3119_v33 = vadd.f32 %v3115_v15, %v3111_v6  ;;  %v3352_v20 = vadd.f32 %v3348_v8, %v3344_v22  ;;  %v8622_v15 = vld [vmem:[#allocation38_spill] sm:$0xff] }
 0x59f   :  { %v3372_v61 = vmul.f32 %v8563_v48, %v8619_v3  ;;  %v3086_v60 = vadd.f32 %v8621_v9, %v8620_v56  ;;  %v3120_v12 = vadd.f32 %v3116_v38, %v3112_v51  ;;  %v3089_v2 = vmul.f32 %v8573_v58, %v8607_v17  ;;  %v8625_v51 = vld [vmem:[#allocation49_spill] sm:$0xff] }
 0x5a0   :  { %v3359_v5 = vadd.f32 %v3355_v47, %v3351_v23  ;;  %v3360_v45 = vadd.f32 %v3356_v62, %v3352_v20  ;;  %v3090_v39 = vmul.f32 %v7259_v10, %v8607_v17  ;;  %v3097_v57 = vmul.f32 %v7381_v40, %v8610_v41  ;;  %v8624_v47 = vld [vmem:[#allocation45_spill] sm:$0xff] }
 0x5a1   :  { %3716 = vmatpush.bf16.msrb.mxu1 %v3541_v37  ;;  %4875 = vmatpush.bf16.msra.mxu3 %v3541_v37  ;;  %v3098_v16 = vmul.f32 %v7384_v42, %v8610_v41  ;;  %v3540_v30 = vpack.c.bf16 %v3120_v12, %v3119_v33  ;;  %v3093_v37 = vadd.f32 %v3089_v2, %v8622_v15  ;;  %v8628_v2 = vld [vmem:[#allocation115_spill] sm:$0xff] }
 0x5a2   :  { %3777 = vmatpush.bf16.msrb.mxu2 %v3549_v44  ;;  %v3367_v55 = vadd.f32 %v3363_v59, %v3359_v5  ;;  %v3105_v38 = vmul.f32 %v7433_v27, %v8611_v11  ;;  %v3368_v13 = vadd.f32 %v3364_v4, %v3360_v45  ;;  %v3094_v63 = vadd.f32 %v3090_v39, %v3086_v60  ;;  %v8626_v4 = vld [vmem:[#allocation78_spill] sm:$0xff]  ;;  %v8627_v5 = vld [vmem:[#allocation69_spill] sm:$0xff] }
 0x5a3   :  { %v3106_v44 = vmul.f32 %v7485_v21, %v8611_v11  ;;  %v3113_v17 = vmul.f32 %v7618_v29, %v8612_v35  ;;  %v3101_v28 = vadd.f32 %v3097_v57, %v3093_v37  ;;  %v3114_v41 = vmul.f32 %v7659_v1, %v8612_v35  ;;  %v8630_v57 = vld [vmem:[#allocation71_spill] sm:$0xff]  ;;  %v8631_v37 = vld [vmem:[#allocation40_spill] sm:$0xff] }
 0x5a4   :  { %v3375_v49 = vadd.f32 %v3371_v7, %v3367_v55  ;;  %v3376_v8 = vadd.f32 %v3372_v61, %v3368_v13  ;;  %v3102_v25 = vadd.f32 %v3098_v16, %v3094_v63  ;;  %v3337_v34 = vmul.f32 %v8623_v31, %v8613_v32  ;;  %v8632_v13 = vld [vmem:[#allocation15_spill] sm:$0xff] }
 0x5a5   :  { %3717 = vmatpush.bf16.msrb.mxu1 %v3540_v30  ;;  %4876 = vmatpush.bf16.msra.mxu3 %v3540_v30  ;;  %v3338_v6 = vmul.f32 %v8624_v47, %v8613_v32  ;;  %v3109_v14 = vadd.f32 %v3105_v38, %v3101_v28  ;;  %v3345_v11 = vmul.f32 %v8573_v58, %v8614_v50 }
 0x5a6   :  { %v3346_v22 = vmul.f32 %v7259_v10, %v8614_v50  ;;  %v3353_v62 = vmul.f32 %v7381_v40, %v8616_v36  ;;  %v3548_v59 = vpack.c.bf16 %v3376_v8, %v3375_v49  ;;  %v3110_v35 = vadd.f32 %v3106_v44, %v3102_v25 }
 0x5a7   :  { %v3341_v23 = vadd.f32 %v3337_v34, %v8625_v51  ;;  %v3342_v7 = vadd.f32 %v3338_v6, %v8626_v4  ;;  %v3117_v33 = vadd.f32 %v3113_v17, %v3109_v14  ;;  %v3354_v32 = vmul.f32 %v7384_v42, %v8616_v36  ;;  %v8629_v36 = vld [vmem:[#allocation116_spill] sm:$0xff]  ;;  %v8635_v14 = vld [vmem:[#allocation74_spill] sm:$0xff] }
 0x5a8   :  { %v3361_v20 = vmul.f32 %v7433_v27, %v8618_v26  ;;  %v3362_v61 = vmul.f32 %v7485_v21, %v8618_v26  ;;  %3778 = vmatpush.bf16.msrb.mxu2 %v3548_v59  ;;  %v3118_v50 = vadd.f32 %v3114_v41, %v3110_v35  ;;  %v3369_v60 = vmul.f32 %v7618_v29, %v8619_v3  ;;  %v8634_v41 = vld [vmem:[#allocation73_spill] sm:$0xff]  ;;  %v8636_v35 = vld [vmem:[#allocation75_spill] sm:$0xff] }
 0x5a9   :  { %v3349_v56 = vadd.f32 %v3345_v11, %v3341_v23  ;;  %v3350_v9 = vadd.f32 %v3346_v22, %v3342_v7  ;;  %v3370_v12 = vmul.f32 %v7659_v1, %v8619_v3  ;;  %v3011_v45 = vmul.f32 %v8628_v2, %v8627_v5  ;;  %v8633_v3 = vld [vmem:[#allocation72_spill] sm:$0xff] }
 0x5aa   :  { %v3012_v39 = vmul.f32 %v8629_v36, %v8627_v5  ;;  %v3019_v16 = vmul.f32 %v8557_v18, %v8630_v57  ;;  %v3539_v26 = vpack.c.bf16 %v3118_v50, %v3117_v33  ;;  %v3020_v15 = vmul.f32 %v8558_v0, %v8630_v57  ;;  %v8637_v33 = vld [vmem:[#allocation87_spill] sm:$0xff]  ;;  %v8639_v50 = vld [vmem:[#allocation112_spill] sm:$0xff] }
 0x5ab   :  { %v3357_v30 = vadd.f32 %v3353_v62, %v3349_v56  ;;  %v3358_v55 = vadd.f32 %v3354_v32, %v3350_v9  ;;  %v3015_v38 = vadd.f32 %v3011_v45, %v8631_v37  ;;  %v3027_v44 = vmul.f32 %v7280_v43, %v8633_v3  ;;  %v8638_v32 = vld [vmem:[#allocation111_spill] sm:$0xff]  ;;  %v8640_v9 = vld [vmem:[#allocation88_spill] sm:$0xff] }
 0x5ac   :  { %v3016_v63 = vadd.f32 %v3012_v39, %v8632_v13  ;;  %v3028_v17 = vmul.f32 %v7370_v24, %v8633_v3  ;;  %3718 = vmatpush.bf16.msrb.mxu1 %v3539_v26  ;;  %4877 = vmatpush.bf16.msra.mxu3 %v3539_v26  ;;  %v3035_v8 = vmul.f32 %v7395_v54, %v8634_v41  ;;  %v8644_v13 = vld [vmem:[#allocation90_spill] sm:$0xff] }
 0x5ad   :  { %v3365_v49 = vadd.f32 %v3361_v20, %v3357_v30  ;;  %v3366_v28 = vadd.f32 %v3362_v61, %v3358_v55  ;;  %v3023_v25 = vadd.f32 %v3019_v16, %v3015_v38  ;;  %v3036_v6 = vmul.f32 %v7398_v52, %v8634_v41  ;;  %v8641_v16 = vld [vmem:[#allocation59_spill] sm:$0xff]  ;;  %v8642_v30 = vld [vmem:[#allocation89_spill] sm:$0xff] }
 0x5ae   :  { %v3024_v34 = vadd.f32 %v3020_v15, %v3016_v63  ;;  %v3043_v11 = vmul.f32 %v7540_v46, %v8635_v14  ;;  %v3044_v59 = vmul.f32 %v7580_v53, %v8635_v14  ;;  %v3051_v51 = vmul.f32 %v8562_v19, %v8636_v35  ;;  %v8643_v15 = vld [vmem:[#allocation21_spill] sm:$0xff] }
 0x5af   :  { %v3373_v22 = vadd.f32 %v3369_v60, %v3365_v49  ;;  %v3374_v62 = vadd.f32 %v3370_v12, %v3366_v28  ;;  %v3031_v23 = vadd.f32 %v3027_v44, %v3023_v25  ;;  %v3052_v7 = vmul.f32 %v8563_v48, %v8636_v35  ;;  %v8645_v49 = vld [vmem:[#allocation91_spill] sm:$0xff]  ;;  %v8646_v25 = vld [vmem:[#allocation92_spill] sm:$0xff] }
 0x5b0   :  { %v3032_v4 = vadd.f32 %v3028_v17, %v3024_v34  ;;  %v3259_v20 = vmul.f32 %v8638_v32, %v8637_v33  ;;  %v3260_v56 = vmul.f32 %v8639_v50, %v8637_v33  ;;  %v3267_v60 = vmul.f32 %v8628_v2, %v8640_v9  ;;  %v8651_v32 = vld [vmem:[#allocation109_spill] sm:$0xff] }
 0x5b1   :  { %v3547_v61 = vpack.c.bf16 %v3374_v62, %v3373_v22  ;;  %v3268_v12 = vmul.f32 %v8629_v36, %v8640_v9  ;;  %v3039_v45 = vadd.f32 %v3035_v8, %v3031_v23  ;;  %v3275_v55 = vmul.f32 %v8557_v18, %v8642_v30  ;;  %v8649_v23 = vld [vmem:[#allocation106_spill] sm:$0xff] }
 0x5b2   :  { %v3040_v39 = vadd.f32 %v3036_v6, %v3032_v4  ;;  %v3263_v26 = vadd.f32 %v3259_v20, %v8641_v16  ;;  %v3264_v37 = vadd.f32 %v3260_v56, %v8643_v15  ;;  %v3276_v38 = vmul.f32 %v8558_v0, %v8642_v30 }
 0x5b3   :  { %3779 = vmatpush.bf16.msrb.mxu2 %v3547_v61  ;;  %v3283_v63 = vmul.f32 %v7280_v43, %v8644_v13  ;;  %v3284_v2 = vmul.f32 %v7370_v24, %v8644_v13  ;;  %v3047_v36 = vadd.f32 %v3043_v11, %v3039_v45  ;;  %v3291_v28 = vmul.f32 %v7395_v54, %v8645_v49  ;;  %v8647_v24 = vld [vmem:[#allocation93_spill] sm:$0xff] }
 0x5b4   :  { %v3048_v44 = vadd.f32 %v3044_v59, %v3040_v39  ;;  %v3271_v17 = vadd.f32 %v3267_v60, %v3263_v26  ;;  %v3272_v8 = vadd.f32 %v3268_v12, %v3264_v37  ;;  %v3292_v18 = vmul.f32 %v7398_v52, %v8645_v49  ;;  %v8648_v59 = vld [vmem:[#allocation67_spill] sm:$0xff]  ;;  %v8650_v52 = vld [vmem:[#allocation68_spill] sm:$0xff]  ;;  %v8655_v12 = vld [vmem:[#allocation114_spill] sm:$0xff] }
 0x5b5   :  { %v3299_v34 = vmul.f32 %v7540_v46, %v8646_v25  ;;  %v3300_v0 = vmul.f32 %v7580_v53, %v8646_v25  ;;  %v3055_v43 = vadd.f32 %v3051_v51, %v3047_v36  ;;  %v3307_v11 = vmul.f32 %v8562_v19, %v8647_v24  ;;  %v8652_v53 = vld [vmem:[#allocation110_spill] sm:$0xff] }
 0x5b6   :  { %v3056_v6 = vadd.f32 %v3052_v7, %v3048_v44  ;;  %v3279_v22 = vadd.f32 %v3275_v55, %v3271_v17  ;;  %v3280_v62 = vadd.f32 %v3276_v38, %v3272_v8  ;;  %v3308_v54 = vmul.f32 %v8563_v48, %v8647_v24  ;;  %v8653_v7 = vld [vmem:[#allocation113_spill] sm:$0xff]  ;;  %v8654_v19 = vld [vmem:[#allocation94_spill] sm:$0xff] }
 0x5b7   :  { %v2994_v4 = vmul.f32 %v8649_v23, %v8648_v59  ;;  %v3001_v20 = vmul.f32 %v8651_v32, %v8650_v52  ;;  %v3002_v51 = vmul.f32 %v8652_v53, %v8650_v52  ;;  %v3009_v50 = vmul.f32 %v8653_v7, %v8627_v5 }
 0x5b8   :  { %v3538_v46 = vpack.c.bf16 %v3056_v6, %v3055_v43  ;;  %v3287_v61 = vadd.f32 %v3283_v63, %v3279_v22  ;;  %v3288_v56 = vadd.f32 %v3284_v2, %v3280_v62  ;;  %v3010_v48 = vmul.f32 %v8655_v12, %v8627_v5  ;;  %v8656_v22 = vld [vmem:[#allocation18_spill] sm:$0xff] }
 0x5b9   :  { %v3005_v60 = vadd.f32 %v3001_v20, %v8654_v19  ;;  %v3017_v45 = vmul.f32 %v8623_v31, %v8630_v57  ;;  %v3006_v16 = vadd.f32 %v3002_v51, %v2994_v4  ;;  %v3018_v26 = vmul.f32 %v8624_v47, %v8630_v57 }
 0x5ba   :  { %3719 = vmatpush.bf16.msrb.mxu1 %v3538_v46  ;;  %4878 = vmatpush.bf16.msra.mxu3 %v3538_v46  ;;  %v3295_v39 = vadd.f32 %v3291_v28, %v3287_v61  ;;  %v3296_v55 = vadd.f32 %v3292_v18, %v3288_v56  ;;  %v3025_v37 = vmul.f32 %v8573_v58, %v8633_v3 }
 0x5bb   :  { %v3013_v15 = vadd.f32 %v3009_v50, %v3005_v60  ;;  %v3026_v38 = vmul.f32 %v7259_v10, %v8633_v3  ;;  %v3014_v5 = vadd.f32 %v3010_v48, %v3006_v16  ;;  %v3033_v2 = vmul.f32 %v7381_v40, %v8634_v41  ;;  %v4558_v48 = vld [vmem:[#allocation6] sm:$0xf] }
 0x5bc   :  { %v3303_v63 = vadd.f32 %v3299_v34, %v3295_v39  ;;  %v3034_v36 = vmul.f32 %v7384_v42, %v8634_v41  ;;  %v3304_v44 = vadd.f32 %v3300_v0, %v3296_v55  ;;  %v3041_v57 = vmul.f32 %v7433_v27, %v8635_v14  ;;  %v8657_v41 = vld [vmem:[#allocation105_spill] sm:$0xff] }
 0x5bd   :  { %v3021_v17 = vadd.f32 %v3017_v45, %v3013_v15  ;;  %v3042_v28 = vmul.f32 %v7485_v21, %v8635_v14  ;;  %v3022_v18 = vadd.f32 %v3018_v26, %v3014_v5  ;;  %v3049_v3 = vmul.f32 %v7618_v29, %v8636_v35  ;;  %v4823_v45 = vld [vmem:[#allocation6 + $0x4] sm:$0xf0]  ;;  %v4560_v5 = vld [vmem:[#allocation6 + $0x8] sm:$0xf0] }
 0x5be   :  { %v3311_v8 = vadd.f32 %v3307_v11, %v3303_v63  ;;  %v3050_v34 = vmul.f32 %v7659_v1, %v8636_v35  ;;  %v3312_v43 = vadd.f32 %v3308_v54, %v3304_v44  ;;  %v3249_v0 = vmul.f32 %v8657_v41, %v8656_v22  ;;  %v4822_v63 = vld [vmem:[#allocation6 + $0x4] sm:$0xf]  ;;  %v4824_v44 = vld [vmem:[#allocation6 + $0x14] sm:$0xf] }
 0x5bf   :  { %v3029_v6 = vadd.f32 %v3025_v37, %v3021_v17  ;;  %v3250_v62 = vmul.f32 %v8649_v23, %v8656_v22  ;;  %v3030_v59 = vadd.f32 %v3026_v38, %v3022_v18  ;;  %v3257_v14 = vmul.f32 %v8651_v32, %v8637_v33  ;;  %v4568_v17 = vld [vmem:[#allocation6 + $0x18] sm:$0xf0] }
 0x5c0   :  { %v3258_v11 = vmul.f32 %v8652_v53, %v8637_v33  ;;  %v3265_v4 = vmul.f32 %v8653_v7, %v8640_v9  ;;  %v3546_v52 = vpack.c.bf16 %v3312_v43, %v3311_v8  ;;  %v3266_v54 = vmul.f32 %v8655_v12, %v8640_v9 }
 0x5c1   :  { %v3037_v35 = vadd.f32 %v3033_v2, %v3029_v6  ;;  %v3273_v20 = vmul.f32 %v8623_v31, %v8642_v30  ;;  %v3038_v46 = vadd.f32 %v3034_v36, %v3030_v59  ;;  %v3261_v61 = vadd.f32 %v3257_v14, %v3249_v0 }
 0x5c2   :  { %v3262_v51 = vadd.f32 %v3258_v11, %v3250_v62  ;;  %v3274_v32 = vmul.f32 %v8624_v47, %v8642_v30  ;;  %3780 = vmatpush.bf16.msrb.mxu2 %v3546_v52  ;;  %v3281_v33 = vmul.f32 %v8573_v58, %v8644_v13  ;;  %v3282_v9 = vmul.f32 %v7259_v10, %v8644_v13 }
 0x5c3   :  { %v3045_v50 = vadd.f32 %v3041_v57, %v3037_v35  ;;  %v3046_v53 = vadd.f32 %v3042_v28, %v3038_v46  ;;  %v3269_v7 = vadd.f32 %v3265_v4, %v3261_v61  ;;  %v3289_v31 = vmul.f32 %v7381_v40, %v8645_v49  ;;  %v8659_v61 = vld [vmem:[#allocation108_spill] sm:$0xff] }
 0x5c4   :  { %v3270_v56 = vadd.f32 %v3266_v54, %v3262_v51  ;;  %v3290_v19 = vmul.f32 %v7384_v42, %v8645_v49  ;;  %v3297_v58 = vmul.f32 %v7433_v27, %v8646_v25  ;;  %v3298_v10 = vmul.f32 %v7485_v21, %v8646_v25  ;;  %v4825_v25 = vld [vmem:[#allocation6 + $0x14] sm:$0xf0] }
 0x5c5   :  { %v3053_v60 = vadd.f32 %v3049_v3, %v3045_v50  ;;  %v3054_v12 = vadd.f32 %v3050_v34, %v3046_v53  ;;  %v3277_v47 = vadd.f32 %v3273_v20, %v3269_v7  ;;  %v3305_v40 = vmul.f32 %v7618_v29, %v8647_v24  ;;  %v4566_v29 = vld [vmem:[#allocation6 + $0x10] sm:$0xf]  ;;  %v8658_v20 = vld [vmem:[#allocation107_spill] sm:$0xff] }
 0x5c6   :  { %v3278_v30 = vadd.f32 %v3274_v32, %v3270_v56  ;;  %v4559_v13 = vor.u32 %v4823_v45, %v4558_v48  ;;  %v3306_v55 = vmul.f32 %v7659_v1, %v8647_v24  ;;  %v4563_v21 = vor.u32 %v4822_v63, %v4560_v5  ;;  %v4678_v1 = vld [vmem:[#allocation6 + $0xf0] sm:$0xf]  ;;  %v4853_v24 = vld [vmem:[#allocation6 + $0xf4] sm:$0xf0]  ;;  %v4854_v7 = vld [vmem:[%s7954_s6] sm:$0xff] }
 0x5c7   :  { %v3537_v39 = vpack.c.bf16 %v3054_v12, %v3053_v60  ;;  %v3285_v16 = vadd.f32 %v3281_v33, %v3277_v47  ;;  %v4567_v36 = vor.u32 %v4825_v25, %v4566_v29  ;;  %v4571_v57 = vor.u32 %v4824_v44, %v4568_v17  ;;  %v4855_v56 = vld [vmem:[%s7954_s6 + $0x8] sm:$0xff]  ;;  %v3871_v12 = vpop.permute.xlu0 %3870 }
 0x5c8   :  { %v3286_v26 = vadd.f32 %v3282_v9, %v3278_v30  ;;  %v4679_v28 = vor.u32 %v4853_v24, %v4678_v1  ;;  %v4861_v63 = vld [vmem:[%s7956_s8 + $0x28] sm:$0xff] }
 0x5c9   :  { %3720 = vmatpush.bf16.msrb.mxu1 %v3537_v39  ;;  %4879 = vmatpush.bf16.msra.mxu3 %v3537_v39  ;;  %v3293_v42 = vadd.f32 %v3289_v31, %v3285_v16  ;;  %v3856_v39 = vpop.permute.xlu1 %3855 }
 0x5ca   :  { %v3294_v49 = vadd.f32 %v3290_v19, %v3286_v26  ;;  %v3866_v19 = vpop.permute.xlu2 %3865 }
 0x5cb   :  { %v3301_v15 = vadd.f32 %v3297_v58, %v3293_v42 }
 0x5cc   :  { %v3302_v37 = vadd.f32 %v3298_v10, %v3294_v49  ;;  %3721 = vmatmul.bf16.vlgmr.msrb.gmra.mxu1 %v4559_v13  ;;  %3770 = vmatmul.bf16.vlgmr.msra.gmra.mxu3 %v4679_v28 }
 0x5cd   :  { %v3309_v27 = vadd.f32 %v3305_v40, %v3301_v15  ;;  %v4857_v15 = vld [vmem:[%s7956_s8 + $0x8] sm:$0xff] }
 0x5ce   :  { %v3310_v38 = vadd.f32 %v3306_v55, %v3302_v37  ;;  %v4856_v55 = vld [vmem:[%s7956_s8] sm:$0xff]  ;;  %v4858_v37 = vld [vmem:[%s7956_s8 + $0x10] sm:$0xff] }
 0x5cf   :  { %v4020_v5 = vpop.permute.xlu0 %4019 }
 0x5d0   :  { %v3545_v2 = vpack.c.bf16 %v3310_v38, %v3309_v27  ;;  %v4859_v27 = vld [vmem:[%s7956_s8 + $0x18] sm:$0xff]  ;;  %v4860_v38 = vld [vmem:[%s7956_s8 + $0x20] sm:$0xff] }
 0x5d1   :  { %v4025_v17 = vpop.permute.xlu1 %4024 }
 0x5d2   :  { %3781 = vmatpush.bf16.msrb.mxu2 %v3545_v2  ;;  %v3861_v30 = vpop.permute.xlu2 %3860  ;;  %v4862_v2 = vld [vmem:[%s7956_s8 + $0x30] sm:$0xff] }
 0x5d5   :  { %3782 = vmatmul.bf16.vlgmr.msrb.gmra.mxu2 %v4563_v21 }
 0x5d7   :  { %v4015_v29 = vpop.permute.xlu0 %4014 }
 0x5d9   :  { %v4000_v24 = vpop.permute.xlu1 %3999 }
 0x5da   :  { %v4010_v21 = vpop.permute.xlu2 %4009 }
 0x5dc   :  { %3726 = vmatmul.bf16.gmra.mxu1 %v4567_v36  ;;  %v4863_v36 = vld [vmem:[%s7956_s8 + $0x38] sm:$0xff] }
 0x5df   :  { %v7932_v44 = vpop.permute.xlu0 %3989 }
 0x5e2   :  { %v4005_v25 = vpop.permute.xlu2 %4004 }
 0x5e5   :  { %3787 = vmatmul.bf16.gmra.mxu2 %v4571_v57 }
 0x5e7   :  { %v3985_v1 = vpop.permute.xlu0 %3984 }
 0x5ea   :  { %v3980_v57 = vpop.permute.xlu2 %3979 }
 0x5f2   :  { %v3975_v28 = vpop.permute.xlu2 %3974 }
 0x649   :  { %v3722_v8 = vpop.f32.mrf.mxu1 }
 0x651   :  { %v3724_v3 = vpop.f32.mrf.mxu1 }
 0x658   :  { %v3783_v18 = vpop.f32.mrf.mxu2 }
 0x659   :  { %v3727_v43 = vpop.f32.mrf.mxu1  ;;  %v3784_v14 = vadd.f32 %v3783_v18, %v3722_v8  ;;  %v3960_v8 = vpop.permute.xlu0 %3959 }
 0x65b   :  { %v3835_v54 = vmax.f32 %v3784_v14, 0.0 }
 0x65d   :  { %v3839_v33 = vadd.f32 %v3835_v54, %v8657_v41 }
 0x660   :  { %v3785_v34 = vpop.f32.mrf.mxu2 }
 0x661   :  { %v3786_v0 = vadd.f32 %v3785_v34, %v3724_v3  ;;  %v3729_v62 = vpop.f32.mrf.mxu1  ;;  %v3995_v3 = vpop.permute.xlu1 %3994 }
 0x662   :  { %v3950_v34 = vpop.permute.xlu2 %3949 }
 0x663   :  { %v3836_v52 = vmax.f32 %v3786_v0, 0.0 }
 0x665   :  { %v3840_v32 = vadd.f32 %v3836_v52, %v8649_v23  ;;  %v3771_v23 = vpop.f32.mrf.mxu3 }
 0x667   :  { %v3847_v53 = vpack.c.bf16 %v3840_v32, %v3839_v33 }
 0x668   :  { %v3788_v6 = vpop.f32.mrf.mxu2 }
 0x669   :  { %v3789_v22 = vadd.f32 %v3788_v6, %v3727_v43  ;;  %v3955_v6 = vpop.permute.xlu0 %3954 }
 0x66b   :  { %v3837_v11 = vmax.f32 %v3789_v22, 0.0 }
 0x66d   :  { %v3841_v46 = vadd.f32 %v3837_v11, %v8658_v20  ;;  %v3772_v9 = vpop.f32.mrf.mxu3  ;;  %v3970_v11 = vpop.permute.xlu1 %3969 }
 0x670   :  { %v3790_v59 = vpop.f32.mrf.mxu2 }
 0x671   :  { %v3791_v4 = vadd.f32 %v3790_v59, %v3729_v62 }
 0x673   :  { %v3838_v35 = vmax.f32 %v3791_v4, 0.0 }
 0x675   :  { %v3842_v51 = vadd.f32 %v3838_v35, %v8659_v61  ;;  %v3965_v35 = vpop.permute.xlu1 %3964 }
 0x677   :  { %v3848_v50 = vpack.c.bf16 %v3842_v51, %v3841_v46 }
 0x679   :  { %3896 = vmatpush.bf16.msrb.mxu3 %v3848_v50 }
 0x67d   :  { %3897 = vmatpush.bf16.msrb.mxu3 %v3847_v53 }
 0x680   :  { %4692 = vmatmul.msk.bf16.vlgmr.msrb.gmra.mxu3 %vm3883_vm7, %v4854_v7 }
 0x690   :  { %4693 = vmatmul.msk.bf16.gmra.mxu3 %vm3883_vm7, %v4855_v56 }
 0x703   :  { %v3899_v31 = vpop.f32.mrf.mxu3 }
 0x704   :  { %v3900_v16 = vadd.f32 %v3899_v31, %v3856_v39 }
 0x706   :  { %v3909_v42 = vmax.f32 %v3900_v16, 0.0 }
 0x70b   :  { %v3901_v41 = vpop.f32.mrf.mxu3 }
 0x70c   :  { %v3902_v45 = vadd.f32 %v3901_v41, %v3861_v30 }
 0x70e   :  { %v3910_v40 = vmax.f32 %v3902_v45, 0.0 }
 0x710   :  { %v3929_v49 = vpack.c.bf16 %v3910_v40, %v3909_v42 }
 0x713   :  { %v3904_v60 = vpop.f32.mrf.mxu3 }
 0x714   :  { %v3905_v47 = vadd.f32 %v3904_v60, %v3866_v19 }
 0x716   :  { %v3911_v26 = vmax.f32 %v3905_v47, 0.0 }
 0x71b   :  { %v3906_v48 = vpop.f32.mrf.mxu3 }
 0x71c   :  { %v3907_v58 = vadd.f32 %v3906_v48, %v3871_v12 }
 0x71e   :  { %v3912_v10 = vmax.f32 %v3907_v58, 0.0 }
 0x720   :  { %v3930_v13 = vpack.c.bf16 %v3912_v10, %v3911_v26 }
 0x722   :  { %4097 = vmatpush.bf16.msra.mxu3 %v3930_v13 }
 0x726   :  { %4098 = vmatpush.bf16.msra.mxu3 %v3929_v49 }
 0x729   :  { %4726 = vmatmul.msk.bf16.vlgmr.msra.gmra.mxu3 %vm3883_vm7, %v4856_v55 }
 0x739   :  { %4727 = vmatmul.msk.bf16.gmra.mxu3 %vm3883_vm7, %v4857_v15 }
 0x749   :  { %4728 = vmatmul.msk.bf16.gmra.mxu3 %vm3883_vm7, %v4858_v37 }
 0x759   :  { %4729 = vmatmul.msk.bf16.gmra.mxu3 %vm3883_vm7, %v4859_v27 }
 0x769   :  { %4730 = vmatmul.msk.bf16.gmra.mxu3 %vm3883_vm7, %v4860_v38 }
 0x779   :  { %4731 = vmatmul.msk.bf16.gmra.mxu3 %vm3883_vm7, %v4861_v63  ;;  %v4826_v63 = vld [vmem:[#allocation6 + $0x24] sm:$0xf] }
 0x789   :  { %4732 = vmatmul.msk.bf16.gmra.mxu3 %vm3883_vm7, %v4862_v2  ;;  %v4576_v2 = vld [vmem:[#allocation6 + $0x28] sm:$0xf0] }
 0x799   :  { %4733 = vmatmul.msk.bf16.gmra.mxu3 %vm3883_vm7, %v4863_v36 }
 0x7ac   :  { %v4100_v18 = vpop.f32.mrf.mxu3 }
 0x7ad   :  { %v4101_v43 = vadd.f32 %v4100_v18, %v3950_v34 }
 0x7af   :  { %v4140_v62 = vmax.f32 %v4101_v43, 0.0 }
 0x7b4   :  { %v4102_v22 = vpop.f32.mrf.mxu3 }
 0x7b5   :  { %v4103_v0 = vadd.f32 %v4102_v22, %v3955_v6  ;;  %v4828_v22 = vld [vmem:[#allocation6 + $0x34] sm:$0xf] }
 0x7b7   :  { %v4141_v59 = vmax.f32 %v4103_v0, 0.0  ;;  %v4584_v0 = vld [vmem:[#allocation6 + $0x38] sm:$0xf0] }
 0x7b9   :  { %v7935_v14 = vpack.c.bf16 %v4141_v59, %v4140_v62  ;;  %v4582_v62 = vld [vmem:[#allocation6 + $0x30] sm:$0xf]  ;;  %v4829_v59 = vld [vmem:[#allocation6 + $0x34] sm:$0xf0] }
 0x7bc   :  { %v4105_v4 = vpop.f32.mrf.mxu3 }
 0x7bd   :  { %v4106_v52 = vadd.f32 %v4105_v4, %v3960_v8  ;;  %v4827_v8 = vld [vmem:[#allocation6 + $0x24] sm:$0xf0]  ;;  %v4592_v4 = vld [vmem:[#allocation6 + $0x48] sm:$0xf0] }
 0x7bf   :  { %v4142_v46 = vmax.f32 %v4106_v52, 0.0  ;;  %v4156_v52 = vld [vmem:[%s7958_s10] sm:$0x1] }
 0x7c4   :  { %v4107_v54 = vpop.f32.mrf.mxu3 }
 0x7c5   :  { %v4108_v20 = vadd.f32 %v4107_v54, %v3965_v35  ;;  %v4590_v35 = vld [vmem:[#allocation6 + $0x40] sm:$0xf]  ;;  %v4831_v54 = vld [vmem:[#allocation6 + $0x44] sm:$0xf0] }
 0x7c7   :  { %v4143_v61 = vmax.f32 %v4108_v20, 0.0 }
 0x7c9   :  { %v7937_v51 = vpack.c.bf16 %v4143_v61, %v4142_v46  ;;  %v4591_v46 = vor.u32 %v4831_v54, %v4590_v35  ;;  %v4832_v61 = vld [vmem:[#allocation6 + $0x54] sm:$0xf] }
 0x7cc   :  { %v4110_v32 = vpop.f32.mrf.mxu3 }
 0x7cd   :  { %v4111_v50 = vadd.f32 %v4110_v32, %v3970_v11  ;;  %v4587_v11 = vor.u32 %v4828_v22, %v4584_v0  ;;  %v4600_v32 = vld [vmem:[#allocation6 + $0x58] sm:$0xf0]  ;;  %v4656_v22 = vld [vmem:[#allocation6 + $0xc8] sm:$0xf0] }
 0x7cf   :  { %v4144_v7 = vmax.f32 %v4111_v50, 0.0  ;;  %v4598_v50 = vld [vmem:[#allocation6 + $0x50] sm:$0xf] }
 0x7d4   :  { %v4112_v33 = vpop.f32.mrf.mxu3 }
 0x7d5   :  { %v4113_v53 = vadd.f32 %v4112_v33, %v3975_v28  ;;  %v4574_v28 = vld [vmem:[#allocation6 + $0x20] sm:$0xf]  ;;  %v4833_v33 = vld [vmem:[#allocation6 + $0x54] sm:$0xf0] }
 0x7d6   :  { %v4575_v18 = vor.u32 %v4827_v8, %v4574_v28  ;;  %v4648_v28 = vld [vmem:[#allocation6 + $0xb8] sm:$0xf0]  ;;  %v4638_v8 = vld [vmem:[#allocation6 + $0xa0] sm:$0xf] }
 0x7d7   :  { %v4145_v56 = vmax.f32 %v4113_v53, 0.0  ;;  %v4599_v53 = vor.u32 %v4833_v33, %v4598_v50  ;;  %v4847_v50 = vld [vmem:[#allocation6 + $0xc4] sm:$0xf0] }
 0x7d8   :  { %3731 = vmatmul.bf16.gmra.mxu1 %v4575_v18  ;;  %v4843_v18 = vld [vmem:[#allocation6 + $0xa4] sm:$0xf0] }
 0x7d9   :  { %v4159_v23 = vpack.c.bf16 %v4145_v56, %v4144_v7  ;;  %v4608_v7 = vld [vmem:[#allocation6 + $0x68] sm:$0xf0]  ;;  %v4606_v56 = vld [vmem:[#allocation6 + $0x60] sm:$0xf] }
 0x7dc   :  { %v4115_v9 = vpop.f32.mrf.mxu3 }
 0x7dd   :  { %v4116_v31 = vadd.f32 %v4115_v9, %v3980_v57 }
 0x7df   :  { %v4146_v60 = vmax.f32 %v4116_v31, 0.0 }
 0x7e4   :  { %v4117_v41 = vpop.f32.mrf.mxu3 }
 0x7e5   :  { %v4118_v19 = vadd.f32 %v4117_v41, %v3985_v1  ;;  %v4579_v1 = vor.u32 %v4826_v63, %v4576_v2  ;;  %v4836_v41 = vld [vmem:[#allocation6 + $0x74] sm:$0xf] }
 0x7e7   :  { %v4147_v12 = vmax.f32 %v4118_v19, 0.0  ;;  %3792 = vmatmul.bf16.gmra.mxu2 %v4579_v1  ;;  %v4616_v19 = vld [vmem:[#allocation6 + $0x78] sm:$0xf0]  ;;  %v4844_v1 = vld [vmem:[#allocation6 + $0xb4] sm:$0xf] }
 0x7e9   :  { %v4160_v47 = vpack.c.bf16 %v4147_v12, %v4146_v60  ;;  %v4614_v60 = vld [vmem:[#allocation6 + $0x70] sm:$0xf]  ;;  %v4837_v12 = vld [vmem:[#allocation6 + $0x74] sm:$0xf0] }
 0x7ec   :  { %v4120_v30 = vpop.f32.mrf.mxu3 }
 0x7f4   :  { %v4122_v48 = vpop.f32.mrf.mxu3 }
 0x7f5   :  { %v4123_v34 = vadd.f32 %v4122_v48, %v3995_v3  ;;  %v4583_v3 = vor.u32 %v4829_v59, %v4582_v62  ;;  %v4838_v48 = vld [vmem:[#allocation6 + $0x84] sm:$0xf]  ;;  %v4646_v62 = vld [vmem:[#allocation6 + $0xb0] sm:$0xf]  ;;  %v4845_v59 = vld [vmem:[#allocation6 + $0xb4] sm:$0xf0] }
 0x7f7   :  { %3795 = vmatmul.bf16.gmra.mxu2 %v4587_v11  ;;  %3734 = vmatmul.bf16.gmra.mxu1 %v4583_v3 }
 0x7fc   :  { %v4125_v45 = vpop.f32.mrf.mxu3 }
 0x7fd   :  { %v4126_v36 = vadd.f32 %v4125_v45, %v4000_v24  ;;  %v4624_v45 = vld [vmem:[#allocation6 + $0x88] sm:$0xf0] }
 0x804   :  { %v4127_v58 = vpop.f32.mrf.mxu3 }
 0x805   :  { %v4128_v37 = vadd.f32 %v4127_v58, %v4005_v25  ;;  %v4149_v25 = vmax.f32 %v4123_v34, 0.0  ;;  %v4622_v58 = vld [vmem:[#allocation6 + $0x80] sm:$0xf]  ;;  %v4651_v34 = vor.u32 %v4844_v1, %v4648_v28 }
 0x807   :  { %3737 = vmatmul.bf16.gmra.mxu1 %v4591_v46  ;;  %v4848_v46 = vld [vmem:[#allocation6 + $0xd4] sm:$0xf] }
 0x80c   :  { %v4130_v39 = vpop.f32.mrf.mxu3 }
 0x80d   :  { %v4131_v49 = vadd.f32 %v4130_v39, %v4010_v21  ;;  %v4121_v21 = vadd.f32 %v4120_v30, %v7932_v44  ;;  %v4830_v44 = vld [vmem:[#allocation6 + $0x44] sm:$0xf]  ;;  %v4615_v30 = vor.u32 %v4837_v12, %v4614_v60  ;;  %v4839_v39 = vld [vmem:[#allocation6 + $0x84] sm:$0xf0] }
 0x80e   :  { %v4595_v20 = vor.u32 %v4830_v44, %v4592_v4  ;;  %v4647_v4 = vor.u32 %v4845_v59, %v4646_v62 }
 0x80f   :  { %v4152_v57 = vmax.f32 %v4131_v49, 0.0  ;;  %v4148_v6 = vmax.f32 %v4121_v21, 0.0  ;;  %v4842_v49 = vld [vmem:[#allocation6 + $0xa4] sm:$0xf] }
 0x810   :  { %3798 = vmatmul.bf16.gmra.mxu2 %v4595_v20 }
 0x811   :  { %v4161_v24 = vpack.c.bf16 %v4149_v25, %v4148_v6  ;;  %v4169_v25 = vpop.permute.xlu1 %4168 }
 0x812   :  { %v4171_v6 = vperm.slane %v4169_v25, 0 }
 0x814   :  { %v4132_v16 = vpop.f32.mrf.mxu3 }
 0x815   :  { %v4133_v13 = vadd.f32 %v4132_v16, %v4015_v29  ;;  %v4150_v29 = vmax.f32 %v4126_v36, 0.0  ;;  %v4627_v16 = vor.u32 %v4838_v48, %v4624_v45  ;;  %v4852_v45 = vld [vmem:[#allocation6 + $0xf4] sm:$0xf] }
 0x817   :  { %v4153_v27 = vmax.f32 %v4133_v13, 0.0  ;;  %3740 = vmatmul.bf16.gmra.mxu1 %v4599_v53 }
 0x819   :  { %v4163_v43 = vpack.c.bf16 %v4153_v27, %v4152_v57 }
 0x81c   :  { %v4135_v26 = vpop.f32.mrf.mxu3 }
 0x81d   :  { %v4136_v10 = vadd.f32 %v4135_v26, %v4020_v5  ;;  %v4151_v5 = vmax.f32 %v4128_v37, 0.0  ;;  %v4623_v26 = vor.u32 %v4839_v39, %v4622_v58  ;;  %v4630_v37 = vld [vmem:[#allocation6 + $0x90] sm:$0xf]  ;;  %v4680_v58 = vld [vmem:[#allocation6 + $0xf8] sm:$0xf0] }
 0x81e   :  { %v4670_v39 = vld [vmem:[#allocation6 + $0xe0] sm:$0xf] }
 0x81f   :  { %v4154_v55 = vmax.f32 %v4136_v10, 0.0  ;;  %v4840_v10 = vld [vmem:[#allocation6 + $0x94] sm:$0xf] }
 0x824   :  { %v4137_v40 = vpop.f32.mrf.mxu3 }
 0x825   :  { %v4138_v42 = vadd.f32 %v4137_v40, %v4025_v17  ;;  %v4162_v17 = vpack.c.bf16 %v4151_v5, %v4150_v29  ;;  %v4632_v40 = vld [vmem:[#allocation6 + $0x98] sm:$0xf0] }
 0x826   :  { %v4635_v13 = vor.u32 %v4840_v10, %v4632_v40 }
 0x827   :  { %v4155_v15 = vmax.f32 %v4138_v42, 0.0 }
 0x829   :  { %v4164_v38 = vpack.c.bf16 %v4155_v15, %v4154_v55  ;;  %v4640_v55 = vld [vmem:[#allocation6 + $0xa8] sm:$0xf0] }
 0x82a   :  { %v4643_v27 = vor.u32 %v4842_v49, %v4640_v55 }
 0x82b   :  { %4172 = vmatpush.bf16.msrb.mxu3 %v4164_v38  ;;  %v4841_v38 = vld [vmem:[#allocation6 + $0x94] sm:$0xf0] }
 0x82c   :  { %v4631_v63 = vor.u32 %v4841_v38, %v4630_v37 }
 0x82f   :  { %4173 = vmatpush.bf16.msrb.mxu3 %v4163_v43  ;;  %v4639_v43 = vor.u32 %v4843_v18, %v4638_v8 }
 0x833   :  { %4174 = vmatpush.bf16.msrb.mxu3 %v4162_v17 }
 0x837   :  { %4175 = vmatpush.bf16.msrb.mxu3 %v4161_v24  ;;  %v4846_v24 = vld [vmem:[#allocation6 + $0xc4] sm:$0xf] }
 0x838   :  { %v4659_v3 = vor.u32 %v4846_v24, %v4656_v22 }
 0x83b   :  { %4176 = vmatpush.bf16.msrb.mxu3 %v4160_v47  ;;  %v4619_v47 = vor.u32 %v4836_v41, %v4616_v19  ;;  %v4849_v41 = vld [vmem:[#allocation6 + $0xd4] sm:$0xf0] }
 0x83f   :  { %4177 = vmatpush.bf16.msrb.mxu3 %v4159_v23  ;;  %v4835_v23 = vld [vmem:[#allocation6 + $0x64] sm:$0xf0] }
 0x840   :  { %v4607_v31 = vor.u32 %v4835_v23, %v4606_v56  ;;  %v4850_v23 = vld [vmem:[#allocation6 + $0xe4] sm:$0xf] }
 0x842   :  { %3743 = vmatmul.bf16.gmra.mxu1 %v4607_v31  ;;  %v4662_v31 = vld [vmem:[#allocation6 + $0xd0] sm:$0xf] }
 0x843   :  { %4178 = vmatpush.bf16.msrb.mxu3 %v7937_v51  ;;  %v4603_v51 = vor.u32 %v4832_v61, %v4600_v32  ;;  %v4664_v61 = vld [vmem:[#allocation6 + $0xd8] sm:$0xf0]  ;;  %v4654_v32 = vld [vmem:[#allocation6 + $0xc0] sm:$0xf]  ;;  %v4663_v12 = vor.u32 %v4849_v41, %v4662_v31 }
 0x844   :  { %v4667_v33 = vor.u32 %v4848_v46, %v4664_v61  ;;  %v4655_v53 = vor.u32 %v4847_v50, %v4654_v32 }
 0x845   :  { %3801 = vmatmul.bf16.gmra.mxu2 %v4603_v51 }
 0x847   :  { %4179 = vmatpush.bf16.msrb.mxu3 %v7935_v14  ;;  %v4834_v14 = vld [vmem:[#allocation6 + $0x64] sm:$0xf] }
 0x848   :  { %v4611_v9 = vor.u32 %v4834_v14, %v4608_v7 }
 0x84a   :  { %4180 = vmatmul.bf16.vlgmr.msrb.gmra.mxu3 %v4156_v52 }
 0x852   :  { %3746 = vmatmul.bf16.gmra.mxu1 %v4615_v30 }
 0x855   :  { %3804 = vmatmul.bf16.gmra.mxu2 %v4611_v9  ;;  %v3732_v42 = vpop.f32.mrf.mxu1  ;;  %v4672_v9 = vld [vmem:[#allocation6 + $0xe8] sm:$0xf0] }
 0x856   :  { %v4675_v19 = vor.u32 %v4850_v23, %v4672_v9 }
 0x85d   :  { %v3733_v2 = vpop.f32.mrf.mxu1 }
 0x862   :  { %3749 = vmatmul.bf16.gmra.mxu1 %v4623_v26  ;;  %v4683_v26 = vor.u32 %v4852_v45, %v4680_v58 }
 0x865   :  { %3807 = vmatmul.bf16.gmra.mxu2 %v4619_v47 }
 0x86a   :  { %v3793_v15 = vpop.f32.mrf.mxu2 }
 0x872   :  { %3752 = vmatmul.bf16.gmra.mxu1 %v4631_v63  ;;  %v3794_v36 = vpop.f32.mrf.mxu2 }
 0x874   :  { %v3735_v57 = vpop.f32.mrf.mxu1 }
 0x875   :  { %3810 = vmatmul.bf16.gmra.mxu2 %v4627_v16  ;;  %v4851_v16 = vld [vmem:[#allocation6 + $0xe4] sm:$0xf0] }
 0x876   :  { %v4671_v40 = vor.u32 %v4851_v16, %v4670_v39 }
 0x87a   :  { %v3796_v5 = vpop.f32.mrf.mxu2 }
 0x87c   :  { %v3736_v21 = vpop.f32.mrf.mxu1 }
 0x882   :  { %3755 = vmatmul.bf16.gmra.mxu1 %v4639_v43  ;;  %v3797_v29 = vpop.f32.mrf.mxu2 }
 0x884   :  { %v3738_v17 = vpop.f32.mrf.mxu1 }
 0x885   :  { %3813 = vmatmul.bf16.gmra.mxu2 %v4635_v13 }
 0x88c   :  { %v3739_v52 = vpop.f32.mrf.mxu1 }
 0x892   :  { %3758 = vmatmul.bf16.gmra.mxu1 %v4647_v4 }
 0x893   :  { %v3799_v44 = vpop.f32.mrf.mxu2 }
 0x894   :  { %v3741_v20 = vpop.f32.mrf.mxu1 }
 0x895   :  { %3816 = vmatmul.bf16.gmra.mxu2 %v4643_v27 }
 0x89b   :  { %v3800_v54 = vpop.f32.mrf.mxu2 }
 0x89c   :  { %v3742_v14 = vpop.f32.mrf.mxu1 }
 0x8a2   :  { %3761 = vmatmul.bf16.gmra.mxu1 %v4655_v53 }
 0x8a5   :  { %3819 = vmatmul.bf16.gmra.mxu2 %v4651_v34 }
 0x8b2   :  { %3764 = vmatmul.bf16.gmra.mxu1 %v4663_v12 }
 0x8b5   :  { %3822 = vmatmul.bf16.gmra.mxu2 %v4659_v3 }
 0x8bf   :  { %v3744_v56 = vpop.f32.mrf.mxu1 }
 0x8c2   :  { %3767 = vmatmul.bf16.gmra.mxu1 %v4671_v40 }
 0x8c5   :  { %3825 = vmatmul.bf16.gmra.mxu2 %v4667_v33 }
 0x8c7   :  { %v3745_v47 = vpop.f32.mrf.mxu1 }
 0x8c8   :  { %v3802_v51 = vpop.f32.mrf.mxu2 }
 0x8cd   :  { %v4181_v0 = vpop.f32.mrf.mxu3 }
 0x8ce   :  { %v4182_v11 = vadd.f32 %v4181_v0, %v4171_v6 }
 0x8cf   :  { %v3747_v48 = vpop.f32.mrf.mxu1 }
 0x8d0   :  { %4185 = vst [vmem:[#allocation8] sm:$0x1] %v4182_v11  ;;  %v3803_v7 = vpop.f32.mrf.mxu2 }
 0x8d1   :  { %4196 = dma.vmem_to_hbm [thread:$0]  %s4192_s25, 16, %s4194_s23, [#allocation5]  }
 0x8d5   :  { %v4183_v35 = vpop.f32.mrf.mxu3  ;;  %3828 = vmatmul.bf16.gmra.mxu2 %v4675_v19 }
 0x8d7   :  { %v3748_v13 = vpop.f32.mrf.mxu1 }
 0x8d8   :  { %v3805_v60 = vpop.f32.mrf.mxu2 }
 0x8df   :  { %v3750_v49 = vpop.f32.mrf.mxu1 }
 0x8e0   :  { %v3806_v30 = vpop.f32.mrf.mxu2 }
 0x8e5   :  { %3831 = vmatmul.bf16.gmra.mxu2 %v4683_v26 }
 0x8e7   :  { %v3751_v15 = vpop.f32.mrf.mxu1 }
 0x8e8   :  { %v3808_v10 = vpop.f32.mrf.mxu2 }
 0x8ef   :  { %v3753_v63 = vpop.f32.mrf.mxu1 }
 0x8f0   :  { %v3809_v42 = vpop.f32.mrf.mxu2 }
 0x8f7   :  { %v3754_v36 = vpop.f32.mrf.mxu1 }
 0x8f8   :  { %v3811_v55 = vpop.f32.mrf.mxu2 }
 0x8ff   :  { %v3756_v1 = vpop.f32.mrf.mxu1 }
 0x900   :  { %v3812_v37 = vpop.f32.mrf.mxu2 }
 0x907   :  { %v3757_v8 = vpop.f32.mrf.mxu1 }
 0x908   :  { %v3814_v27 = vpop.f32.mrf.mxu2 }
 0x90f   :  { %v3759_v34 = vpop.f32.mrf.mxu1 }
 0x910   :  { %v3815_v38 = vpop.f32.mrf.mxu2 }
 0x917   :  { %v3760_v43 = vpop.f32.mrf.mxu1 }
 0x918   :  { %v3817_v2 = vpop.f32.mrf.mxu2 }
 0x91f   :  { %v3762_v29 = vpop.f32.mrf.mxu1 }
 0x920   :  { %v3818_v57 = vpop.f32.mrf.mxu2 }
 0x927   :  { %v3763_v17 = vpop.f32.mrf.mxu1 }
 0x928   :  { %v3820_v28 = vpop.f32.mrf.mxu2 }
 0x92f   :  { %v3765_v24 = vpop.f32.mrf.mxu1 }
 0x930   :  { %v3821_v18 = vpop.f32.mrf.mxu2 }
 0x937   :  { %v3766_v0 = vpop.f32.mrf.mxu1 }
 0x938   :  { %v3823_v5 = vpop.f32.mrf.mxu2 }
 0x93f   :  { %v3768_v59 = vpop.f32.mrf.mxu1 }
 0x940   :  { %v3824_v21 = vpop.f32.mrf.mxu2 }
 0x947   :  { %v3769_v3 = vpop.f32.mrf.mxu1 }
 0x948   :  { %v3826_v25 = vpop.f32.mrf.mxu2 }
 0x950   :  { %v3827_v6 = vpop.f32.mrf.mxu2 }
 0x958   :  { %v3829_v22 = vpop.f32.mrf.mxu2 }
 0x960   :  { %v3830_v62 = vpop.f32.mrf.mxu2 }
 0x968   :  { %v3832_v11 = vpop.f32.mrf.mxu2 }
 0x970   :  { %v3833_v44 = vpop.f32.mrf.mxu2 }
 0x971   :  { %4997 = dma.done.wait [#allocation5], 16  }
 0x972   :  { %4998 = vsyncadd [#allocation5], 4294967280 }
 0x973   :  { %4201 = vsyncpa [#allocation4], 1 }
 0x974   :  { %4202 = vsyncpa [#allocation7], 1 }
 0x975   :  { %4203 = vsyncpa [#allocation5], 1 }

</bundles_post_ra>
